<compile_context>
chip_gen: v5e
topology: v5e:2x2
jax: 0.10.0
libtpu: 0.0.40
codegen_flags: <defaults>
</compile_context>

<pallas_src>
import functools
import math

import numpy as np

import jax
import jax.numpy as jnp
from jax.experimental import pallas as pl
from jax.experimental.pallas import tpu as pltpu


# ----------------------------------------------------------------------------
# Static tap sets (conv kernel offsets, (dh, dw) relative to the output pixel)
# ----------------------------------------------------------------------------
def _taps(kh, kw, dil_h, dil_w, pad_h, pad_w):
    return tuple((i * dil_h - pad_h, j * dil_w - pad_w)
                 for i in range(kh) for j in range(kw))


TAPS_3x3_D1 = _taps(3, 3, 1, 1, 1, 1)   # Conv2d k=3, pad=1, dil=1
TAPS_3x3_D2 = _taps(3, 3, 2, 2, 2, 2)   # Conv2d k=3, pad=2, dil=2
TAPS_3x1 = _taps(3, 1, 1, 1, 1, 0)      # Conv3d (3,1,1), pad (1,0,0)
TAPS_5x1 = _taps(5, 1, 1, 1, 2, 0)      # Conv3d (5,1,1), pad (2,0,0)

_ALL_TAP_SETS = (TAPS_3x1, TAPS_3x3_D1, TAPS_3x3_D2, TAPS_5x1)

# Every non-center tap MUST have a zero-padding mask.  This both implements the
# conv zero padding and makes folding batch into the lane axis safe: a masked
# tap can never read a neighbouring image or the roll wrap-around.
MASK_OFFSETS = tuple(sorted({off for taps in _ALL_TAP_SETS for off in taps
                             if off != (0, 0)}))
MASK_INDEX = {off: i for i, off in enumerate(MASK_OFFSETS)}
assert all(off in MASK_INDEX
           for taps in _ALL_TAP_SETS for off in taps if off != (0, 0))


def _build_masks(H, W, reps):
    """f32 masks (n_masks, 1, reps*H*W): 1 where the shifted tap stays in-image."""
    hh = np.arange(H).reshape(H, 1)
    ww = np.arange(W).reshape(1, W)
    ms = []
    for di, dj in MASK_OFFSETS:
        m = ((hh + di >= 0) & (hh + di < H) & (ww + dj >= 0) & (ww + dj < W))
        ms.append(np.tile(m.astype(np.float32).reshape(1, H * W), (1, reps)))
    return np.stack(ms, axis=0)


# ----------------------------------------------------------------------------
# Fused Trunk kernel: one grid step per batch group; everything stays in VMEM.
# ----------------------------------------------------------------------------
def _trunk_kernel(x_ref, masks_ref,
                  w3i_ref, b3i_ref, w9_ref, b9_ref,
                  wA_ref, bA_ref, wB_ref, bB_ref,
                  wf_ref, bf_ref,
                  o_ref, stk_ref, *, W, L, C):

    def tap(v, di, dj):
        # tap(v)[:, p] = v[:, p + di*W + dj], zeroed outside the image.
        # pltpu.roll follows the jnp.roll convention: roll(v, s)[i] == v[i - s].
        if (di, dj) == (0, 0):
            return v
        shift = (-(di * W + dj)) % L
        return pltpu.roll(v, shift, axis=1) * masks_ref[MASK_INDEX[(di, dj)]]

    def conv(v, w_ref, b_ref, row, taps, act):
        # Stack rolled+masked taps along the contraction axis in VMEM scratch
        # and issue ONE MXU matmul; BN scale is already folded into the packed
        # weights, so only the additive shift remains.
        cin = v.shape[0]
        for t, (di, dj) in enumerate(taps):
            stk_ref[t * cin:(t + 1) * cin, :] = tap(v, di, dj)
        k_rows = len(taps) * cin
        y = jnp.dot(w_ref[row], stk_ref[0:k_rows, :],
                    preferred_element_type=jnp.float32) + b_ref[row]
        if act:
            y = jnp.maximum(y, 0.01 * y)          # leaky_relu(0.01)
        return y

    def msab(v, i):
        h1 = conv(v, w9_ref, b9_ref, 1 + 2 * i, TAPS_3x3_D1, True)   # conv2d1+bn1
        h2 = conv(h1, w9_ref, b9_ref, 2 + 2 * i, TAPS_3x3_D2, True)  # conv2d2+bn2
        # k=3 and k=5 branches merged into one block-diagonal 2C-channel chain.
        u = conv(h2, wA_ref, bA_ref, i, TAPS_5x1, True)              # conv3d1|4
        u = conv(u, wB_ref, bB_ref, 2 * i, TAPS_5x1, True)           # conv3d2|5
        u = conv(u, wB_ref, bB_ref, 2 * i + 1, TAPS_5x1, True)       # conv3d3|6
        z = u[0:C, :] + u[C:2 * C, :]             # conv3image + conv5image
        gate = pl.reciprocal(1.0 + jnp.exp(-z), approx=True)   # sigmoid on EUP
        return gate * h2

    x = x_ref[0]                                              # (C, L) lane-dense
    h = conv(x, w3i_ref, b3i_ref, 0, TAPS_3x1, False)         # inconv
    h = conv(h, w9_ref, b9_ref, 0, TAPS_3x3_D1, False)        # conv1
    m1 = msab(h, 0)
    m2 = msab(m1, 1)
    m3 = msab(m2, 2)
    m3 = m3 + x + m2 + m1                     # m3 += x; m3 += m2; m3 += m1
    m3 = conv(m3, w9_ref, b9_ref, 7, TAPS_3x3_D1, False)      # conv2
    o_ref[0] = conv(m3, wf_ref, bf_ref, 0, TAPS_3x3_D1, False)  # conv (final)


# ----------------------------------------------------------------------------
# Wrapper: single top-level jit; one pallas_call for the whole Trunk.
# ----------------------------------------------------------------------------
def _pixel_shuffle(x, r):
    if r == 1:
        return x
    B, C, H, W = x.shape
    c2 = C // (r * r)
    x = x.reshape(B, c2, r, r, H, W).transpose(0, 1, 4, 2, 5, 3)
    return x.reshape(B, c2, H * r, W * r)


@functools.partial(jax.jit, static_argnames=("up", "batch_groups"))
def trunk_forward(packed, x, *, up, batch_groups=2):
    B, C, H, W = x.shape
    S = H * W
    G = batch_groups if (batch_groups >= 1 and B % batch_groups == 0) else 1
    BPG = B // G
    L = BPG * S
    cout_last = packed["wf"].shape[1]

    # Fold batch into the lane axis: (G, C, BPG*H*W); lane order = (image, pixel).
    x2 = (x.astype(jnp.float32).reshape(G, BPG, C, S)
          .transpose(0, 2, 1, 3).reshape(G, C, L))
    masks = jnp.asarray(_build_masks(H, W, BPG))

    # Widest tap-stacked operand across all conv shapes in the plan.
    max_rows = max(len(TAPS_3x3_D1) * C,      # 9-tap C->C (and C->cout) convs
                   len(TAPS_5x1) * 2 * C,     # merged 5-tap 2C->2C convs
                   len(TAPS_3x1) * C)         # inconv

    kernel = functools.partial(_trunk_kernel, W=W, L=L, C=C)
    const = lambda g: (0, 0, 0)
    out2 = pl.pallas_call(
        kernel,
        out_shape=jax.ShapeDtypeStruct((G, cout_last, L), jnp.float32),
        grid=(G,),
        in_specs=[
            pl.BlockSpec((1, C, L), lambda g: (g, 0, 0)),
            pl.BlockSpec(masks.shape, const),
            pl.BlockSpec(packed["w3i"].shape, const),
            pl.BlockSpec(packed["b3i"].shape, const),
            pl.BlockSpec(packed["w9"].shape, const),
            pl.BlockSpec(packed["b9"].shape, const),
            pl.BlockSpec(packed["wA"].shape, const),
            pl.BlockSpec(packed["bA"].shape, const),
            pl.BlockSpec(packed["wB"].shape, const),
            pl.BlockSpec(packed["bB"].shape, const),
            pl.BlockSpec(packed["wf"].shape, const),
            pl.BlockSpec(packed["bf"].shape, const),
        ],
        out_specs=pl.BlockSpec((1, cout_last, L), lambda g: (g, 0, 0)),
        scratch_shapes=[pltpu.VMEM((max_rows, L), jnp.float32)],
        compiler_params=pltpu.CompilerParams(
            dimension_semantics=("parallel",)),
    )(x2, masks, packed["w3i"], packed["b3i"], packed["w9"], packed["b9"],
      packed["wA"], packed["bA"], packed["wB"], packed["bB"],
      packed["wf"], packed["bf"])

    out = (out2.reshape(G, cout_last, BPG, S).transpose(0, 2, 1, 3)
           .reshape(B, cout_last, H, W))
    return _pixel_shuffle(out, up)


# ----------------------------------------------------------------------------
# Deterministic parameter construction
# ----------------------------------------------------------------------------
class ParamGen:
    def __init__(self, seed):
        self._key = jax.random.PRNGKey(seed)
        self._i = 0

    def normal(self, shape, std):
        self._i += 1
        k = jax.random.fold_in(self._key, self._i)
        return (std * jax.random.normal(k, shape)).astype(jnp.float32)


def init_conv(pg, cin, cout, kh, kw):
    std = 1.0 / math.sqrt(cin * kh * kw)
    return {"w": pg.normal((cout, cin, kh, kw), std),
            "b": pg.normal((cout,), std)}


def init_bn(pg, c):
    return {"gamma": 1.0 + pg.normal((c,), 0.05),
            "beta": pg.normal((c,), 0.05),
            "mean": pg.normal((c,), 0.05),
            "var": 1.0 + jnp.abs(pg.normal((c,), 0.05))}


def init_msab(pg, c):
    return {"conv2d1": init_conv(pg, c, c, 3, 3),
            "conv2d2": init_conv(pg, c, c, 3, 3),
            "bn1": init_bn(pg, c),
            "bn2": init_bn(pg, c),
            "conv3d_k3": [init_conv(pg, c, c, 3, 1) for _ in range(3)],
            "conv3d_k5": [init_conv(pg, c, c, 5, 1) for _ in range(3)]}


def init_trunk(pg, cin, cout, up):
    return {"inconv": init_conv(pg, cin, cin, 3, 1),   # Piece3DConv approx.
            "conv1": init_conv(pg, cin, cin, 3, 3),
            "conv2": init_conv(pg, cin, cin, 3, 3),
            "msabs": [init_msab(pg, cin) for _ in range(3)],
            "conv": init_conv(pg, cin, cout * up * up, 3, 3)}


# ----------------------------------------------------------------------------
# Parameter packing: fold BN scale into weights, merge MSAB branches
# block-diagonally, stack taps along the contraction axis, group by shape.
# ----------------------------------------------------------------------------
def _fold_bn(cp, bn):
    w = jnp.asarray(cp["w"], jnp.float32)
    b = jnp.asarray(cp["b"], jnp.float32)
    if bn is None:
        return w, b
    inv = bn["gamma"] / jnp.sqrt(bn["var"] + 1e-5)
    return w * inv[:, None, None, None], bn["beta"] + inv * (b - bn["mean"])


def _stack_taps(w):
    """(Cout, Cin, kh, kw) -> (Cout, ntaps*Cin); column = tap*Cin + cin, taps
    ordered exactly like _taps() (kh-major, kw-minor)."""
    co, ci, kh, kw = w.shape
    return jnp.transpose(w.reshape(co, ci, kh * kw),
                         (0, 2, 1)).reshape(co, kh * kw * ci)


def _pad_k3_to_k5(w):   # (co, ci, 3, 1) -> (co, ci, 5, 1) with zero end taps
    return jnp.pad(w, ((0, 0), (0, 0), (1, 1), (0, 0)))


def pack_trunk_params(params):
    def packed(w, s):
        return _stack_taps(w), s.reshape(-1, 1)

    w9, b9, wA, bA, wB, bB = [], [], [], [], [], []

    w, s = packed(*_fold_bn(params["conv1"], None)); w9.append(w); b9.append(s)
    for mp in params["msabs"]:
        for ck, bk in (("conv2d1", "bn1"), ("conv2d2", "bn2")):
            w, s = packed(*_fold_bn(mp[ck], mp[bk])); w9.append(w); b9.append(s)
        k3 = [_fold_bn(cp, None) for cp in mp["conv3d_k3"]]
        k5 = [_fold_bn(cp, None) for cp in mp["conv3d_k5"]]
        # First merged conv: (2C, C) per tap -- both branches read the same h2.
        w0 = jnp.concatenate([_pad_k3_to_k5(k3[0][0]), k5[0][0]], axis=0)
        s0 = jnp.concatenate([k3[0][1], k5[0][1]], axis=0)
        w, s = packed(w0, s0); wA.append(w); bA.append(s)
        # Next two merged convs: block-diagonal (2C, 2C) per tap.
        for j in (1, 2):
            w3p = _pad_k3_to_k5(k3[j][0])
            w5 = k5[j][0]
            top = jnp.concatenate([w3p, jnp.zeros_like(w3p)], axis=1)
            bot = jnp.concatenate([jnp.zeros_like(w5), w5], axis=1)
            wj = jnp.concatenate([top, bot], axis=0)
            sj = jnp.concatenate([k3[j][1], k5[j][1]], axis=0)
            w, s = packed(wj, sj); wB.append(w); bB.append(s)
    w, s = packed(*_fold_bn(params["conv2"], None)); w9.append(w); b9.append(s)

    w3i, b3i = packed(*_fold_bn(params["inconv"], None))
    wf, bf = packed(*_fold_bn(params["conv"], None))

    return {"w3i": w3i[None], "b3i": b3i[None],
            "w9": jnp.stack(w9), "b9": jnp.stack(b9),
            "wA": jnp.stack(wA), "bA": jnp.stack(bA),
            "wB": jnp.stack(wB), "bB": jnp.stack(bB),
            "wf": wf[None], "bf": bf[None]}


# ----------------------------------------------------------------------------
# Pure-JAX reference (validates the fused kernel, incl. the roll convention)
# ----------------------------------------------------------------------------
def _conv2d_ref(x, cp, dil=1):
    w, b = cp["w"], cp["b"]
    kh, kw = w.shape[2], w.shape[3]
    pad = ((dil * (kh // 2),) * 2, (dil * (kw // 2),) * 2)
    y = jax.lax.conv_general_dilated(
        x, w, window_strides=(1, 1), padding=pad, rhs_dilation=(dil, dil),
        dimension_numbers=("NCHW", "OIHW", "NCHW"))
    return y + b[None, :, None, None]


def trunk_reference(params, x, *, up):
    def bn(h, p):
        inv = p["gamma"] / jnp.sqrt(p["var"] + 1e-5)
        return ((h - p["mean"][None, :, None, None]) * inv[None, :, None, None]
                + p["beta"][None, :, None, None])

    def lrelu(h):
        return jnp.where(h >= 0, h, 0.01 * h)

    def msab(h, mp):
        h = lrelu(bn(_conv2d_ref(h, mp["conv2d1"], 1), mp["bn1"]))
        h = lrelu(bn(_conv2d_ref(h, mp["conv2d2"], 2), mp["bn2"]))
        c3 = h
        for cp in mp["conv3d_k3"]:
            c3 = lrelu(_conv2d_ref(c3, cp))
        c5 = h
        for cp in mp["conv3d_k5"]:
            c5 = lrelu(_conv2d_ref(c5, cp))
        gate = jax.nn.sigmoid(c3 + c5)
        return gate * h

    h = _conv2d_ref(x, params["inconv"])
    h = _conv2d_ref(h, params["conv1"])
    m1 = msab(h, params["msabs"][0])
    m2 = msab(m1, params["msabs"][1])
    m3 = msab(m2, params["msabs"][2])
    m3 = m3 + x + m2 + m1
    m3 = _conv2d_ref(m3, params["conv2"])
    out = _conv2d_ref(m3, params["conv"])
    return _pixel_shuffle(out, up)


# ----------------------------------------------------------------------------
if __name__ == "__main__":
    in_channels = 4
    out_channels = 4
    l_resolution = 16
    h_resolution = 16        # upscale_factor = 1 -> PixelShuffle(1) is identity
    batch = 2
    up = int(h_resolution // l_resolution)

    params = init_trunk(ParamGen(0), in_channels, out_channels, up)
    packed = pack_trunk_params(params)

    x = jax.random.normal(jax.random.PRNGKey(0),
                          (batch, in_channels, l_resolution, l_resolution),
                          dtype=jnp.float32)

    # Keep a size-2 parallel grid when batch allows (both v7x TensorCores busy);
    # remaining batch elements are folded into the lane axis inside each step.
    groups = 2 if batch % 2 == 0 else 1
    out = trunk_forward(packed, x, up=up, batch_groups=groups)
    out = jax.block_until_ready(out)

    assert out.shape == (batch, out_channels, h_resolution, h_resolution), out.shape
    assert bool(jnp.all(jnp.isfinite(out)))

    # Validate the fused kernel (roll convention, BN folding, branch merging,
    # tap stacking, batch folding) against the pure-JAX reference.
    ref = jax.block_until_ready(
        jax.jit(functools.partial(trunk_reference, up=up))(params, x))
    max_err = float(jnp.max(jnp.abs(out - ref)))
    assert max_err < 1e-1, f"kernel vs reference max abs error {max_err}"

    print("KERNEL_OK")
</pallas_src>

<mosaic_0001>
module attributes {stable_mosaic.version = 11 : i64} {
  func.func @_trunk_kernel(%arg0: i32, %arg1: memref<1x4x256xf32, #tpu.memory_space<vmem>>, %arg2: memref<16x1x256xf32, #tpu.memory_space<vmem>>, %arg3: memref<1x4x12xf32, #tpu.memory_space<vmem>>, %arg4: memref<1x4x1xf32, #tpu.memory_space<vmem>>, %arg5: memref<8x4x36xf32, #tpu.memory_space<vmem>>, %arg6: memref<8x4x1xf32, #tpu.memory_space<vmem>>, %arg7: memref<3x8x20xf32, #tpu.memory_space<vmem>>, %arg8: memref<3x8x1xf32, #tpu.memory_space<vmem>>, %arg9: memref<6x8x40xf32, #tpu.memory_space<vmem>>, %arg10: memref<6x8x1xf32, #tpu.memory_space<vmem>>, %arg11: memref<1x4x36xf32, #tpu.memory_space<vmem>>, %arg12: memref<1x4x1xf32, #tpu.memory_space<vmem>>, %arg13: memref<1x4x256xf32, #tpu.memory_space<vmem>>, %arg14: memref<40x256xf32, #tpu.memory_space<vmem>>) attributes {dimension_semantics = [#tpu.dimension_semantics<parallel>], iteration_bounds = array<i64: 2>, scalar_prefetch = 0 : i64, scratch_operands = 1 : i64, tpu.core_type = #tpu.core_type<tc>, window_params = [{transform_indices = @transform_0, window_bounds = array<i64: 1, 4, 256>}, {pipeline_mode = #tpu.pipeline_mode<synchronous>, transform_indices = @transform_1, window_bounds = array<i64: 16, 1, 256>}, {pipeline_mode = #tpu.pipeline_mode<synchronous>, transform_indices = @transform_2, window_bounds = array<i64: 1, 4, 12>}, {pipeline_mode = #tpu.pipeline_mode<synchronous>, transform_indices = @transform_3, window_bounds = array<i64: 1, 4, 1>}, {pipeline_mode = #tpu.pipeline_mode<synchronous>, transform_indices = @transform_4, window_bounds = array<i64: 8, 4, 36>}, {pipeline_mode = #tpu.pipeline_mode<synchronous>, transform_indices = @transform_5, window_bounds = array<i64: 8, 4, 1>}, {pipeline_mode = #tpu.pipeline_mode<synchronous>, transform_indices = @transform_6, window_bounds = array<i64: 3, 8, 20>}, {pipeline_mode = #tpu.pipeline_mode<synchronous>, transform_indices = @transform_7, window_bounds = array<i64: 3, 8, 1>}, {pipeline_mode = #tpu.pipeline_mode<synchronous>, transform_indices = @transform_8, window_bounds = array<i64: 6, 8, 40>}, {pipeline_mode = #tpu.pipeline_mode<synchronous>, transform_indices = @transform_9, window_bounds = array<i64: 6, 8, 1>}, {pipeline_mode = #tpu.pipeline_mode<synchronous>, transform_indices = @transform_10, window_bounds = array<i64: 1, 4, 36>}, {pipeline_mode = #tpu.pipeline_mode<synchronous>, transform_indices = @transform_11, window_bounds = array<i64: 1, 4, 1>}, {transform_indices = @transform_12, window_bounds = array<i64: 1, 4, 256>}]} {
    %c0 = arith.constant 0 : index
    %c0_0 = arith.constant 0 : index
    %c0_1 = arith.constant 0 : index
    %0 = vector.load %arg1[%c0, %c0_0, %c0_1] : memref<1x4x256xf32, #tpu.memory_space<vmem>>, vector<1x4x256xf32>
    %1 = vector.shape_cast %0 : vector<1x4x256xf32> to vector<4x256xf32>
    %c16_i32 = arith.constant 16 : i32
    %2 = tpu.dynamic_rotate %1 by %c16_i32 dim 1 : vector<4x256xf32>, i32 -> vector<4x256xf32>
    %c4 = arith.constant 4 : index
    %c0_2 = arith.constant 0 : index
    %c0_3 = arith.constant 0 : index
    %3 = vector.load %arg2[%c4, %c0_2, %c0_3] : memref<16x1x256xf32, #tpu.memory_space<vmem>>, vector<1x1x256xf32>
    %4 = vector.shape_cast %3 : vector<1x1x256xf32> to vector<1x256xf32>
    %5 = vector.broadcast %4 : vector<1x256xf32> to vector<4x256xf32>
    %6 = arith.mulf %2, %5 : vector<4x256xf32>
    %c0_4 = arith.constant 0 : index
    %c0_5 = arith.constant 0 : index
    %7 = vector.load %arg14[%c0_4, %c0_5] : memref<40x256xf32, #tpu.memory_space<vmem>>, vector<4x256xf32>
    tpu.vector_store %arg14[%c0_4, %c0_5], %6 {strides = array<i32>} : memref<40x256xf32, #tpu.memory_space<vmem>>, vector<4x256xf32>,
    %c4_6 = arith.constant 4 : index
    %c0_7 = arith.constant 0 : index
    %8 = vector.load %arg14[%c4_6, %c0_7] : memref<40x256xf32, #tpu.memory_space<vmem>>, vector<4x256xf32>
    tpu.vector_store %arg14[%c4_6, %c0_7], %1 {strides = array<i32>} : memref<40x256xf32, #tpu.memory_space<vmem>>, vector<4x256xf32>,
    %c240_i32 = arith.constant 240 : i32
    %9 = tpu.dynamic_rotate %1 by %c240_i32 dim 1 : vector<4x256xf32>, i32 -> vector<4x256xf32>
    %c11 = arith.constant 11 : index
    %c0_8 = arith.constant 0 : index
    %c0_9 = arith.constant 0 : index
    %10 = vector.load %arg2[%c11, %c0_8, %c0_9] : memref<16x1x256xf32, #tpu.memory_space<vmem>>, vector<1x1x256xf32>
    %11 = vector.shape_cast %10 : vector<1x1x256xf32> to vector<1x256xf32>
    %12 = vector.broadcast %11 : vector<1x256xf32> to vector<4x256xf32>
    %13 = arith.mulf %9, %12 : vector<4x256xf32>
    %c8 = arith.constant 8 : index
    %c0_10 = arith.constant 0 : index
    %14 = vector.load %arg14[%c8, %c0_10] : memref<40x256xf32, #tpu.memory_space<vmem>>, vector<4x256xf32>
    tpu.vector_store %arg14[%c8, %c0_10], %13 {strides = array<i32>} : memref<40x256xf32, #tpu.memory_space<vmem>>, vector<4x256xf32>,
    %c0_11 = arith.constant 0 : index
    %c0_12 = arith.constant 0 : index
    %c0_13 = arith.constant 0 : index
    %15 = vector.load %arg3[%c0_11, %c0_12, %c0_13] : memref<1x4x12xf32, #tpu.memory_space<vmem>>, vector<1x4x12xf32>
    %16 = vector.shape_cast %15 : vector<1x4x12xf32> to vector<4x12xf32>
    %c0_14 = arith.constant 0 : index
    %c0_15 = arith.constant 0 : index
    %17 = vector.load %arg14[%c0_14, %c0_15] : memref<40x256xf32, #tpu.memory_space<vmem>>, vector<12x256xf32>
    %cst = arith.constant dense<0.000000e+00> : vector<4x256xf32>
    %18 = tpu.matmul %16, %17, %cst {dimension_numbers = #tpu.dot_dimension_numbers<[1], [0], [0], [1], [0, 0, 1, 1], [], []>} : vector<4x12xf32>, vector<12x256xf32>, vector<4x256xf32> -> vector<4x256xf32>
    %c0_16 = arith.constant 0 : index
    %c0_17 = arith.constant 0 : index
    %c0_18 = arith.constant 0 : index
    %19 = vector.load %arg4[%c0_16, %c0_17, %c0_18] : memref<1x4x1xf32, #tpu.memory_space<vmem>>, vector<1x4x1xf32>
    %20 = vector.shape_cast %19 : vector<1x4x1xf32> to vector<4x1xf32>
    %21 = vector.broadcast %20 : vector<4x1xf32> to vector<4x256xf32>
    %22 = arith.addf %18, %21 : vector<4x256xf32>
    %c17_i32 = arith.constant 17 : i32
    %23 = tpu.dynamic_rotate %22 by %c17_i32 dim 1 : vector<4x256xf32>, i32 -> vector<4x256xf32>
    %c3 = arith.constant 3 : index
    %c0_19 = arith.constant 0 : index
    %c0_20 = arith.constant 0 : index
    %24 = vector.load %arg2[%c3, %c0_19, %c0_20] : memref<16x1x256xf32, #tpu.memory_space<vmem>>, vector<1x1x256xf32>
    %25 = vector.shape_cast %24 : vector<1x1x256xf32> to vector<1x256xf32>
    %26 = vector.broadcast %25 : vector<1x256xf32> to vector<4x256xf32>
    %27 = arith.mulf %23, %26 : vector<4x256xf32>
    %c0_21 = arith.constant 0 : index
    %c0_22 = arith.constant 0 : index
    %28 = vector.load %arg14[%c0_21, %c0_22] : memref<40x256xf32, #tpu.memory_space<vmem>>, vector<4x256xf32>
    tpu.vector_store %arg14[%c0_21, %c0_22], %27 {strides = array<i32>} : memref<40x256xf32, #tpu.memory_space<vmem>>, vector<4x256xf32>,
    %c16_i32_23 = arith.constant 16 : i32
    %29 = tpu.dynamic_rotate %22 by %c16_i32_23 dim 1 : vector<4x256xf32>, i32 -> vector<4x256xf32>
    %c4_24 = arith.constant 4 : index
    %c0_25 = arith.constant 0 : index
    %c0_26 = arith.constant 0 : index
    %30 = vector.load %arg2[%c4_24, %c0_25, %c0_26] : memref<16x1x256xf32, #tpu.memory_space<vmem>>, vector<1x1x256xf32>
    %31 = vector.shape_cast %30 : vector<1x1x256xf32> to vector<1x256xf32>
    %32 = vector.broadcast %31 : vector<1x256xf32> to vector<4x256xf32>
    %33 = arith.mulf %29, %32 : vector<4x256xf32>
    %c4_27 = arith.constant 4 : index
    %c0_28 = arith.constant 0 : index
    %34 = vector.load %arg14[%c4_27, %c0_28] : memref<40x256xf32, #tpu.memory_space<vmem>>, vector<4x256xf32>
    tpu.vector_store %arg14[%c4_27, %c0_28], %33 {strides = array<i32>} : memref<40x256xf32, #tpu.memory_space<vmem>>, vector<4x256xf32>,
    %c15_i32 = arith.constant 15 : i32
    %35 = tpu.dynamic_rotate %22 by %c15_i32 dim 1 : vector<4x256xf32>, i32 -> vector<4x256xf32>
    %c5 = arith.constant 5 : index
    %c0_29 = arith.constant 0 : index
    %c0_30 = arith.constant 0 : index
    %36 = vector.load %arg2[%c5, %c0_29, %c0_30] : memref<16x1x256xf32, #tpu.memory_space<vmem>>, vector<1x1x256xf32>
    %37 = vector.shape_cast %36 : vector<1x1x256xf32> to vector<1x256xf32>
    %38 = vector.broadcast %37 : vector<1x256xf32> to vector<4x256xf32>
    %39 = arith.mulf %35, %38 : vector<4x256xf32>
    %c8_31 = arith.constant 8 : index
    %c0_32 = arith.constant 0 : index
    %40 = vector.load %arg14[%c8_31, %c0_32] : memref<40x256xf32, #tpu.memory_space<vmem>>, vector<4x256xf32>
    tpu.vector_store %arg14[%c8_31, %c0_32], %39 {strides = array<i32>} : memref<40x256xf32, #tpu.memory_space<vmem>>, vector<4x256xf32>,
    %c1_i32 = arith.constant 1 : i32
    %41 = tpu.dynamic_rotate %22 by %c1_i32 dim 1 : vector<4x256xf32>, i32 -> vector<4x256xf32>
    %c7 = arith.constant 7 : index
    %c0_33 = arith.constant 0 : index
    %c0_34 = arith.constant 0 : index
    %42 = vector.load %arg2[%c7, %c0_33, %c0_34] : memref<16x1x256xf32, #tpu.memory_space<vmem>>, vector<1x1x256xf32>
    %43 = vector.shape_cast %42 : vector<1x1x256xf32> to vector<1x256xf32>
    %44 = vector.broadcast %43 : vector<1x256xf32> to vector<4x256xf32>
    %45 = arith.mulf %41, %44 : vector<4x256xf32>
    %c12 = arith.constant 12 : index
    %c0_35 = arith.constant 0 : index
    %46 = vector.load %arg14[%c12, %c0_35] : memref<40x256xf32, #tpu.memory_space<vmem>>, vector<4x256xf32>
    tpu.vector_store %arg14[%c12, %c0_35], %45 {strides = array<i32>} : memref<40x256xf32, #tpu.memory_space<vmem>>, vector<4x256xf32>,
    %c16 = arith.constant 16 : index
    %c0_36 = arith.constant 0 : index
    %47 = vector.load %arg14[%c16, %c0_36] : memref<40x256xf32, #tpu.memory_space<vmem>>, vector<4x256xf32>
    tpu.vector_store %arg14[%c16, %c0_36], %22 {strides = array<i32>} : memref<40x256xf32, #tpu.memory_space<vmem>>, vector<4x256xf32>,
    %c255_i32 = arith.constant 255 : i32
    %48 = tpu.dynamic_rotate %22 by %c255_i32 dim 1 : vector<4x256xf32>, i32 -> vector<4x256xf32>
    %c8_37 = arith.constant 8 : index
    %c0_38 = arith.constant 0 : index
    %c0_39 = arith.constant 0 : index
    %49 = vector.load %arg2[%c8_37, %c0_38, %c0_39] : memref<16x1x256xf32, #tpu.memory_space<vmem>>, vector<1x1x256xf32>
    %50 = vector.shape_cast %49 : vector<1x1x256xf32> to vector<1x256xf32>
    %51 = vector.broadcast %50 : vector<1x256xf32> to vector<4x256xf32>
    %52 = arith.mulf %48, %51 : vector<4x256xf32>
    %c20 = arith.constant 20 : index
    %c0_40 = arith.constant 0 : index
    %53 = vector.load %arg14[%c20, %c0_40] : memref<40x256xf32, #tpu.memory_space<vmem>>, vector<4x256xf32>
    tpu.vector_store %arg14[%c20, %c0_40], %52 {strides = array<i32>} : memref<40x256xf32, #tpu.memory_space<vmem>>, vector<4x256xf32>,
    %c241_i32 = arith.constant 241 : i32
    %54 = tpu.dynamic_rotate %22 by %c241_i32 dim 1 : vector<4x256xf32>, i32 -> vector<4x256xf32>
    %c10 = arith.constant 10 : index
    %c0_41 = arith.constant 0 : index
    %c0_42 = arith.constant 0 : index
    %55 = vector.load %arg2[%c10, %c0_41, %c0_42] : memref<16x1x256xf32, #tpu.memory_space<vmem>>, vector<1x1x256xf32>
    %56 = vector.shape_cast %55 : vector<1x1x256xf32> to vector<1x256xf32>
    %57 = vector.broadcast %56 : vector<1x256xf32> to vector<4x256xf32>
    %58 = arith.mulf %54, %57 : vector<4x256xf32>
    %c24 = arith.constant 24 : index
    %c0_43 = arith.constant 0 : index
    %59 = vector.load %arg14[%c24, %c0_43] : memref<40x256xf32, #tpu.memory_space<vmem>>, vector<4x256xf32>
    tpu.vector_store %arg14[%c24, %c0_43], %58 {strides = array<i32>} : memref<40x256xf32, #tpu.memory_space<vmem>>, vector<4x256xf32>,
    %c240_i32_44 = arith.constant 240 : i32
    %60 = tpu.dynamic_rotate %22 by %c240_i32_44 dim 1 : vector<4x256xf32>, i32 -> vector<4x256xf32>
    %c11_45 = arith.constant 11 : index
    %c0_46 = arith.constant 0 : index
    %c0_47 = arith.constant 0 : index
    %61 = vector.load %arg2[%c11_45, %c0_46, %c0_47] : memref<16x1x256xf32, #tpu.memory_space<vmem>>, vector<1x1x256xf32>
    %62 = vector.shape_cast %61 : vector<1x1x256xf32> to vector<1x256xf32>
    %63 = vector.broadcast %62 : vector<1x256xf32> to vector<4x256xf32>
    %64 = arith.mulf %60, %63 : vector<4x256xf32>
    %c28 = arith.constant 28 : index
    %c0_48 = arith.constant 0 : index
    %65 = vector.load %arg14[%c28, %c0_48] : memref<40x256xf32, #tpu.memory_space<vmem>>, vector<4x256xf32>
    tpu.vector_store %arg14[%c28, %c0_48], %64 {strides = array<i32>} : memref<40x256xf32, #tpu.memory_space<vmem>>, vector<4x256xf32>,
    %c239_i32 = arith.constant 239 : i32
    %66 = tpu.dynamic_rotate %22 by %c239_i32 dim 1 : vector<4x256xf32>, i32 -> vector<4x256xf32>
    %c12_49 = arith.constant 12 : index
    %c0_50 = arith.constant 0 : index
    %c0_51 = arith.constant 0 : index
    %67 = vector.load %arg2[%c12_49, %c0_50, %c0_51] : memref<16x1x256xf32, #tpu.memory_space<vmem>>, vector<1x1x256xf32>
    %68 = vector.shape_cast %67 : vector<1x1x256xf32> to vector<1x256xf32>
    %69 = vector.broadcast %68 : vector<1x256xf32> to vector<4x256xf32>
    %70 = arith.mulf %66, %69 : vector<4x256xf32>
    %c32 = arith.constant 32 : index
    %c0_52 = arith.constant 0 : index
    %71 = vector.load %arg14[%c32, %c0_52] : memref<40x256xf32, #tpu.memory_space<vmem>>, vector<4x256xf32>
    tpu.vector_store %arg14[%c32, %c0_52], %70 {strides = array<i32>} : memref<40x256xf32, #tpu.memory_space<vmem>>, vector<4x256xf32>,
    %c0_53 = arith.constant 0 : index
    %c0_54 = arith.constant 0 : index
    %c0_55 = arith.constant 0 : index
    %72 = vector.load %arg5[%c0_53, %c0_54, %c0_55] : memref<8x4x36xf32, #tpu.memory_space<vmem>>, vector<1x4x36xf32>
    %73 = vector.shape_cast %72 : vector<1x4x36xf32> to vector<4x36xf32>
    %c0_56 = arith.constant 0 : index
    %c0_57 = arith.constant 0 : index
    %74 = vector.load %arg14[%c0_56, %c0_57] : memref<40x256xf32, #tpu.memory_space<vmem>>, vector<36x256xf32>
    %cst_58 = arith.constant dense<0.000000e+00> : vector<4x256xf32>
    %75 = tpu.matmul %73, %74, %cst_58 {dimension_numbers = #tpu.dot_dimension_numbers<[1], [0], [0], [1], [0, 0, 1, 1], [], []>} : vector<4x36xf32>, vector<36x256xf32>, vector<4x256xf32> -> vector<4x256xf32>
    %c0_59 = arith.constant 0 : index
    %c0_60 = arith.constant 0 : index
    %c0_61 = arith.constant 0 : index
    %76 = vector.load %arg6[%c0_59, %c0_60, %c0_61] : memref<8x4x1xf32, #tpu.memory_space<vmem>>, vector<1x4x1xf32>
    %77 = vector.shape_cast %76 : vector<1x4x1xf32> to vector<4x1xf32>
    %78 = vector.broadcast %77 : vector<4x1xf32> to vector<4x256xf32>
    %79 = arith.addf %75, %78 : vector<4x256xf32>
    %c17_i32_62 = arith.constant 17 : i32
    %80 = tpu.dynamic_rotate %79 by %c17_i32_62 dim 1 : vector<4x256xf32>, i32 -> vector<4x256xf32>
    %c3_63 = arith.constant 3 : index
    %c0_64 = arith.constant 0 : index
    %c0_65 = arith.constant 0 : index
    %81 = vector.load %arg2[%c3_63, %c0_64, %c0_65] : memref<16x1x256xf32, #tpu.memory_space<vmem>>, vector<1x1x256xf32>
    %82 = vector.shape_cast %81 : vector<1x1x256xf32> to vector<1x256xf32>
    %83 = vector.broadcast %82 : vector<1x256xf32> to vector<4x256xf32>
    %84 = arith.mulf %80, %83 : vector<4x256xf32>
    %c0_66 = arith.constant 0 : index
    %c0_67 = arith.constant 0 : index
    %85 = vector.load %arg14[%c0_66, %c0_67] : memref<40x256xf32, #tpu.memory_space<vmem>>, vector<4x256xf32>
    tpu.vector_store %arg14[%c0_66, %c0_67], %84 {strides = array<i32>} : memref<40x256xf32, #tpu.memory_space<vmem>>, vector<4x256xf32>,
    %c16_i32_68 = arith.constant 16 : i32
    %86 = tpu.dynamic_rotate %79 by %c16_i32_68 dim 1 : vector<4x256xf32>, i32 -> vector<4x256xf32>
    %c4_69 = arith.constant 4 : index
    %c0_70 = arith.constant 0 : index
    %c0_71 = arith.constant 0 : index
    %87 = vector.load %arg2[%c4_69, %c0_70, %c0_71] : memref<16x1x256xf32, #tpu.memory_space<vmem>>, vector<1x1x256xf32>
    %88 = vector.shape_cast %87 : vector<1x1x256xf32> to vector<1x256xf32>
    %89 = vector.broadcast %88 : vector<1x256xf32> to vector<4x256xf32>
    %90 = arith.mulf %86, %89 : vector<4x256xf32>
    %c4_72 = arith.constant 4 : index
    %c0_73 = arith.constant 0 : index
    %91 = vector.load %arg14[%c4_72, %c0_73] : memref<40x256xf32, #tpu.memory_space<vmem>>, vector<4x256xf32>
    tpu.vector_store %arg14[%c4_72, %c0_73], %90 {strides = array<i32>} : memref<40x256xf32, #tpu.memory_space<vmem>>, vector<4x256xf32>,
    %c15_i32_74 = arith.constant 15 : i32
    %92 = tpu.dynamic_rotate %79 by %c15_i32_74 dim 1 : vector<4x256xf32>, i32 -> vector<4x256xf32>
    %c5_75 = arith.constant 5 : index
    %c0_76 = arith.constant 0 : index
    %c0_77 = arith.constant 0 : index
    %93 = vector.load %arg2[%c5_75, %c0_76, %c0_77] : memref<16x1x256xf32, #tpu.memory_space<vmem>>, vector<1x1x256xf32>
    %94 = vector.shape_cast %93 : vector<1x1x256xf32> to vector<1x256xf32>
    %95 = vector.broadcast %94 : vector<1x256xf32> to vector<4x256xf32>
    %96 = arith.mulf %92, %95 : vector<4x256xf32>
    %c8_78 = arith.constant 8 : index
    %c0_79 = arith.constant 0 : index
    %97 = vector.load %arg14[%c8_78, %c0_79] : memref<40x256xf32, #tpu.memory_space<vmem>>, vector<4x256xf32>
    tpu.vector_store %arg14[%c8_78, %c0_79], %96 {strides = array<i32>} : memref<40x256xf32, #tpu.memory_space<vmem>>, vector<4x256xf32>,
    %c1_i32_80 = arith.constant 1 : i32
    %98 = tpu.dynamic_rotate %79 by %c1_i32_80 dim 1 : vector<4x256xf32>, i32 -> vector<4x256xf32>
    %c7_81 = arith.constant 7 : index
    %c0_82 = arith.constant 0 : index
    %c0_83 = arith.constant 0 : index
    %99 = vector.load %arg2[%c7_81, %c0_82, %c0_83] : memref<16x1x256xf32, #tpu.memory_space<vmem>>, vector<1x1x256xf32>
    %100 = vector.shape_cast %99 : vector<1x1x256xf32> to vector<1x256xf32>
    %101 = vector.broadcast %100 : vector<1x256xf32> to vector<4x256xf32>
    %102 = arith.mulf %98, %101 : vector<4x256xf32>
    %c12_84 = arith.constant 12 : index
    %c0_85 = arith.constant 0 : index
    %103 = vector.load %arg14[%c12_84, %c0_85] : memref<40x256xf32, #tpu.memory_space<vmem>>, vector<4x256xf32>
    tpu.vector_store %arg14[%c12_84, %c0_85], %102 {strides = array<i32>} : memref<40x256xf32, #tpu.memory_space<vmem>>, vector<4x256xf32>,
    %c16_86 = arith.constant 16 : index
    %c0_87 = arith.constant 0 : index
    %104 = vector.load %arg14[%c16_86, %c0_87] : memref<40x256xf32, #tpu.memory_space<vmem>>, vector<4x256xf32>
    tpu.vector_store %arg14[%c16_86, %c0_87], %79 {strides = array<i32>} : memref<40x256xf32, #tpu.memory_space<vmem>>, vector<4x256xf32>,
    %c255_i32_88 = arith.constant 255 : i32
    %105 = tpu.dynamic_rotate %79 by %c255_i32_88 dim 1 : vector<4x256xf32>, i32 -> vector<4x256xf32>
    %c8_89 = arith.constant 8 : index
    %c0_90 = arith.constant 0 : index
    %c0_91 = arith.constant 0 : index
    %106 = vector.load %arg2[%c8_89, %c0_90, %c0_91] : memref<16x1x256xf32, #tpu.memory_space<vmem>>, vector<1x1x256xf32>
    %107 = vector.shape_cast %106 : vector<1x1x256xf32> to vector<1x256xf32>
    %108 = vector.broadcast %107 : vector<1x256xf32> to vector<4x256xf32>
    %109 = arith.mulf %105, %108 : vector<4x256xf32>
    %c20_92 = arith.constant 20 : index
    %c0_93 = arith.constant 0 : index
    %110 = vector.load %arg14[%c20_92, %c0_93] : memref<40x256xf32, #tpu.memory_space<vmem>>, vector<4x256xf32>
    tpu.vector_store %arg14[%c20_92, %c0_93], %109 {strides = array<i32>} : memref<40x256xf32, #tpu.memory_space<vmem>>, vector<4x256xf32>,
    %c241_i32_94 = arith.constant 241 : i32
    %111 = tpu.dynamic_rotate %79 by %c241_i32_94 dim 1 : vector<4x256xf32>, i32 -> vector<4x256xf32>
    %c10_95 = arith.constant 10 : index
    %c0_96 = arith.constant 0 : index
    %c0_97 = arith.constant 0 : index
    %112 = vector.load %arg2[%c10_95, %c0_96, %c0_97] : memref<16x1x256xf32, #tpu.memory_space<vmem>>, vector<1x1x256xf32>
    %113 = vector.shape_cast %112 : vector<1x1x256xf32> to vector<1x256xf32>
    %114 = vector.broadcast %113 : vector<1x256xf32> to vector<4x256xf32>
    %115 = arith.mulf %111, %114 : vector<4x256xf32>
    %c24_98 = arith.constant 24 : index
    %c0_99 = arith.constant 0 : index
    %116 = vector.load %arg14[%c24_98, %c0_99] : memref<40x256xf32, #tpu.memory_space<vmem>>, vector<4x256xf32>
    tpu.vector_store %arg14[%c24_98, %c0_99], %115 {strides = array<i32>} : memref<40x256xf32, #tpu.memory_space<vmem>>, vector<4x256xf32>,
    %c240_i32_100 = arith.constant 240 : i32
    %117 = tpu.dynamic_rotate %79 by %c240_i32_100 dim 1 : vector<4x256xf32>, i32 -> vector<4x256xf32>
    %c11_101 = arith.constant 11 : index
    %c0_102 = arith.constant 0 : index
    %c0_103 = arith.constant 0 : index
    %118 = vector.load %arg2[%c11_101, %c0_102, %c0_103] : memref<16x1x256xf32, #tpu.memory_space<vmem>>, vector<1x1x256xf32>
    %119 = vector.shape_cast %118 : vector<1x1x256xf32> to vector<1x256xf32>
    %120 = vector.broadcast %119 : vector<1x256xf32> to vector<4x256xf32>
    %121 = arith.mulf %117, %120 : vector<4x256xf32>
    %c28_104 = arith.constant 28 : index
    %c0_105 = arith.constant 0 : index
    %122 = vector.load %arg14[%c28_104, %c0_105] : memref<40x256xf32, #tpu.memory_space<vmem>>, vector<4x256xf32>
    tpu.vector_store %arg14[%c28_104, %c0_105], %121 {strides = array<i32>} : memref<40x256xf32, #tpu.memory_space<vmem>>, vector<4x256xf32>,
    %c239_i32_106 = arith.constant 239 : i32
    %123 = tpu.dynamic_rotate %79 by %c239_i32_106 dim 1 : vector<4x256xf32>, i32 -> vector<4x256xf32>
    %c12_107 = arith.constant 12 : index
    %c0_108 = arith.constant 0 : index
    %c0_109 = arith.constant 0 : index
    %124 = vector.load %arg2[%c12_107, %c0_108, %c0_109] : memref<16x1x256xf32, #tpu.memory_space<vmem>>, vector<1x1x256xf32>
    %125 = vector.shape_cast %124 : vector<1x1x256xf32> to vector<1x256xf32>
    %126 = vector.broadcast %125 : vector<1x256xf32> to vector<4x256xf32>
    %127 = arith.mulf %123, %126 : vector<4x256xf32>
    %c32_110 = arith.constant 32 : index
    %c0_111 = arith.constant 0 : index
    %128 = vector.load %arg14[%c32_110, %c0_111] : memref<40x256xf32, #tpu.memory_space<vmem>>, vector<4x256xf32>
    tpu.vector_store %arg14[%c32_110, %c0_111], %127 {strides = array<i32>} : memref<40x256xf32, #tpu.memory_space<vmem>>, vector<4x256xf32>,
    %c1 = arith.constant 1 : index
    %c0_112 = arith.constant 0 : index
    %c0_113 = arith.constant 0 : index
    %129 = vector.load %arg5[%c1, %c0_112, %c0_113] : memref<8x4x36xf32, #tpu.memory_space<vmem>>, vector<1x4x36xf32>
    %130 = vector.shape_cast %129 : vector<1x4x36xf32> to vector<4x36xf32>
    %c0_114 = arith.constant 0 : index
    %c0_115 = arith.constant 0 : index
    %131 = vector.load %arg14[%c0_114, %c0_115] : memref<40x256xf32, #tpu.memory_space<vmem>>, vector<36x256xf32>
    %cst_116 = arith.constant dense<0.000000e+00> : vector<4x256xf32>
    %132 = tpu.matmul %130, %131, %cst_116 {dimension_numbers = #tpu.dot_dimension_numbers<[1], [0], [0], [1], [0, 0, 1, 1], [], []>} : vector<4x36xf32>, vector<36x256xf32>, vector<4x256xf32> -> vector<4x256xf32>
    %c1_117 = arith.constant 1 : index
    %c0_118 = arith.constant 0 : index
    %c0_119 = arith.constant 0 : index
    %133 = vector.load %arg6[%c1_117, %c0_118, %c0_119] : memref<8x4x1xf32, #tpu.memory_space<vmem>>, vector<1x4x1xf32>
    %134 = vector.shape_cast %133 : vector<1x4x1xf32> to vector<4x1xf32>
    %135 = vector.broadcast %134 : vector<4x1xf32> to vector<4x256xf32>
    %136 = arith.addf %132, %135 : vector<4x256xf32>
    %cst_120 = arith.constant 0.00999999977 : f32
    %137 = vector.broadcast %cst_120 : f32 to vector<4x256xf32>
    %138 = arith.mulf %137, %136 : vector<4x256xf32>
    %139 = arith.maximumf %136, %138 : vector<4x256xf32>
    %c34_i32 = arith.constant 34 : i32
    %140 = tpu.dynamic_rotate %139 by %c34_i32 dim 1 : vector<4x256xf32>, i32 -> vector<4x256xf32>
    %c0_121 = arith.constant 0 : index
    %c0_122 = arith.constant 0 : index
    %c0_123 = arith.constant 0 : index
    %141 = vector.load %arg2[%c0_121, %c0_122, %c0_123] : memref<16x1x256xf32, #tpu.memory_space<vmem>>, vector<1x1x256xf32>
    %142 = vector.shape_cast %141 : vector<1x1x256xf32> to vector<1x256xf32>
    %143 = vector.broadcast %142 : vector<1x256xf32> to vector<4x256xf32>
    %144 = arith.mulf %140, %143 : vector<4x256xf32>
    %c0_124 = arith.constant 0 : index
    %c0_125 = arith.constant 0 : index
    %145 = vector.load %arg14[%c0_124, %c0_125] : memref<40x256xf32, #tpu.memory_space<vmem>>, vector<4x256xf32>
    tpu.vector_store %arg14[%c0_124, %c0_125], %144 {strides = array<i32>} : memref<40x256xf32, #tpu.memory_space<vmem>>, vector<4x256xf32>,
    %c32_i32 = arith.constant 32 : i32
    %146 = tpu.dynamic_rotate %139 by %c32_i32 dim 1 : vector<4x256xf32>, i32 -> vector<4x256xf32>
    %c1_126 = arith.constant 1 : index
    %c0_127 = arith.constant 0 : index
    %c0_128 = arith.constant 0 : index
    %147 = vector.load %arg2[%c1_126, %c0_127, %c0_128] : memref<16x1x256xf32, #tpu.memory_space<vmem>>, vector<1x1x256xf32>
    %148 = vector.shape_cast %147 : vector<1x1x256xf32> to vector<1x256xf32>
    %149 = vector.broadcast %148 : vector<1x256xf32> to vector<4x256xf32>
    %150 = arith.mulf %146, %149 : vector<4x256xf32>
    %c4_129 = arith.constant 4 : index
    %c0_130 = arith.constant 0 : index
    %151 = vector.load %arg14[%c4_129, %c0_130] : memref<40x256xf32, #tpu.memory_space<vmem>>, vector<4x256xf32>
    tpu.vector_store %arg14[%c4_129, %c0_130], %150 {strides = array<i32>} : memref<40x256xf32, #tpu.memory_space<vmem>>, vector<4x256xf32>,
    %c30_i32 = arith.constant 30 : i32
    %152 = tpu.dynamic_rotate %139 by %c30_i32 dim 1 : vector<4x256xf32>, i32 -> vector<4x256xf32>
    %c2 = arith.constant 2 : index
    %c0_131 = arith.constant 0 : index
    %c0_132 = arith.constant 0 : index
    %153 = vector.load %arg2[%c2, %c0_131, %c0_132] : memref<16x1x256xf32, #tpu.memory_space<vmem>>, vector<1x1x256xf32>
    %154 = vector.shape_cast %153 : vector<1x1x256xf32> to vector<1x256xf32>
    %155 = vector.broadcast %154 : vector<1x256xf32> to vector<4x256xf32>
    %156 = arith.mulf %152, %155 : vector<4x256xf32>
    %c8_133 = arith.constant 8 : index
    %c0_134 = arith.constant 0 : index
    %157 = vector.load %arg14[%c8_133, %c0_134] : memref<40x256xf32, #tpu.memory_space<vmem>>, vector<4x256xf32>
    tpu.vector_store %arg14[%c8_133, %c0_134], %156 {strides = array<i32>} : memref<40x256xf32, #tpu.memory_space<vmem>>, vector<4x256xf32>,
    %c2_i32 = arith.constant 2 : i32
    %158 = tpu.dynamic_rotate %139 by %c2_i32 dim 1 : vector<4x256xf32>, i32 -> vector<4x256xf32>
    %c6 = arith.constant 6 : index
    %c0_135 = arith.constant 0 : index
    %c0_136 = arith.constant 0 : index
    %159 = vector.load %arg2[%c6, %c0_135, %c0_136] : memref<16x1x256xf32, #tpu.memory_space<vmem>>, vector<1x1x256xf32>
    %160 = vector.shape_cast %159 : vector<1x1x256xf32> to vector<1x256xf32>
    %161 = vector.broadcast %160 : vector<1x256xf32> to vector<4x256xf32>
    %162 = arith.mulf %158, %161 : vector<4x256xf32>
    %c12_137 = arith.constant 12 : index
    %c0_138 = arith.constant 0 : index
    %163 = vector.load %arg14[%c12_137, %c0_138] : memref<40x256xf32, #tpu.memory_space<vmem>>, vector<4x256xf32>
    tpu.vector_store %arg14[%c12_137, %c0_138], %162 {strides = array<i32>} : memref<40x256xf32, #tpu.memory_space<vmem>>, vector<4x256xf32>,
    %c16_139 = arith.constant 16 : index
    %c0_140 = arith.constant 0 : index
    %164 = vector.load %arg14[%c16_139, %c0_140] : memref<40x256xf32, #tpu.memory_space<vmem>>, vector<4x256xf32>
    tpu.vector_store %arg14[%c16_139, %c0_140], %139 {strides = array<i32>} : memref<40x256xf32, #tpu.memory_space<vmem>>, vector<4x256xf32>,
    %c254_i32 = arith.constant 254 : i32
    %165 = tpu.dynamic_rotate %139 by %c254_i32 dim 1 : vector<4x256xf32>, i32 -> vector<4x256xf32>
    %c9 = arith.constant 9 : index
    %c0_141 = arith.constant 0 : index
    %c0_142 = arith.constant 0 : index
    %166 = vector.load %arg2[%c9, %c0_141, %c0_142] : memref<16x1x256xf32, #tpu.memory_space<vmem>>, vector<1x1x256xf32>
    %167 = vector.shape_cast %166 : vector<1x1x256xf32> to vector<1x256xf32>
    %168 = vector.broadcast %167 : vector<1x256xf32> to vector<4x256xf32>
    %169 = arith.mulf %165, %168 : vector<4x256xf32>
    %c20_143 = arith.constant 20 : index
    %c0_144 = arith.constant 0 : index
    %170 = vector.load %arg14[%c20_143, %c0_144] : memref<40x256xf32, #tpu.memory_space<vmem>>, vector<4x256xf32>
    tpu.vector_store %arg14[%c20_143, %c0_144], %169 {strides = array<i32>} : memref<40x256xf32, #tpu.memory_space<vmem>>, vector<4x256xf32>,
    %c226_i32 = arith.constant 226 : i32
    %171 = tpu.dynamic_rotate %139 by %c226_i32 dim 1 : vector<4x256xf32>, i32 -> vector<4x256xf32>
    %c13 = arith.constant 13 : index
    %c0_145 = arith.constant 0 : index
    %c0_146 = arith.constant 0 : index
    %172 = vector.load %arg2[%c13, %c0_145, %c0_146] : memref<16x1x256xf32, #tpu.memory_space<vmem>>, vector<1x1x256xf32>
    %173 = vector.shape_cast %172 : vector<1x1x256xf32> to vector<1x256xf32>
    %174 = vector.broadcast %173 : vector<1x256xf32> to vector<4x256xf32>
    %175 = arith.mulf %171, %174 : vector<4x256xf32>
    %c24_147 = arith.constant 24 : index
    %c0_148 = arith.constant 0 : index
    %176 = vector.load %arg14[%c24_147, %c0_148] : memref<40x256xf32, #tpu.memory_space<vmem>>, vector<4x256xf32>
    tpu.vector_store %arg14[%c24_147, %c0_148], %175 {strides = array<i32>} : memref<40x256xf32, #tpu.memory_space<vmem>>, vector<4x256xf32>,
    %c224_i32 = arith.constant 224 : i32
    %177 = tpu.dynamic_rotate %139 by %c224_i32 dim 1 : vector<4x256xf32>, i32 -> vector<4x256xf32>
    %c14 = arith.constant 14 : index
    %c0_149 = arith.constant 0 : index
    %c0_150 = arith.constant 0 : index
    %178 = vector.load %arg2[%c14, %c0_149, %c0_150] : memref<16x1x256xf32, #tpu.memory_space<vmem>>, vector<1x1x256xf32>
    %179 = vector.shape_cast %178 : vector<1x1x256xf32> to vector<1x256xf32>
    %180 = vector.broadcast %179 : vector<1x256xf32> to vector<4x256xf32>
    %181 = arith.mulf %177, %180 : vector<4x256xf32>
    %c28_151 = arith.constant 28 : index
    %c0_152 = arith.constant 0 : index
    %182 = vector.load %arg14[%c28_151, %c0_152] : memref<40x256xf32, #tpu.memory_space<vmem>>, vector<4x256xf32>
    tpu.vector_store %arg14[%c28_151, %c0_152], %181 {strides = array<i32>} : memref<40x256xf32, #tpu.memory_space<vmem>>, vector<4x256xf32>,
    %c222_i32 = arith.constant 222 : i32
    %183 = tpu.dynamic_rotate %139 by %c222_i32 dim 1 : vector<4x256xf32>, i32 -> vector<4x256xf32>
    %c15 = arith.constant 15 : index
    %c0_153 = arith.constant 0 : index
    %c0_154 = arith.constant 0 : index
    %184 = vector.load %arg2[%c15, %c0_153, %c0_154] : memref<16x1x256xf32, #tpu.memory_space<vmem>>, vector<1x1x256xf32>
    %185 = vector.shape_cast %184 : vector<1x1x256xf32> to vector<1x256xf32>
    %186 = vector.broadcast %185 : vector<1x256xf32> to vector<4x256xf32>
    %187 = arith.mulf %183, %186 : vector<4x256xf32>
    %c32_155 = arith.constant 32 : index
    %c0_156 = arith.constant 0 : index
    %188 = vector.load %arg14[%c32_155, %c0_156] : memref<40x256xf32, #tpu.memory_space<vmem>>, vector<4x256xf32>
    tpu.vector_store %arg14[%c32_155, %c0_156], %187 {strides = array<i32>} : memref<40x256xf32, #tpu.memory_space<vmem>>, vector<4x256xf32>,
    %c2_157 = arith.constant 2 : index
    %c0_158 = arith.constant 0 : index
    %c0_159 = arith.constant 0 : index
    %189 = vector.load %arg5[%c2_157, %c0_158, %c0_159] : memref<8x4x36xf32, #tpu.memory_space<vmem>>, vector<1x4x36xf32>
    %190 = vector.shape_cast %189 : vector<1x4x36xf32> to vector<4x36xf32>
    %c0_160 = arith.constant 0 : index
    %c0_161 = arith.constant 0 : index
    %191 = vector.load %arg14[%c0_160, %c0_161] : memref<40x256xf32, #tpu.memory_space<vmem>>, vector<36x256xf32>
    %cst_162 = arith.constant dense<0.000000e+00> : vector<4x256xf32>
    %192 = tpu.matmul %190, %191, %cst_162 {dimension_numbers = #tpu.dot_dimension_numbers<[1], [0], [0], [1], [0, 0, 1, 1], [], []>} : vector<4x36xf32>, vector<36x256xf32>, vector<4x256xf32> -> vector<4x256xf32>
    %c2_163 = arith.constant 2 : index
    %c0_164 = arith.constant 0 : index
    %c0_165 = arith.constant 0 : index
    %193 = vector.load %arg6[%c2_163, %c0_164, %c0_165] : memref<8x4x1xf32, #tpu.memory_space<vmem>>, vector<1x4x1xf32>
    %194 = vector.shape_cast %193 : vector<1x4x1xf32> to vector<4x1xf32>
    %195 = vector.broadcast %194 : vector<4x1xf32> to vector<4x256xf32>
    %196 = arith.addf %192, %195 : vector<4x256xf32>
    %cst_166 = arith.constant 0.00999999977 : f32
    %197 = vector.broadcast %cst_166 : f32 to vector<4x256xf32>
    %198 = arith.mulf %197, %196 : vector<4x256xf32>
    %199 = arith.maximumf %196, %198 : vector<4x256xf32>
    %c32_i32_167 = arith.constant 32 : i32
    %200 = tpu.dynamic_rotate %199 by %c32_i32_167 dim 1 : vector<4x256xf32>, i32 -> vector<4x256xf32>
    %c1_168 = arith.constant 1 : index
    %c0_169 = arith.constant 0 : index
    %c0_170 = arith.constant 0 : index
    %201 = vector.load %arg2[%c1_168, %c0_169, %c0_170] : memref<16x1x256xf32, #tpu.memory_space<vmem>>, vector<1x1x256xf32>
    %202 = vector.shape_cast %201 : vector<1x1x256xf32> to vector<1x256xf32>
    %203 = vector.broadcast %202 : vector<1x256xf32> to vector<4x256xf32>
    %204 = arith.mulf %200, %203 : vector<4x256xf32>
    %c0_171 = arith.constant 0 : index
    %c0_172 = arith.constant 0 : index
    %205 = vector.load %arg14[%c0_171, %c0_172] : memref<40x256xf32, #tpu.memory_space<vmem>>, vector<4x256xf32>
    tpu.vector_store %arg14[%c0_171, %c0_172], %204 {strides = array<i32>} : memref<40x256xf32, #tpu.memory_space<vmem>>, vector<4x256xf32>,
    %c16_i32_173 = arith.constant 16 : i32
    %206 = tpu.dynamic_rotate %199 by %c16_i32_173 dim 1 : vector<4x256xf32>, i32 -> vector<4x256xf32>
    %c4_174 = arith.constant 4 : index
    %c0_175 = arith.constant 0 : index
    %c0_176 = arith.constant 0 : index
    %207 = vector.load %arg2[%c4_174, %c0_175, %c0_176] : memref<16x1x256xf32, #tpu.memory_space<vmem>>, vector<1x1x256xf32>
    %208 = vector.shape_cast %207 : vector<1x1x256xf32> to vector<1x256xf32>
    %209 = vector.broadcast %208 : vector<1x256xf32> to vector<4x256xf32>
    %210 = arith.mulf %206, %209 : vector<4x256xf32>
    %c4_177 = arith.constant 4 : index
    %c0_178 = arith.constant 0 : index
    %211 = vector.load %arg14[%c4_177, %c0_178] : memref<40x256xf32, #tpu.memory_space<vmem>>, vector<4x256xf32>
    tpu.vector_store %arg14[%c4_177, %c0_178], %210 {strides = array<i32>} : memref<40x256xf32, #tpu.memory_space<vmem>>, vector<4x256xf32>,
    %c8_179 = arith.constant 8 : index
    %c0_180 = arith.constant 0 : index
    %212 = vector.load %arg14[%c8_179, %c0_180] : memref<40x256xf32, #tpu.memory_space<vmem>>, vector<4x256xf32>
    tpu.vector_store %arg14[%c8_179, %c0_180], %199 {strides = array<i32>} : memref<40x256xf32, #tpu.memory_space<vmem>>, vector<4x256xf32>,
    %c240_i32_181 = arith.constant 240 : i32
    %213 = tpu.dynamic_rotate %199 by %c240_i32_181 dim 1 : vector<4x256xf32>, i32 -> vector<4x256xf32>
    %c11_182 = arith.constant 11 : index
    %c0_183 = arith.constant 0 : index
    %c0_184 = arith.constant 0 : index
    %214 = vector.load %arg2[%c11_182, %c0_183, %c0_184] : memref<16x1x256xf32, #tpu.memory_space<vmem>>, vector<1x1x256xf32>
    %215 = vector.shape_cast %214 : vector<1x1x256xf32> to vector<1x256xf32>
    %216 = vector.broadcast %215 : vector<1x256xf32> to vector<4x256xf32>
    %217 = arith.mulf %213, %216 : vector<4x256xf32>
    %c12_185 = arith.constant 12 : index
    %c0_186 = arith.constant 0 : index
    %218 = vector.load %arg14[%c12_185, %c0_186] : memref<40x256xf32, #tpu.memory_space<vmem>>, vector<4x256xf32>
    tpu.vector_store %arg14[%c12_185, %c0_186], %217 {strides = array<i32>} : memref<40x256xf32, #tpu.memory_space<vmem>>, vector<4x256xf32>,
    %c224_i32_187 = arith.constant 224 : i32
    %219 = tpu.dynamic_rotate %199 by %c224_i32_187 dim 1 : vector<4x256xf32>, i32 -> vector<4x256xf32>
    %c14_188 = arith.constant 14 : index
    %c0_189 = arith.constant 0 : index
    %c0_190 = arith.constant 0 : index
    %220 = vector.load %arg2[%c14_188, %c0_189, %c0_190] : memref<16x1x256xf32, #tpu.memory_space<vmem>>, vector<1x1x256xf32>
    %221 = vector.shape_cast %220 : vector<1x1x256xf32> to vector<1x256xf32>
    %222 = vector.broadcast %221 : vector<1x256xf32> to vector<4x256xf32>
    %223 = arith.mulf %219, %222 : vector<4x256xf32>
    %c16_191 = arith.constant 16 : index
    %c0_192 = arith.constant 0 : index
    %224 = vector.load %arg14[%c16_191, %c0_192] : memref<40x256xf32, #tpu.memory_space<vmem>>, vector<4x256xf32>
    tpu.vector_store %arg14[%c16_191, %c0_192], %223 {strides = array<i32>} : memref<40x256xf32, #tpu.memory_space<vmem>>, vector<4x256xf32>,
    %c0_193 = arith.constant 0 : index
    %c0_194 = arith.constant 0 : index
    %c0_195 = arith.constant 0 : index
    %225 = vector.load %arg7[%c0_193, %c0_194, %c0_195] : memref<3x8x20xf32, #tpu.memory_space<vmem>>, vector<1x8x20xf32>
    %226 = vector.shape_cast %225 : vector<1x8x20xf32> to vector<8x20xf32>
    %c0_196 = arith.constant 0 : index
    %c0_197 = arith.constant 0 : index
    %227 = vector.load %arg14[%c0_196, %c0_197] : memref<40x256xf32, #tpu.memory_space<vmem>>, vector<20x256xf32>
    %cst_198 = arith.constant dense<0.000000e+00> : vector<8x256xf32>
    %228 = tpu.matmul %226, %227, %cst_198 {dimension_numbers = #tpu.dot_dimension_numbers<[1], [0], [0], [1], [0, 0, 1, 1], [], []>} : vector<8x20xf32>, vector<20x256xf32>, vector<8x256xf32> -> vector<8x256xf32>
    %c0_199 = arith.constant 0 : index
    %c0_200 = arith.constant 0 : index
    %c0_201 = arith.constant 0 : index
    %229 = vector.load %arg8[%c0_199, %c0_200, %c0_201] : memref<3x8x1xf32, #tpu.memory_space<vmem>>, vector<1x8x1xf32>
    %230 = vector.shape_cast %229 : vector<1x8x1xf32> to vector<8x1xf32>
    %231 = vector.broadcast %230 : vector<8x1xf32> to vector<8x256xf32>
    %232 = arith.addf %228, %231 : vector<8x256xf32>
    %cst_202 = arith.constant 0.00999999977 : f32
    %233 = vector.broadcast %cst_202 : f32 to vector<8x256xf32>
    %234 = arith.mulf %233, %232 : vector<8x256xf32>
    %235 = arith.maximumf %232, %234 : vector<8x256xf32>
    %c32_i32_203 = arith.constant 32 : i32
    %236 = tpu.dynamic_rotate %235 by %c32_i32_203 dim 1 : vector<8x256xf32>, i32 -> vector<8x256xf32>
    %c1_204 = arith.constant 1 : index
    %c0_205 = arith.constant 0 : index
    %c0_206 = arith.constant 0 : index
    %237 = vector.load %arg2[%c1_204, %c0_205, %c0_206] : memref<16x1x256xf32, #tpu.memory_space<vmem>>, vector<1x1x256xf32>
    %238 = vector.shape_cast %237 : vector<1x1x256xf32> to vector<1x256xf32>
    %239 = vector.broadcast %238 : vector<1x256xf32> to vector<8x256xf32>
    %240 = arith.mulf %236, %239 : vector<8x256xf32>
    %c0_207 = arith.constant 0 : index
    %c0_208 = arith.constant 0 : index
    %241 = vector.load %arg14[%c0_207, %c0_208] : memref<40x256xf32, #tpu.memory_space<vmem>>, vector<8x256xf32>
    tpu.vector_store %arg14[%c0_207, %c0_208], %240 {strides = array<i32>} : memref<40x256xf32, #tpu.memory_space<vmem>>, vector<8x256xf32>,
    %c16_i32_209 = arith.constant 16 : i32
    %242 = tpu.dynamic_rotate %235 by %c16_i32_209 dim 1 : vector<8x256xf32>, i32 -> vector<8x256xf32>
    %c4_210 = arith.constant 4 : index
    %c0_211 = arith.constant 0 : index
    %c0_212 = arith.constant 0 : index
    %243 = vector.load %arg2[%c4_210, %c0_211, %c0_212] : memref<16x1x256xf32, #tpu.memory_space<vmem>>, vector<1x1x256xf32>
    %244 = vector.shape_cast %243 : vector<1x1x256xf32> to vector<1x256xf32>
    %245 = vector.broadcast %244 : vector<1x256xf32> to vector<8x256xf32>
    %246 = arith.mulf %242, %245 : vector<8x256xf32>
    %c8_213 = arith.constant 8 : index
    %c0_214 = arith.constant 0 : index
    %247 = vector.load %arg14[%c8_213, %c0_214] : memref<40x256xf32, #tpu.memory_space<vmem>>, vector<8x256xf32>
    tpu.vector_store %arg14[%c8_213, %c0_214], %246 {strides = array<i32>} : memref<40x256xf32, #tpu.memory_space<vmem>>, vector<8x256xf32>,
    %c16_215 = arith.constant 16 : index
    %c0_216 = arith.constant 0 : index
    %248 = vector.load %arg14[%c16_215, %c0_216] : memref<40x256xf32, #tpu.memory_space<vmem>>, vector<8x256xf32>
    tpu.vector_store %arg14[%c16_215, %c0_216], %235 {strides = array<i32>} : memref<40x256xf32, #tpu.memory_space<vmem>>, vector<8x256xf32>,
    %c240_i32_217 = arith.constant 240 : i32
    %249 = tpu.dynamic_rotate %235 by %c240_i32_217 dim 1 : vector<8x256xf32>, i32 -> vector<8x256xf32>
    %c11_218 = arith.constant 11 : index
    %c0_219 = arith.constant 0 : index
    %c0_220 = arith.constant 0 : index
    %250 = vector.load %arg2[%c11_218, %c0_219, %c0_220] : memref<16x1x256xf32, #tpu.memory_space<vmem>>, vector<1x1x256xf32>
    %251 = vector.shape_cast %250 : vector<1x1x256xf32> to vector<1x256xf32>
    %252 = vector.broadcast %251 : vector<1x256xf32> to vector<8x256xf32>
    %253 = arith.mulf %249, %252 : vector<8x256xf32>
    %c24_221 = arith.constant 24 : index
    %c0_222 = arith.constant 0 : index
    %254 = vector.load %arg14[%c24_221, %c0_222] : memref<40x256xf32, #tpu.memory_space<vmem>>, vector<8x256xf32>
    tpu.vector_store %arg14[%c24_221, %c0_222], %253 {strides = array<i32>} : memref<40x256xf32, #tpu.memory_space<vmem>>, vector<8x256xf32>,
    %c224_i32_223 = arith.constant 224 : i32
    %255 = tpu.dynamic_rotate %235 by %c224_i32_223 dim 1 : vector<8x256xf32>, i32 -> vector<8x256xf32>
    %c14_224 = arith.constant 14 : index
    %c0_225 = arith.constant 0 : index
    %c0_226 = arith.constant 0 : index
    %256 = vector.load %arg2[%c14_224, %c0_225, %c0_226] : memref<16x1x256xf32, #tpu.memory_space<vmem>>, vector<1x1x256xf32>
    %257 = vector.shape_cast %256 : vector<1x1x256xf32> to vector<1x256xf32>
    %258 = vector.broadcast %257 : vector<1x256xf32> to vector<8x256xf32>
    %259 = arith.mulf %255, %258 : vector<8x256xf32>
    %c32_227 = arith.constant 32 : index
    %c0_228 = arith.constant 0 : index
    %260 = vector.load %arg14[%c32_227, %c0_228] : memref<40x256xf32, #tpu.memory_space<vmem>>, vector<8x256xf32>
    tpu.vector_store %arg14[%c32_227, %c0_228], %259 {strides = array<i32>} : memref<40x256xf32, #tpu.memory_space<vmem>>, vector<8x256xf32>,
    %c0_229 = arith.constant 0 : index
    %c0_230 = arith.constant 0 : index
    %c0_231 = arith.constant 0 : index
    %261 = vector.load %arg9[%c0_229, %c0_230, %c0_231] : memref<6x8x40xf32, #tpu.memory_space<vmem>>, vector<1x8x40xf32>
    %262 = vector.shape_cast %261 : vector<1x8x40xf32> to vector<8x40xf32>
    %c0_232 = arith.constant 0 : index
    %c0_233 = arith.constant 0 : index
    %263 = vector.load %arg14[%c0_232, %c0_233] : memref<40x256xf32, #tpu.memory_space<vmem>>, vector<40x256xf32>
    %cst_234 = arith.constant dense<0.000000e+00> : vector<8x256xf32>
    %264 = tpu.matmul %262, %263, %cst_234 {dimension_numbers = #tpu.dot_dimension_numbers<[1], [0], [0], [1], [0, 0, 1, 1], [], []>} : vector<8x40xf32>, vector<40x256xf32>, vector<8x256xf32> -> vector<8x256xf32>
    %c0_235 = arith.constant 0 : index
    %c0_236 = arith.constant 0 : index
    %c0_237 = arith.constant 0 : index
    %265 = vector.load %arg10[%c0_235, %c0_236, %c0_237] : memref<6x8x1xf32, #tpu.memory_space<vmem>>, vector<1x8x1xf32>
    %266 = vector.shape_cast %265 : vector<1x8x1xf32> to vector<8x1xf32>
    %267 = vector.broadcast %266 : vector<8x1xf32> to vector<8x256xf32>
    %268 = arith.addf %264, %267 : vector<8x256xf32>
    %cst_238 = arith.constant 0.00999999977 : f32
    %269 = vector.broadcast %cst_238 : f32 to vector<8x256xf32>
    %270 = arith.mulf %269, %268 : vector<8x256xf32>
    %271 = arith.maximumf %268, %270 : vector<8x256xf32>
    %c32_i32_239 = arith.constant 32 : i32
    %272 = tpu.dynamic_rotate %271 by %c32_i32_239 dim 1 : vector<8x256xf32>, i32 -> vector<8x256xf32>
    %c1_240 = arith.constant 1 : index
    %c0_241 = arith.constant 0 : index
    %c0_242 = arith.constant 0 : index
    %273 = vector.load %arg2[%c1_240, %c0_241, %c0_242] : memref<16x1x256xf32, #tpu.memory_space<vmem>>, vector<1x1x256xf32>
    %274 = vector.shape_cast %273 : vector<1x1x256xf32> to vector<1x256xf32>
    %275 = vector.broadcast %274 : vector<1x256xf32> to vector<8x256xf32>
    %276 = arith.mulf %272, %275 : vector<8x256xf32>
    %c0_243 = arith.constant 0 : index
    %c0_244 = arith.constant 0 : index
    %277 = vector.load %arg14[%c0_243, %c0_244] : memref<40x256xf32, #tpu.memory_space<vmem>>, vector<8x256xf32>
    tpu.vector_store %arg14[%c0_243, %c0_244], %276 {strides = array<i32>} : memref<40x256xf32, #tpu.memory_space<vmem>>, vector<8x256xf32>,
    %c16_i32_245 = arith.constant 16 : i32
    %278 = tpu.dynamic_rotate %271 by %c16_i32_245 dim 1 : vector<8x256xf32>, i32 -> vector<8x256xf32>
    %c4_246 = arith.constant 4 : index
    %c0_247 = arith.constant 0 : index
    %c0_248 = arith.constant 0 : index
    %279 = vector.load %arg2[%c4_246, %c0_247, %c0_248] : memref<16x1x256xf32, #tpu.memory_space<vmem>>, vector<1x1x256xf32>
    %280 = vector.shape_cast %279 : vector<1x1x256xf32> to vector<1x256xf32>
    %281 = vector.broadcast %280 : vector<1x256xf32> to vector<8x256xf32>
    %282 = arith.mulf %278, %281 : vector<8x256xf32>
    %c8_249 = arith.constant 8 : index
    %c0_250 = arith.constant 0 : index
    %283 = vector.load %arg14[%c8_249, %c0_250] : memref<40x256xf32, #tpu.memory_space<vmem>>, vector<8x256xf32>
    tpu.vector_store %arg14[%c8_249, %c0_250], %282 {strides = array<i32>} : memref<40x256xf32, #tpu.memory_space<vmem>>, vector<8x256xf32>,
    %c16_251 = arith.constant 16 : index
    %c0_252 = arith.constant 0 : index
    %284 = vector.load %arg14[%c16_251, %c0_252] : memref<40x256xf32, #tpu.memory_space<vmem>>, vector<8x256xf32>
    tpu.vector_store %arg14[%c16_251, %c0_252], %271 {strides = array<i32>} : memref<40x256xf32, #tpu.memory_space<vmem>>, vector<8x256xf32>,
    %c240_i32_253 = arith.constant 240 : i32
    %285 = tpu.dynamic_rotate %271 by %c240_i32_253 dim 1 : vector<8x256xf32>, i32 -> vector<8x256xf32>
    %c11_254 = arith.constant 11 : index
    %c0_255 = arith.constant 0 : index
    %c0_256 = arith.constant 0 : index
    %286 = vector.load %arg2[%c11_254, %c0_255, %c0_256] : memref<16x1x256xf32, #tpu.memory_space<vmem>>, vector<1x1x256xf32>
    %287 = vector.shape_cast %286 : vector<1x1x256xf32> to vector<1x256xf32>
    %288 = vector.broadcast %287 : vector<1x256xf32> to vector<8x256xf32>
    %289 = arith.mulf %285, %288 : vector<8x256xf32>
    %c24_257 = arith.constant 24 : index
    %c0_258 = arith.constant 0 : index
    %290 = vector.load %arg14[%c24_257, %c0_258] : memref<40x256xf32, #tpu.memory_space<vmem>>, vector<8x256xf32>
    tpu.vector_store %arg14[%c24_257, %c0_258], %289 {strides = array<i32>} : memref<40x256xf32, #tpu.memory_space<vmem>>, vector<8x256xf32>,
    %c224_i32_259 = arith.constant 224 : i32
    %291 = tpu.dynamic_rotate %271 by %c224_i32_259 dim 1 : vector<8x256xf32>, i32 -> vector<8x256xf32>
    %c14_260 = arith.constant 14 : index
    %c0_261 = arith.constant 0 : index
    %c0_262 = arith.constant 0 : index
    %292 = vector.load %arg2[%c14_260, %c0_261, %c0_262] : memref<16x1x256xf32, #tpu.memory_space<vmem>>, vector<1x1x256xf32>
    %293 = vector.shape_cast %292 : vector<1x1x256xf32> to vector<1x256xf32>
    %294 = vector.broadcast %293 : vector<1x256xf32> to vector<8x256xf32>
    %295 = arith.mulf %291, %294 : vector<8x256xf32>
    %c32_263 = arith.constant 32 : index
    %c0_264 = arith.constant 0 : index
    %296 = vector.load %arg14[%c32_263, %c0_264] : memref<40x256xf32, #tpu.memory_space<vmem>>, vector<8x256xf32>
    tpu.vector_store %arg14[%c32_263, %c0_264], %295 {strides = array<i32>} : memref<40x256xf32, #tpu.memory_space<vmem>>, vector<8x256xf32>,
    %c1_265 = arith.constant 1 : index
    %c0_266 = arith.constant 0 : index
    %c0_267 = arith.constant 0 : index
    %297 = vector.load %arg9[%c1_265, %c0_266, %c0_267] : memref<6x8x40xf32, #tpu.memory_space<vmem>>, vector<1x8x40xf32>
    %298 = vector.shape_cast %297 : vector<1x8x40xf32> to vector<8x40xf32>
    %c0_268 = arith.constant 0 : index
    %c0_269 = arith.constant 0 : index
    %299 = vector.load %arg14[%c0_268, %c0_269] : memref<40x256xf32, #tpu.memory_space<vmem>>, vector<40x256xf32>
    %cst_270 = arith.constant dense<0.000000e+00> : vector<8x256xf32>
    %300 = tpu.matmul %298, %299, %cst_270 {dimension_numbers = #tpu.dot_dimension_numbers<[1], [0], [0], [1], [0, 0, 1, 1], [], []>} : vector<8x40xf32>, vector<40x256xf32>, vector<8x256xf32> -> vector<8x256xf32>
    %c1_271 = arith.constant 1 : index
    %c0_272 = arith.constant 0 : index
    %c0_273 = arith.constant 0 : index
    %301 = vector.load %arg10[%c1_271, %c0_272, %c0_273] : memref<6x8x1xf32, #tpu.memory_space<vmem>>, vector<1x8x1xf32>
    %302 = vector.shape_cast %301 : vector<1x8x1xf32> to vector<8x1xf32>
    %303 = vector.broadcast %302 : vector<8x1xf32> to vector<8x256xf32>
    %304 = arith.addf %300, %303 : vector<8x256xf32>
    %cst_274 = arith.constant 0.00999999977 : f32
    %305 = vector.broadcast %cst_274 : f32 to vector<8x256xf32>
    %306 = arith.mulf %305, %304 : vector<8x256xf32>
    %307 = arith.maximumf %304, %306 : vector<8x256xf32>
    %308 = vector.extract_strided_slice %307 {offsets = [0, 0], sizes = [4, 256], strides = [1, 1]} : vector<8x256xf32> to vector<4x256xf32>
    %309 = vector.extract_strided_slice %307 {offsets = [4, 0], sizes = [4, 256], strides = [1, 1]} : vector<8x256xf32> to vector<4x256xf32>
    %310 = arith.addf %308, %309 : vector<4x256xf32>
    %cst_275 = arith.constant 0.000000e+00 : f32
    %311 = vector.broadcast %cst_275 : f32 to vector<4x256xf32>
    %312 = arith.subf %311, %310 : vector<4x256xf32>
    %313 = math.exp %312 : vector<4x256xf32>
    %cst_276 = arith.constant 1.000000e+00 : f32
    %314 = vector.broadcast %cst_276 : f32 to vector<4x256xf32>
    %315 = arith.addf %314, %313 : vector<4x256xf32>
    %316 = tpu.reciprocal %315 {approx = true} : vector<4x256xf32> -> vector<4x256xf32>
    %317 = arith.mulf %316, %199 : vector<4x256xf32>
    %c17_i32_277 = arith.constant 17 : i32
    %318 = tpu.dynamic_rotate %317 by %c17_i32_277 dim 1 : vector<4x256xf32>, i32 -> vector<4x256xf32>
    %c3_278 = arith.constant 3 : index
    %c0_279 = arith.constant 0 : index
    %c0_280 = arith.constant 0 : index
    %319 = vector.load %arg2[%c3_278, %c0_279, %c0_280] : memref<16x1x256xf32, #tpu.memory_space<vmem>>, vector<1x1x256xf32>
    %320 = vector.shape_cast %319 : vector<1x1x256xf32> to vector<1x256xf32>
    %321 = vector.broadcast %320 : vector<1x256xf32> to vector<4x256xf32>
    %322 = arith.mulf %318, %321 : vector<4x256xf32>
    %c0_281 = arith.constant 0 : index
    %c0_282 = arith.constant 0 : index
    %323 = vector.load %arg14[%c0_281, %c0_282] : memref<40x256xf32, #tpu.memory_space<vmem>>, vector<4x256xf32>
    tpu.vector_store %arg14[%c0_281, %c0_282], %322 {strides = array<i32>} : memref<40x256xf32, #tpu.memory_space<vmem>>, vector<4x256xf32>,
    %c16_i32_283 = arith.constant 16 : i32
    %324 = tpu.dynamic_rotate %317 by %c16_i32_283 dim 1 : vector<4x256xf32>, i32 -> vector<4x256xf32>
    %c4_284 = arith.constant 4 : index
    %c0_285 = arith.constant 0 : index
    %c0_286 = arith.constant 0 : index
    %325 = vector.load %arg2[%c4_284, %c0_285, %c0_286] : memref<16x1x256xf32, #tpu.memory_space<vmem>>, vector<1x1x256xf32>
    %326 = vector.shape_cast %325 : vector<1x1x256xf32> to vector<1x256xf32>
    %327 = vector.broadcast %326 : vector<1x256xf32> to vector<4x256xf32>
    %328 = arith.mulf %324, %327 : vector<4x256xf32>
    %c4_287 = arith.constant 4 : index
    %c0_288 = arith.constant 0 : index
    %329 = vector.load %arg14[%c4_287, %c0_288] : memref<40x256xf32, #tpu.memory_space<vmem>>, vector<4x256xf32>
    tpu.vector_store %arg14[%c4_287, %c0_288], %328 {strides = array<i32>} : memref<40x256xf32, #tpu.memory_space<vmem>>, vector<4x256xf32>,
    %c15_i32_289 = arith.constant 15 : i32
    %330 = tpu.dynamic_rotate %317 by %c15_i32_289 dim 1 : vector<4x256xf32>, i32 -> vector<4x256xf32>
    %c5_290 = arith.constant 5 : index
    %c0_291 = arith.constant 0 : index
    %c0_292 = arith.constant 0 : index
    %331 = vector.load %arg2[%c5_290, %c0_291, %c0_292] : memref<16x1x256xf32, #tpu.memory_space<vmem>>, vector<1x1x256xf32>
    %332 = vector.shape_cast %331 : vector<1x1x256xf32> to vector<1x256xf32>
    %333 = vector.broadcast %332 : vector<1x256xf32> to vector<4x256xf32>
    %334 = arith.mulf %330, %333 : vector<4x256xf32>
    %c8_293 = arith.constant 8 : index
    %c0_294 = arith.constant 0 : index
    %335 = vector.load %arg14[%c8_293, %c0_294] : memref<40x256xf32, #tpu.memory_space<vmem>>, vector<4x256xf32>
    tpu.vector_store %arg14[%c8_293, %c0_294], %334 {strides = array<i32>} : memref<40x256xf32, #tpu.memory_space<vmem>>, vector<4x256xf32>,
    %c1_i32_295 = arith.constant 1 : i32
    %336 = tpu.dynamic_rotate %317 by %c1_i32_295 dim 1 : vector<4x256xf32>, i32 -> vector<4x256xf32>
    %c7_296 = arith.constant 7 : index
    %c0_297 = arith.constant 0 : index
    %c0_298 = arith.constant 0 : index
    %337 = vector.load %arg2[%c7_296, %c0_297, %c0_298] : memref<16x1x256xf32, #tpu.memory_space<vmem>>, vector<1x1x256xf32>
    %338 = vector.shape_cast %337 : vector<1x1x256xf32> to vector<1x256xf32>
    %339 = vector.broadcast %338 : vector<1x256xf32> to vector<4x256xf32>
    %340 = arith.mulf %336, %339 : vector<4x256xf32>
    %c12_299 = arith.constant 12 : index
    %c0_300 = arith.constant 0 : index
    %341 = vector.load %arg14[%c12_299, %c0_300] : memref<40x256xf32, #tpu.memory_space<vmem>>, vector<4x256xf32>
    tpu.vector_store %arg14[%c12_299, %c0_300], %340 {strides = array<i32>} : memref<40x256xf32, #tpu.memory_space<vmem>>, vector<4x256xf32>,
    %c16_301 = arith.constant 16 : index
    %c0_302 = arith.constant 0 : index
    %342 = vector.load %arg14[%c16_301, %c0_302] : memref<40x256xf32, #tpu.memory_space<vmem>>, vector<4x256xf32>
    tpu.vector_store %arg14[%c16_301, %c0_302], %317 {strides = array<i32>} : memref<40x256xf32, #tpu.memory_space<vmem>>, vector<4x256xf32>,
    %c255_i32_303 = arith.constant 255 : i32
    %343 = tpu.dynamic_rotate %317 by %c255_i32_303 dim 1 : vector<4x256xf32>, i32 -> vector<4x256xf32>
    %c8_304 = arith.constant 8 : index
    %c0_305 = arith.constant 0 : index
    %c0_306 = arith.constant 0 : index
    %344 = vector.load %arg2[%c8_304, %c0_305, %c0_306] : memref<16x1x256xf32, #tpu.memory_space<vmem>>, vector<1x1x256xf32>
    %345 = vector.shape_cast %344 : vector<1x1x256xf32> to vector<1x256xf32>
    %346 = vector.broadcast %345 : vector<1x256xf32> to vector<4x256xf32>
    %347 = arith.mulf %343, %346 : vector<4x256xf32>
    %c20_307 = arith.constant 20 : index
    %c0_308 = arith.constant 0 : index
    %348 = vector.load %arg14[%c20_307, %c0_308] : memref<40x256xf32, #tpu.memory_space<vmem>>, vector<4x256xf32>
    tpu.vector_store %arg14[%c20_307, %c0_308], %347 {strides = array<i32>} : memref<40x256xf32, #tpu.memory_space<vmem>>, vector<4x256xf32>,
    %c241_i32_309 = arith.constant 241 : i32
    %349 = tpu.dynamic_rotate %317 by %c241_i32_309 dim 1 : vector<4x256xf32>, i32 -> vector<4x256xf32>
    %c10_310 = arith.constant 10 : index
    %c0_311 = arith.constant 0 : index
    %c0_312 = arith.constant 0 : index
    %350 = vector.load %arg2[%c10_310, %c0_311, %c0_312] : memref<16x1x256xf32, #tpu.memory_space<vmem>>, vector<1x1x256xf32>
    %351 = vector.shape_cast %350 : vector<1x1x256xf32> to vector<1x256xf32>
    %352 = vector.broadcast %351 : vector<1x256xf32> to vector<4x256xf32>
    %353 = arith.mulf %349, %352 : vector<4x256xf32>
    %c24_313 = arith.constant 24 : index
    %c0_314 = arith.constant 0 : index
    %354 = vector.load %arg14[%c24_313, %c0_314] : memref<40x256xf32, #tpu.memory_space<vmem>>, vector<4x256xf32>
    tpu.vector_store %arg14[%c24_313, %c0_314], %353 {strides = array<i32>} : memref<40x256xf32, #tpu.memory_space<vmem>>, vector<4x256xf32>,
    %c240_i32_315 = arith.constant 240 : i32
    %355 = tpu.dynamic_rotate %317 by %c240_i32_315 dim 1 : vector<4x256xf32>, i32 -> vector<4x256xf32>
    %c11_316 = arith.constant 11 : index
    %c0_317 = arith.constant 0 : index
    %c0_318 = arith.constant 0 : index
    %356 = vector.load %arg2[%c11_316, %c0_317, %c0_318] : memref<16x1x256xf32, #tpu.memory_space<vmem>>, vector<1x1x256xf32>
    %357 = vector.shape_cast %356 : vector<1x1x256xf32> to vector<1x256xf32>
    %358 = vector.broadcast %357 : vector<1x256xf32> to vector<4x256xf32>
    %359 = arith.mulf %355, %358 : vector<4x256xf32>
    %c28_319 = arith.constant 28 : index
    %c0_320 = arith.constant 0 : index
    %360 = vector.load %arg14[%c28_319, %c0_320] : memref<40x256xf32, #tpu.memory_space<vmem>>, vector<4x256xf32>
    tpu.vector_store %arg14[%c28_319, %c0_320], %359 {strides = array<i32>} : memref<40x256xf32, #tpu.memory_space<vmem>>, vector<4x256xf32>,
    %c239_i32_321 = arith.constant 239 : i32
    %361 = tpu.dynamic_rotate %317 by %c239_i32_321 dim 1 : vector<4x256xf32>, i32 -> vector<4x256xf32>
    %c12_322 = arith.constant 12 : index
    %c0_323 = arith.constant 0 : index
    %c0_324 = arith.constant 0 : index
    %362 = vector.load %arg2[%c12_322, %c0_323, %c0_324] : memref<16x1x256xf32, #tpu.memory_space<vmem>>, vector<1x1x256xf32>
    %363 = vector.shape_cast %362 : vector<1x1x256xf32> to vector<1x256xf32>
    %364 = vector.broadcast %363 : vector<1x256xf32> to vector<4x256xf32>
    %365 = arith.mulf %361, %364 : vector<4x256xf32>
    %c32_325 = arith.constant 32 : index
    %c0_326 = arith.constant 0 : index
    %366 = vector.load %arg14[%c32_325, %c0_326] : memref<40x256xf32, #tpu.memory_space<vmem>>, vector<4x256xf32>
    tpu.vector_store %arg14[%c32_325, %c0_326], %365 {strides = array<i32>} : memref<40x256xf32, #tpu.memory_space<vmem>>, vector<4x256xf32>,
    %c3_327 = arith.constant 3 : index
    %c0_328 = arith.constant 0 : index
    %c0_329 = arith.constant 0 : index
    %367 = vector.load %arg5[%c3_327, %c0_328, %c0_329] : memref<8x4x36xf32, #tpu.memory_space<vmem>>, vector<1x4x36xf32>
    %368 = vector.shape_cast %367 : vector<1x4x36xf32> to vector<4x36xf32>
    %c0_330 = arith.constant 0 : index
    %c0_331 = arith.constant 0 : index
    %369 = vector.load %arg14[%c0_330, %c0_331] : memref<40x256xf32, #tpu.memory_space<vmem>>, vector<36x256xf32>
    %cst_332 = arith.constant dense<0.000000e+00> : vector<4x256xf32>
    %370 = tpu.matmul %368, %369, %cst_332 {dimension_numbers = #tpu.dot_dimension_numbers<[1], [0], [0], [1], [0, 0, 1, 1], [], []>} : vector<4x36xf32>, vector<36x256xf32>, vector<4x256xf32> -> vector<4x256xf32>
    %c3_333 = arith.constant 3 : index
    %c0_334 = arith.constant 0 : index
    %c0_335 = arith.constant 0 : index
    %371 = vector.load %arg6[%c3_333, %c0_334, %c0_335] : memref<8x4x1xf32, #tpu.memory_space<vmem>>, vector<1x4x1xf32>
    %372 = vector.shape_cast %371 : vector<1x4x1xf32> to vector<4x1xf32>
    %373 = vector.broadcast %372 : vector<4x1xf32> to vector<4x256xf32>
    %374 = arith.addf %370, %373 : vector<4x256xf32>
    %cst_336 = arith.constant 0.00999999977 : f32
    %375 = vector.broadcast %cst_336 : f32 to vector<4x256xf32>
    %376 = arith.mulf %375, %374 : vector<4x256xf32>
    %377 = arith.maximumf %374, %376 : vector<4x256xf32>
    %c34_i32_337 = arith.constant 34 : i32
    %378 = tpu.dynamic_rotate %377 by %c34_i32_337 dim 1 : vector<4x256xf32>, i32 -> vector<4x256xf32>
    %c0_338 = arith.constant 0 : index
    %c0_339 = arith.constant 0 : index
    %c0_340 = arith.constant 0 : index
    %379 = vector.load %arg2[%c0_338, %c0_339, %c0_340] : memref<16x1x256xf32, #tpu.memory_space<vmem>>, vector<1x1x256xf32>
    %380 = vector.shape_cast %379 : vector<1x1x256xf32> to vector<1x256xf32>
    %381 = vector.broadcast %380 : vector<1x256xf32> to vector<4x256xf32>
    %382 = arith.mulf %378, %381 : vector<4x256xf32>
    %c0_341 = arith.constant 0 : index
    %c0_342 = arith.constant 0 : index
    %383 = vector.load %arg14[%c0_341, %c0_342] : memref<40x256xf32, #tpu.memory_space<vmem>>, vector<4x256xf32>
    tpu.vector_store %arg14[%c0_341, %c0_342], %382 {strides = array<i32>} : memref<40x256xf32, #tpu.memory_space<vmem>>, vector<4x256xf32>,
    %c32_i32_343 = arith.constant 32 : i32
    %384 = tpu.dynamic_rotate %377 by %c32_i32_343 dim 1 : vector<4x256xf32>, i32 -> vector<4x256xf32>
    %c1_344 = arith.constant 1 : index
    %c0_345 = arith.constant 0 : index
    %c0_346 = arith.constant 0 : index
    %385 = vector.load %arg2[%c1_344, %c0_345, %c0_346] : memref<16x1x256xf32, #tpu.memory_space<vmem>>, vector<1x1x256xf32>
    %386 = vector.shape_cast %385 : vector<1x1x256xf32> to vector<1x256xf32>
    %387 = vector.broadcast %386 : vector<1x256xf32> to vector<4x256xf32>
    %388 = arith.mulf %384, %387 : vector<4x256xf32>
    %c4_347 = arith.constant 4 : index
    %c0_348 = arith.constant 0 : index
    %389 = vector.load %arg14[%c4_347, %c0_348] : memref<40x256xf32, #tpu.memory_space<vmem>>, vector<4x256xf32>
    tpu.vector_store %arg14[%c4_347, %c0_348], %388 {strides = array<i32>} : memref<40x256xf32, #tpu.memory_space<vmem>>, vector<4x256xf32>,
    %c30_i32_349 = arith.constant 30 : i32
    %390 = tpu.dynamic_rotate %377 by %c30_i32_349 dim 1 : vector<4x256xf32>, i32 -> vector<4x256xf32>
    %c2_350 = arith.constant 2 : index
    %c0_351 = arith.constant 0 : index
    %c0_352 = arith.constant 0 : index
    %391 = vector.load %arg2[%c2_350, %c0_351, %c0_352] : memref<16x1x256xf32, #tpu.memory_space<vmem>>, vector<1x1x256xf32>
    %392 = vector.shape_cast %391 : vector<1x1x256xf32> to vector<1x256xf32>
    %393 = vector.broadcast %392 : vector<1x256xf32> to vector<4x256xf32>
    %394 = arith.mulf %390, %393 : vector<4x256xf32>
    %c8_353 = arith.constant 8 : index
    %c0_354 = arith.constant 0 : index
    %395 = vector.load %arg14[%c8_353, %c0_354] : memref<40x256xf32, #tpu.memory_space<vmem>>, vector<4x256xf32>
    tpu.vector_store %arg14[%c8_353, %c0_354], %394 {strides = array<i32>} : memref<40x256xf32, #tpu.memory_space<vmem>>, vector<4x256xf32>,
    %c2_i32_355 = arith.constant 2 : i32
    %396 = tpu.dynamic_rotate %377 by %c2_i32_355 dim 1 : vector<4x256xf32>, i32 -> vector<4x256xf32>
    %c6_356 = arith.constant 6 : index
    %c0_357 = arith.constant 0 : index
    %c0_358 = arith.constant 0 : index
    %397 = vector.load %arg2[%c6_356, %c0_357, %c0_358] : memref<16x1x256xf32, #tpu.memory_space<vmem>>, vector<1x1x256xf32>
    %398 = vector.shape_cast %397 : vector<1x1x256xf32> to vector<1x256xf32>
    %399 = vector.broadcast %398 : vector<1x256xf32> to vector<4x256xf32>
    %400 = arith.mulf %396, %399 : vector<4x256xf32>
    %c12_359 = arith.constant 12 : index
    %c0_360 = arith.constant 0 : index
    %401 = vector.load %arg14[%c12_359, %c0_360] : memref<40x256xf32, #tpu.memory_space<vmem>>, vector<4x256xf32>
    tpu.vector_store %arg14[%c12_359, %c0_360], %400 {strides = array<i32>} : memref<40x256xf32, #tpu.memory_space<vmem>>, vector<4x256xf32>,
    %c16_361 = arith.constant 16 : index
    %c0_362 = arith.constant 0 : index
    %402 = vector.load %arg14[%c16_361, %c0_362] : memref<40x256xf32, #tpu.memory_space<vmem>>, vector<4x256xf32>
    tpu.vector_store %arg14[%c16_361, %c0_362], %377 {strides = array<i32>} : memref<40x256xf32, #tpu.memory_space<vmem>>, vector<4x256xf32>,
    %c254_i32_363 = arith.constant 254 : i32
    %403 = tpu.dynamic_rotate %377 by %c254_i32_363 dim 1 : vector<4x256xf32>, i32 -> vector<4x256xf32>
    %c9_364 = arith.constant 9 : index
    %c0_365 = arith.constant 0 : index
    %c0_366 = arith.constant 0 : index
    %404 = vector.load %arg2[%c9_364, %c0_365, %c0_366] : memref<16x1x256xf32, #tpu.memory_space<vmem>>, vector<1x1x256xf32>
    %405 = vector.shape_cast %404 : vector<1x1x256xf32> to vector<1x256xf32>
    %406 = vector.broadcast %405 : vector<1x256xf32> to vector<4x256xf32>
    %407 = arith.mulf %403, %406 : vector<4x256xf32>
    %c20_367 = arith.constant 20 : index
    %c0_368 = arith.constant 0 : index
    %408 = vector.load %arg14[%c20_367, %c0_368] : memref<40x256xf32, #tpu.memory_space<vmem>>, vector<4x256xf32>
    tpu.vector_store %arg14[%c20_367, %c0_368], %407 {strides = array<i32>} : memref<40x256xf32, #tpu.memory_space<vmem>>, vector<4x256xf32>,
    %c226_i32_369 = arith.constant 226 : i32
    %409 = tpu.dynamic_rotate %377 by %c226_i32_369 dim 1 : vector<4x256xf32>, i32 -> vector<4x256xf32>
    %c13_370 = arith.constant 13 : index
    %c0_371 = arith.constant 0 : index
    %c0_372 = arith.constant 0 : index
    %410 = vector.load %arg2[%c13_370, %c0_371, %c0_372] : memref<16x1x256xf32, #tpu.memory_space<vmem>>, vector<1x1x256xf32>
    %411 = vector.shape_cast %410 : vector<1x1x256xf32> to vector<1x256xf32>
    %412 = vector.broadcast %411 : vector<1x256xf32> to vector<4x256xf32>
    %413 = arith.mulf %409, %412 : vector<4x256xf32>
    %c24_373 = arith.constant 24 : index
    %c0_374 = arith.constant 0 : index
    %414 = vector.load %arg14[%c24_373, %c0_374] : memref<40x256xf32, #tpu.memory_space<vmem>>, vector<4x256xf32>
    tpu.vector_store %arg14[%c24_373, %c0_374], %413 {strides = array<i32>} : memref<40x256xf32, #tpu.memory_space<vmem>>, vector<4x256xf32>,
    %c224_i32_375 = arith.constant 224 : i32
    %415 = tpu.dynamic_rotate %377 by %c224_i32_375 dim 1 : vector<4x256xf32>, i32 -> vector<4x256xf32>
    %c14_376 = arith.constant 14 : index
    %c0_377 = arith.constant 0 : index
    %c0_378 = arith.constant 0 : index
    %416 = vector.load %arg2[%c14_376, %c0_377, %c0_378] : memref<16x1x256xf32, #tpu.memory_space<vmem>>, vector<1x1x256xf32>
    %417 = vector.shape_cast %416 : vector<1x1x256xf32> to vector<1x256xf32>
    %418 = vector.broadcast %417 : vector<1x256xf32> to vector<4x256xf32>
    %419 = arith.mulf %415, %418 : vector<4x256xf32>
    %c28_379 = arith.constant 28 : index
    %c0_380 = arith.constant 0 : index
    %420 = vector.load %arg14[%c28_379, %c0_380] : memref<40x256xf32, #tpu.memory_space<vmem>>, vector<4x256xf32>
    tpu.vector_store %arg14[%c28_379, %c0_380], %419 {strides = array<i32>} : memref<40x256xf32, #tpu.memory_space<vmem>>, vector<4x256xf32>,
    %c222_i32_381 = arith.constant 222 : i32
    %421 = tpu.dynamic_rotate %377 by %c222_i32_381 dim 1 : vector<4x256xf32>, i32 -> vector<4x256xf32>
    %c15_382 = arith.constant 15 : index
    %c0_383 = arith.constant 0 : index
    %c0_384 = arith.constant 0 : index
    %422 = vector.load %arg2[%c15_382, %c0_383, %c0_384] : memref<16x1x256xf32, #tpu.memory_space<vmem>>, vector<1x1x256xf32>
    %423 = vector.shape_cast %422 : vector<1x1x256xf32> to vector<1x256xf32>
    %424 = vector.broadcast %423 : vector<1x256xf32> to vector<4x256xf32>
    %425 = arith.mulf %421, %424 : vector<4x256xf32>
    %c32_385 = arith.constant 32 : index
    %c0_386 = arith.constant 0 : index
    %426 = vector.load %arg14[%c32_385, %c0_386] : memref<40x256xf32, #tpu.memory_space<vmem>>, vector<4x256xf32>
    tpu.vector_store %arg14[%c32_385, %c0_386], %425 {strides = array<i32>} : memref<40x256xf32, #tpu.memory_space<vmem>>, vector<4x256xf32>,
    %c4_387 = arith.constant 4 : index
    %c0_388 = arith.constant 0 : index
    %c0_389 = arith.constant 0 : index
    %427 = vector.load %arg5[%c4_387, %c0_388, %c0_389] : memref<8x4x36xf32, #tpu.memory_space<vmem>>, vector<1x4x36xf32>
    %428 = vector.shape_cast %427 : vector<1x4x36xf32> to vector<4x36xf32>
    %c0_390 = arith.constant 0 : index
    %c0_391 = arith.constant 0 : index
    %429 = vector.load %arg14[%c0_390, %c0_391] : memref<40x256xf32, #tpu.memory_space<vmem>>, vector<36x256xf32>
    %cst_392 = arith.constant dense<0.000000e+00> : vector<4x256xf32>
    %430 = tpu.matmul %428, %429, %cst_392 {dimension_numbers = #tpu.dot_dimension_numbers<[1], [0], [0], [1], [0, 0, 1, 1], [], []>} : vector<4x36xf32>, vector<36x256xf32>, vector<4x256xf32> -> vector<4x256xf32>
    %c4_393 = arith.constant 4 : index
    %c0_394 = arith.constant 0 : index
    %c0_395 = arith.constant 0 : index
    %431 = vector.load %arg6[%c4_393, %c0_394, %c0_395] : memref<8x4x1xf32, #tpu.memory_space<vmem>>, vector<1x4x1xf32>
    %432 = vector.shape_cast %431 : vector<1x4x1xf32> to vector<4x1xf32>
    %433 = vector.broadcast %432 : vector<4x1xf32> to vector<4x256xf32>
    %434 = arith.addf %430, %433 : vector<4x256xf32>
    %cst_396 = arith.constant 0.00999999977 : f32
    %435 = vector.broadcast %cst_396 : f32 to vector<4x256xf32>
    %436 = arith.mulf %435, %434 : vector<4x256xf32>
    %437 = arith.maximumf %434, %436 : vector<4x256xf32>
    %c32_i32_397 = arith.constant 32 : i32
    %438 = tpu.dynamic_rotate %437 by %c32_i32_397 dim 1 : vector<4x256xf32>, i32 -> vector<4x256xf32>
    %c1_398 = arith.constant 1 : index
    %c0_399 = arith.constant 0 : index
    %c0_400 = arith.constant 0 : index
    %439 = vector.load %arg2[%c1_398, %c0_399, %c0_400] : memref<16x1x256xf32, #tpu.memory_space<vmem>>, vector<1x1x256xf32>
    %440 = vector.shape_cast %439 : vector<1x1x256xf32> to vector<1x256xf32>
    %441 = vector.broadcast %440 : vector<1x256xf32> to vector<4x256xf32>
    %442 = arith.mulf %438, %441 : vector<4x256xf32>
    %c0_401 = arith.constant 0 : index
    %c0_402 = arith.constant 0 : index
    %443 = vector.load %arg14[%c0_401, %c0_402] : memref<40x256xf32, #tpu.memory_space<vmem>>, vector<4x256xf32>
    tpu.vector_store %arg14[%c0_401, %c0_402], %442 {strides = array<i32>} : memref<40x256xf32, #tpu.memory_space<vmem>>, vector<4x256xf32>,
    %c16_i32_403 = arith.constant 16 : i32
    %444 = tpu.dynamic_rotate %437 by %c16_i32_403 dim 1 : vector<4x256xf32>, i32 -> vector<4x256xf32>
    %c4_404 = arith.constant 4 : index
    %c0_405 = arith.constant 0 : index
    %c0_406 = arith.constant 0 : index
    %445 = vector.load %arg2[%c4_404, %c0_405, %c0_406] : memref<16x1x256xf32, #tpu.memory_space<vmem>>, vector<1x1x256xf32>
    %446 = vector.shape_cast %445 : vector<1x1x256xf32> to vector<1x256xf32>
    %447 = vector.broadcast %446 : vector<1x256xf32> to vector<4x256xf32>
    %448 = arith.mulf %444, %447 : vector<4x256xf32>
    %c4_407 = arith.constant 4 : index
    %c0_408 = arith.constant 0 : index
    %449 = vector.load %arg14[%c4_407, %c0_408] : memref<40x256xf32, #tpu.memory_space<vmem>>, vector<4x256xf32>
    tpu.vector_store %arg14[%c4_407, %c0_408], %448 {strides = array<i32>} : memref<40x256xf32, #tpu.memory_space<vmem>>, vector<4x256xf32>,
    %c8_409 = arith.constant 8 : index
    %c0_410 = arith.constant 0 : index
    %450 = vector.load %arg14[%c8_409, %c0_410] : memref<40x256xf32, #tpu.memory_space<vmem>>, vector<4x256xf32>
    tpu.vector_store %arg14[%c8_409, %c0_410], %437 {strides = array<i32>} : memref<40x256xf32, #tpu.memory_space<vmem>>, vector<4x256xf32>,
    %c240_i32_411 = arith.constant 240 : i32
    %451 = tpu.dynamic_rotate %437 by %c240_i32_411 dim 1 : vector<4x256xf32>, i32 -> vector<4x256xf32>
    %c11_412 = arith.constant 11 : index
    %c0_413 = arith.constant 0 : index
    %c0_414 = arith.constant 0 : index
    %452 = vector.load %arg2[%c11_412, %c0_413, %c0_414] : memref<16x1x256xf32, #tpu.memory_space<vmem>>, vector<1x1x256xf32>
    %453 = vector.shape_cast %452 : vector<1x1x256xf32> to vector<1x256xf32>
    %454 = vector.broadcast %453 : vector<1x256xf32> to vector<4x256xf32>
    %455 = arith.mulf %451, %454 : vector<4x256xf32>
    %c12_415 = arith.constant 12 : index
    %c0_416 = arith.constant 0 : index
    %456 = vector.load %arg14[%c12_415, %c0_416] : memref<40x256xf32, #tpu.memory_space<vmem>>, vector<4x256xf32>
    tpu.vector_store %arg14[%c12_415, %c0_416], %455 {strides = array<i32>} : memref<40x256xf32, #tpu.memory_space<vmem>>, vector<4x256xf32>,
    %c224_i32_417 = arith.constant 224 : i32
    %457 = tpu.dynamic_rotate %437 by %c224_i32_417 dim 1 : vector<4x256xf32>, i32 -> vector<4x256xf32>
    %c14_418 = arith.constant 14 : index
    %c0_419 = arith.constant 0 : index
    %c0_420 = arith.constant 0 : index
    %458 = vector.load %arg2[%c14_418, %c0_419, %c0_420] : memref<16x1x256xf32, #tpu.memory_space<vmem>>, vector<1x1x256xf32>
    %459 = vector.shape_cast %458 : vector<1x1x256xf32> to vector<1x256xf32>
    %460 = vector.broadcast %459 : vector<1x256xf32> to vector<4x256xf32>
    %461 = arith.mulf %457, %460 : vector<4x256xf32>
    %c16_421 = arith.constant 16 : index
    %c0_422 = arith.constant 0 : index
    %462 = vector.load %arg14[%c16_421, %c0_422] : memref<40x256xf32, #tpu.memory_space<vmem>>, vector<4x256xf32>
    tpu.vector_store %arg14[%c16_421, %c0_422], %461 {strides = array<i32>} : memref<40x256xf32, #tpu.memory_space<vmem>>, vector<4x256xf32>,
    %c1_423 = arith.constant 1 : index
    %c0_424 = arith.constant 0 : index
    %c0_425 = arith.constant 0 : index
    %463 = vector.load %arg7[%c1_423, %c0_424, %c0_425] : memref<3x8x20xf32, #tpu.memory_space<vmem>>, vector<1x8x20xf32>
    %464 = vector.shape_cast %463 : vector<1x8x20xf32> to vector<8x20xf32>
    %c0_426 = arith.constant 0 : index
    %c0_427 = arith.constant 0 : index
    %465 = vector.load %arg14[%c0_426, %c0_427] : memref<40x256xf32, #tpu.memory_space<vmem>>, vector<20x256xf32>
    %cst_428 = arith.constant dense<0.000000e+00> : vector<8x256xf32>
    %466 = tpu.matmul %464, %465, %cst_428 {dimension_numbers = #tpu.dot_dimension_numbers<[1], [0], [0], [1], [0, 0, 1, 1], [], []>} : vector<8x20xf32>, vector<20x256xf32>, vector<8x256xf32> -> vector<8x256xf32>
    %c1_429 = arith.constant 1 : index
    %c0_430 = arith.constant 0 : index
    %c0_431 = arith.constant 0 : index
    %467 = vector.load %arg8[%c1_429, %c0_430, %c0_431] : memref<3x8x1xf32, #tpu.memory_space<vmem>>, vector<1x8x1xf32>
    %468 = vector.shape_cast %467 : vector<1x8x1xf32> to vector<8x1xf32>
    %469 = vector.broadcast %468 : vector<8x1xf32> to vector<8x256xf32>
    %470 = arith.addf %466, %469 : vector<8x256xf32>
    %cst_432 = arith.constant 0.00999999977 : f32
    %471 = vector.broadcast %cst_432 : f32 to vector<8x256xf32>
    %472 = arith.mulf %471, %470 : vector<8x256xf32>
    %473 = arith.maximumf %470, %472 : vector<8x256xf32>
    %c32_i32_433 = arith.constant 32 : i32
    %474 = tpu.dynamic_rotate %473 by %c32_i32_433 dim 1 : vector<8x256xf32>, i32 -> vector<8x256xf32>
    %c1_434 = arith.constant 1 : index
    %c0_435 = arith.constant 0 : index
    %c0_436 = arith.constant 0 : index
    %475 = vector.load %arg2[%c1_434, %c0_435, %c0_436] : memref<16x1x256xf32, #tpu.memory_space<vmem>>, vector<1x1x256xf32>
    %476 = vector.shape_cast %475 : vector<1x1x256xf32> to vector<1x256xf32>
    %477 = vector.broadcast %476 : vector<1x256xf32> to vector<8x256xf32>
    %478 = arith.mulf %474, %477 : vector<8x256xf32>
    %c0_437 = arith.constant 0 : index
    %c0_438 = arith.constant 0 : index
    %479 = vector.load %arg14[%c0_437, %c0_438] : memref<40x256xf32, #tpu.memory_space<vmem>>, vector<8x256xf32>
    tpu.vector_store %arg14[%c0_437, %c0_438], %478 {strides = array<i32>} : memref<40x256xf32, #tpu.memory_space<vmem>>, vector<8x256xf32>,
    %c16_i32_439 = arith.constant 16 : i32
    %480 = tpu.dynamic_rotate %473 by %c16_i32_439 dim 1 : vector<8x256xf32>, i32 -> vector<8x256xf32>
    %c4_440 = arith.constant 4 : index
    %c0_441 = arith.constant 0 : index
    %c0_442 = arith.constant 0 : index
    %481 = vector.load %arg2[%c4_440, %c0_441, %c0_442] : memref<16x1x256xf32, #tpu.memory_space<vmem>>, vector<1x1x256xf32>
    %482 = vector.shape_cast %481 : vector<1x1x256xf32> to vector<1x256xf32>
    %483 = vector.broadcast %482 : vector<1x256xf32> to vector<8x256xf32>
    %484 = arith.mulf %480, %483 : vector<8x256xf32>
    %c8_443 = arith.constant 8 : index
    %c0_444 = arith.constant 0 : index
    %485 = vector.load %arg14[%c8_443, %c0_444] : memref<40x256xf32, #tpu.memory_space<vmem>>, vector<8x256xf32>
    tpu.vector_store %arg14[%c8_443, %c0_444], %484 {strides = array<i32>} : memref<40x256xf32, #tpu.memory_space<vmem>>, vector<8x256xf32>,
    %c16_445 = arith.constant 16 : index
    %c0_446 = arith.constant 0 : index
    %486 = vector.load %arg14[%c16_445, %c0_446] : memref<40x256xf32, #tpu.memory_space<vmem>>, vector<8x256xf32>
    tpu.vector_store %arg14[%c16_445, %c0_446], %473 {strides = array<i32>} : memref<40x256xf32, #tpu.memory_space<vmem>>, vector<8x256xf32>,
    %c240_i32_447 = arith.constant 240 : i32
    %487 = tpu.dynamic_rotate %473 by %c240_i32_447 dim 1 : vector<8x256xf32>, i32 -> vector<8x256xf32>
    %c11_448 = arith.constant 11 : index
    %c0_449 = arith.constant 0 : index
    %c0_450 = arith.constant 0 : index
    %488 = vector.load %arg2[%c11_448, %c0_449, %c0_450] : memref<16x1x256xf32, #tpu.memory_space<vmem>>, vector<1x1x256xf32>
    %489 = vector.shape_cast %488 : vector<1x1x256xf32> to vector<1x256xf32>
    %490 = vector.broadcast %489 : vector<1x256xf32> to vector<8x256xf32>
    %491 = arith.mulf %487, %490 : vector<8x256xf32>
    %c24_451 = arith.constant 24 : index
    %c0_452 = arith.constant 0 : index
    %492 = vector.load %arg14[%c24_451, %c0_452] : memref<40x256xf32, #tpu.memory_space<vmem>>, vector<8x256xf32>
    tpu.vector_store %arg14[%c24_451, %c0_452], %491 {strides = array<i32>} : memref<40x256xf32, #tpu.memory_space<vmem>>, vector<8x256xf32>,
    %c224_i32_453 = arith.constant 224 : i32
    %493 = tpu.dynamic_rotate %473 by %c224_i32_453 dim 1 : vector<8x256xf32>, i32 -> vector<8x256xf32>
    %c14_454 = arith.constant 14 : index
    %c0_455 = arith.constant 0 : index
    %c0_456 = arith.constant 0 : index
    %494 = vector.load %arg2[%c14_454, %c0_455, %c0_456] : memref<16x1x256xf32, #tpu.memory_space<vmem>>, vector<1x1x256xf32>
    %495 = vector.shape_cast %494 : vector<1x1x256xf32> to vector<1x256xf32>
    %496 = vector.broadcast %495 : vector<1x256xf32> to vector<8x256xf32>
    %497 = arith.mulf %493, %496 : vector<8x256xf32>
    %c32_457 = arith.constant 32 : index
    %c0_458 = arith.constant 0 : index
    %498 = vector.load %arg14[%c32_457, %c0_458] : memref<40x256xf32, #tpu.memory_space<vmem>>, vector<8x256xf32>
    tpu.vector_store %arg14[%c32_457, %c0_458], %497 {strides = array<i32>} : memref<40x256xf32, #tpu.memory_space<vmem>>, vector<8x256xf32>,
    %c2_459 = arith.constant 2 : index
    %c0_460 = arith.constant 0 : index
    %c0_461 = arith.constant 0 : index
    %499 = vector.load %arg9[%c2_459, %c0_460, %c0_461] : memref<6x8x40xf32, #tpu.memory_space<vmem>>, vector<1x8x40xf32>
    %500 = vector.shape_cast %499 : vector<1x8x40xf32> to vector<8x40xf32>
    %c0_462 = arith.constant 0 : index
    %c0_463 = arith.constant 0 : index
    %501 = vector.load %arg14[%c0_462, %c0_463] : memref<40x256xf32, #tpu.memory_space<vmem>>, vector<40x256xf32>
    %cst_464 = arith.constant dense<0.000000e+00> : vector<8x256xf32>
    %502 = tpu.matmul %500, %501, %cst_464 {dimension_numbers = #tpu.dot_dimension_numbers<[1], [0], [0], [1], [0, 0, 1, 1], [], []>} : vector<8x40xf32>, vector<40x256xf32>, vector<8x256xf32> -> vector<8x256xf32>
    %c2_465 = arith.constant 2 : index
    %c0_466 = arith.constant 0 : index
    %c0_467 = arith.constant 0 : index
    %503 = vector.load %arg10[%c2_465, %c0_466, %c0_467] : memref<6x8x1xf32, #tpu.memory_space<vmem>>, vector<1x8x1xf32>
    %504 = vector.shape_cast %503 : vector<1x8x1xf32> to vector<8x1xf32>
    %505 = vector.broadcast %504 : vector<8x1xf32> to vector<8x256xf32>
    %506 = arith.addf %502, %505 : vector<8x256xf32>
    %cst_468 = arith.constant 0.00999999977 : f32
    %507 = vector.broadcast %cst_468 : f32 to vector<8x256xf32>
    %508 = arith.mulf %507, %506 : vector<8x256xf32>
    %509 = arith.maximumf %506, %508 : vector<8x256xf32>
    %c32_i32_469 = arith.constant 32 : i32
    %510 = tpu.dynamic_rotate %509 by %c32_i32_469 dim 1 : vector<8x256xf32>, i32 -> vector<8x256xf32>
    %c1_470 = arith.constant 1 : index
    %c0_471 = arith.constant 0 : index
    %c0_472 = arith.constant 0 : index
    %511 = vector.load %arg2[%c1_470, %c0_471, %c0_472] : memref<16x1x256xf32, #tpu.memory_space<vmem>>, vector<1x1x256xf32>
    %512 = vector.shape_cast %511 : vector<1x1x256xf32> to vector<1x256xf32>
    %513 = vector.broadcast %512 : vector<1x256xf32> to vector<8x256xf32>
    %514 = arith.mulf %510, %513 : vector<8x256xf32>
    %c0_473 = arith.constant 0 : index
    %c0_474 = arith.constant 0 : index
    %515 = vector.load %arg14[%c0_473, %c0_474] : memref<40x256xf32, #tpu.memory_space<vmem>>, vector<8x256xf32>
    tpu.vector_store %arg14[%c0_473, %c0_474], %514 {strides = array<i32>} : memref<40x256xf32, #tpu.memory_space<vmem>>, vector<8x256xf32>,
    %c16_i32_475 = arith.constant 16 : i32
    %516 = tpu.dynamic_rotate %509 by %c16_i32_475 dim 1 : vector<8x256xf32>, i32 -> vector<8x256xf32>
    %c4_476 = arith.constant 4 : index
    %c0_477 = arith.constant 0 : index
    %c0_478 = arith.constant 0 : index
    %517 = vector.load %arg2[%c4_476, %c0_477, %c0_478] : memref<16x1x256xf32, #tpu.memory_space<vmem>>, vector<1x1x256xf32>
    %518 = vector.shape_cast %517 : vector<1x1x256xf32> to vector<1x256xf32>
    %519 = vector.broadcast %518 : vector<1x256xf32> to vector<8x256xf32>
    %520 = arith.mulf %516, %519 : vector<8x256xf32>
    %c8_479 = arith.constant 8 : index
    %c0_480 = arith.constant 0 : index
    %521 = vector.load %arg14[%c8_479, %c0_480] : memref<40x256xf32, #tpu.memory_space<vmem>>, vector<8x256xf32>
    tpu.vector_store %arg14[%c8_479, %c0_480], %520 {strides = array<i32>} : memref<40x256xf32, #tpu.memory_space<vmem>>, vector<8x256xf32>,
    %c16_481 = arith.constant 16 : index
    %c0_482 = arith.constant 0 : index
    %522 = vector.load %arg14[%c16_481, %c0_482] : memref<40x256xf32, #tpu.memory_space<vmem>>, vector<8x256xf32>
    tpu.vector_store %arg14[%c16_481, %c0_482], %509 {strides = array<i32>} : memref<40x256xf32, #tpu.memory_space<vmem>>, vector<8x256xf32>,
    %c240_i32_483 = arith.constant 240 : i32
    %523 = tpu.dynamic_rotate %509 by %c240_i32_483 dim 1 : vector<8x256xf32>, i32 -> vector<8x256xf32>
    %c11_484 = arith.constant 11 : index
    %c0_485 = arith.constant 0 : index
    %c0_486 = arith.constant 0 : index
    %524 = vector.load %arg2[%c11_484, %c0_485, %c0_486] : memref<16x1x256xf32, #tpu.memory_space<vmem>>, vector<1x1x256xf32>
    %525 = vector.shape_cast %524 : vector<1x1x256xf32> to vector<1x256xf32>
    %526 = vector.broadcast %525 : vector<1x256xf32> to vector<8x256xf32>
    %527 = arith.mulf %523, %526 : vector<8x256xf32>
    %c24_487 = arith.constant 24 : index
    %c0_488 = arith.constant 0 : index
    %528 = vector.load %arg14[%c24_487, %c0_488] : memref<40x256xf32, #tpu.memory_space<vmem>>, vector<8x256xf32>
    tpu.vector_store %arg14[%c24_487, %c0_488], %527 {strides = array<i32>} : memref<40x256xf32, #tpu.memory_space<vmem>>, vector<8x256xf32>,
    %c224_i32_489 = arith.constant 224 : i32
    %529 = tpu.dynamic_rotate %509 by %c224_i32_489 dim 1 : vector<8x256xf32>, i32 -> vector<8x256xf32>
    %c14_490 = arith.constant 14 : index
    %c0_491 = arith.constant 0 : index
    %c0_492 = arith.constant 0 : index
    %530 = vector.load %arg2[%c14_490, %c0_491, %c0_492] : memref<16x1x256xf32, #tpu.memory_space<vmem>>, vector<1x1x256xf32>
    %531 = vector.shape_cast %530 : vector<1x1x256xf32> to vector<1x256xf32>
    %532 = vector.broadcast %531 : vector<1x256xf32> to vector<8x256xf32>
    %533 = arith.mulf %529, %532 : vector<8x256xf32>
    %c32_493 = arith.constant 32 : index
    %c0_494 = arith.constant 0 : index
    %534 = vector.load %arg14[%c32_493, %c0_494] : memref<40x256xf32, #tpu.memory_space<vmem>>, vector<8x256xf32>
    tpu.vector_store %arg14[%c32_493, %c0_494], %533 {strides = array<i32>} : memref<40x256xf32, #tpu.memory_space<vmem>>, vector<8x256xf32>,
    %c3_495 = arith.constant 3 : index
    %c0_496 = arith.constant 0 : index
    %c0_497 = arith.constant 0 : index
    %535 = vector.load %arg9[%c3_495, %c0_496, %c0_497] : memref<6x8x40xf32, #tpu.memory_space<vmem>>, vector<1x8x40xf32>
    %536 = vector.shape_cast %535 : vector<1x8x40xf32> to vector<8x40xf32>
    %c0_498 = arith.constant 0 : index
    %c0_499 = arith.constant 0 : index
    %537 = vector.load %arg14[%c0_498, %c0_499] : memref<40x256xf32, #tpu.memory_space<vmem>>, vector<40x256xf32>
    %cst_500 = arith.constant dense<0.000000e+00> : vector<8x256xf32>
    %538 = tpu.matmul %536, %537, %cst_500 {dimension_numbers = #tpu.dot_dimension_numbers<[1], [0], [0], [1], [0, 0, 1, 1], [], []>} : vector<8x40xf32>, vector<40x256xf32>, vector<8x256xf32> -> vector<8x256xf32>
    %c3_501 = arith.constant 3 : index
    %c0_502 = arith.constant 0 : index
    %c0_503 = arith.constant 0 : index
    %539 = vector.load %arg10[%c3_501, %c0_502, %c0_503] : memref<6x8x1xf32, #tpu.memory_space<vmem>>, vector<1x8x1xf32>
    %540 = vector.shape_cast %539 : vector<1x8x1xf32> to vector<8x1xf32>
    %541 = vector.broadcast %540 : vector<8x1xf32> to vector<8x256xf32>
    %542 = arith.addf %538, %541 : vector<8x256xf32>
    %cst_504 = arith.constant 0.00999999977 : f32
    %543 = vector.broadcast %cst_504 : f32 to vector<8x256xf32>
    %544 = arith.mulf %543, %542 : vector<8x256xf32>
    %545 = arith.maximumf %542, %544 : vector<8x256xf32>
    %546 = vector.extract_strided_slice %545 {offsets = [0, 0], sizes = [4, 256], strides = [1, 1]} : vector<8x256xf32> to vector<4x256xf32>
    %547 = vector.extract_strided_slice %545 {offsets = [4, 0], sizes = [4, 256], strides = [1, 1]} : vector<8x256xf32> to vector<4x256xf32>
    %548 = arith.addf %546, %547 : vector<4x256xf32>
    %cst_505 = arith.constant 0.000000e+00 : f32
    %549 = vector.broadcast %cst_505 : f32 to vector<4x256xf32>
    %550 = arith.subf %549, %548 : vector<4x256xf32>
    %551 = math.exp %550 : vector<4x256xf32>
    %cst_506 = arith.constant 1.000000e+00 : f32
    %552 = vector.broadcast %cst_506 : f32 to vector<4x256xf32>
    %553 = arith.addf %552, %551 : vector<4x256xf32>
    %554 = tpu.reciprocal %553 {approx = true} : vector<4x256xf32> -> vector<4x256xf32>
    %555 = arith.mulf %554, %437 : vector<4x256xf32>
    %c17_i32_507 = arith.constant 17 : i32
    %556 = tpu.dynamic_rotate %555 by %c17_i32_507 dim 1 : vector<4x256xf32>, i32 -> vector<4x256xf32>
    %c3_508 = arith.constant 3 : index
    %c0_509 = arith.constant 0 : index
    %c0_510 = arith.constant 0 : index
    %557 = vector.load %arg2[%c3_508, %c0_509, %c0_510] : memref<16x1x256xf32, #tpu.memory_space<vmem>>, vector<1x1x256xf32>
    %558 = vector.shape_cast %557 : vector<1x1x256xf32> to vector<1x256xf32>
    %559 = vector.broadcast %558 : vector<1x256xf32> to vector<4x256xf32>
    %560 = arith.mulf %556, %559 : vector<4x256xf32>
    %c0_511 = arith.constant 0 : index
    %c0_512 = arith.constant 0 : index
    %561 = vector.load %arg14[%c0_511, %c0_512] : memref<40x256xf32, #tpu.memory_space<vmem>>, vector<4x256xf32>
    tpu.vector_store %arg14[%c0_511, %c0_512], %560 {strides = array<i32>} : memref<40x256xf32, #tpu.memory_space<vmem>>, vector<4x256xf32>,
    %c16_i32_513 = arith.constant 16 : i32
    %562 = tpu.dynamic_rotate %555 by %c16_i32_513 dim 1 : vector<4x256xf32>, i32 -> vector<4x256xf32>
    %c4_514 = arith.constant 4 : index
    %c0_515 = arith.constant 0 : index
    %c0_516 = arith.constant 0 : index
    %563 = vector.load %arg2[%c4_514, %c0_515, %c0_516] : memref<16x1x256xf32, #tpu.memory_space<vmem>>, vector<1x1x256xf32>
    %564 = vector.shape_cast %563 : vector<1x1x256xf32> to vector<1x256xf32>
    %565 = vector.broadcast %564 : vector<1x256xf32> to vector<4x256xf32>
    %566 = arith.mulf %562, %565 : vector<4x256xf32>
    %c4_517 = arith.constant 4 : index
    %c0_518 = arith.constant 0 : index
    %567 = vector.load %arg14[%c4_517, %c0_518] : memref<40x256xf32, #tpu.memory_space<vmem>>, vector<4x256xf32>
    tpu.vector_store %arg14[%c4_517, %c0_518], %566 {strides = array<i32>} : memref<40x256xf32, #tpu.memory_space<vmem>>, vector<4x256xf32>,
    %c15_i32_519 = arith.constant 15 : i32
    %568 = tpu.dynamic_rotate %555 by %c15_i32_519 dim 1 : vector<4x256xf32>, i32 -> vector<4x256xf32>
    %c5_520 = arith.constant 5 : index
    %c0_521 = arith.constant 0 : index
    %c0_522 = arith.constant 0 : index
    %569 = vector.load %arg2[%c5_520, %c0_521, %c0_522] : memref<16x1x256xf32, #tpu.memory_space<vmem>>, vector<1x1x256xf32>
    %570 = vector.shape_cast %569 : vector<1x1x256xf32> to vector<1x256xf32>
    %571 = vector.broadcast %570 : vector<1x256xf32> to vector<4x256xf32>
    %572 = arith.mulf %568, %571 : vector<4x256xf32>
    %c8_523 = arith.constant 8 : index
    %c0_524 = arith.constant 0 : index
    %573 = vector.load %arg14[%c8_523, %c0_524] : memref<40x256xf32, #tpu.memory_space<vmem>>, vector<4x256xf32>
    tpu.vector_store %arg14[%c8_523, %c0_524], %572 {strides = array<i32>} : memref<40x256xf32, #tpu.memory_space<vmem>>, vector<4x256xf32>,
    %c1_i32_525 = arith.constant 1 : i32
    %574 = tpu.dynamic_rotate %555 by %c1_i32_525 dim 1 : vector<4x256xf32>, i32 -> vector<4x256xf32>
    %c7_526 = arith.constant 7 : index
    %c0_527 = arith.constant 0 : index
    %c0_528 = arith.constant 0 : index
    %575 = vector.load %arg2[%c7_526, %c0_527, %c0_528] : memref<16x1x256xf32, #tpu.memory_space<vmem>>, vector<1x1x256xf32>
    %576 = vector.shape_cast %575 : vector<1x1x256xf32> to vector<1x256xf32>
    %577 = vector.broadcast %576 : vector<1x256xf32> to vector<4x256xf32>
    %578 = arith.mulf %574, %577 : vector<4x256xf32>
    %c12_529 = arith.constant 12 : index
    %c0_530 = arith.constant 0 : index
    %579 = vector.load %arg14[%c12_529, %c0_530] : memref<40x256xf32, #tpu.memory_space<vmem>>, vector<4x256xf32>
    tpu.vector_store %arg14[%c12_529, %c0_530], %578 {strides = array<i32>} : memref<40x256xf32, #tpu.memory_space<vmem>>, vector<4x256xf32>,
    %c16_531 = arith.constant 16 : index
    %c0_532 = arith.constant 0 : index
    %580 = vector.load %arg14[%c16_531, %c0_532] : memref<40x256xf32, #tpu.memory_space<vmem>>, vector<4x256xf32>
    tpu.vector_store %arg14[%c16_531, %c0_532], %555 {strides = array<i32>} : memref<40x256xf32, #tpu.memory_space<vmem>>, vector<4x256xf32>,
    %c255_i32_533 = arith.constant 255 : i32
    %581 = tpu.dynamic_rotate %555 by %c255_i32_533 dim 1 : vector<4x256xf32>, i32 -> vector<4x256xf32>
    %c8_534 = arith.constant 8 : index
    %c0_535 = arith.constant 0 : index
    %c0_536 = arith.constant 0 : index
    %582 = vector.load %arg2[%c8_534, %c0_535, %c0_536] : memref<16x1x256xf32, #tpu.memory_space<vmem>>, vector<1x1x256xf32>
    %583 = vector.shape_cast %582 : vector<1x1x256xf32> to vector<1x256xf32>
    %584 = vector.broadcast %583 : vector<1x256xf32> to vector<4x256xf32>
    %585 = arith.mulf %581, %584 : vector<4x256xf32>
    %c20_537 = arith.constant 20 : index
    %c0_538 = arith.constant 0 : index
    %586 = vector.load %arg14[%c20_537, %c0_538] : memref<40x256xf32, #tpu.memory_space<vmem>>, vector<4x256xf32>
    tpu.vector_store %arg14[%c20_537, %c0_538], %585 {strides = array<i32>} : memref<40x256xf32, #tpu.memory_space<vmem>>, vector<4x256xf32>,
    %c241_i32_539 = arith.constant 241 : i32
    %587 = tpu.dynamic_rotate %555 by %c241_i32_539 dim 1 : vector<4x256xf32>, i32 -> vector<4x256xf32>
    %c10_540 = arith.constant 10 : index
    %c0_541 = arith.constant 0 : index
    %c0_542 = arith.constant 0 : index
    %588 = vector.load %arg2[%c10_540, %c0_541, %c0_542] : memref<16x1x256xf32, #tpu.memory_space<vmem>>, vector<1x1x256xf32>
    %589 = vector.shape_cast %588 : vector<1x1x256xf32> to vector<1x256xf32>
    %590 = vector.broadcast %589 : vector<1x256xf32> to vector<4x256xf32>
    %591 = arith.mulf %587, %590 : vector<4x256xf32>
    %c24_543 = arith.constant 24 : index
    %c0_544 = arith.constant 0 : index
    %592 = vector.load %arg14[%c24_543, %c0_544] : memref<40x256xf32, #tpu.memory_space<vmem>>, vector<4x256xf32>
    tpu.vector_store %arg14[%c24_543, %c0_544], %591 {strides = array<i32>} : memref<40x256xf32, #tpu.memory_space<vmem>>, vector<4x256xf32>,
    %c240_i32_545 = arith.constant 240 : i32
    %593 = tpu.dynamic_rotate %555 by %c240_i32_545 dim 1 : vector<4x256xf32>, i32 -> vector<4x256xf32>
    %c11_546 = arith.constant 11 : index
    %c0_547 = arith.constant 0 : index
    %c0_548 = arith.constant 0 : index
    %594 = vector.load %arg2[%c11_546, %c0_547, %c0_548] : memref<16x1x256xf32, #tpu.memory_space<vmem>>, vector<1x1x256xf32>
    %595 = vector.shape_cast %594 : vector<1x1x256xf32> to vector<1x256xf32>
    %596 = vector.broadcast %595 : vector<1x256xf32> to vector<4x256xf32>
    %597 = arith.mulf %593, %596 : vector<4x256xf32>
    %c28_549 = arith.constant 28 : index
    %c0_550 = arith.constant 0 : index
    %598 = vector.load %arg14[%c28_549, %c0_550] : memref<40x256xf32, #tpu.memory_space<vmem>>, vector<4x256xf32>
    tpu.vector_store %arg14[%c28_549, %c0_550], %597 {strides = array<i32>} : memref<40x256xf32, #tpu.memory_space<vmem>>, vector<4x256xf32>,
    %c239_i32_551 = arith.constant 239 : i32
    %599 = tpu.dynamic_rotate %555 by %c239_i32_551 dim 1 : vector<4x256xf32>, i32 -> vector<4x256xf32>
    %c12_552 = arith.constant 12 : index
    %c0_553 = arith.constant 0 : index
    %c0_554 = arith.constant 0 : index
    %600 = vector.load %arg2[%c12_552, %c0_553, %c0_554] : memref<16x1x256xf32, #tpu.memory_space<vmem>>, vector<1x1x256xf32>
    %601 = vector.shape_cast %600 : vector<1x1x256xf32> to vector<1x256xf32>
    %602 = vector.broadcast %601 : vector<1x256xf32> to vector<4x256xf32>
    %603 = arith.mulf %599, %602 : vector<4x256xf32>
    %c32_555 = arith.constant 32 : index
    %c0_556 = arith.constant 0 : index
    %604 = vector.load %arg14[%c32_555, %c0_556] : memref<40x256xf32, #tpu.memory_space<vmem>>, vector<4x256xf32>
    tpu.vector_store %arg14[%c32_555, %c0_556], %603 {strides = array<i32>} : memref<40x256xf32, #tpu.memory_space<vmem>>, vector<4x256xf32>,
    %c5_557 = arith.constant 5 : index
    %c0_558 = arith.constant 0 : index
    %c0_559 = arith.constant 0 : index
    %605 = vector.load %arg5[%c5_557, %c0_558, %c0_559] : memref<8x4x36xf32, #tpu.memory_space<vmem>>, vector<1x4x36xf32>
    %606 = vector.shape_cast %605 : vector<1x4x36xf32> to vector<4x36xf32>
    %c0_560 = arith.constant 0 : index
    %c0_561 = arith.constant 0 : index
    %607 = vector.load %arg14[%c0_560, %c0_561] : memref<40x256xf32, #tpu.memory_space<vmem>>, vector<36x256xf32>
    %cst_562 = arith.constant dense<0.000000e+00> : vector<4x256xf32>
    %608 = tpu.matmul %606, %607, %cst_562 {dimension_numbers = #tpu.dot_dimension_numbers<[1], [0], [0], [1], [0, 0, 1, 1], [], []>} : vector<4x36xf32>, vector<36x256xf32>, vector<4x256xf32> -> vector<4x256xf32>
    %c5_563 = arith.constant 5 : index
    %c0_564 = arith.constant 0 : index
    %c0_565 = arith.constant 0 : index
    %609 = vector.load %arg6[%c5_563, %c0_564, %c0_565] : memref<8x4x1xf32, #tpu.memory_space<vmem>>, vector<1x4x1xf32>
    %610 = vector.shape_cast %609 : vector<1x4x1xf32> to vector<4x1xf32>
    %611 = vector.broadcast %610 : vector<4x1xf32> to vector<4x256xf32>
    %612 = arith.addf %608, %611 : vector<4x256xf32>
    %cst_566 = arith.constant 0.00999999977 : f32
    %613 = vector.broadcast %cst_566 : f32 to vector<4x256xf32>
    %614 = arith.mulf %613, %612 : vector<4x256xf32>
    %615 = arith.maximumf %612, %614 : vector<4x256xf32>
    %c34_i32_567 = arith.constant 34 : i32
    %616 = tpu.dynamic_rotate %615 by %c34_i32_567 dim 1 : vector<4x256xf32>, i32 -> vector<4x256xf32>
    %c0_568 = arith.constant 0 : index
    %c0_569 = arith.constant 0 : index
    %c0_570 = arith.constant 0 : index
    %617 = vector.load %arg2[%c0_568, %c0_569, %c0_570] : memref<16x1x256xf32, #tpu.memory_space<vmem>>, vector<1x1x256xf32>
    %618 = vector.shape_cast %617 : vector<1x1x256xf32> to vector<1x256xf32>
    %619 = vector.broadcast %618 : vector<1x256xf32> to vector<4x256xf32>
    %620 = arith.mulf %616, %619 : vector<4x256xf32>
    %c0_571 = arith.constant 0 : index
    %c0_572 = arith.constant 0 : index
    %621 = vector.load %arg14[%c0_571, %c0_572] : memref<40x256xf32, #tpu.memory_space<vmem>>, vector<4x256xf32>
    tpu.vector_store %arg14[%c0_571, %c0_572], %620 {strides = array<i32>} : memref<40x256xf32, #tpu.memory_space<vmem>>, vector<4x256xf32>,
    %c32_i32_573 = arith.constant 32 : i32
    %622 = tpu.dynamic_rotate %615 by %c32_i32_573 dim 1 : vector<4x256xf32>, i32 -> vector<4x256xf32>
    %c1_574 = arith.constant 1 : index
    %c0_575 = arith.constant 0 : index
    %c0_576 = arith.constant 0 : index
    %623 = vector.load %arg2[%c1_574, %c0_575, %c0_576] : memref<16x1x256xf32, #tpu.memory_space<vmem>>, vector<1x1x256xf32>
    %624 = vector.shape_cast %623 : vector<1x1x256xf32> to vector<1x256xf32>
    %625 = vector.broadcast %624 : vector<1x256xf32> to vector<4x256xf32>
    %626 = arith.mulf %622, %625 : vector<4x256xf32>
    %c4_577 = arith.constant 4 : index
    %c0_578 = arith.constant 0 : index
    %627 = vector.load %arg14[%c4_577, %c0_578] : memref<40x256xf32, #tpu.memory_space<vmem>>, vector<4x256xf32>
    tpu.vector_store %arg14[%c4_577, %c0_578], %626 {strides = array<i32>} : memref<40x256xf32, #tpu.memory_space<vmem>>, vector<4x256xf32>,
    %c30_i32_579 = arith.constant 30 : i32
    %628 = tpu.dynamic_rotate %615 by %c30_i32_579 dim 1 : vector<4x256xf32>, i32 -> vector<4x256xf32>
    %c2_580 = arith.constant 2 : index
    %c0_581 = arith.constant 0 : index
    %c0_582 = arith.constant 0 : index
    %629 = vector.load %arg2[%c2_580, %c0_581, %c0_582] : memref<16x1x256xf32, #tpu.memory_space<vmem>>, vector<1x1x256xf32>
    %630 = vector.shape_cast %629 : vector<1x1x256xf32> to vector<1x256xf32>
    %631 = vector.broadcast %630 : vector<1x256xf32> to vector<4x256xf32>
    %632 = arith.mulf %628, %631 : vector<4x256xf32>
    %c8_583 = arith.constant 8 : index
    %c0_584 = arith.constant 0 : index
    %633 = vector.load %arg14[%c8_583, %c0_584] : memref<40x256xf32, #tpu.memory_space<vmem>>, vector<4x256xf32>
    tpu.vector_store %arg14[%c8_583, %c0_584], %632 {strides = array<i32>} : memref<40x256xf32, #tpu.memory_space<vmem>>, vector<4x256xf32>,
    %c2_i32_585 = arith.constant 2 : i32
    %634 = tpu.dynamic_rotate %615 by %c2_i32_585 dim 1 : vector<4x256xf32>, i32 -> vector<4x256xf32>
    %c6_586 = arith.constant 6 : index
    %c0_587 = arith.constant 0 : index
    %c0_588 = arith.constant 0 : index
    %635 = vector.load %arg2[%c6_586, %c0_587, %c0_588] : memref<16x1x256xf32, #tpu.memory_space<vmem>>, vector<1x1x256xf32>
    %636 = vector.shape_cast %635 : vector<1x1x256xf32> to vector<1x256xf32>
    %637 = vector.broadcast %636 : vector<1x256xf32> to vector<4x256xf32>
    %638 = arith.mulf %634, %637 : vector<4x256xf32>
    %c12_589 = arith.constant 12 : index
    %c0_590 = arith.constant 0 : index
    %639 = vector.load %arg14[%c12_589, %c0_590] : memref<40x256xf32, #tpu.memory_space<vmem>>, vector<4x256xf32>
    tpu.vector_store %arg14[%c12_589, %c0_590], %638 {strides = array<i32>} : memref<40x256xf32, #tpu.memory_space<vmem>>, vector<4x256xf32>,
    %c16_591 = arith.constant 16 : index
    %c0_592 = arith.constant 0 : index
    %640 = vector.load %arg14[%c16_591, %c0_592] : memref<40x256xf32, #tpu.memory_space<vmem>>, vector<4x256xf32>
    tpu.vector_store %arg14[%c16_591, %c0_592], %615 {strides = array<i32>} : memref<40x256xf32, #tpu.memory_space<vmem>>, vector<4x256xf32>,
    %c254_i32_593 = arith.constant 254 : i32
    %641 = tpu.dynamic_rotate %615 by %c254_i32_593 dim 1 : vector<4x256xf32>, i32 -> vector<4x256xf32>
    %c9_594 = arith.constant 9 : index
    %c0_595 = arith.constant 0 : index
    %c0_596 = arith.constant 0 : index
    %642 = vector.load %arg2[%c9_594, %c0_595, %c0_596] : memref<16x1x256xf32, #tpu.memory_space<vmem>>, vector<1x1x256xf32>
    %643 = vector.shape_cast %642 : vector<1x1x256xf32> to vector<1x256xf32>
    %644 = vector.broadcast %643 : vector<1x256xf32> to vector<4x256xf32>
    %645 = arith.mulf %641, %644 : vector<4x256xf32>
    %c20_597 = arith.constant 20 : index
    %c0_598 = arith.constant 0 : index
    %646 = vector.load %arg14[%c20_597, %c0_598] : memref<40x256xf32, #tpu.memory_space<vmem>>, vector<4x256xf32>
    tpu.vector_store %arg14[%c20_597, %c0_598], %645 {strides = array<i32>} : memref<40x256xf32, #tpu.memory_space<vmem>>, vector<4x256xf32>,
    %c226_i32_599 = arith.constant 226 : i32
    %647 = tpu.dynamic_rotate %615 by %c226_i32_599 dim 1 : vector<4x256xf32>, i32 -> vector<4x256xf32>
    %c13_600 = arith.constant 13 : index
    %c0_601 = arith.constant 0 : index
    %c0_602 = arith.constant 0 : index
    %648 = vector.load %arg2[%c13_600, %c0_601, %c0_602] : memref<16x1x256xf32, #tpu.memory_space<vmem>>, vector<1x1x256xf32>
    %649 = vector.shape_cast %648 : vector<1x1x256xf32> to vector<1x256xf32>
    %650 = vector.broadcast %649 : vector<1x256xf32> to vector<4x256xf32>
    %651 = arith.mulf %647, %650 : vector<4x256xf32>
    %c24_603 = arith.constant 24 : index
    %c0_604 = arith.constant 0 : index
    %652 = vector.load %arg14[%c24_603, %c0_604] : memref<40x256xf32, #tpu.memory_space<vmem>>, vector<4x256xf32>
    tpu.vector_store %arg14[%c24_603, %c0_604], %651 {strides = array<i32>} : memref<40x256xf32, #tpu.memory_space<vmem>>, vector<4x256xf32>,
    %c224_i32_605 = arith.constant 224 : i32
    %653 = tpu.dynamic_rotate %615 by %c224_i32_605 dim 1 : vector<4x256xf32>, i32 -> vector<4x256xf32>
    %c14_606 = arith.constant 14 : index
    %c0_607 = arith.constant 0 : index
    %c0_608 = arith.constant 0 : index
    %654 = vector.load %arg2[%c14_606, %c0_607, %c0_608] : memref<16x1x256xf32, #tpu.memory_space<vmem>>, vector<1x1x256xf32>
    %655 = vector.shape_cast %654 : vector<1x1x256xf32> to vector<1x256xf32>
    %656 = vector.broadcast %655 : vector<1x256xf32> to vector<4x256xf32>
    %657 = arith.mulf %653, %656 : vector<4x256xf32>
    %c28_609 = arith.constant 28 : index
    %c0_610 = arith.constant 0 : index
    %658 = vector.load %arg14[%c28_609, %c0_610] : memref<40x256xf32, #tpu.memory_space<vmem>>, vector<4x256xf32>
    tpu.vector_store %arg14[%c28_609, %c0_610], %657 {strides = array<i32>} : memref<40x256xf32, #tpu.memory_space<vmem>>, vector<4x256xf32>,
    %c222_i32_611 = arith.constant 222 : i32
    %659 = tpu.dynamic_rotate %615 by %c222_i32_611 dim 1 : vector<4x256xf32>, i32 -> vector<4x256xf32>
    %c15_612 = arith.constant 15 : index
    %c0_613 = arith.constant 0 : index
    %c0_614 = arith.constant 0 : index
    %660 = vector.load %arg2[%c15_612, %c0_613, %c0_614] : memref<16x1x256xf32, #tpu.memory_space<vmem>>, vector<1x1x256xf32>
    %661 = vector.shape_cast %660 : vector<1x1x256xf32> to vector<1x256xf32>
    %662 = vector.broadcast %661 : vector<1x256xf32> to vector<4x256xf32>
    %663 = arith.mulf %659, %662 : vector<4x256xf32>
    %c32_615 = arith.constant 32 : index
    %c0_616 = arith.constant 0 : index
    %664 = vector.load %arg14[%c32_615, %c0_616] : memref<40x256xf32, #tpu.memory_space<vmem>>, vector<4x256xf32>
    tpu.vector_store %arg14[%c32_615, %c0_616], %663 {strides = array<i32>} : memref<40x256xf32, #tpu.memory_space<vmem>>, vector<4x256xf32>,
    %c6_617 = arith.constant 6 : index
    %c0_618 = arith.constant 0 : index
    %c0_619 = arith.constant 0 : index
    %665 = vector.load %arg5[%c6_617, %c0_618, %c0_619] : memref<8x4x36xf32, #tpu.memory_space<vmem>>, vector<1x4x36xf32>
    %666 = vector.shape_cast %665 : vector<1x4x36xf32> to vector<4x36xf32>
    %c0_620 = arith.constant 0 : index
    %c0_621 = arith.constant 0 : index
    %667 = vector.load %arg14[%c0_620, %c0_621] : memref<40x256xf32, #tpu.memory_space<vmem>>, vector<36x256xf32>
    %cst_622 = arith.constant dense<0.000000e+00> : vector<4x256xf32>
    %668 = tpu.matmul %666, %667, %cst_622 {dimension_numbers = #tpu.dot_dimension_numbers<[1], [0], [0], [1], [0, 0, 1, 1], [], []>} : vector<4x36xf32>, vector<36x256xf32>, vector<4x256xf32> -> vector<4x256xf32>
    %c6_623 = arith.constant 6 : index
    %c0_624 = arith.constant 0 : index
    %c0_625 = arith.constant 0 : index
    %669 = vector.load %arg6[%c6_623, %c0_624, %c0_625] : memref<8x4x1xf32, #tpu.memory_space<vmem>>, vector<1x4x1xf32>
    %670 = vector.shape_cast %669 : vector<1x4x1xf32> to vector<4x1xf32>
    %671 = vector.broadcast %670 : vector<4x1xf32> to vector<4x256xf32>
    %672 = arith.addf %668, %671 : vector<4x256xf32>
    %cst_626 = arith.constant 0.00999999977 : f32
    %673 = vector.broadcast %cst_626 : f32 to vector<4x256xf32>
    %674 = arith.mulf %673, %672 : vector<4x256xf32>
    %675 = arith.maximumf %672, %674 : vector<4x256xf32>
    %c32_i32_627 = arith.constant 32 : i32
    %676 = tpu.dynamic_rotate %675 by %c32_i32_627 dim 1 : vector<4x256xf32>, i32 -> vector<4x256xf32>
    %c1_628 = arith.constant 1 : index
    %c0_629 = arith.constant 0 : index
    %c0_630 = arith.constant 0 : index
    %677 = vector.load %arg2[%c1_628, %c0_629, %c0_630] : memref<16x1x256xf32, #tpu.memory_space<vmem>>, vector<1x1x256xf32>
    %678 = vector.shape_cast %677 : vector<1x1x256xf32> to vector<1x256xf32>
    %679 = vector.broadcast %678 : vector<1x256xf32> to vector<4x256xf32>
    %680 = arith.mulf %676, %679 : vector<4x256xf32>
    %c0_631 = arith.constant 0 : index
    %c0_632 = arith.constant 0 : index
    %681 = vector.load %arg14[%c0_631, %c0_632] : memref<40x256xf32, #tpu.memory_space<vmem>>, vector<4x256xf32>
    tpu.vector_store %arg14[%c0_631, %c0_632], %680 {strides = array<i32>} : memref<40x256xf32, #tpu.memory_space<vmem>>, vector<4x256xf32>,
    %c16_i32_633 = arith.constant 16 : i32
    %682 = tpu.dynamic_rotate %675 by %c16_i32_633 dim 1 : vector<4x256xf32>, i32 -> vector<4x256xf32>
    %c4_634 = arith.constant 4 : index
    %c0_635 = arith.constant 0 : index
    %c0_636 = arith.constant 0 : index
    %683 = vector.load %arg2[%c4_634, %c0_635, %c0_636] : memref<16x1x256xf32, #tpu.memory_space<vmem>>, vector<1x1x256xf32>
    %684 = vector.shape_cast %683 : vector<1x1x256xf32> to vector<1x256xf32>
    %685 = vector.broadcast %684 : vector<1x256xf32> to vector<4x256xf32>
    %686 = arith.mulf %682, %685 : vector<4x256xf32>
    %c4_637 = arith.constant 4 : index
    %c0_638 = arith.constant 0 : index
    %687 = vector.load %arg14[%c4_637, %c0_638] : memref<40x256xf32, #tpu.memory_space<vmem>>, vector<4x256xf32>
    tpu.vector_store %arg14[%c4_637, %c0_638], %686 {strides = array<i32>} : memref<40x256xf32, #tpu.memory_space<vmem>>, vector<4x256xf32>,
    %c8_639 = arith.constant 8 : index
    %c0_640 = arith.constant 0 : index
    %688 = vector.load %arg14[%c8_639, %c0_640] : memref<40x256xf32, #tpu.memory_space<vmem>>, vector<4x256xf32>
    tpu.vector_store %arg14[%c8_639, %c0_640], %675 {strides = array<i32>} : memref<40x256xf32, #tpu.memory_space<vmem>>, vector<4x256xf32>,
    %c240_i32_641 = arith.constant 240 : i32
    %689 = tpu.dynamic_rotate %675 by %c240_i32_641 dim 1 : vector<4x256xf32>, i32 -> vector<4x256xf32>
    %c11_642 = arith.constant 11 : index
    %c0_643 = arith.constant 0 : index
    %c0_644 = arith.constant 0 : index
    %690 = vector.load %arg2[%c11_642, %c0_643, %c0_644] : memref<16x1x256xf32, #tpu.memory_space<vmem>>, vector<1x1x256xf32>
    %691 = vector.shape_cast %690 : vector<1x1x256xf32> to vector<1x256xf32>
    %692 = vector.broadcast %691 : vector<1x256xf32> to vector<4x256xf32>
    %693 = arith.mulf %689, %692 : vector<4x256xf32>
    %c12_645 = arith.constant 12 : index
    %c0_646 = arith.constant 0 : index
    %694 = vector.load %arg14[%c12_645, %c0_646] : memref<40x256xf32, #tpu.memory_space<vmem>>, vector<4x256xf32>
    tpu.vector_store %arg14[%c12_645, %c0_646], %693 {strides = array<i32>} : memref<40x256xf32, #tpu.memory_space<vmem>>, vector<4x256xf32>,
    %c224_i32_647 = arith.constant 224 : i32
    %695 = tpu.dynamic_rotate %675 by %c224_i32_647 dim 1 : vector<4x256xf32>, i32 -> vector<4x256xf32>
    %c14_648 = arith.constant 14 : index
    %c0_649 = arith.constant 0 : index
    %c0_650 = arith.constant 0 : index
    %696 = vector.load %arg2[%c14_648, %c0_649, %c0_650] : memref<16x1x256xf32, #tpu.memory_space<vmem>>, vector<1x1x256xf32>
    %697 = vector.shape_cast %696 : vector<1x1x256xf32> to vector<1x256xf32>
    %698 = vector.broadcast %697 : vector<1x256xf32> to vector<4x256xf32>
    %699 = arith.mulf %695, %698 : vector<4x256xf32>
    %c16_651 = arith.constant 16 : index
    %c0_652 = arith.constant 0 : index
    %700 = vector.load %arg14[%c16_651, %c0_652] : memref<40x256xf32, #tpu.memory_space<vmem>>, vector<4x256xf32>
    tpu.vector_store %arg14[%c16_651, %c0_652], %699 {strides = array<i32>} : memref<40x256xf32, #tpu.memory_space<vmem>>, vector<4x256xf32>,
    %c2_653 = arith.constant 2 : index
    %c0_654 = arith.constant 0 : index
    %c0_655 = arith.constant 0 : index
    %701 = vector.load %arg7[%c2_653, %c0_654, %c0_655] : memref<3x8x20xf32, #tpu.memory_space<vmem>>, vector<1x8x20xf32>
    %702 = vector.shape_cast %701 : vector<1x8x20xf32> to vector<8x20xf32>
    %c0_656 = arith.constant 0 : index
    %c0_657 = arith.constant 0 : index
    %703 = vector.load %arg14[%c0_656, %c0_657] : memref<40x256xf32, #tpu.memory_space<vmem>>, vector<20x256xf32>
    %cst_658 = arith.constant dense<0.000000e+00> : vector<8x256xf32>
    %704 = tpu.matmul %702, %703, %cst_658 {dimension_numbers = #tpu.dot_dimension_numbers<[1], [0], [0], [1], [0, 0, 1, 1], [], []>} : vector<8x20xf32>, vector<20x256xf32>, vector<8x256xf32> -> vector<8x256xf32>
    %c2_659 = arith.constant 2 : index
    %c0_660 = arith.constant 0 : index
    %c0_661 = arith.constant 0 : index
    %705 = vector.load %arg8[%c2_659, %c0_660, %c0_661] : memref<3x8x1xf32, #tpu.memory_space<vmem>>, vector<1x8x1xf32>
    %706 = vector.shape_cast %705 : vector<1x8x1xf32> to vector<8x1xf32>
    %707 = vector.broadcast %706 : vector<8x1xf32> to vector<8x256xf32>
    %708 = arith.addf %704, %707 : vector<8x256xf32>
    %cst_662 = arith.constant 0.00999999977 : f32
    %709 = vector.broadcast %cst_662 : f32 to vector<8x256xf32>
    %710 = arith.mulf %709, %708 : vector<8x256xf32>
    %711 = arith.maximumf %708, %710 : vector<8x256xf32>
    %c32_i32_663 = arith.constant 32 : i32
    %712 = tpu.dynamic_rotate %711 by %c32_i32_663 dim 1 : vector<8x256xf32>, i32 -> vector<8x256xf32>
    %c1_664 = arith.constant 1 : index
    %c0_665 = arith.constant 0 : index
    %c0_666 = arith.constant 0 : index
    %713 = vector.load %arg2[%c1_664, %c0_665, %c0_666] : memref<16x1x256xf32, #tpu.memory_space<vmem>>, vector<1x1x256xf32>
    %714 = vector.shape_cast %713 : vector<1x1x256xf32> to vector<1x256xf32>
    %715 = vector.broadcast %714 : vector<1x256xf32> to vector<8x256xf32>
    %716 = arith.mulf %712, %715 : vector<8x256xf32>
    %c0_667 = arith.constant 0 : index
    %c0_668 = arith.constant 0 : index
    %717 = vector.load %arg14[%c0_667, %c0_668] : memref<40x256xf32, #tpu.memory_space<vmem>>, vector<8x256xf32>
    tpu.vector_store %arg14[%c0_667, %c0_668], %716 {strides = array<i32>} : memref<40x256xf32, #tpu.memory_space<vmem>>, vector<8x256xf32>,
    %c16_i32_669 = arith.constant 16 : i32
    %718 = tpu.dynamic_rotate %711 by %c16_i32_669 dim 1 : vector<8x256xf32>, i32 -> vector<8x256xf32>
    %c4_670 = arith.constant 4 : index
    %c0_671 = arith.constant 0 : index
    %c0_672 = arith.constant 0 : index
    %719 = vector.load %arg2[%c4_670, %c0_671, %c0_672] : memref<16x1x256xf32, #tpu.memory_space<vmem>>, vector<1x1x256xf32>
    %720 = vector.shape_cast %719 : vector<1x1x256xf32> to vector<1x256xf32>
    %721 = vector.broadcast %720 : vector<1x256xf32> to vector<8x256xf32>
    %722 = arith.mulf %718, %721 : vector<8x256xf32>
    %c8_673 = arith.constant 8 : index
    %c0_674 = arith.constant 0 : index
    %723 = vector.load %arg14[%c8_673, %c0_674] : memref<40x256xf32, #tpu.memory_space<vmem>>, vector<8x256xf32>
    tpu.vector_store %arg14[%c8_673, %c0_674], %722 {strides = array<i32>} : memref<40x256xf32, #tpu.memory_space<vmem>>, vector<8x256xf32>,
    %c16_675 = arith.constant 16 : index
    %c0_676 = arith.constant 0 : index
    %724 = vector.load %arg14[%c16_675, %c0_676] : memref<40x256xf32, #tpu.memory_space<vmem>>, vector<8x256xf32>
    tpu.vector_store %arg14[%c16_675, %c0_676], %711 {strides = array<i32>} : memref<40x256xf32, #tpu.memory_space<vmem>>, vector<8x256xf32>,
    %c240_i32_677 = arith.constant 240 : i32
    %725 = tpu.dynamic_rotate %711 by %c240_i32_677 dim 1 : vector<8x256xf32>, i32 -> vector<8x256xf32>
    %c11_678 = arith.constant 11 : index
    %c0_679 = arith.constant 0 : index
    %c0_680 = arith.constant 0 : index
    %726 = vector.load %arg2[%c11_678, %c0_679, %c0_680] : memref<16x1x256xf32, #tpu.memory_space<vmem>>, vector<1x1x256xf32>
    %727 = vector.shape_cast %726 : vector<1x1x256xf32> to vector<1x256xf32>
    %728 = vector.broadcast %727 : vector<1x256xf32> to vector<8x256xf32>
    %729 = arith.mulf %725, %728 : vector<8x256xf32>
    %c24_681 = arith.constant 24 : index
    %c0_682 = arith.constant 0 : index
    %730 = vector.load %arg14[%c24_681, %c0_682] : memref<40x256xf32, #tpu.memory_space<vmem>>, vector<8x256xf32>
    tpu.vector_store %arg14[%c24_681, %c0_682], %729 {strides = array<i32>} : memref<40x256xf32, #tpu.memory_space<vmem>>, vector<8x256xf32>,
    %c224_i32_683 = arith.constant 224 : i32
    %731 = tpu.dynamic_rotate %711 by %c224_i32_683 dim 1 : vector<8x256xf32>, i32 -> vector<8x256xf32>
    %c14_684 = arith.constant 14 : index
    %c0_685 = arith.constant 0 : index
    %c0_686 = arith.constant 0 : index
    %732 = vector.load %arg2[%c14_684, %c0_685, %c0_686] : memref<16x1x256xf32, #tpu.memory_space<vmem>>, vector<1x1x256xf32>
    %733 = vector.shape_cast %732 : vector<1x1x256xf32> to vector<1x256xf32>
    %734 = vector.broadcast %733 : vector<1x256xf32> to vector<8x256xf32>
    %735 = arith.mulf %731, %734 : vector<8x256xf32>
    %c32_687 = arith.constant 32 : index
    %c0_688 = arith.constant 0 : index
    %736 = vector.load %arg14[%c32_687, %c0_688] : memref<40x256xf32, #tpu.memory_space<vmem>>, vector<8x256xf32>
    tpu.vector_store %arg14[%c32_687, %c0_688], %735 {strides = array<i32>} : memref<40x256xf32, #tpu.memory_space<vmem>>, vector<8x256xf32>,
    %c4_689 = arith.constant 4 : index
    %c0_690 = arith.constant 0 : index
    %c0_691 = arith.constant 0 : index
    %737 = vector.load %arg9[%c4_689, %c0_690, %c0_691] : memref<6x8x40xf32, #tpu.memory_space<vmem>>, vector<1x8x40xf32>
    %738 = vector.shape_cast %737 : vector<1x8x40xf32> to vector<8x40xf32>
    %c0_692 = arith.constant 0 : index
    %c0_693 = arith.constant 0 : index
    %739 = vector.load %arg14[%c0_692, %c0_693] : memref<40x256xf32, #tpu.memory_space<vmem>>, vector<40x256xf32>
    %cst_694 = arith.constant dense<0.000000e+00> : vector<8x256xf32>
    %740 = tpu.matmul %738, %739, %cst_694 {dimension_numbers = #tpu.dot_dimension_numbers<[1], [0], [0], [1], [0, 0, 1, 1], [], []>} : vector<8x40xf32>, vector<40x256xf32>, vector<8x256xf32> -> vector<8x256xf32>
    %c4_695 = arith.constant 4 : index
    %c0_696 = arith.constant 0 : index
    %c0_697 = arith.constant 0 : index
    %741 = vector.load %arg10[%c4_695, %c0_696, %c0_697] : memref<6x8x1xf32, #tpu.memory_space<vmem>>, vector<1x8x1xf32>
    %742 = vector.shape_cast %741 : vector<1x8x1xf32> to vector<8x1xf32>
    %743 = vector.broadcast %742 : vector<8x1xf32> to vector<8x256xf32>
    %744 = arith.addf %740, %743 : vector<8x256xf32>
    %cst_698 = arith.constant 0.00999999977 : f32
    %745 = vector.broadcast %cst_698 : f32 to vector<8x256xf32>
    %746 = arith.mulf %745, %744 : vector<8x256xf32>
    %747 = arith.maximumf %744, %746 : vector<8x256xf32>
    %c32_i32_699 = arith.constant 32 : i32
    %748 = tpu.dynamic_rotate %747 by %c32_i32_699 dim 1 : vector<8x256xf32>, i32 -> vector<8x256xf32>
    %c1_700 = arith.constant 1 : index
    %c0_701 = arith.constant 0 : index
    %c0_702 = arith.constant 0 : index
    %749 = vector.load %arg2[%c1_700, %c0_701, %c0_702] : memref<16x1x256xf32, #tpu.memory_space<vmem>>, vector<1x1x256xf32>
    %750 = vector.shape_cast %749 : vector<1x1x256xf32> to vector<1x256xf32>
    %751 = vector.broadcast %750 : vector<1x256xf32> to vector<8x256xf32>
    %752 = arith.mulf %748, %751 : vector<8x256xf32>
    %c0_703 = arith.constant 0 : index
    %c0_704 = arith.constant 0 : index
    %753 = vector.load %arg14[%c0_703, %c0_704] : memref<40x256xf32, #tpu.memory_space<vmem>>, vector<8x256xf32>
    tpu.vector_store %arg14[%c0_703, %c0_704], %752 {strides = array<i32>} : memref<40x256xf32, #tpu.memory_space<vmem>>, vector<8x256xf32>,
    %c16_i32_705 = arith.constant 16 : i32
    %754 = tpu.dynamic_rotate %747 by %c16_i32_705 dim 1 : vector<8x256xf32>, i32 -> vector<8x256xf32>
    %c4_706 = arith.constant 4 : index
    %c0_707 = arith.constant 0 : index
    %c0_708 = arith.constant 0 : index
    %755 = vector.load %arg2[%c4_706, %c0_707, %c0_708] : memref<16x1x256xf32, #tpu.memory_space<vmem>>, vector<1x1x256xf32>
    %756 = vector.shape_cast %755 : vector<1x1x256xf32> to vector<1x256xf32>
    %757 = vector.broadcast %756 : vector<1x256xf32> to vector<8x256xf32>
    %758 = arith.mulf %754, %757 : vector<8x256xf32>
    %c8_709 = arith.constant 8 : index
    %c0_710 = arith.constant 0 : index
    %759 = vector.load %arg14[%c8_709, %c0_710] : memref<40x256xf32, #tpu.memory_space<vmem>>, vector<8x256xf32>
    tpu.vector_store %arg14[%c8_709, %c0_710], %758 {strides = array<i32>} : memref<40x256xf32, #tpu.memory_space<vmem>>, vector<8x256xf32>,
    %c16_711 = arith.constant 16 : index
    %c0_712 = arith.constant 0 : index
    %760 = vector.load %arg14[%c16_711, %c0_712] : memref<40x256xf32, #tpu.memory_space<vmem>>, vector<8x256xf32>
    tpu.vector_store %arg14[%c16_711, %c0_712], %747 {strides = array<i32>} : memref<40x256xf32, #tpu.memory_space<vmem>>, vector<8x256xf32>,
    %c240_i32_713 = arith.constant 240 : i32
    %761 = tpu.dynamic_rotate %747 by %c240_i32_713 dim 1 : vector<8x256xf32>, i32 -> vector<8x256xf32>
    %c11_714 = arith.constant 11 : index
    %c0_715 = arith.constant 0 : index
    %c0_716 = arith.constant 0 : index
    %762 = vector.load %arg2[%c11_714, %c0_715, %c0_716] : memref<16x1x256xf32, #tpu.memory_space<vmem>>, vector<1x1x256xf32>
    %763 = vector.shape_cast %762 : vector<1x1x256xf32> to vector<1x256xf32>
    %764 = vector.broadcast %763 : vector<1x256xf32> to vector<8x256xf32>
    %765 = arith.mulf %761, %764 : vector<8x256xf32>
    %c24_717 = arith.constant 24 : index
    %c0_718 = arith.constant 0 : index
    %766 = vector.load %arg14[%c24_717, %c0_718] : memref<40x256xf32, #tpu.memory_space<vmem>>, vector<8x256xf32>
    tpu.vector_store %arg14[%c24_717, %c0_718], %765 {strides = array<i32>} : memref<40x256xf32, #tpu.memory_space<vmem>>, vector<8x256xf32>,
    %c224_i32_719 = arith.constant 224 : i32
    %767 = tpu.dynamic_rotate %747 by %c224_i32_719 dim 1 : vector<8x256xf32>, i32 -> vector<8x256xf32>
    %c14_720 = arith.constant 14 : index
    %c0_721 = arith.constant 0 : index
    %c0_722 = arith.constant 0 : index
    %768 = vector.load %arg2[%c14_720, %c0_721, %c0_722] : memref<16x1x256xf32, #tpu.memory_space<vmem>>, vector<1x1x256xf32>
    %769 = vector.shape_cast %768 : vector<1x1x256xf32> to vector<1x256xf32>
    %770 = vector.broadcast %769 : vector<1x256xf32> to vector<8x256xf32>
    %771 = arith.mulf %767, %770 : vector<8x256xf32>
    %c32_723 = arith.constant 32 : index
    %c0_724 = arith.constant 0 : index
    %772 = vector.load %arg14[%c32_723, %c0_724] : memref<40x256xf32, #tpu.memory_space<vmem>>, vector<8x256xf32>
    tpu.vector_store %arg14[%c32_723, %c0_724], %771 {strides = array<i32>} : memref<40x256xf32, #tpu.memory_space<vmem>>, vector<8x256xf32>,
    %c5_725 = arith.constant 5 : index
    %c0_726 = arith.constant 0 : index
    %c0_727 = arith.constant 0 : index
    %773 = vector.load %arg9[%c5_725, %c0_726, %c0_727] : memref<6x8x40xf32, #tpu.memory_space<vmem>>, vector<1x8x40xf32>
    %774 = vector.shape_cast %773 : vector<1x8x40xf32> to vector<8x40xf32>
    %c0_728 = arith.constant 0 : index
    %c0_729 = arith.constant 0 : index
    %775 = vector.load %arg14[%c0_728, %c0_729] : memref<40x256xf32, #tpu.memory_space<vmem>>, vector<40x256xf32>
    %cst_730 = arith.constant dense<0.000000e+00> : vector<8x256xf32>
    %776 = tpu.matmul %774, %775, %cst_730 {dimension_numbers = #tpu.dot_dimension_numbers<[1], [0], [0], [1], [0, 0, 1, 1], [], []>} : vector<8x40xf32>, vector<40x256xf32>, vector<8x256xf32> -> vector<8x256xf32>
    %c5_731 = arith.constant 5 : index
    %c0_732 = arith.constant 0 : index
    %c0_733 = arith.constant 0 : index
    %777 = vector.load %arg10[%c5_731, %c0_732, %c0_733] : memref<6x8x1xf32, #tpu.memory_space<vmem>>, vector<1x8x1xf32>
    %778 = vector.shape_cast %777 : vector<1x8x1xf32> to vector<8x1xf32>
    %779 = vector.broadcast %778 : vector<8x1xf32> to vector<8x256xf32>
    %780 = arith.addf %776, %779 : vector<8x256xf32>
    %cst_734 = arith.constant 0.00999999977 : f32
    %781 = vector.broadcast %cst_734 : f32 to vector<8x256xf32>
    %782 = arith.mulf %781, %780 : vector<8x256xf32>
    %783 = arith.maximumf %780, %782 : vector<8x256xf32>
    %784 = vector.extract_strided_slice %783 {offsets = [0, 0], sizes = [4, 256], strides = [1, 1]} : vector<8x256xf32> to vector<4x256xf32>
    %785 = vector.extract_strided_slice %783 {offsets = [4, 0], sizes = [4, 256], strides = [1, 1]} : vector<8x256xf32> to vector<4x256xf32>
    %786 = arith.addf %784, %785 : vector<4x256xf32>
    %cst_735 = arith.constant 0.000000e+00 : f32
    %787 = vector.broadcast %cst_735 : f32 to vector<4x256xf32>
    %788 = arith.subf %787, %786 : vector<4x256xf32>
    %789 = math.exp %788 : vector<4x256xf32>
    %cst_736 = arith.constant 1.000000e+00 : f32
    %790 = vector.broadcast %cst_736 : f32 to vector<4x256xf32>
    %791 = arith.addf %790, %789 : vector<4x256xf32>
    %792 = tpu.reciprocal %791 {approx = true} : vector<4x256xf32> -> vector<4x256xf32>
    %793 = arith.mulf %792, %675 : vector<4x256xf32>
    %794 = arith.addf %793, %1 : vector<4x256xf32>
    %795 = arith.addf %794, %555 : vector<4x256xf32>
    %796 = arith.addf %795, %317 : vector<4x256xf32>
    %c17_i32_737 = arith.constant 17 : i32
    %797 = tpu.dynamic_rotate %796 by %c17_i32_737 dim 1 : vector<4x256xf32>, i32 -> vector<4x256xf32>
    %c3_738 = arith.constant 3 : index
    %c0_739 = arith.constant 0 : index
    %c0_740 = arith.constant 0 : index
    %798 = vector.load %arg2[%c3_738, %c0_739, %c0_740] : memref<16x1x256xf32, #tpu.memory_space<vmem>>, vector<1x1x256xf32>
    %799 = vector.shape_cast %798 : vector<1x1x256xf32> to vector<1x256xf32>
    %800 = vector.broadcast %799 : vector<1x256xf32> to vector<4x256xf32>
    %801 = arith.mulf %797, %800 : vector<4x256xf32>
    %c0_741 = arith.constant 0 : index
    %c0_742 = arith.constant 0 : index
    %802 = vector.load %arg14[%c0_741, %c0_742] : memref<40x256xf32, #tpu.memory_space<vmem>>, vector<4x256xf32>
    tpu.vector_store %arg14[%c0_741, %c0_742], %801 {strides = array<i32>} : memref<40x256xf32, #tpu.memory_space<vmem>>, vector<4x256xf32>,
    %c16_i32_743 = arith.constant 16 : i32
    %803 = tpu.dynamic_rotate %796 by %c16_i32_743 dim 1 : vector<4x256xf32>, i32 -> vector<4x256xf32>
    %c4_744 = arith.constant 4 : index
    %c0_745 = arith.constant 0 : index
    %c0_746 = arith.constant 0 : index
    %804 = vector.load %arg2[%c4_744, %c0_745, %c0_746] : memref<16x1x256xf32, #tpu.memory_space<vmem>>, vector<1x1x256xf32>
    %805 = vector.shape_cast %804 : vector<1x1x256xf32> to vector<1x256xf32>
    %806 = vector.broadcast %805 : vector<1x256xf32> to vector<4x256xf32>
    %807 = arith.mulf %803, %806 : vector<4x256xf32>
    %c4_747 = arith.constant 4 : index
    %c0_748 = arith.constant 0 : index
    %808 = vector.load %arg14[%c4_747, %c0_748] : memref<40x256xf32, #tpu.memory_space<vmem>>, vector<4x256xf32>
    tpu.vector_store %arg14[%c4_747, %c0_748], %807 {strides = array<i32>} : memref<40x256xf32, #tpu.memory_space<vmem>>, vector<4x256xf32>,
    %c15_i32_749 = arith.constant 15 : i32
    %809 = tpu.dynamic_rotate %796 by %c15_i32_749 dim 1 : vector<4x256xf32>, i32 -> vector<4x256xf32>
    %c5_750 = arith.constant 5 : index
    %c0_751 = arith.constant 0 : index
    %c0_752 = arith.constant 0 : index
    %810 = vector.load %arg2[%c5_750, %c0_751, %c0_752] : memref<16x1x256xf32, #tpu.memory_space<vmem>>, vector<1x1x256xf32>
    %811 = vector.shape_cast %810 : vector<1x1x256xf32> to vector<1x256xf32>
    %812 = vector.broadcast %811 : vector<1x256xf32> to vector<4x256xf32>
    %813 = arith.mulf %809, %812 : vector<4x256xf32>
    %c8_753 = arith.constant 8 : index
    %c0_754 = arith.constant 0 : index
    %814 = vector.load %arg14[%c8_753, %c0_754] : memref<40x256xf32, #tpu.memory_space<vmem>>, vector<4x256xf32>
    tpu.vector_store %arg14[%c8_753, %c0_754], %813 {strides = array<i32>} : memref<40x256xf32, #tpu.memory_space<vmem>>, vector<4x256xf32>,
    %c1_i32_755 = arith.constant 1 : i32
    %815 = tpu.dynamic_rotate %796 by %c1_i32_755 dim 1 : vector<4x256xf32>, i32 -> vector<4x256xf32>
    %c7_756 = arith.constant 7 : index
    %c0_757 = arith.constant 0 : index
    %c0_758 = arith.constant 0 : index
    %816 = vector.load %arg2[%c7_756, %c0_757, %c0_758] : memref<16x1x256xf32, #tpu.memory_space<vmem>>, vector<1x1x256xf32>
    %817 = vector.shape_cast %816 : vector<1x1x256xf32> to vector<1x256xf32>
    %818 = vector.broadcast %817 : vector<1x256xf32> to vector<4x256xf32>
    %819 = arith.mulf %815, %818 : vector<4x256xf32>
    %c12_759 = arith.constant 12 : index
    %c0_760 = arith.constant 0 : index
    %820 = vector.load %arg14[%c12_759, %c0_760] : memref<40x256xf32, #tpu.memory_space<vmem>>, vector<4x256xf32>
    tpu.vector_store %arg14[%c12_759, %c0_760], %819 {strides = array<i32>} : memref<40x256xf32, #tpu.memory_space<vmem>>, vector<4x256xf32>,
    %c16_761 = arith.constant 16 : index
    %c0_762 = arith.constant 0 : index
    %821 = vector.load %arg14[%c16_761, %c0_762] : memref<40x256xf32, #tpu.memory_space<vmem>>, vector<4x256xf32>
    tpu.vector_store %arg14[%c16_761, %c0_762], %796 {strides = array<i32>} : memref<40x256xf32, #tpu.memory_space<vmem>>, vector<4x256xf32>,
    %c255_i32_763 = arith.constant 255 : i32
    %822 = tpu.dynamic_rotate %796 by %c255_i32_763 dim 1 : vector<4x256xf32>, i32 -> vector<4x256xf32>
    %c8_764 = arith.constant 8 : index
    %c0_765 = arith.constant 0 : index
    %c0_766 = arith.constant 0 : index
    %823 = vector.load %arg2[%c8_764, %c0_765, %c0_766] : memref<16x1x256xf32, #tpu.memory_space<vmem>>, vector<1x1x256xf32>
    %824 = vector.shape_cast %823 : vector<1x1x256xf32> to vector<1x256xf32>
    %825 = vector.broadcast %824 : vector<1x256xf32> to vector<4x256xf32>
    %826 = arith.mulf %822, %825 : vector<4x256xf32>
    %c20_767 = arith.constant 20 : index
    %c0_768 = arith.constant 0 : index
    %827 = vector.load %arg14[%c20_767, %c0_768] : memref<40x256xf32, #tpu.memory_space<vmem>>, vector<4x256xf32>
    tpu.vector_store %arg14[%c20_767, %c0_768], %826 {strides = array<i32>} : memref<40x256xf32, #tpu.memory_space<vmem>>, vector<4x256xf32>,
    %c241_i32_769 = arith.constant 241 : i32
    %828 = tpu.dynamic_rotate %796 by %c241_i32_769 dim 1 : vector<4x256xf32>, i32 -> vector<4x256xf32>
    %c10_770 = arith.constant 10 : index
    %c0_771 = arith.constant 0 : index
    %c0_772 = arith.constant 0 : index
    %829 = vector.load %arg2[%c10_770, %c0_771, %c0_772] : memref<16x1x256xf32, #tpu.memory_space<vmem>>, vector<1x1x256xf32>
    %830 = vector.shape_cast %829 : vector<1x1x256xf32> to vector<1x256xf32>
    %831 = vector.broadcast %830 : vector<1x256xf32> to vector<4x256xf32>
    %832 = arith.mulf %828, %831 : vector<4x256xf32>
    %c24_773 = arith.constant 24 : index
    %c0_774 = arith.constant 0 : index
    %833 = vector.load %arg14[%c24_773, %c0_774] : memref<40x256xf32, #tpu.memory_space<vmem>>, vector<4x256xf32>
    tpu.vector_store %arg14[%c24_773, %c0_774], %832 {strides = array<i32>} : memref<40x256xf32, #tpu.memory_space<vmem>>, vector<4x256xf32>,
    %c240_i32_775 = arith.constant 240 : i32
    %834 = tpu.dynamic_rotate %796 by %c240_i32_775 dim 1 : vector<4x256xf32>, i32 -> vector<4x256xf32>
    %c11_776 = arith.constant 11 : index
    %c0_777 = arith.constant 0 : index
    %c0_778 = arith.constant 0 : index
    %835 = vector.load %arg2[%c11_776, %c0_777, %c0_778] : memref<16x1x256xf32, #tpu.memory_space<vmem>>, vector<1x1x256xf32>
    %836 = vector.shape_cast %835 : vector<1x1x256xf32> to vector<1x256xf32>
    %837 = vector.broadcast %836 : vector<1x256xf32> to vector<4x256xf32>
    %838 = arith.mulf %834, %837 : vector<4x256xf32>
    %c28_779 = arith.constant 28 : index
    %c0_780 = arith.constant 0 : index
    %839 = vector.load %arg14[%c28_779, %c0_780] : memref<40x256xf32, #tpu.memory_space<vmem>>, vector<4x256xf32>
    tpu.vector_store %arg14[%c28_779, %c0_780], %838 {strides = array<i32>} : memref<40x256xf32, #tpu.memory_space<vmem>>, vector<4x256xf32>,
    %c239_i32_781 = arith.constant 239 : i32
    %840 = tpu.dynamic_rotate %796 by %c239_i32_781 dim 1 : vector<4x256xf32>, i32 -> vector<4x256xf32>
    %c12_782 = arith.constant 12 : index
    %c0_783 = arith.constant 0 : index
    %c0_784 = arith.constant 0 : index
    %841 = vector.load %arg2[%c12_782, %c0_783, %c0_784] : memref<16x1x256xf32, #tpu.memory_space<vmem>>, vector<1x1x256xf32>
    %842 = vector.shape_cast %841 : vector<1x1x256xf32> to vector<1x256xf32>
    %843 = vector.broadcast %842 : vector<1x256xf32> to vector<4x256xf32>
    %844 = arith.mulf %840, %843 : vector<4x256xf32>
    %c32_785 = arith.constant 32 : index
    %c0_786 = arith.constant 0 : index
    %845 = vector.load %arg14[%c32_785, %c0_786] : memref<40x256xf32, #tpu.memory_space<vmem>>, vector<4x256xf32>
    tpu.vector_store %arg14[%c32_785, %c0_786], %844 {strides = array<i32>} : memref<40x256xf32, #tpu.memory_space<vmem>>, vector<4x256xf32>,
    %c7_787 = arith.constant 7 : index
    %c0_788 = arith.constant 0 : index
    %c0_789 = arith.constant 0 : index
    %846 = vector.load %arg5[%c7_787, %c0_788, %c0_789] : memref<8x4x36xf32, #tpu.memory_space<vmem>>, vector<1x4x36xf32>
    %847 = vector.shape_cast %846 : vector<1x4x36xf32> to vector<4x36xf32>
    %c0_790 = arith.constant 0 : index
    %c0_791 = arith.constant 0 : index
    %848 = vector.load %arg14[%c0_790, %c0_791] : memref<40x256xf32, #tpu.memory_space<vmem>>, vector<36x256xf32>
    %cst_792 = arith.constant dense<0.000000e+00> : vector<4x256xf32>
    %849 = tpu.matmul %847, %848, %cst_792 {dimension_numbers = #tpu.dot_dimension_numbers<[1], [0], [0], [1], [0, 0, 1, 1], [], []>} : vector<4x36xf32>, vector<36x256xf32>, vector<4x256xf32> -> vector<4x256xf32>
    %c7_793 = arith.constant 7 : index
    %c0_794 = arith.constant 0 : index
    %c0_795 = arith.constant 0 : index
    %850 = vector.load %arg6[%c7_793, %c0_794, %c0_795] : memref<8x4x1xf32, #tpu.memory_space<vmem>>, vector<1x4x1xf32>
    %851 = vector.shape_cast %850 : vector<1x4x1xf32> to vector<4x1xf32>
    %852 = vector.broadcast %851 : vector<4x1xf32> to vector<4x256xf32>
    %853 = arith.addf %849, %852 : vector<4x256xf32>
    %c17_i32_796 = arith.constant 17 : i32
    %854 = tpu.dynamic_rotate %853 by %c17_i32_796 dim 1 : vector<4x256xf32>, i32 -> vector<4x256xf32>
    %c3_797 = arith.constant 3 : index
    %c0_798 = arith.constant 0 : index
    %c0_799 = arith.constant 0 : index
    %855 = vector.load %arg2[%c3_797, %c0_798, %c0_799] : memref<16x1x256xf32, #tpu.memory_space<vmem>>, vector<1x1x256xf32>
    %856 = vector.shape_cast %855 : vector<1x1x256xf32> to vector<1x256xf32>
    %857 = vector.broadcast %856 : vector<1x256xf32> to vector<4x256xf32>
    %858 = arith.mulf %854, %857 : vector<4x256xf32>
    %c0_800 = arith.constant 0 : index
    %c0_801 = arith.constant 0 : index
    %859 = vector.load %arg14[%c0_800, %c0_801] : memref<40x256xf32, #tpu.memory_space<vmem>>, vector<4x256xf32>
    tpu.vector_store %arg14[%c0_800, %c0_801], %858 {strides = array<i32>} : memref<40x256xf32, #tpu.memory_space<vmem>>, vector<4x256xf32>,
    %c16_i32_802 = arith.constant 16 : i32
    %860 = tpu.dynamic_rotate %853 by %c16_i32_802 dim 1 : vector<4x256xf32>, i32 -> vector<4x256xf32>
    %c4_803 = arith.constant 4 : index
    %c0_804 = arith.constant 0 : index
    %c0_805 = arith.constant 0 : index
    %861 = vector.load %arg2[%c4_803, %c0_804, %c0_805] : memref<16x1x256xf32, #tpu.memory_space<vmem>>, vector<1x1x256xf32>
    %862 = vector.shape_cast %861 : vector<1x1x256xf32> to vector<1x256xf32>
    %863 = vector.broadcast %862 : vector<1x256xf32> to vector<4x256xf32>
    %864 = arith.mulf %860, %863 : vector<4x256xf32>
    %c4_806 = arith.constant 4 : index
    %c0_807 = arith.constant 0 : index
    %865 = vector.load %arg14[%c4_806, %c0_807] : memref<40x256xf32, #tpu.memory_space<vmem>>, vector<4x256xf32>
    tpu.vector_store %arg14[%c4_806, %c0_807], %864 {strides = array<i32>} : memref<40x256xf32, #tpu.memory_space<vmem>>, vector<4x256xf32>,
    %c15_i32_808 = arith.constant 15 : i32
    %866 = tpu.dynamic_rotate %853 by %c15_i32_808 dim 1 : vector<4x256xf32>, i32 -> vector<4x256xf32>
    %c5_809 = arith.constant 5 : index
    %c0_810 = arith.constant 0 : index
    %c0_811 = arith.constant 0 : index
    %867 = vector.load %arg2[%c5_809, %c0_810, %c0_811] : memref<16x1x256xf32, #tpu.memory_space<vmem>>, vector<1x1x256xf32>
    %868 = vector.shape_cast %867 : vector<1x1x256xf32> to vector<1x256xf32>
    %869 = vector.broadcast %868 : vector<1x256xf32> to vector<4x256xf32>
    %870 = arith.mulf %866, %869 : vector<4x256xf32>
    %c8_812 = arith.constant 8 : index
    %c0_813 = arith.constant 0 : index
    %871 = vector.load %arg14[%c8_812, %c0_813] : memref<40x256xf32, #tpu.memory_space<vmem>>, vector<4x256xf32>
    tpu.vector_store %arg14[%c8_812, %c0_813], %870 {strides = array<i32>} : memref<40x256xf32, #tpu.memory_space<vmem>>, vector<4x256xf32>,
    %c1_i32_814 = arith.constant 1 : i32
    %872 = tpu.dynamic_rotate %853 by %c1_i32_814 dim 1 : vector<4x256xf32>, i32 -> vector<4x256xf32>
    %c7_815 = arith.constant 7 : index
    %c0_816 = arith.constant 0 : index
    %c0_817 = arith.constant 0 : index
    %873 = vector.load %arg2[%c7_815, %c0_816, %c0_817] : memref<16x1x256xf32, #tpu.memory_space<vmem>>, vector<1x1x256xf32>
    %874 = vector.shape_cast %873 : vector<1x1x256xf32> to vector<1x256xf32>
    %875 = vector.broadcast %874 : vector<1x256xf32> to vector<4x256xf32>
    %876 = arith.mulf %872, %875 : vector<4x256xf32>
    %c12_818 = arith.constant 12 : index
    %c0_819 = arith.constant 0 : index
    %877 = vector.load %arg14[%c12_818, %c0_819] : memref<40x256xf32, #tpu.memory_space<vmem>>, vector<4x256xf32>
    tpu.vector_store %arg14[%c12_818, %c0_819], %876 {strides = array<i32>} : memref<40x256xf32, #tpu.memory_space<vmem>>, vector<4x256xf32>,
    %c16_820 = arith.constant 16 : index
    %c0_821 = arith.constant 0 : index
    %878 = vector.load %arg14[%c16_820, %c0_821] : memref<40x256xf32, #tpu.memory_space<vmem>>, vector<4x256xf32>
    tpu.vector_store %arg14[%c16_820, %c0_821], %853 {strides = array<i32>} : memref<40x256xf32, #tpu.memory_space<vmem>>, vector<4x256xf32>,
    %c255_i32_822 = arith.constant 255 : i32
    %879 = tpu.dynamic_rotate %853 by %c255_i32_822 dim 1 : vector<4x256xf32>, i32 -> vector<4x256xf32>
    %c8_823 = arith.constant 8 : index
    %c0_824 = arith.constant 0 : index
    %c0_825 = arith.constant 0 : index
    %880 = vector.load %arg2[%c8_823, %c0_824, %c0_825] : memref<16x1x256xf32, #tpu.memory_space<vmem>>, vector<1x1x256xf32>
    %881 = vector.shape_cast %880 : vector<1x1x256xf32> to vector<1x256xf32>
    %882 = vector.broadcast %881 : vector<1x256xf32> to vector<4x256xf32>
    %883 = arith.mulf %879, %882 : vector<4x256xf32>
    %c20_826 = arith.constant 20 : index
    %c0_827 = arith.constant 0 : index
    %884 = vector.load %arg14[%c20_826, %c0_827] : memref<40x256xf32, #tpu.memory_space<vmem>>, vector<4x256xf32>
    tpu.vector_store %arg14[%c20_826, %c0_827], %883 {strides = array<i32>} : memref<40x256xf32, #tpu.memory_space<vmem>>, vector<4x256xf32>,
    %c241_i32_828 = arith.constant 241 : i32
    %885 = tpu.dynamic_rotate %853 by %c241_i32_828 dim 1 : vector<4x256xf32>, i32 -> vector<4x256xf32>
    %c10_829 = arith.constant 10 : index
    %c0_830 = arith.constant 0 : index
    %c0_831 = arith.constant 0 : index
    %886 = vector.load %arg2[%c10_829, %c0_830, %c0_831] : memref<16x1x256xf32, #tpu.memory_space<vmem>>, vector<1x1x256xf32>
    %887 = vector.shape_cast %886 : vector<1x1x256xf32> to vector<1x256xf32>
    %888 = vector.broadcast %887 : vector<1x256xf32> to vector<4x256xf32>
    %889 = arith.mulf %885, %888 : vector<4x256xf32>
    %c24_832 = arith.constant 24 : index
    %c0_833 = arith.constant 0 : index
    %890 = vector.load %arg14[%c24_832, %c0_833] : memref<40x256xf32, #tpu.memory_space<vmem>>, vector<4x256xf32>
    tpu.vector_store %arg14[%c24_832, %c0_833], %889 {strides = array<i32>} : memref<40x256xf32, #tpu.memory_space<vmem>>, vector<4x256xf32>,
    %c240_i32_834 = arith.constant 240 : i32
    %891 = tpu.dynamic_rotate %853 by %c240_i32_834 dim 1 : vector<4x256xf32>, i32 -> vector<4x256xf32>
    %c11_835 = arith.constant 11 : index
    %c0_836 = arith.constant 0 : index
    %c0_837 = arith.constant 0 : index
    %892 = vector.load %arg2[%c11_835, %c0_836, %c0_837] : memref<16x1x256xf32, #tpu.memory_space<vmem>>, vector<1x1x256xf32>
    %893 = vector.shape_cast %892 : vector<1x1x256xf32> to vector<1x256xf32>
    %894 = vector.broadcast %893 : vector<1x256xf32> to vector<4x256xf32>
    %895 = arith.mulf %891, %894 : vector<4x256xf32>
    %c28_838 = arith.constant 28 : index
    %c0_839 = arith.constant 0 : index
    %896 = vector.load %arg14[%c28_838, %c0_839] : memref<40x256xf32, #tpu.memory_space<vmem>>, vector<4x256xf32>
    tpu.vector_store %arg14[%c28_838, %c0_839], %895 {strides = array<i32>} : memref<40x256xf32, #tpu.memory_space<vmem>>, vector<4x256xf32>,
    %c239_i32_840 = arith.constant 239 : i32
    %897 = tpu.dynamic_rotate %853 by %c239_i32_840 dim 1 : vector<4x256xf32>, i32 -> vector<4x256xf32>
    %c12_841 = arith.constant 12 : index
    %c0_842 = arith.constant 0 : index
    %c0_843 = arith.constant 0 : index
    %898 = vector.load %arg2[%c12_841, %c0_842, %c0_843] : memref<16x1x256xf32, #tpu.memory_space<vmem>>, vector<1x1x256xf32>
    %899 = vector.shape_cast %898 : vector<1x1x256xf32> to vector<1x256xf32>
    %900 = vector.broadcast %899 : vector<1x256xf32> to vector<4x256xf32>
    %901 = arith.mulf %897, %900 : vector<4x256xf32>
    %c32_844 = arith.constant 32 : index
    %c0_845 = arith.constant 0 : index
    %902 = vector.load %arg14[%c32_844, %c0_845] : memref<40x256xf32, #tpu.memory_space<vmem>>, vector<4x256xf32>
    tpu.vector_store %arg14[%c32_844, %c0_845], %901 {strides = array<i32>} : memref<40x256xf32, #tpu.memory_space<vmem>>, vector<4x256xf32>,
    %c0_846 = arith.constant 0 : index
    %c0_847 = arith.constant 0 : index
    %c0_848 = arith.constant 0 : index
    %903 = vector.load %arg11[%c0_846, %c0_847, %c0_848] : memref<1x4x36xf32, #tpu.memory_space<vmem>>, vector<1x4x36xf32>
    %904 = vector.shape_cast %903 : vector<1x4x36xf32> to vector<4x36xf32>
    %c0_849 = arith.constant 0 : index
    %c0_850 = arith.constant 0 : index
    %905 = vector.load %arg14[%c0_849, %c0_850] : memref<40x256xf32, #tpu.memory_space<vmem>>, vector<36x256xf32>
    %cst_851 = arith.constant dense<0.000000e+00> : vector<4x256xf32>
    %906 = tpu.matmul %904, %905, %cst_851 {dimension_numbers = #tpu.dot_dimension_numbers<[1], [0], [0], [1], [0, 0, 1, 1], [], []>} : vector<4x36xf32>, vector<36x256xf32>, vector<4x256xf32> -> vector<4x256xf32>
    %c0_852 = arith.constant 0 : index
    %c0_853 = arith.constant 0 : index
    %c0_854 = arith.constant 0 : index
    %907 = vector.load %arg12[%c0_852, %c0_853, %c0_854] : memref<1x4x1xf32, #tpu.memory_space<vmem>>, vector<1x4x1xf32>
    %908 = vector.shape_cast %907 : vector<1x4x1xf32> to vector<4x1xf32>
    %909 = vector.broadcast %908 : vector<4x1xf32> to vector<4x256xf32>
    %910 = arith.addf %906, %909 : vector<4x256xf32>
    %c0_855 = arith.constant 0 : index
    %c0_856 = arith.constant 0 : index
    %c0_857 = arith.constant 0 : index
    %911 = vector.load %arg13[%c0_855, %c0_856, %c0_857] : memref<1x4x256xf32, #tpu.memory_space<vmem>>, vector<1x4x256xf32>
    %912 = vector.shape_cast %911 : vector<1x4x256xf32> to vector<4x256xf32>
    %913 = vector.shape_cast %910 : vector<4x256xf32> to vector<1x4x256xf32>
    tpu.vector_store %arg13[%c0_855, %c0_856, %c0_857], %913 {strides = array<i32>} : memref<1x4x256xf32, #tpu.memory_space<vmem>>, vector<1x4x256xf32>,
    return
  }
  func.func @transform_0(%arg0: i32) -> (i32, i32, i32) {
    %c0_i32 = arith.constant 0 : i32
    %c0_i32_0 = arith.constant 0 : i32
    %c0_i32_1 = arith.constant 0 : i32
    return %arg0, %c0_i32, %c0_i32_0 : i32, i32, i32
  }
  func.func @transform_1(%arg0: i32) -> (i32, i32, i32) {
    %c0_i32 = arith.constant 0 : i32
    %c0_i32_0 = arith.constant 0 : i32
    %c0_i32_1 = arith.constant 0 : i32
    %c0_i32_2 = arith.constant 0 : i32
    return %c0_i32, %c0_i32_0, %c0_i32_1 : i32, i32, i32
  }
  func.func @transform_2(%arg0: i32) -> (i32, i32, i32) {
    %c0_i32 = arith.constant 0 : i32
    %c0_i32_0 = arith.constant 0 : i32
    %c0_i32_1 = arith.constant 0 : i32
    %c0_i32_2 = arith.constant 0 : i32
    return %c0_i32, %c0_i32_0, %c0_i32_1 : i32, i32, i32
  }
  func.func @transform_3(%arg0: i32) -> (i32, i32, i32) {
    %c0_i32 = arith.constant 0 : i32
    %c0_i32_0 = arith.constant 0 : i32
    %c0_i32_1 = arith.constant 0 : i32
    %c0_i32_2 = arith.constant 0 : i32
    return %c0_i32, %c0_i32_0, %c0_i32_1 : i32, i32, i32
  }
  func.func @transform_4(%arg0: i32) -> (i32, i32, i32) {
    %c0_i32 = arith.constant 0 : i32
    %c0_i32_0 = arith.constant 0 : i32
    %c0_i32_1 = arith.constant 0 : i32
    %c0_i32_2 = arith.constant 0 : i32
    return %c0_i32, %c0_i32_0, %c0_i32_1 : i32, i32, i32
  }
  func.func @transform_5(%arg0: i32) -> (i32, i32, i32) {
    %c0_i32 = arith.constant 0 : i32
    %c0_i32_0 = arith.constant 0 : i32
    %c0_i32_1 = arith.constant 0 : i32
    %c0_i32_2 = arith.constant 0 : i32
    return %c0_i32, %c0_i32_0, %c0_i32_1 : i32, i32, i32
  }
  func.func @transform_6(%arg0: i32) -> (i32, i32, i32) {
    %c0_i32 = arith.constant 0 : i32
    %c0_i32_0 = arith.constant 0 : i32
    %c0_i32_1 = arith.constant 0 : i32
    %c0_i32_2 = arith.constant 0 : i32
    return %c0_i32, %c0_i32_0, %c0_i32_1 : i32, i32, i32
  }
  func.func @transform_7(%arg0: i32) -> (i32, i32, i32) {
    %c0_i32 = arith.constant 0 : i32
    %c0_i32_0 = arith.constant 0 : i32
    %c0_i32_1 = arith.constant 0 : i32
    %c0_i32_2 = arith.constant 0 : i32
    return %c0_i32, %c0_i32_0, %c0_i32_1 : i32, i32, i32
  }
  func.func @transform_8(%arg0: i32) -> (i32, i32, i32) {
    %c0_i32 = arith.constant 0 : i32
    %c0_i32_0 = arith.constant 0 : i32
    %c0_i32_1 = arith.constant 0 : i32
    %c0_i32_2 = arith.constant 0 : i32
    return %c0_i32, %c0_i32_0, %c0_i32_1 : i32, i32, i32
  }
  func.func @transform_9(%arg0: i32) -> (i32, i32, i32) {
    %c0_i32 = arith.constant 0 : i32
    %c0_i32_0 = arith.constant 0 : i32
    %c0_i32_1 = arith.constant 0 : i32
    %c0_i32_2 = arith.constant 0 : i32
    return %c0_i32, %c0_i32_0, %c0_i32_1 : i32, i32, i32
  }
  func.func @transform_10(%arg0: i32) -> (i32, i32, i32) {
    %c0_i32 = arith.constant 0 : i32
    %c0_i32_0 = arith.constant 0 : i32
    %c0_i32_1 = arith.constant 0 : i32
    %c0_i32_2 = arith.constant 0 : i32
    return %c0_i32, %c0_i32_0, %c0_i32_1 : i32, i32, i32
  }
  func.func @transform_11(%arg0: i32) -> (i32, i32, i32) {
    %c0_i32 = arith.constant 0 : i32
    %c0_i32_0 = arith.constant 0 : i32
    %c0_i32_1 = arith.constant 0 : i32
    %c0_i32_2 = arith.constant 0 : i32
    return %c0_i32, %c0_i32_0, %c0_i32_1 : i32, i32, i32
  }
  func.func @transform_12(%arg0: i32) -> (i32, i32, i32) {
    %c0_i32 = arith.constant 0 : i32
    %c0_i32_0 = arith.constant 0 : i32
    %c0_i32_1 = arith.constant 0 : i32
    return %arg0, %c0_i32, %c0_i32_0 : i32, i32, i32
  }
}

</mosaic_0001>

<bundles_post_ra>
// kernel: trunk_forward.1
= control target key start
LH: loop header
LB: loop body
LE: loop exit
PB: predicated region body
PF: predicated region fallthrough
CT: control target
= control target key end

     0   :  { %s4294_s21 = smov 0   ;;  %s5599_s0 = inlined_call_operand.vmem [shape: f32[2,4,256], index: 0, kind: input, shape index: {}]   ;;  %s5600_s1 = inlined_call_operand.vmem [shape: f32[16,1,256], index: 1, kind: input, shape index: {}]   ;;  %s5601_s2 = inlined_call_operand.vmem [shape: f32[1,4,12], index: 2, kind: input, shape index: {}]   ;;  %s5602_s3 = inlined_call_operand.vmem [shape: f32[1,4,1], index: 3, kind: input, shape index: {}]   ;;  %s5603_s4 = inlined_call_operand.vmem [shape: f32[8,4,36], index: 4, kind: input, shape index: {}]   ;;  %s5604_s5 = inlined_call_operand.vmem [shape: f32[8,4,1], index: 5, kind: input, shape index: {}]   ;;  %s5605_s6 = inlined_call_operand.vmem [shape: f32[3,8,20], index: 6, kind: input, shape index: {}]   ;;  %s5606_s7 = inlined_call_operand.vmem [shape: f32[3,8,1], index: 7, kind: input, shape index: {}]   ;;  %s5607_s8 = inlined_call_operand.vmem [shape: f32[6,8,40], index: 8, kind: input, shape index: {}]   ;;  %s5608_s9 = inlined_call_operand.vmem [shape: f32[6,8,1], index: 9, kind: input, shape index: {}]   ;;  %s5609_s10 = inlined_call_operand.vmem [shape: f32[1,4,36], index: 10, kind: input, shape index: {}]   ;;  %s5610_s11 = inlined_call_operand.vmem [shape: f32[1,4,1], index: 11, kind: input, shape index: {}]   ;;  %s5611_s12 = inlined_call_operand.vmem [shape: f32[2,4,256], index: 12, kind: output, shape index: {}]  }
   0x1 LB: > { %s3940_s22 = sadd.s32 4294967295, %s4210_s21   ;;  %p3944_p0 = scmp.ge.s32.totalorder %s4210_s21, 1  ;;  %s4210_s21 = sphi %s4294_s21, %s22_s21  }
   0x2   : > { %p362_p1 = scmp.lt.s32.totalorder %s4210_s21, 3 }
   0x4   : > { %p363_p2 = pnand %p3944_p0, %p362_p1 }
   0x5   : > { %p404_p3 = scmp.lt.s32.totalorder (!%p363_p2), %s3940_s22, 1  ;;  %s5649_s27 = smov (!%p363_p2), 16  }
   0x6   : > { %366 = sbr.rel (%p363_p2) target bundleno = 5546 (0x15aa), region = 68  ;;  %s5643_s28 = smov (!%p363_p2), 112  }
   0x7   : > { %s5637_s19 = smov (!%p363_p2), 111   ;;  %s5635_s20 = smov (!%p363_p2), 127  }
   0x8   : > { %s5633_s24 = smov (!%p363_p2), 1   ;;  %s5631_s25 = smov (!%p363_p2), 113  }
   0x9   : > { %s5627_s29 = smov (!%p363_p2), 15   ;;  %s5615_s17 = smov (!%p363_p2), 94  }
   0xa   : > { %s5651_s18 = smov (!%p363_p2), 96   ;;  %s5613_s30 = smov (!%p363_p2), 126  }
   0xb   : > { %s5703_s22 = smov (!%p404_p3, %s3940_s22), 1  ;;  %v425_v7 = vlaneseq  ;;  %v3949_v10 = vld [vmem:[%s5600_s1 + $0x8] sm:$0x3]  ;;  %v477_v18 = vld [vmem:[%s5602_s3] sm:$0xf]  ;;  %v4214_v19 = vmov 0  }
   0xc   : > { %s5612_s23 = sshll.u32 %s5703_s22, 3  ;;  %v433_v11 = vperm.slane %v3949_v10, 0  ;;  %v434_v12 = vperm.slane %v3949_v10, 1  ;;  %4177 = vset.pattern.permute.xlu2 %v4214_v19  ;;  %4178 = vset.pattern.permute.xlu0 %v4214_v19  ;;  %v3950_v21 = vld [vmem:[%s5600_s1 + $0x16] sm:$0x3]  ;;  %vm487_vm2 = vcmask 1043456  }
   0xd   : > { %s408_s26 = scalar_lea.vmem %s5599_s0, %s5612_s23  ;;  %v4314_v9 = vand.u32 127, %v425_v7  ;;  %480 = vperm.xlu2 %4177, %v477_v18   ;;  %4179 = vset.pattern.permute.xlu1 %v4214_v19  ;;  %v464_v22 = vperm.slane %v3950_v21, 0  ;;  %v465_v23 = vperm.slane %v3950_v21, 1  ;;  %v472_v31 = vld [vmem:[%s5601_s2] sm:$0xf]  ;;  %vm483_vm3 = vcmask 97280  }
   0xe   : > { %v414_v0 = vld [vmem:[%s408_s26] sm:$0xff]  ;;  %s5629_s26 = smov 17   ;;  %v3962_v41 = vld [vmem:[%s5600_s1 + $0x18] sm:$0x3]  ;;  %v3961_v42 = vld [vmem:[%s5600_s1 + $0x16] sm:$0x3] }
   0xf   : > { %416 = vst [vmem:[#allocation1] ss:$2 sm:$0xff] %v414_v0  ;;  %vm427_vm0 = vcmp.lt.s32.totalorder %v4314_v9, 16  ;;  %vm458_vm1 = vcmp.lt.s32.totalorder %v4314_v9, 112  ;;  %vm686_vm4 = vcmp.lt.s32.totalorder %v4314_v9, 111  ;;  %v692_v43 = vperm.slane %v3962_v41, 0 }
  0x10   : > { %v693_v44 = vperm.slane %v3962_v41, 1  ;;  %v668_v45 = vperm.slane %v3961_v42, 0  ;;  %v669_v46 = vperm.slane %v3961_v42, 1  ;;  %v3959_v58 = vld [vmem:[%s5600_s1 + $0x10] sm:$0x3]  ;;  %vm622_vm5 = vcmp.lt.s32.totalorder %v4314_v9, 127 }
  0x11   : > { %v628_v61 = vperm.slane %v3959_v58, 0  ;;  %v629_v62 = vperm.slane %v3959_v58, 1  ;;  %v3960_v10 = vld [vmem:[%s5600_s1 + $0x14] sm:$0x3]  ;;  %vm596_vm6 = vcmp.lt.s32.totalorder %v4314_v9, 1  ;;  %vm646_vm7 = vcmp.lt.s32.totalorder %v4314_v9, 113 }
  0x12   : > { %v711_v21 = vld [vmem:[%s5604_s5] sm:$0xf]  ;;  %v3957_v42 = vld [vmem:[%s5600_s1 + $0xa] sm:$0x3]  ;;  %vm5642_vm8 = vcmp.lt.s32.totalorder %v4314_v9, 15  ;;  %vm5641_vm9 = vcmp.lt.s32.totalorder %v4314_v9, 17 }
  0x13   : > { %vm717_vm10 = vcmask 293888   ;;  %s5619_s13 = smov 2   ;;  %s5617_s14 = smov 98   ;;  %vm1124_vm11 = vcmp.lt.s32.totalorder %v4314_v9, 96  ;;  %vm5639_vm12 = vcmp.lt.s32.totalorder %v4314_v9, 126  ;;  %vm5640_vm13 = vcmp.lt.s32.totalorder %v4314_v9, 94 }
  0x14   : > { %s5647_s15 = smov 32   ;;  %s5645_s16 = smov 34   ;;  %vm5621_vm14 = vcmp.lt.s32.totalorder %v4314_v9, 98  ;;  %vm1014_vm15 = vcmp.lt.s32.totalorder %v4314_v9, 32 }
  0x15   : > { %s5623_s23 = smov 30  }
  0x16   : > { %v417_v1 = vld.sshfl [vmem:[#allocation1] sm:$0xff pattern:$0x75316420]  ;;  %v418_v2 = vld.sshfl [vmem:[#allocation1 + $0x8] sm:$0xff pattern:$0x75316420] }
  0x17   : > { %421 = vrot.lane.b32.xlu1 %v417_v1, %s5649_s27  ;;  %442 = vst [vmem:[#allocation1 + $0x1] ss:$2 sm:$0xff] %v414_v0 }
  0x1e   : > { %v443_v3 = vld.sshfl [vmem:[#allocation1] sm:$0xff pattern:$0x75316420]  ;;  %v444_v4 = vld.sshfl [vmem:[#allocation1 + $0x8] sm:$0xff pattern:$0x75316420] }
  0x1f   : > { %447 = vst [vmem:[#allocation2 + $0x30] sm:$0xf0] %v443_v3  ;;  %423 = vrot.lane.b32.xlu1 %v418_v2, %s5649_s27 }
  0x20   : > { %448 = vst [vmem:[#allocation2] sm:$0xf0] %v444_v4 }
  0x21   : > { %449 = vst [vmem:[#allocation1] ss:$2 sm:$0xff] %v414_v0 }
  0x28   : > { %v450_v5 = vld.sshfl [vmem:[#allocation1] sm:$0xff pattern:$0x75316420]  ;;  %v451_v6 = vld.sshfl [vmem:[#allocation1 + $0x8] sm:$0xff pattern:$0x75316420] }
  0x29   : > { %454 = vrot.lane.b32.xlu0 %v450_v5, %s5643_s28  ;;  %3426 = vst [vmem:[#allocation1] ss:$2 sm:$0xff] %v414_v0 }
  0x31   : > { %456 = vrot.lane.b32.xlu0 %v451_v6, %s5643_s28  ;;  %v3958_v6 = vld [vmem:[%s5600_s1 + $0xe] sm:$0x3] }
  0x67   : > { %v481_v34 = vpop.permute.xlu2 %480 }
  0x89   : > { %v422_v8 = vpop.permute.xlu1 %421 }
  0x91   : > { %v424_v13 = vpop.permute.xlu1 %423 }
  0x92   : > { %v428_v14 = vsel %vm427_vm0, %v422_v8, %v424_v13  ;;  %v429_v15 = vsel %vm427_vm0, %v424_v13, %v422_v8  ;;  %v602_v13 = vperm.slane %v3958_v6, 0 }
  0x93   : > { %v437_v16 = vmul.f32 %v433_v11, %v429_v15  ;;  %v438_v17 = vmul.f32 %v434_v12, %v428_v14  ;;  %v603_v14 = vperm.slane %v3958_v6, 1  ;;  %v652_v15 = vperm.slane %v3960_v10, 0 }
  0x95   : > { %439 = vst [vmem:[#allocation2 + $0x30] sm:$0xf] %v437_v16  ;;  %v653_v16 = vperm.slane %v3960_v10, 1  ;;  %v3976_v10 = vld [vmem:[%s5604_s5 + $0x4] sm:$0xf] }
  0x96   : > { %440 = vst [vmem:[#allocation2] sm:$0xf] %v438_v17 }
  0x9b   : > { %v455_v20 = vpop.permute.xlu0 %454 }
  0x9c   : > { %v473_v32 = vld [vmem:[#allocation2 + $0x30] sm:$0xff] }
  0x9d   : > { %v474_v33 = vld [vmem:[#allocation2] sm:$0xff] }
  0xa3   : > { %v457_v24 = vpop.permute.xlu0 %456 }
  0xa4   : > { %v459_v25 = vsel %vm458_vm1, %v455_v20, %v457_v24  ;;  %v460_v26 = vsel %vm458_vm1, %v457_v24, %v455_v20 }
  0xa5   : > { %v468_v27 = vmul.f32 %v464_v22, %v459_v25  ;;  %v469_v28 = vmul.f32 %v465_v23, %v460_v26 }
  0xa7   : > { %470 = vst [vmem:[#allocation2 + $0x18] sm:$0xf] %v468_v27 }
  0xa8   : > { %471 = vst [vmem:[#allocation2 + $0x10] sm:$0xf] %v469_v28 }
  0xae   : > { %v475_v29 = vld [vmem:[#allocation2 + $0x18] sm:$0xf] }
  0xaf   : > { %3951 = vmatpush.msk.msra.mxu0 %vm487_vm2, %v475_v29  ;;  %v476_v30 = vld [vmem:[#allocation2 + $0x10] sm:$0xf] }
  0xb0   : > { %3953 = vmatpush.msk.msra.mxu1 %vm487_vm2, %v476_v30  ;;  %v3956_v30 = vld [vmem:[%s5600_s1 + $0x8] sm:$0x3] }
  0xb1   : > { %509 = vmatpush.msra.mxu0 %v473_v32  ;;  %v560_v32 = vperm.slane %v3956_v30, 0 }
  0xb2   : > { %529 = vmatpush.msra.mxu1 %v474_v33  ;;  %3952 = vmatmul.msk.f32.vlgmr.msra.gmra.mxu0 %vm483_vm3, %v472_v31  ;;  %v561_v33 = vperm.slane %v3956_v30, 1 }
  0xb3   : > { %3954 = vmatmul.msk.f32.vlgmr.msra.gmra.mxu1 %vm483_vm3, %v472_v31  ;;  %vm5622_vm3 = vcmp.lt.s32.totalorder %v4314_v9, 2 }
 0x12f   : > { %v511_v35 = vpop.f32.mrf.mxu0 }
 0x130   : > { %v512_v36 = vadd.f32 %v511_v35, %v481_v34  ;;  %v531_v37 = vpop.f32.mrf.mxu1 }
 0x131   : > { %v532_v38 = vadd.f32 %v531_v37, %v481_v34 }
 0x132   : > { %616 = vst [vmem:[#allocation2 + $0x48] sm:$0xf] %v512_v36  ;;  %682 = vrot.lane.b32.xlu1 %v512_v36, %s5637_s19  ;;  %660 = vrot.lane.b32.xlu2 %v512_v36, %s5643_s28 }
 0x133   : > { %617 = vst [vmem:[#allocation2 + $0x28] sm:$0xf] %v532_v38  ;;  %662 = vrot.lane.b32.xlu0 %v532_v38, %s5643_s28 }
 0x13a   : > { %620 = vrot.lane.b32.xlu1 %v532_v38, %s5635_s20  ;;  %684 = vrot.lane.b32.xlu2 %v532_v38, %s5637_s19 }
 0x13b   : > { %618 = vrot.lane.b32.xlu0 %v512_v36, %s5635_s20 }
 0x142   : > { %592 = vrot.lane.b32.xlu1 %v512_v36, %s5633_s24  ;;  %642 = vrot.lane.b32.xlu2 %v512_v36, %s5631_s25 }
 0x143   : > { %644 = vrot.lane.b32.xlu0 %v532_v38, %s5631_s25 }
 0x14a   : > { %554 = vrot.lane.b32.xlu1 %v532_v38, %s5649_s27  ;;  %594 = vrot.lane.b32.xlu2 %v532_v38, %s5633_s24 }
 0x14b   : > { %552 = vrot.lane.b32.xlu0 %v512_v36, %s5649_s27 }
 0x152   : > { %534 = vrot.lane.b32.xlu1 %v512_v36, %s5629_s26  ;;  %574 = vrot.lane.b32.xlu2 %v512_v36, %s5627_s29 }
 0x153   : > { %576 = vrot.lane.b32.xlu0 %v532_v38, %s5627_s29 }
 0x15a   : > { %536 = vrot.lane.b32.xlu2 %v532_v38, %s5629_s26 }
 0x15b   : > { %714 = vperm.xlu0 %4178, %v711_v21  }
 0x18c   : > { %v661_v39 = vpop.permute.xlu2 %660 }
 0x194   : > { %v685_v40 = vpop.permute.xlu2 %684 }
 0x19c   : > { %v643_v51 = vpop.permute.xlu2 %642 }
 0x1a4   : > { %v683_v47 = vpop.permute.xlu1 %682  ;;  %v595_v7 = vpop.permute.xlu2 %594 }
 0x1a5   : > { %v663_v48 = vpop.permute.xlu0 %662  ;;  %v687_v49 = vsel %vm686_vm4, %v683_v47, %v685_v40  ;;  %v688_v50 = vsel %vm686_vm4, %v685_v40, %v683_v47  ;;  %v3955_v40 = vld [vmem:[%s5600_s1 + $0x6] sm:$0x3] }
 0x1a6   : > { %v664_v52 = vsel %vm458_vm1, %v661_v39, %v663_v48  ;;  %v665_v53 = vsel %vm458_vm1, %v663_v48, %v661_v39  ;;  %v696_v54 = vmul.f32 %v692_v43, %v687_v49  ;;  %v697_v55 = vmul.f32 %v693_v44, %v688_v50 }
 0x1a7   : > { %v672_v56 = vmul.f32 %v668_v45, %v664_v52  ;;  %v673_v57 = vmul.f32 %v669_v46, %v665_v53  ;;  %v544_v47 = vperm.slane %v3955_v40, 0  ;;  %v584_v49 = vperm.slane %v3957_v42, 0 }
 0x1a8   : > { %698 = vst [vmem:[#allocation2 + $0x40] sm:$0xf] %v696_v54  ;;  %v585_v50 = vperm.slane %v3957_v42, 1 }
 0x1a9   : > { %v676_v59 = vrot.slane %v672_v56, 4  ;;  %v677_v60 = vrot.slane %v673_v57, 4  ;;  %699 = vst [vmem:[#allocation2 + $0x38] sm:$0xf] %v697_v55 }
 0x1ab   : > { %680 = vst [vmem:[#allocation2 + $0x8] sm:$0xf0] %v676_v59 }
 0x1ac   : > { %681 = vst [vmem:[#allocation2 + $0x20] sm:$0xf0] %v677_v60  ;;  %v621_v63 = vpop.permute.xlu1 %620  ;;  %v575_v31 = vpop.permute.xlu2 %574 }
 0x1ad   : > { %v619_v0 = vpop.permute.xlu0 %618 }
 0x1ae   : > { %v623_v1 = vsel %vm622_vm5, %v619_v0, %v621_v63  ;;  %v624_v2 = vsel %vm622_vm5, %v621_v63, %v619_v0 }
 0x1af   : > { %v632_v3 = vmul.f32 %v628_v61, %v623_v1  ;;  %v633_v4 = vmul.f32 %v629_v62, %v624_v2  ;;  %v709_v5 = vld [vmem:[#allocation2 + $0x40] sm:$0xf]  ;;  %v700_v1 = vld [vmem:[%s5603_s4] sm:$0xf] }
 0x1b0   : > { %3963 = vmatpush.msk.msra.mxu2 %vm487_vm2, %v709_v5  ;;  %v710_v8 = vld [vmem:[#allocation2 + $0x38] sm:$0xf] }
 0x1b1   : > { %v636_v11 = vrot.slane %v632_v3, 4  ;;  %v637_v12 = vrot.slane %v633_v4, 4  ;;  %3965 = vmatpush.msk.msra.mxu3 %vm487_vm2, %v710_v8 }
 0x1b3   : > { %640 = vst [vmem:[#allocation2 + $0x48] sm:$0xf0] %v636_v11 }
 0x1b4   : > { %641 = vst [vmem:[#allocation2 + $0x28] sm:$0xf0] %v637_v12  ;;  %v593_v17 = vpop.permute.xlu1 %592  ;;  %v537_v52 = vpop.permute.xlu2 %536 }
 0x1b5   : > { %v645_v18 = vpop.permute.xlu0 %644  ;;  %v597_v19 = vsel %vm596_vm6, %v593_v17, %v595_v7  ;;  %v598_v20 = vsel %vm596_vm6, %v595_v7, %v593_v17 }
 0x1b6   : > { %v647_v22 = vsel %vm646_vm7, %v643_v51, %v645_v18  ;;  %v648_v23 = vsel %vm646_vm7, %v645_v18, %v643_v51  ;;  %v606_v24 = vmul.f32 %v602_v13, %v598_v20  ;;  %v607_v25 = vmul.f32 %v603_v14, %v597_v19  ;;  %v3973_v13 = vld [vmem:[%s5600_s1 + $0x16] sm:$0x3] }
 0x1b7   : > { %v656_v26 = vmul.f32 %v652_v15, %v647_v22  ;;  %v657_v27 = vmul.f32 %v653_v16, %v648_v23  ;;  %v545_v51 = vperm.slane %v3955_v40, 1  ;;  %v891_v14 = vperm.slane %v3973_v13, 0  ;;  %v3972_v23 = vld [vmem:[%s5600_s1 + $0x14] sm:$0x3] }
 0x1b8   : > { %v610_v28 = vrot.slane %v606_v24, 4  ;;  %v611_v29 = vrot.slane %v607_v25, 4  ;;  %v892_v15 = vperm.slane %v3973_v13, 1  ;;  %v3974_v24 = vld [vmem:[%s5600_s1 + $0x18] sm:$0x3] }
 0x1b9   : > { %658 = vst [vmem:[#allocation2 + $0x8] sm:$0xf] %v656_v26  ;;  %v914_v30 = vperm.slane %v3974_v24, 1 }
 0x1ba   : > { %659 = vst [vmem:[#allocation2 + $0x20] sm:$0xf] %v657_v27  ;;  %v705_v46 = vld [vmem:[#allocation2 + $0x48] sm:$0xff]  ;;  %v875_v27 = vperm.slane %v3972_v23, 0 }
 0x1bb   : > { %614 = vst [vmem:[#allocation2 + $0x18] sm:$0xf0] %v610_v28  ;;  %v706_v48 = vld [vmem:[#allocation2 + $0x28] sm:$0xff]  ;;  %v876_v28 = vperm.slane %v3972_v23, 1  ;;  %v3967_v23 = vld [vmem:[%s5600_s1 + $0x6] sm:$0x3] }
 0x1bc   : > { %615 = vst [vmem:[#allocation2 + $0x10] sm:$0xf0] %v611_v29  ;;  %v555_v34 = vpop.permute.xlu1 %554  ;;  %v913_v29 = vperm.slane %v3974_v24, 0 }
 0x1bd   : > { %v553_v35 = vpop.permute.xlu0 %552 }
 0x1be   : > { %v556_v36 = vsel %vm427_vm0, %v553_v35, %v555_v34  ;;  %v557_v37 = vsel %vm427_vm0, %v555_v34, %v553_v35 }
 0x1bf   : > { %v564_v38 = vmul.f32 %v560_v32, %v557_v37  ;;  %v565_v39 = vmul.f32 %v561_v33, %v556_v36 }
 0x1c0   : > { %v707_v41 = vld [vmem:[#allocation2 + $0x8] sm:$0xff] }
 0x1c1   : > { %v568_v43 = vrot.slane %v564_v38, 4  ;;  %v569_v44 = vrot.slane %v565_v39, 4  ;;  %739 = vmatpush.msra.mxu2 %v707_v41  ;;  %v708_v45 = vld [vmem:[#allocation2 + $0x20] sm:$0xff]  ;;  %v3971_v41 = vld [vmem:[%s5600_s1 + $0x10] sm:$0x3] }
 0x1c2   : > { %759 = vmatpush.msra.mxu3 %v708_v45 }
 0x1c3   : > { %572 = vst [vmem:[#allocation2 + $0x30] sm:$0xf0] %v568_v43  ;;  %740 = vmatpush.msra.mxu2 %v705_v46  ;;  %v853_v43 = vperm.slane %v3971_v41, 0 }
 0x1c4   : > { %573 = vst [vmem:[#allocation2] sm:$0xf0] %v569_v44  ;;  %760 = vmatpush.msra.mxu3 %v706_v48  ;;  %v535_v53 = vpop.permute.xlu1 %534  ;;  %v854_v44 = vperm.slane %v3971_v41, 1 }
 0x1c5   : > { %v577_v54 = vpop.permute.xlu0 %576  ;;  %v539_v55 = vsel %vm5641_vm9, %v535_v53, %v537_v52  ;;  %v540_v56 = vsel %vm5641_vm9, %v537_v52, %v535_v53  ;;  %v3970_v52 = vld [vmem:[%s5600_s1 + $0xe] sm:$0x3] }
 0x1c6   : > { %v579_v57 = vsel %vm5642_vm8, %v575_v31, %v577_v54  ;;  %v580_v58 = vsel %vm5642_vm8, %v577_v54, %v575_v31  ;;  %v548_v59 = vmul.f32 %v544_v47, %v540_v56  ;;  %v549_v62 = vmul.f32 %v545_v51, %v539_v55  ;;  %v3969_v51 = vld [vmem:[%s5600_s1 + $0xa] sm:$0x3] }
 0x1c7   : > { %v588_v60 = vmul.f32 %v584_v49, %v580_v58  ;;  %v589_v61 = vmul.f32 %v585_v50, %v579_v57  ;;  %v813_v56 = vperm.slane %v3969_v51, 0  ;;  %v814_v57 = vperm.slane %v3969_v51, 1 }
 0x1c8   : > { %550 = vst [vmem:[#allocation2 + $0x30] sm:$0xf] %v548_v59  ;;  %v829_v59 = vperm.slane %v3970_v52, 0 }
 0x1c9   : > { %590 = vst [vmem:[#allocation2 + $0x18] sm:$0xf] %v588_v60  ;;  %v830_v60 = vperm.slane %v3970_v52, 1 }
 0x1ca   : > { %591 = vst [vmem:[#allocation2 + $0x10] sm:$0xf] %v589_v61 }
 0x1cb   : > { %551 = vst [vmem:[#allocation2] sm:$0xf] %v549_v62 }
 0x1cd   : > { %v715_v4 = vpop.permute.xlu0 %714 }
 0x1cf   : > { %v701_v2 = vld [vmem:[#allocation2 + $0x30] sm:$0xff] }
 0x1d0   : > { %v703_v63 = vld [vmem:[#allocation2 + $0x18] sm:$0xff] }
 0x1d1   : > { %741 = vmatpush.msra.mxu2 %v703_v63  ;;  %v704_v0 = vld [vmem:[#allocation2 + $0x10] sm:$0xff] }
 0x1d2   : > { %761 = vmatpush.msra.mxu3 %v704_v0  ;;  %v702_v3 = vld [vmem:[#allocation2] sm:$0xff] }
 0x1d3   : > { %742 = vmatpush.msra.mxu2 %v701_v2 }
 0x1d4   : > { %762 = vmatpush.msra.mxu3 %v702_v3  ;;  %3964 = vmatmul.msk.f32.vlgmr.msra.gmra.mxu2 %vm717_vm10, %v700_v1 }
 0x1d5   : > { %3966 = vmatmul.msk.f32.vlgmr.msra.gmra.mxu3 %vm717_vm10, %v700_v1 }
 0x257   : > { %v744_v5 = vpop.f32.mrf.mxu2 }
 0x258   : > { %v745_v6 = vadd.f32 %v744_v5, %v715_v4  ;;  %v764_v7 = vpop.f32.mrf.mxu3 }
 0x259   : > { %v765_v8 = vadd.f32 %v764_v7, %v715_v4 }
 0x25a   : > { %843 = vst [vmem:[#allocation2 + $0x48] sm:$0xf] %v745_v6  ;;  %845 = vrot.lane.b32.xlu0 %v745_v6, %s5635_s20  ;;  %883 = vrot.lane.b32.xlu1 %v745_v6, %s5643_s28 }
 0x25b   : > { %844 = vst [vmem:[#allocation2 + $0x28] sm:$0xf] %v765_v8  ;;  %885 = vrot.lane.b32.xlu2 %v765_v8, %s5643_s28 }
 0x262   : > { %869 = vrot.lane.b32.xlu0 %v765_v8, %s5631_s25  ;;  %905 = vrot.lane.b32.xlu1 %v745_v6, %s5637_s19 }
 0x263   : > { %907 = vrot.lane.b32.xlu2 %v765_v8, %s5637_s19 }
 0x26a   : > { %783 = vrot.lane.b32.xlu0 %v745_v6, %s5649_s27  ;;  %847 = vrot.lane.b32.xlu1 %v765_v8, %s5635_s20 }
 0x26b   : > { %867 = vrot.lane.b32.xlu2 %v745_v6, %s5631_s25 }
 0x272   : > { %807 = vrot.lane.b32.xlu0 %v765_v8, %s5627_s29  ;;  %821 = vrot.lane.b32.xlu1 %v745_v6, %s5633_s24 }
 0x273   : > { %823 = vrot.lane.b32.xlu2 %v765_v8, %s5633_s24 }
 0x27a   : > { %937 = vperm.xlu0 %4178, %v3976_v10   ;;  %785 = vrot.lane.b32.xlu1 %v765_v8, %s5649_s27 }
 0x27b   : > { %805 = vrot.lane.b32.xlu2 %v745_v6, %s5627_s29 }
 0x282   : > { %767 = vrot.lane.b32.xlu1 %v745_v6, %s5629_s26 }
 0x283   : > { %769 = vrot.lane.b32.xlu2 %v765_v8, %s5629_s26 }
 0x2b5   : > { %v886_v11 = vpop.permute.xlu2 %885 }
 0x2bd   : > { %v908_v12 = vpop.permute.xlu2 %907 }
 0x2c5   : > { %v868_v22 = vpop.permute.xlu2 %867 }
 0x2cc   : > { %v846_v16 = vpop.permute.xlu0 %845  ;;  %v884_v17 = vpop.permute.xlu1 %883 }
 0x2cd   : > { %v887_v18 = vsel %vm458_vm1, %v884_v17, %v886_v11  ;;  %v888_v19 = vsel %vm458_vm1, %v886_v11, %v884_v17  ;;  %v824_v42 = vpop.permute.xlu2 %823  ;;  %v3968_v11 = vld [vmem:[%s5600_s1 + $0x8] sm:$0x3] }
 0x2ce   : > { %v895_v20 = vmul.f32 %v891_v14, %v887_v18  ;;  %v896_v21 = vmul.f32 %v892_v15, %v888_v19  ;;  %v792_v17 = vperm.slane %v3968_v11, 1 }
 0x2d0   : > { %v899_v25 = vrot.slane %v895_v20, 4  ;;  %v900_v26 = vrot.slane %v896_v21, 4 }
 0x2d2   : > { %903 = vst [vmem:[#allocation2 + $0x8] sm:$0xf0] %v899_v25 }
 0x2d3   : > { %904 = vst [vmem:[#allocation2 + $0x20] sm:$0xf0] %v900_v26 }
 0x2d4   : > { %v870_v31 = vpop.permute.xlu0 %869  ;;  %v906_v32 = vpop.permute.xlu1 %905 }
 0x2d5   : > { %v871_v33 = vsel %vm646_vm7, %v868_v22, %v870_v31  ;;  %v872_v34 = vsel %vm646_vm7, %v870_v31, %v868_v22  ;;  %v909_v35 = vsel %vm686_vm4, %v906_v32, %v908_v12  ;;  %v910_v36 = vsel %vm686_vm4, %v908_v12, %v906_v32  ;;  %v806_v61 = vpop.permute.xlu2 %805 }
 0x2d6   : > { %v879_v37 = vmul.f32 %v875_v27, %v871_v33  ;;  %v880_v38 = vmul.f32 %v876_v28, %v872_v34  ;;  %v917_v39 = vmul.f32 %v913_v29, %v909_v35  ;;  %v918_v40 = vmul.f32 %v914_v30, %v910_v36  ;;  %v3975_v36 = vld [vmem:[%s5603_s4 + $0x4] sm:$0xf] }
 0x2d7   : > { %v775_v28 = vperm.slane %v3967_v23, 0  ;;  %v776_v29 = vperm.slane %v3967_v23, 1 }
 0x2d8   : > { %881 = vst [vmem:[#allocation2 + $0x8] sm:$0xf] %v879_v37 }
 0x2d9   : > { %882 = vst [vmem:[#allocation2 + $0x20] sm:$0xf] %v880_v38 }
 0x2da   : > { %919 = vst [vmem:[#allocation2 + $0x40] sm:$0xf] %v917_v39 }
 0x2db   : > { %920 = vst [vmem:[#allocation2 + $0x38] sm:$0xf] %v918_v40 }
 0x2dc   : > { %v784_v45 = vpop.permute.xlu0 %783  ;;  %v848_v46 = vpop.permute.xlu1 %847 }
 0x2dd   : > { %v849_v47 = vsel %vm622_vm5, %v846_v16, %v848_v46  ;;  %v850_v48 = vsel %vm622_vm5, %v848_v46, %v846_v16  ;;  %v791_v16 = vperm.slane %v3968_v11, 0  ;;  %v770_v30 = vpop.permute.xlu2 %769 }
 0x2de   : > { %v857_v49 = vmul.f32 %v853_v43, %v849_v47  ;;  %v858_v50 = vmul.f32 %v854_v44, %v850_v48  ;;  %v3989_v48 = vld [vmem:[%s5604_s5 + $0x8] sm:$0xf] }
 0x2df   : > { %v929_v62 = vld [vmem:[#allocation2 + $0x8] sm:$0xff] }
 0x2e0   : > { %v861_v53 = vrot.slane %v857_v49, 4  ;;  %v862_v54 = vrot.slane %v858_v50, 4  ;;  %v930_v63 = vld [vmem:[#allocation2 + $0x20] sm:$0xff]  ;;  %v3986_v50 = vld [vmem:[%s5600_s1 + $0x1c] sm:$0x3] }
 0x2e1   : > { %v931_v55 = vld [vmem:[#allocation2 + $0x40] sm:$0xf]  ;;  %v1130_v51 = vperm.slane %v3986_v50, 0  ;;  %v1131_v52 = vperm.slane %v3986_v50, 1 }
 0x2e2   : > { %865 = vst [vmem:[#allocation2 + $0x48] sm:$0xf0] %v861_v53  ;;  %3977 = vmatpush.msk.msrb.mxu0 %vm487_vm2, %v931_v55  ;;  %v932_v58 = vld [vmem:[#allocation2 + $0x38] sm:$0xf] }
 0x2e3   : > { %866 = vst [vmem:[#allocation2 + $0x28] sm:$0xf0] %v862_v54  ;;  %3979 = vmatpush.msk.msrb.mxu1 %vm487_vm2, %v932_v58 }
 0x2e4   : > { %961 = vmatpush.msrb.mxu0 %v929_v62  ;;  %v808_v0 = vpop.permute.xlu0 %807  ;;  %v822_v1 = vpop.permute.xlu1 %821 }
 0x2e5   : > { %981 = vmatpush.msrb.mxu1 %v930_v63  ;;  %v809_v2 = vsel %vm5642_vm8, %v806_v61, %v808_v0  ;;  %v810_v3 = vsel %vm5642_vm8, %v808_v0, %v806_v61  ;;  %v825_v4 = vsel %vm596_vm6, %v822_v1, %v824_v42  ;;  %v826_v5 = vsel %vm596_vm6, %v824_v42, %v822_v1  ;;  %v3987_v61 = vld [vmem:[%s5600_s1 + $0x1e] sm:$0x3] }
 0x2e6   : > { %v817_v6 = vmul.f32 %v813_v56, %v810_v3  ;;  %v818_v7 = vmul.f32 %v814_v57, %v809_v2  ;;  %v833_v8 = vmul.f32 %v829_v59, %v826_v5  ;;  %v834_v10 = vmul.f32 %v830_v60, %v825_v4  ;;  %v3984_v60 = vld [vmem:[%s5600_s1 + $0x12] sm:$0x3] }
 0x2e7   : > { %v1088_v0 = vperm.slane %v3984_v60, 0  ;;  %v1089_v1 = vperm.slane %v3984_v60, 1  ;;  %v1154_v2 = vperm.slane %v3987_v61, 0  ;;  %v1155_v3 = vperm.slane %v3987_v61, 1 }
 0x2e8   : > { %819 = vst [vmem:[#allocation2 + $0x18] sm:$0xf] %v817_v6  ;;  %v837_v12 = vrot.slane %v833_v8, 4  ;;  %v838_v13 = vrot.slane %v834_v10, 4 }
 0x2e9   : > { %820 = vst [vmem:[#allocation2 + $0x10] sm:$0xf] %v818_v7  ;;  %v927_v14 = vld [vmem:[#allocation2 + $0x48] sm:$0xff] }
 0x2ea   : > { %841 = vst [vmem:[#allocation2 + $0x18] sm:$0xf0] %v837_v12  ;;  %962 = vmatpush.msrb.mxu0 %v927_v14  ;;  %v928_v15 = vld [vmem:[#allocation2 + $0x28] sm:$0xff] }
 0x2eb   : > { %842 = vst [vmem:[#allocation2 + $0x10] sm:$0xf0] %v838_v13  ;;  %982 = vmatpush.msrb.mxu1 %v928_v15  ;;  %v3985_v15 = vld [vmem:[%s5600_s1 + $0x1a] sm:$0x3] }
 0x2ec   : > { %v786_v18 = vpop.permute.xlu1 %785  ;;  %v938_v39 = vpop.permute.xlu0 %937 }
 0x2ed   : > { %v787_v19 = vsel %vm427_vm0, %v784_v45, %v786_v18  ;;  %v788_v20 = vsel %vm427_vm0, %v786_v18, %v784_v45 }
 0x2ee   : > { %v795_v21 = vmul.f32 %v791_v16, %v788_v20  ;;  %v796_v22 = vmul.f32 %v792_v17, %v787_v19  ;;  %v1112_v19 = vperm.slane %v3985_v15, 0  ;;  %v1113_v20 = vperm.slane %v3985_v15, 1 }
 0x2f0   : > { %v799_v24 = vrot.slane %v795_v21, 4  ;;  %v800_v25 = vrot.slane %v796_v22, 4 }
 0x2f1   : > { %v925_v26 = vld [vmem:[#allocation2 + $0x18] sm:$0xff] }
 0x2f2   : > { %803 = vst [vmem:[#allocation2 + $0x30] sm:$0xf0] %v799_v24  ;;  %963 = vmatpush.msrb.mxu0 %v925_v26  ;;  %v926_v27 = vld [vmem:[#allocation2 + $0x10] sm:$0xff] }
 0x2f3   : > { %804 = vst [vmem:[#allocation2] sm:$0xf0] %v800_v25  ;;  %983 = vmatpush.msrb.mxu1 %v926_v27  ;;  %v3981_v27 = vld [vmem:[%s5600_s1 + $0x2] sm:$0x3] }
 0x2f4   : > { %v768_v31 = vpop.permute.xlu1 %767 }
 0x2f5   : > { %v771_v32 = vsel %vm5641_vm9, %v768_v31, %v770_v30  ;;  %v772_v33 = vsel %vm5641_vm9, %v770_v30, %v768_v31  ;;  %v1020_v31 = vperm.slane %v3981_v27, 0 }
 0x2f6   : > { %v779_v34 = vmul.f32 %v775_v28, %v772_v33  ;;  %v780_v35 = vmul.f32 %v776_v29, %v771_v32  ;;  %v3983_v29 = vld [vmem:[%s5600_s1 + $0xc] sm:$0x3]  ;;  %v1021_v33 = vperm.slane %v3981_v27, 1 }
 0x2f8   : > { %781 = vst [vmem:[#allocation2 + $0x30] sm:$0xf] %v779_v34  ;;  %v1062_v34 = vperm.slane %v3983_v29, 0 }
 0x2f9   : > { %782 = vst [vmem:[#allocation2] sm:$0xf] %v780_v35  ;;  %v1063_v35 = vperm.slane %v3983_v29, 1 }
 0x2ff   : > { %v923_v37 = vld [vmem:[#allocation2 + $0x30] sm:$0xff] }
 0x300   : > { %964 = vmatpush.msrb.mxu0 %v923_v37  ;;  %v924_v38 = vld [vmem:[#allocation2] sm:$0xff] }
 0x301   : > { %984 = vmatpush.msrb.mxu1 %v924_v38  ;;  %3978 = vmatmul.msk.f32.vlgmr.msrb.gmra.mxu0 %vm717_vm10, %v3975_v36 }
 0x302   : > { %3980 = vmatmul.msk.f32.vlgmr.msrb.gmra.mxu1 %vm717_vm10, %v3975_v36 }
 0x37e   : > { %v966_v40 = vpop.f32.mrf.mxu0 }
 0x37f   : > { %v967_v41 = vadd.f32 %v966_v40, %v938_v39  ;;  %v986_v42 = vpop.f32.mrf.mxu1 }
 0x380   : > { %v987_v43 = vadd.f32 %v986_v42, %v938_v39 }
 0x381   : > { %v989_v44 = vmul.f32 0.01, %v967_v41 }
 0x382   : > { %v990_v45 = vmul.f32 0.01, %v987_v43 }
 0x383   : > { %v991_v46 = vmax.f32 %v967_v41, %v989_v44 }
 0x384   : > { %v992_v47 = vmax.f32 %v987_v43, %v990_v45 }
 0x385   : > { %1076 = vst [vmem:[#allocation2 + $0x48] sm:$0xf] %v991_v46  ;;  %1144 = vrot.lane.b32.xlu0 %v991_v46, %s5615_s17  ;;  %1120 = vrot.lane.b32.xlu1 %v991_v46, %s5651_s18 }
 0x386   : > { %1077 = vst [vmem:[#allocation2 + $0x28] sm:$0xf] %v992_v47  ;;  %1122 = vrot.lane.b32.xlu2 %v992_v47, %s5651_s18 }
 0x38d   : > { %1080 = vrot.lane.b32.xlu0 %v992_v47, %s5613_s30  ;;  %1146 = vrot.lane.b32.xlu1 %v992_v47, %s5615_s17  ;;  %s5656_s17 = smov 98  }
 0x38e   : > { %1078 = vrot.lane.b32.xlu2 %v991_v46, %s5613_s30  ;;  %s5669_s30 = smov 113  }
 0x395   : > { %1052 = vrot.lane.b32.xlu0 %v991_v46, %s5619_s13  ;;  %1102 = vrot.lane.b32.xlu1 %v991_v46, %s5617_s14 }
 0x396   : > { %1104 = vrot.lane.b32.xlu2 %v992_v47, %s5617_s14  ;;  %s5655_s14 = smov 2  }
 0x39d   : > { %1012 = vrot.lane.b32.xlu0 %v992_v47, %s5647_s15  ;;  %1054 = vrot.lane.b32.xlu1 %v992_v47, %s5619_s13  ;;  %s5653_s13 = smov 94  }
 0x39e   : > { %1010 = vrot.lane.b32.xlu2 %v991_v46, %s5647_s15 }
 0x3a5   : > { %993 = vrot.lane.b32.xlu0 %v991_v46, %s5645_s16  ;;  %1034 = vrot.lane.b32.xlu1 %v991_v46, %s5623_s23 }
 0x3a6   : > { %1036 = vrot.lane.b32.xlu2 %v992_v47, %s5623_s23  ;;  %s5654_s23 = smov 126  }
 0x3ad   : > { %995 = vrot.lane.b32.xlu1 %v992_v47, %s5645_s16  ;;  %v3982_v47 = vld [vmem:[%s5600_s1 + $0x4] sm:$0x3] }
 0x3ae   : > { %1178 = vperm.xlu2 %4177, %v3989_v48  }
 0x3e0   : > { %v1123_v49 = vpop.permute.xlu2 %1122 }
 0x3e8   : > { %v1079_v57 = vpop.permute.xlu2 %1078 }
 0x3f0   : > { %v1105_v16 = vpop.permute.xlu2 %1104 }
 0x3f7   : > { %v1145_v53 = vpop.permute.xlu0 %1144  ;;  %v1121_v54 = vpop.permute.xlu1 %1120 }
 0x3f8   : > { %v1125_v55 = vsel %vm1124_vm11, %v1121_v54, %v1123_v49  ;;  %v1126_v56 = vsel %vm1124_vm11, %v1123_v49, %v1121_v54  ;;  %v1011_v32 = vpop.permute.xlu2 %1010 }
 0x3f9   : > { %v1134_v58 = vmul.f32 %v1130_v51, %v1125_v55  ;;  %v1135_v59 = vmul.f32 %v1131_v52, %v1126_v56  ;;  %v1044_v55 = vperm.slane %v3982_v47, 0  ;;  %v1045_v56 = vperm.slane %v3982_v47, 1 }
 0x3fb   : > { %v1138_v62 = vrot.slane %v1134_v58, 4  ;;  %v1139_v63 = vrot.slane %v1135_v59, 4 }
 0x3fd   : > { %1142 = vst [vmem:[#allocation2 + $0x8] sm:$0xf0] %v1138_v62 }
 0x3fe   : > { %1143 = vst [vmem:[#allocation2 + $0x20] sm:$0xf0] %v1139_v63  ;;  %v1000_v63 = vld [vmem:[%s5600_s1] sm:$0x3] }
 0x3ff   : > { %v1081_v4 = vpop.permute.xlu0 %1080  ;;  %v1147_v5 = vpop.permute.xlu1 %1146 }
 0x400   : > { %v1083_v6 = vsel %vm5639_vm12, %v1079_v57, %v1081_v4  ;;  %v1084_v7 = vsel %vm5639_vm12, %v1081_v4, %v1079_v57  ;;  %v1149_v8 = vsel %vm5640_vm13, %v1145_v53, %v1147_v5  ;;  %v1150_v10 = vsel %vm5640_vm13, %v1147_v5, %v1145_v53  ;;  %v1037_v57 = vpop.permute.xlu2 %1036 }
 0x401   : > { %v1092_v11 = vmul.f32 %v1088_v0, %v1083_v6  ;;  %v1093_v12 = vmul.f32 %v1089_v1, %v1084_v7  ;;  %v1158_v13 = vmul.f32 %v1154_v2, %v1149_v8  ;;  %v1159_v14 = vmul.f32 %v1155_v3, %v1150_v10 }
 0x402   : > { %v1002_v0 = vperm.slane %v1000_v63, 0  ;;  %v1003_v1 = vperm.slane %v1000_v63, 1 }
 0x403   : > { %v1096_v17 = vrot.slane %v1092_v11, 4  ;;  %v1097_v18 = vrot.slane %v1093_v12, 4  ;;  %1160 = vst [vmem:[#allocation2 + $0x40] sm:$0xf] %v1158_v13  ;;  %v3988_v11 = vld [vmem:[%s5603_s4 + $0x8] sm:$0xf] }
 0x404   : > { %1161 = vst [vmem:[#allocation2 + $0x38] sm:$0xf] %v1159_v14 }
 0x405   : > { %1100 = vst [vmem:[#allocation2 + $0x48] sm:$0xf0] %v1096_v17 }
 0x406   : > { %1101 = vst [vmem:[#allocation2 + $0x28] sm:$0xf0] %v1097_v18 }
 0x407   : > { %v1053_v21 = vpop.permute.xlu0 %1052  ;;  %v1103_v22 = vpop.permute.xlu1 %1102 }
 0x408   : > { %v1107_v23 = vsel %vm5621_vm14, %v1103_v22, %v1105_v16  ;;  %v1108_v24 = vsel %vm5621_vm14, %v1105_v16, %v1103_v22  ;;  %vm5625_vm14 = vcmp.lt.s32.totalorder %v4314_v9, 30  ;;  %v1179_v14 = vpop.permute.xlu2 %1178 }
 0x409   : > { %v1116_v25 = vmul.f32 %v1112_v19, %v1107_v23  ;;  %v1117_v26 = vmul.f32 %v1113_v20, %v1108_v24  ;;  %v1319_v23 = vld [vmem:[%s5606_s7] sm:$0xff]  ;;  %v3996_v24 = vld [vmem:[%s5600_s1 + $0x16] sm:$0x3] }
 0x40a   : > { %v1172_v28 = vld [vmem:[#allocation2 + $0x40] sm:$0xf]  ;;  %v1283_v27 = vperm.slane %v3996_v24, 1 }
 0x40b   : > { %1118 = vst [vmem:[#allocation2 + $0x8] sm:$0xf] %v1116_v25  ;;  %3990 = vmatpush.msk.msrb.mxu2 %vm487_vm2, %v1172_v28  ;;  %v1173_v30 = vld [vmem:[#allocation2 + $0x38] sm:$0xf] }
 0x40c   : > { %1119 = vst [vmem:[#allocation2 + $0x20] sm:$0xf] %v1117_v26  ;;  %3992 = vmatpush.msk.msrb.mxu3 %vm487_vm2, %v1173_v30  ;;  %v1168_v53 = vld [vmem:[#allocation2 + $0x48] sm:$0xff]  ;;  %v1282_v26 = vperm.slane %v3996_v24, 0 }
 0x40d   : > { %v1169_v54 = vld [vmem:[#allocation2 + $0x28] sm:$0xff] }
 0x40f   : > { %v1013_v36 = vpop.permute.xlu0 %1012  ;;  %v1055_v37 = vpop.permute.xlu1 %1054 }
 0x410   : > { %v1015_v38 = vsel %vm1014_vm15, %v1011_v32, %v1013_v36  ;;  %v1016_v39 = vsel %vm1014_vm15, %v1013_v36, %v1011_v32  ;;  %v1057_v40 = vsel %vm5622_vm3, %v1053_v21, %v1055_v37  ;;  %v1058_v41 = vsel %vm5622_vm3, %v1055_v37, %v1053_v21 }
 0x411   : > { %v1024_v42 = vmul.f32 %v1020_v31, %v1016_v39  ;;  %v1025_v43 = vmul.f32 %v1021_v33, %v1015_v38  ;;  %v1066_v44 = vmul.f32 %v1062_v34, %v1058_v41  ;;  %v1067_v45 = vmul.f32 %v1063_v35, %v1057_v40  ;;  %v3997_v34 = vld [vmem:[%s5600_s1 + $0x1c] sm:$0x3]  ;;  %v3995_v35 = vld [vmem:[%s5600_s1 + $0x8] sm:$0x3] }
 0x412   : > { %v1170_v46 = vld [vmem:[#allocation2 + $0x8] sm:$0xff]  ;;  %vm997_vm3 = vcmp.lt.s32.totalorder %v4314_v9, 34  ;;  %v1304_v38 = vperm.slane %v3997_v34, 0  ;;  %v1305_v39 = vperm.slane %v3997_v34, 1  ;;  %v1258_v40 = vperm.slane %v3995_v35, 0 }
 0x413   : > { %v1028_v48 = vrot.slane %v1024_v42, 4  ;;  %v1029_v49 = vrot.slane %v1025_v43, 4  ;;  %v1070_v50 = vrot.slane %v1066_v44, 4  ;;  %1202 = vmatpush.msrb.mxu2 %v1170_v46  ;;  %v1171_v51 = vld [vmem:[#allocation2 + $0x20] sm:$0xff]  ;;  %v1071_v52 = vrot.slane %v1067_v45, 4 }
 0x414   : > { %1222 = vmatpush.msrb.mxu3 %v1171_v51  ;;  %v1259_v41 = vperm.slane %v3995_v35, 1 }
 0x415   : > { %1032 = vst [vmem:[#allocation2 + $0x30] sm:$0xf0] %v1028_v48  ;;  %1203 = vmatpush.msrb.mxu2 %v1168_v53  ;;  %v3994_v53 = vld [vmem:[%s5600_s1 + $0x2] sm:$0x3] }
 0x416   : > { %1033 = vst [vmem:[#allocation2] sm:$0xf0] %v1029_v49  ;;  %1223 = vmatpush.msrb.mxu3 %v1169_v54 }
 0x417   : > { %1074 = vst [vmem:[#allocation2 + $0x18] sm:$0xf0] %v1070_v50  ;;  %v1035_v58 = vpop.permute.xlu1 %1034  ;;  %v994_v2 = vpop.permute.xlu0 %993 }
 0x418   : > { %1075 = vst [vmem:[#allocation2 + $0x10] sm:$0xf0] %v1071_v52  ;;  %v1039_v59 = vsel %vm5625_vm14, %v1035_v58, %v1037_v57  ;;  %v1040_v60 = vsel %vm5625_vm14, %v1037_v57, %v1035_v58  ;;  %v1243_v57 = vperm.slane %v3994_v53, 1  ;;  %vm5626_vm14 = vcmask 162816  }
 0x419   : > { %v1048_v61 = vmul.f32 %v1044_v55, %v1040_v60  ;;  %v1049_v62 = vmul.f32 %v1045_v56, %v1039_v59  ;;  %v1242_v56 = vperm.slane %v3994_v53, 0 }
 0x41b   : > { %1050 = vst [vmem:[#allocation2 + $0x18] sm:$0xf] %v1048_v61 }
 0x41c   : > { %1051 = vst [vmem:[#allocation2 + $0x10] sm:$0xf] %v1049_v62 }
 0x41f   : > { %v996_v3 = vpop.permute.xlu1 %995 }
 0x420   : > { %v998_v4 = vsel %vm997_vm3, %v994_v2, %v996_v3  ;;  %v999_v5 = vsel %vm997_vm3, %v996_v3, %v994_v2 }
 0x421   : > { %v1006_v6 = vmul.f32 %v1002_v0, %v999_v5  ;;  %v1007_v7 = vmul.f32 %v1003_v1, %v998_v4  ;;  %v1312_v4 = vld [vmem:[%s5605_s6] sm:$0xff] }
 0x422   : > { %v1166_v8 = vld [vmem:[#allocation2 + $0x18] sm:$0xff] }
 0x423   : > { %1008 = vst [vmem:[#allocation2 + $0x30] sm:$0xf] %v1006_v6  ;;  %1204 = vmatpush.msrb.mxu2 %v1166_v8  ;;  %v1167_v10 = vld [vmem:[#allocation2 + $0x10] sm:$0xff] }
 0x424   : > { %1009 = vst [vmem:[#allocation2] sm:$0xf] %v1007_v7  ;;  %1224 = vmatpush.msrb.mxu3 %v1167_v10 }
 0x42a   : > { %v1164_v12 = vld [vmem:[#allocation2 + $0x30] sm:$0xff] }
 0x42b   : > { %1205 = vmatpush.msrb.mxu2 %v1164_v12  ;;  %v1165_v13 = vld [vmem:[#allocation2] sm:$0xff] }
 0x42c   : > { %1225 = vmatpush.msrb.mxu3 %v1165_v13  ;;  %3991 = vmatmul.msk.f32.vlgmr.msrb.gmra.mxu2 %vm717_vm10, %v3988_v11 }
 0x42d   : > { %3993 = vmatmul.msk.f32.vlgmr.msrb.gmra.mxu3 %vm717_vm10, %v3988_v11 }
 0x4af   : > { %v1207_v15 = vpop.f32.mrf.mxu2 }
 0x4b0   : > { %v1208_v16 = vadd.f32 %v1207_v15, %v1179_v14  ;;  %v1227_v17 = vpop.f32.mrf.mxu3 }
 0x4b1   : > { %v1228_v18 = vadd.f32 %v1227_v17, %v1179_v14  ;;  %v1456_v17 = vld [vmem:[%s5608_s9] sm:$0xff] }
 0x4b2   : > { %v1230_v19 = vmul.f32 0.01, %v1208_v16 }
 0x4b3   : > { %v1231_v20 = vmul.f32 0.01, %v1228_v18 }
 0x4b4   : > { %v4600_v21 = vmax.f32 %v1208_v16, %v1230_v19 }
 0x4b5   : > { %v4602_v22 = vmax.f32 %v1228_v18, %v1231_v20  ;;  %v4005_v18 = vld [vmem:[%s5600_s1 + $0x1c] sm:$0x3] }
 0x4b6   : > { %1272 = vst [vmem:[#allocation2 + $0x18] sm:$0xf] %v4600_v21  ;;  %1296 = vrot.lane.b32.xlu2 %v4600_v21, %s5651_s18  ;;  %1274 = vrot.lane.b32.xlu0 %v4600_v21, %s5643_s28  ;;  %v1437_v19 = vperm.slane %v4005_v18, 0  ;;  %v1438_v20 = vperm.slane %v4005_v18, 1 }
 0x4b7   : > { %1273 = vst [vmem:[#allocation2 + $0x10] sm:$0xf] %v4602_v22  ;;  %1276 = vrot.lane.b32.xlu1 %v4602_v22, %s5643_s28 }
 0x4be   : > { %1252 = vrot.lane.b32.xlu2 %v4602_v22, %s5649_s27  ;;  %1298 = vrot.lane.b32.xlu0 %v4602_v22, %s5651_s18 }
 0x4bf   : > { %1250 = vrot.lane.b32.xlu1 %v4600_v21, %s5649_s27 }
 0x4c6   : > { %1322 = vperm.xlu2 %4177, %v1319_v23   ;;  %1234 = vrot.lane.b32.xlu0 %v4600_v21, %s5647_s15 }
 0x4c7   : > { %1236 = vrot.lane.b32.xlu1 %v4602_v22, %s5647_s15 }
 0x510   : > { %v1297_v25 = vpop.permute.xlu2 %1296 }
 0x518   : > { %v1253_v43 = vpop.permute.xlu2 %1252 }
 0x520   : > { %v1323_v7 = vpop.permute.xlu2 %1322 }
 0x528   : > { %v1275_v28 = vpop.permute.xlu0 %1274 }
 0x529   : > { %v1277_v29 = vpop.permute.xlu1 %1276 }
 0x52a   : > { %v1278_v30 = vsel %vm458_vm1, %v1275_v28, %v1277_v29  ;;  %v1279_v31 = vsel %vm458_vm1, %v1277_v29, %v1275_v28 }
 0x52b   : > { %v1286_v32 = vmul.f32 %v1282_v26, %v1278_v30  ;;  %v1287_v33 = vmul.f32 %v1283_v27, %v1279_v31  ;;  %v4004_v30 = vld [vmem:[%s5600_s1 + $0x16] sm:$0x3] }
 0x52c   : > { %v1421_v31 = vperm.slane %v4004_v30, 0 }
 0x52d   : > { %v1290_v36 = vrot.slane %v1286_v32, 4  ;;  %v1291_v37 = vrot.slane %v1287_v33, 4  ;;  %v1422_v32 = vperm.slane %v4004_v30, 1  ;;  %v4003_v33 = vld [vmem:[%s5600_s1 + $0x8] sm:$0x3] }
 0x52f   : > { %1294 = vst [vmem:[#allocation2 + $0x18] sm:$0xf0] %v1290_v36 }
 0x530   : > { %1295 = vst [vmem:[#allocation2 + $0x10] sm:$0xf0] %v1291_v37  ;;  %v1299_v42 = vpop.permute.xlu0 %1298 }
 0x531   : > { %v1251_v44 = vpop.permute.xlu1 %1250  ;;  %v1300_v45 = vsel %vm1124_vm11, %v1297_v25, %v1299_v42  ;;  %v1301_v46 = vsel %vm1124_vm11, %v1299_v42, %v1297_v25 }
 0x532   : > { %v1254_v47 = vsel %vm427_vm0, %v1251_v44, %v1253_v43  ;;  %v1255_v48 = vsel %vm427_vm0, %v1253_v43, %v1251_v44  ;;  %v1308_v49 = vmul.f32 %v1304_v38, %v1300_v45  ;;  %v1309_v50 = vmul.f32 %v1305_v39, %v1301_v46  ;;  %v4002_v45 = vld [vmem:[%s5600_s1 + $0x2] sm:$0x3] }
 0x533   : > { %v1262_v51 = vmul.f32 %v1258_v40, %v1255_v48  ;;  %v1263_v52 = vmul.f32 %v1259_v41, %v1254_v47  ;;  %v1403_v39 = vperm.slane %v4003_v33, 0  ;;  %v1404_v40 = vperm.slane %v4003_v33, 1  ;;  %v4008_v33 = vld [vmem:[%s5600_s1 + $0x2] sm:$0x3] }
 0x534   : > { %1310 = vst [vmem:[#allocation2 + $0x48] sm:$0xf] %v1308_v49  ;;  %v1387_v48 = vperm.slane %v4002_v45, 0  ;;  %v1388_v49 = vperm.slane %v4002_v45, 1 }
 0x535   : > { %v1266_v54 = vrot.slane %v1262_v51, 4  ;;  %v1267_v55 = vrot.slane %v1263_v52, 4  ;;  %1311 = vst [vmem:[#allocation2 + $0x28] sm:$0xf] %v1309_v50 }
 0x536   : > { %v1315_v2 = vld [vmem:[#allocation2 + $0x18] sm:$0xff] }
 0x537   : > { %1270 = vst [vmem:[#allocation2 + $0x30] sm:$0xf0] %v1266_v54  ;;  %v1316_v3 = vld [vmem:[#allocation2 + $0x10] sm:$0xff] }
 0x538   : > { %1271 = vst [vmem:[#allocation2] sm:$0xf0] %v1267_v55  ;;  %v1235_v58 = vpop.permute.xlu0 %1234 }
 0x539   : > { %v1237_v59 = vpop.permute.xlu1 %1236 }
 0x53a   : > { %v1238_v60 = vsel %vm1014_vm15, %v1235_v58, %v1237_v59  ;;  %v1239_v61 = vsel %vm1014_vm15, %v1237_v59, %v1235_v58 }
 0x53b   : > { %v1246_v62 = vmul.f32 %v1242_v56, %v1239_v61  ;;  %v1247_v63 = vmul.f32 %v1243_v57, %v1238_v60  ;;  %v1317_v0 = vld [vmem:[#allocation2 + $0x48] sm:$0xf]  ;;  %v1445_v56 = vld [vmem:[%s5607_s8] sm:$0xff] }
 0x53c   : > { %3998 = vmatpush.msk.msra.mxu0 %vm487_vm2, %v1317_v0  ;;  %v1318_v1 = vld [vmem:[#allocation2 + $0x28] sm:$0xf] }
 0x53d   : > { %1248 = vst [vmem:[#allocation2 + $0x30] sm:$0xf] %v1246_v62  ;;  %4000 = vmatpush.msk.msra.mxu1 %vm487_vm2, %v1318_v1 }
 0x53e   : > { %1249 = vst [vmem:[#allocation2] sm:$0xf] %v1247_v63  ;;  %1349 = vmatpush.msra.mxu0 %v1315_v2  ;;  %v4013_v2 = vld [vmem:[%s5608_s9 + $0x8] sm:$0xff] }
 0x53f   : > { %1369 = vmatpush.msra.mxu1 %v1316_v3  ;;  %v4011_v3 = vld [vmem:[%s5600_s1 + $0x1c] sm:$0x3] }
 0x544   : > { %v1313_v5 = vld [vmem:[#allocation2 + $0x30] sm:$0xff] }
 0x545   : > { %1350 = vmatpush.msra.mxu0 %v1313_v5  ;;  %v1314_v6 = vld [vmem:[#allocation2] sm:$0xff]  ;;  %v1568_v5 = vperm.slane %v4011_v3, 0 }
 0x546   : > { %1370 = vmatpush.msra.mxu1 %v1314_v6  ;;  %3999 = vmatmul.msk.f32.vlgmr.msra.gmra.mxu0 %vm5626_vm14, %v1312_v4  ;;  %v1569_v6 = vperm.slane %v4011_v3, 1 }
 0x547   : > { %4001 = vmatmul.msk.f32.vlgmr.msra.gmra.mxu1 %vm5626_vm14, %v1312_v4  ;;  %vm1462_vm14 = vcmask 326656  }
 0x5c3   : > { %v1352_v8 = vpop.f32.mrf.mxu0 }
 0x5c4   : > { %v1353_v10 = vadd.f32 %v1352_v8, %v1323_v7  ;;  %v1372_v11 = vpop.f32.mrf.mxu1 }
 0x5c5   : > { %v1373_v12 = vadd.f32 %v1372_v11, %v1323_v7 }
 0x5c6   : > { %v1375_v13 = vmul.f32 0.01, %v1353_v10 }
 0x5c7   : > { %v1376_v14 = vmul.f32 0.01, %v1373_v12 }
 0x5c8   : > { %v1377_v15 = vmax.f32 %v1353_v10, %v1375_v13 }
 0x5c9   : > { %v1378_v16 = vmax.f32 %v1373_v12, %v1376_v14  ;;  %v4009_v14 = vld [vmem:[%s5600_s1 + $0x8] sm:$0x3] }
 0x5ca   : > { %1413 = vrot.lane.b32.xlu2 %v1377_v15, %s5643_s28  ;;  %1429 = vrot.lane.b32.xlu0 %v1377_v15, %s5651_s18 }
 0x5cb   : > { %1431 = vrot.lane.b32.xlu1 %v1378_v16, %s5651_s18 }
 0x5d2   : > { %1397 = vrot.lane.b32.xlu2 %v1378_v16, %s5649_s27  ;;  %1415 = vrot.lane.b32.xlu0 %v1378_v16, %s5643_s28 }
 0x5d3   : > { %1395 = vrot.lane.b32.xlu1 %v1377_v15, %s5649_s27 }
 0x5da   : > { %1459 = vperm.xlu2 %4177, %v1456_v17   ;;  %1379 = vrot.lane.b32.xlu0 %v1377_v15, %s5647_s15  ;;  %v1535_v17 = vperm.slane %v4009_v14, 1 }
 0x5db   : > { %1381 = vrot.lane.b32.xlu1 %v1378_v16, %s5647_s15 }
 0x624   : > { %v1414_v23 = vpop.permute.xlu2 %1413 }
 0x62c   : > { %v1398_v38 = vpop.permute.xlu2 %1397 }
 0x634   : > { %v1460_v57 = vpop.permute.xlu2 %1459 }
 0x63c   : > { %v1430_v24 = vpop.permute.xlu0 %1429 }
 0x63d   : > { %v1432_v25 = vpop.permute.xlu1 %1431 }
 0x63e   : > { %v1433_v26 = vsel %vm1124_vm11, %v1430_v24, %v1432_v25  ;;  %v1434_v27 = vsel %vm1124_vm11, %v1432_v25, %v1430_v24 }
 0x63f   : > { %v1441_v28 = vmul.f32 %v1437_v19, %v1433_v26  ;;  %v1442_v29 = vmul.f32 %v1438_v20, %v1434_v27 }
 0x641   : > { %1477 = vmatpush.msra.mxu2 %v1441_v28  ;;  %1497 = vmatpush.msra.mxu3 %v1442_v29 }
 0x644   : > { %v1416_v34 = vpop.permute.xlu0 %1415 }
 0x645   : > { %v1396_v35 = vpop.permute.xlu1 %1395  ;;  %v1417_v36 = vsel %vm458_vm1, %v1414_v23, %v1416_v34  ;;  %v1418_v37 = vsel %vm458_vm1, %v1416_v34, %v1414_v23  ;;  %v1518_v34 = vperm.slane %v4008_v33, 0 }
 0x646   : > { %v1425_v41 = vmul.f32 %v1421_v31, %v1417_v36  ;;  %v1426_v42 = vmul.f32 %v1422_v32, %v1418_v37  ;;  %v1399_v43 = vsel %vm427_vm0, %v1396_v35, %v1398_v38  ;;  %v1400_v44 = vsel %vm427_vm0, %v1398_v38, %v1396_v35 }
 0x647   : > { %v1407_v46 = vmul.f32 %v1403_v39, %v1400_v44  ;;  %v1408_v47 = vmul.f32 %v1404_v40, %v1399_v43  ;;  %v1519_v35 = vperm.slane %v4008_v33, 1 }
 0x648   : > { %1478 = vmatpush.msra.mxu2 %v1425_v41  ;;  %1498 = vmatpush.msra.mxu3 %v1426_v42  ;;  %v4012_v42 = vld [vmem:[%s5607_s8 + $0x8] sm:$0xff] }
 0x64a   : > { %1479 = vmatpush.msra.mxu2 %v1377_v15  ;;  %1499 = vmatpush.msra.mxu3 %v1378_v16  ;;  %v4010_v15 = vld [vmem:[%s5600_s1 + $0x16] sm:$0x3]  ;;  %v1534_v16 = vperm.slane %v4009_v14, 0  ;;  %v4020_v14 = vld [vmem:[%s5600_s1 + $0x10] sm:$0x3] }
 0x64b   : > { %v1552_v18 = vperm.slane %v4010_v15, 0  ;;  %v1553_v19 = vperm.slane %v4010_v15, 1 }
 0x64c   : > { %v1380_v50 = vpop.permute.xlu0 %1379  ;;  %1480 = vmatpush.msra.mxu2 %v1407_v46  ;;  %1500 = vmatpush.msra.mxu3 %v1408_v47 }
 0x64d   : > { %v1382_v51 = vpop.permute.xlu1 %1381 }
 0x64e   : > { %v1383_v52 = vsel %vm1014_vm15, %v1380_v50, %v1382_v51  ;;  %v1384_v53 = vsel %vm1014_vm15, %v1382_v51, %v1380_v50 }
 0x64f   : > { %v1391_v54 = vmul.f32 %v1387_v48, %v1384_v53  ;;  %v1392_v55 = vmul.f32 %v1388_v49, %v1383_v52 }
 0x651   : > { %1481 = vmatpush.msra.mxu2 %v1391_v54  ;;  %1501 = vmatpush.msra.mxu3 %v1392_v55 }
 0x652   : > { %4006 = vmatmul.msk.f32.vlgmr.msra.gmra.mxu2 %vm1462_vm14, %v1445_v56  ;;  %4007 = vmatmul.msk.f32.vlgmr.msra.gmra.mxu3 %vm1462_vm14, %v1445_v56 }
 0x6d5   : > { %v1483_v58 = vpop.f32.mrf.mxu2  ;;  %v1503_v59 = vpop.f32.mrf.mxu3 }
 0x6d6   : > { %v1484_v60 = vadd.f32 %v1483_v58, %v1460_v57  ;;  %v1504_v61 = vadd.f32 %v1503_v59, %v1460_v57 }
 0x6d8   : > { %v1506_v62 = vmul.f32 0.01, %v1484_v60  ;;  %v1507_v63 = vmul.f32 0.01, %v1504_v61 }
 0x6da   : > { %v1508_v0 = vmax.f32 %v1484_v60, %v1506_v62  ;;  %v1509_v1 = vmax.f32 %v1504_v61, %v1507_v63 }
 0x6dc   : > { %1542 = vst [vmem:[#allocation2 + $0x48] sm:$0xff] %v1508_v0  ;;  %1562 = vrot.lane.b32.xlu1 %v1509_v1, %s5651_s18  ;;  %1544 = vrot.lane.b32.xlu2 %v1508_v0, %s5643_s28 }
 0x6dd   : > { %1543 = vst [vmem:[#allocation2 + $0x28] sm:$0xff] %v1509_v1  ;;  %1560 = vrot.lane.b32.xlu0 %v1508_v0, %s5651_s18 }
 0x6e4   : > { %1526 = vrot.lane.b32.xlu1 %v1508_v0, %s5649_s27  ;;  %1528 = vrot.lane.b32.xlu2 %v1509_v1, %s5649_s27 }
 0x6e5   : > { %1546 = vrot.lane.b32.xlu0 %v1509_v1, %s5643_s28 }
 0x6ec   : > { %1512 = vrot.lane.b32.xlu1 %v1509_v1, %s5647_s15  ;;  %1592 = vperm.xlu2 %4177, %v4013_v2  }
 0x6ed   : > { %1510 = vrot.lane.b32.xlu0 %v1508_v0, %s5647_s15 }
 0x736   : > { %v1545_v4 = vpop.permute.xlu2 %1544 }
 0x73e   : > { %v1529_v20 = vpop.permute.xlu2 %1528 }
 0x746   : > { %v1593_v43 = vpop.permute.xlu2 %1592 }
 0x74e   : > { %v1563_v7 = vpop.permute.xlu1 %1562 }
 0x74f   : > { %v1561_v8 = vpop.permute.xlu0 %1560 }
 0x750   : > { %v1564_v10 = vsel %vm1124_vm11, %v1561_v8, %v1563_v7  ;;  %v1565_v11 = vsel %vm1124_vm11, %v1563_v7, %v1561_v8 }
 0x751   : > { %v1572_v12 = vmul.f32 %v1568_v5, %v1564_v10  ;;  %v1573_v13 = vmul.f32 %v1569_v6, %v1565_v11 }
 0x753   : > { %1574 = vst [vmem:[#allocation2 + $0x40] sm:$0xff] %v1572_v12  ;;  %1609 = vmatpush.msrb.mxu0 %v1572_v12  ;;  %1629 = vmatpush.msrb.mxu1 %v1573_v13 }
 0x754   : > { %1575 = vst [vmem:[#allocation2 + $0x38] sm:$0xff] %v1573_v13  ;;  %v4023_v13 = vld [vmem:[%s5600_s1 + $0x18] sm:$0x3] }
 0x756   : > { %v1527_v23 = vpop.permute.xlu1 %1526 }
 0x757   : > { %v1530_v24 = vsel %vm427_vm0, %v1527_v23, %v1529_v20  ;;  %v1531_v25 = vsel %vm427_vm0, %v1529_v20, %v1527_v23  ;;  %v1547_v26 = vpop.permute.xlu0 %1546  ;;  %v1748_v20 = vperm.slane %v4020_v14, 0  ;;  %v1749_v23 = vperm.slane %v4020_v14, 1 }
 0x758   : > { %v1538_v27 = vmul.f32 %v1534_v16, %v1531_v25  ;;  %v1539_v28 = vmul.f32 %v1535_v17, %v1530_v24  ;;  %v1548_v29 = vsel %vm458_vm1, %v1545_v4, %v1547_v26  ;;  %v1549_v30 = vsel %vm458_vm1, %v1547_v26, %v1545_v4 }
 0x759   : > { %v1556_v31 = vmul.f32 %v1552_v18, %v1548_v29  ;;  %v1557_v32 = vmul.f32 %v1553_v19, %v1549_v30  ;;  %v1808_v18 = vperm.slane %v4023_v13, 0  ;;  %v1809_v19 = vperm.slane %v4023_v13, 1 }
 0x75a   : > { %1540 = vst [vmem:[#allocation2 + $0x18] sm:$0xff] %v1538_v27 }
 0x75b   : > { %1541 = vst [vmem:[#allocation2 + $0x10] sm:$0xff] %v1539_v28  ;;  %1610 = vmatpush.msrb.mxu0 %v1556_v31  ;;  %1630 = vmatpush.msrb.mxu1 %v1557_v32 }
 0x75c   : > { %1558 = vst [vmem:[#allocation2 + $0x8] sm:$0xff] %v1556_v31 }
 0x75d   : > { %1559 = vst [vmem:[#allocation2 + $0x20] sm:$0xff] %v1557_v32  ;;  %1611 = vmatpush.msrb.mxu0 %v1508_v0  ;;  %1631 = vmatpush.msrb.mxu1 %v1509_v1 }
 0x75e   : > { %v1513_v36 = vpop.permute.xlu1 %1512 }
 0x75f   : > { %v1511_v37 = vpop.permute.xlu0 %1510  ;;  %1612 = vmatpush.msrb.mxu0 %v1538_v27  ;;  %1632 = vmatpush.msrb.mxu1 %v1539_v28 }
 0x760   : > { %v1514_v38 = vsel %vm1014_vm15, %v1511_v37, %v1513_v36  ;;  %v1515_v39 = vsel %vm1014_vm15, %v1513_v36, %v1511_v37 }
 0x761   : > { %v1522_v40 = vmul.f32 %v1518_v34, %v1515_v39  ;;  %v1523_v41 = vmul.f32 %v1519_v35, %v1514_v38  ;;  %v4021_v34 = vld [vmem:[%s5600_s1 + $0x14] sm:$0x3] }
 0x762   : > { %v1770_v38 = vperm.slane %v4021_v34, 0  ;;  %v1771_v39 = vperm.slane %v4021_v34, 1 }
 0x763   : > { %1524 = vst [vmem:[#allocation2 + $0x30] sm:$0xff] %v1522_v40  ;;  %1613 = vmatpush.msrb.mxu0 %v1522_v40  ;;  %1633 = vmatpush.msrb.mxu1 %v1523_v41 }
 0x764   : > { %1525 = vst [vmem:[#allocation2] sm:$0xff] %v1523_v41  ;;  %4014 = vmatmul.msk.f32.vlgmr.msrb.gmra.mxu0 %vm1462_vm14, %v4012_v42  ;;  %4015 = vmatmul.msk.f32.vlgmr.msrb.gmra.mxu1 %vm1462_vm14, %v4012_v42 }
 0x7e1   : > { %v1615_v44 = vpop.f32.mrf.mxu0  ;;  %v1635_v45 = vpop.f32.mrf.mxu1 }
 0x7e2   : > { %v1616_v46 = vadd.f32 %v1615_v44, %v1593_v43  ;;  %v1636_v47 = vadd.f32 %v1635_v45, %v1593_v43 }
 0x7e4   : > { %v1638_v48 = vmul.f32 0.01, %v1616_v46  ;;  %v1639_v49 = vmul.f32 0.01, %v1636_v47 }
 0x7e6   : > { %v1640_v50 = vmax.f32 %v1616_v46, %v1638_v48  ;;  %v1641_v51 = vmax.f32 %v1636_v47, %v1639_v49  ;;  %v4019_v47 = vld [vmem:[%s5600_s1 + $0xe] sm:$0x3]  ;;  %v4017_v49 = vld [vmem:[%s5600_s1 + $0x8] sm:$0x3] }
 0x7e8   : > { %v1644_v52 = vrot.slane %v1640_v50, 4  ;;  %v1645_v53 = vrot.slane %v1641_v51, 4 }
 0x7ea   : > { %v1648_v54 = vadd.f32 %v1644_v52, %v1640_v50  ;;  %v1649_v55 = vadd.f32 %v1645_v53, %v1641_v51  ;;  %v1724_v50 = vperm.slane %v4019_v47, 0  ;;  %v1725_v51 = vperm.slane %v4019_v47, 1  ;;  %v4025_v52 = vld [vmem:[%s5604_s5 + $0xc] sm:$0xf] }
 0x7eb   : > { %v1686_v53 = vperm.slane %v4017_v49, 0 }
 0x7ec   : > { %v1650_v56 = vsub.f32 0.0, %v1648_v54  ;;  %v1651_v57 = vsub.f32 0.0, %v1649_v55  ;;  %v1687_v54 = vperm.slane %v4017_v49, 1  ;;  %v4035_v49 = vld [vmem:[%s5600_s1 + $0x1c] sm:$0x3] }
 0x7ee   : > { %v1652_v58 = vmul.f32 1.442695, %v1650_v56  ;;  %v1654_v59 = vmul.f32 1.442695, %v1651_v57 }
 0x7f0   : > { %4180 = vpow2.f32 %v1652_v58 }
 0x7f1   : > { %4182 = vpow2.f32 %v1654_v59 }
 0x7f6   : > { %v4181_v60 = vpop.eup %4180 }
 0x7f7   : > { %v4183_v61 = vpop.eup %4182  ;;  %v1656_v62 = vadd.f32 1.0, %v4181_v60 }
 0x7f8   : > { %v1657_v63 = vadd.f32 1.0, %v4183_v61 }
 0x7f9   : > { %4184 = vrcp.f32 %v1656_v62 }
 0x7fa   : > { %4186 = vrcp.f32 %v1657_v63 }
 0x7ff   : > { %v4185_v0 = vpop.eup %4184 }
 0x800   : > { %v4187_v1 = vpop.eup %4186  ;;  %v4749_v2 = vmul.f32 %v4185_v0, %v4600_v21 }
 0x801   : > { %v4752_v3 = vmul.f32 %v4187_v1, %v4602_v22  ;;  %v4022_v22 = vld [vmem:[%s5600_s1 + $0x16] sm:$0x3] }
 0x802   : > { %1738 = vst [vmem:[#allocation2 + $0x48] sm:$0xf] %v4749_v2  ;;  %1800 = vrot.lane.b32.xlu2 %v4749_v2, %s5637_s19  ;;  %1778 = vrot.lane.b32.xlu0 %v4749_v2, %s5643_s28  ;;  %v1786_v4 = vperm.slane %v4022_v22, 0  ;;  %v1787_v5 = vperm.slane %v4022_v22, 1 }
 0x803   : > { %1739 = vst [vmem:[#allocation2 + $0x28] sm:$0xf] %v4752_v3  ;;  %1780 = vrot.lane.b32.xlu1 %v4752_v3, %s5643_s28 }
 0x80a   : > { %1742 = vrot.lane.b32.xlu2 %v4752_v3, %s5635_s20  ;;  %1802 = vrot.lane.b32.xlu0 %v4752_v3, %s5637_s19  ;;  %s5670_s19 = smov 17  }
 0x80b   : > { %1740 = vrot.lane.b32.xlu1 %v4749_v2, %s5635_s20  ;;  %s5671_s20 = smov 15  }
 0x812   : > { %1716 = vrot.lane.b32.xlu2 %v4749_v2, %s5633_s24  ;;  %1762 = vrot.lane.b32.xlu0 %v4749_v2, %s5631_s25 }
 0x813   : > { %1764 = vrot.lane.b32.xlu1 %v4752_v3, %s5631_s25  ;;  %s5667_s25 = smov 127  }
 0x81a   : > { %1680 = vrot.lane.b32.xlu2 %v4752_v3, %s5649_s27  ;;  %1718 = vrot.lane.b32.xlu0 %v4752_v3, %s5633_s24  ;;  %s5666_s24 = smov 111  }
 0x81b   : > { %1678 = vrot.lane.b32.xlu1 %v4749_v2, %s5649_s27 }
 0x822   : > { %1662 = vrot.lane.b32.xlu2 %v4749_v2, %s5629_s26  ;;  %1700 = vrot.lane.b32.xlu0 %v4749_v2, %s5627_s29 }
 0x823   : > { %1702 = vrot.lane.b32.xlu1 %v4752_v3, %s5627_s29  ;;  %s5657_s29 = smov 30  }
 0x82a   : > { %1664 = vrot.lane.b32.xlu0 %v4752_v3, %s5629_s26  ;;  %s5668_s26 = smov 1  }
 0x82b   : > { %1832 = vperm.xlu1 %4179, %v4025_v52   ;;  %v2012_v52 = vperm.slane %v4035_v49, 0 }
 0x85c   : > { %v1801_v21 = vpop.permute.xlu2 %1800 }
 0x864   : > { %v1743_v15 = vpop.permute.xlu2 %1742 }
 0x86c   : > { %v1717_v37 = vpop.permute.xlu2 %1716 }
 0x874   : > { %v1779_v6 = vpop.permute.xlu0 %1778  ;;  %v1681_v56 = vpop.permute.xlu2 %1680 }
 0x875   : > { %v1781_v7 = vpop.permute.xlu1 %1780 }
 0x876   : > { %v1782_v8 = vsel %vm458_vm1, %v1779_v6, %v1781_v7  ;;  %v1783_v10 = vsel %vm458_vm1, %v1781_v7, %v1779_v6 }
 0x877   : > { %v1790_v11 = vmul.f32 %v1786_v4, %v1782_v8  ;;  %v1791_v12 = vmul.f32 %v1787_v5, %v1783_v10  ;;  %v4018_v4 = vld [vmem:[%s5600_s1 + $0xa] sm:$0x3] }
 0x878   : > { %v1709_v13 = vperm.slane %v4018_v4, 1 }
 0x879   : > { %v1794_v16 = vrot.slane %v1790_v11, 4  ;;  %v1795_v17 = vrot.slane %v1791_v12, 4  ;;  %v1708_v12 = vperm.slane %v4018_v4, 0 }
 0x87b   : > { %1798 = vst [vmem:[#allocation2 + $0x8] sm:$0xf0] %v1794_v16 }
 0x87c   : > { %1799 = vst [vmem:[#allocation2 + $0x20] sm:$0xf0] %v1795_v17  ;;  %v1803_v24 = vpop.permute.xlu0 %1802 }
 0x87d   : > { %v1741_v25 = vpop.permute.xlu1 %1740  ;;  %v1804_v26 = vsel %vm686_vm4, %v1801_v21, %v1803_v24  ;;  %v1805_v27 = vsel %vm686_vm4, %v1803_v24, %v1801_v21 }
 0x87e   : > { %v1744_v28 = vsel %vm622_vm5, %v1741_v25, %v1743_v15  ;;  %v1745_v29 = vsel %vm622_vm5, %v1743_v15, %v1741_v25  ;;  %v1812_v30 = vmul.f32 %v1808_v18, %v1804_v26  ;;  %v1813_v31 = vmul.f32 %v1809_v19, %v1805_v27  ;;  %v1663_v25 = vpop.permute.xlu2 %1662 }
 0x87f   : > { %v1752_v32 = vmul.f32 %v1748_v20, %v1744_v28  ;;  %v1753_v33 = vmul.f32 %v1749_v23, %v1745_v29  ;;  %v4016_v20 = vld [vmem:[%s5600_s1 + $0x6] sm:$0x3] }
 0x880   : > { %1814 = vst [vmem:[#allocation2 + $0x40] sm:$0xf] %v1812_v30  ;;  %v1670_v23 = vperm.slane %v4016_v20, 0  ;;  %v1671_v24 = vperm.slane %v4016_v20, 1 }
 0x881   : > { %v1756_v35 = vrot.slane %v1752_v32, 4  ;;  %v1757_v36 = vrot.slane %v1753_v33, 4  ;;  %1815 = vst [vmem:[#allocation2 + $0x38] sm:$0xf] %v1813_v31  ;;  %v4024_v33 = vld [vmem:[%s5603_s4 + $0xc] sm:$0xf] }
 0x883   : > { %1760 = vst [vmem:[#allocation2 + $0x48] sm:$0xf0] %v1756_v35 }
 0x884   : > { %1761 = vst [vmem:[#allocation2 + $0x28] sm:$0xf0] %v1757_v36  ;;  %v1763_v40 = vpop.permute.xlu0 %1762 }
 0x885   : > { %v1765_v41 = vpop.permute.xlu1 %1764 }
 0x886   : > { %v1766_v42 = vsel %vm646_vm7, %v1763_v40, %v1765_v41  ;;  %v1767_v43 = vsel %vm646_vm7, %v1765_v41, %v1763_v40 }
 0x887   : > { %v1774_v44 = vmul.f32 %v1770_v38, %v1766_v42  ;;  %v1775_v45 = vmul.f32 %v1771_v39, %v1767_v43  ;;  %v1826_v46 = vld [vmem:[#allocation2 + $0x40] sm:$0xf] }
 0x888   : > { %4026 = vmatpush.msk.msrb.mxu2 %vm487_vm2, %v1826_v46  ;;  %v1827_v48 = vld [vmem:[#allocation2 + $0x38] sm:$0xf] }
 0x889   : > { %1776 = vst [vmem:[#allocation2 + $0x8] sm:$0xf] %v1774_v44  ;;  %4028 = vmatpush.msk.msrb.mxu3 %vm487_vm2, %v1827_v48  ;;  %v4036_v48 = vld [vmem:[%s5600_s1 + $0x1e] sm:$0x3] }
 0x88a   : > { %1777 = vst [vmem:[#allocation2 + $0x20] sm:$0xf] %v1775_v45  ;;  %v1822_v10 = vld [vmem:[#allocation2 + $0x48] sm:$0xff] }
 0x88b   : > { %v1823_v11 = vld [vmem:[#allocation2 + $0x28] sm:$0xff] }
 0x88c   : > { %v1719_v55 = vpop.permute.xlu0 %1718  ;;  %v4038_v45 = vld [vmem:[%s5604_s5 + $0x10] sm:$0xf] }
 0x88d   : > { %v1679_v57 = vpop.permute.xlu1 %1678  ;;  %v1720_v58 = vsel %vm596_vm6, %v1717_v37, %v1719_v55  ;;  %v1721_v59 = vsel %vm596_vm6, %v1719_v55, %v1717_v37 }
 0x88e   : > { %v1682_v60 = vsel %vm427_vm0, %v1679_v57, %v1681_v56  ;;  %v1683_v61 = vsel %vm427_vm0, %v1681_v56, %v1679_v57  ;;  %v1728_v62 = vmul.f32 %v1724_v50, %v1721_v59  ;;  %v1729_v63 = vmul.f32 %v1725_v51, %v1720_v58 }
 0x88f   : > { %v1690_v0 = vmul.f32 %v1686_v53, %v1683_v61  ;;  %v1691_v1 = vmul.f32 %v1687_v54, %v1682_v60  ;;  %v2034_v50 = vperm.slane %v4036_v48, 0  ;;  %v2035_v51 = vperm.slane %v4036_v48, 1  ;;  %v1894_v48 = vld [vmem:[%s5600_s1] sm:$0x3] }
 0x890   : > { %v1732_v21 = vrot.slane %v1728_v62, 4  ;;  %v1824_v22 = vld [vmem:[#allocation2 + $0x8] sm:$0xff]  ;;  %v1733_v7 = vrot.slane %v1729_v63, 4  ;;  %v2013_v53 = vperm.slane %v4035_v49, 1 }
 0x891   : > { %v1694_v5 = vrot.slane %v1690_v0, 4  ;;  %v1695_v6 = vrot.slane %v1691_v1, 4  ;;  %1856 = vmatpush.msrb.mxu2 %v1824_v22  ;;  %v1825_v8 = vld [vmem:[#allocation2 + $0x20] sm:$0xff]  ;;  %v4033_v1 = vld [vmem:[%s5600_s1 + $0x12] sm:$0x3] }
 0x892   : > { %1736 = vst [vmem:[#allocation2 + $0x18] sm:$0xf0] %v1732_v21  ;;  %1876 = vmatpush.msrb.mxu3 %v1825_v8  ;;  %v1974_v4 = vperm.slane %v4033_v1, 0 }
 0x893   : > { %1698 = vst [vmem:[#allocation2 + $0x30] sm:$0xf0] %v1694_v5  ;;  %1857 = vmatpush.msrb.mxu2 %v1822_v10  ;;  %v1975_v5 = vperm.slane %v4033_v1, 1 }
 0x894   : > { %1699 = vst [vmem:[#allocation2] sm:$0xf0] %v1695_v6  ;;  %1877 = vmatpush.msrb.mxu3 %v1823_v11  ;;  %v1701_v14 = vpop.permute.xlu0 %1700 }
 0x895   : > { %1737 = vst [vmem:[#allocation2 + $0x10] sm:$0xf0] %v1733_v7  ;;  %v1703_v15 = vpop.permute.xlu1 %1702 }
 0x896   : > { %v1704_v16 = vsel %vm5642_vm8, %v1701_v14, %v1703_v15  ;;  %v1705_v17 = vsel %vm5642_vm8, %v1703_v15, %v1701_v14  ;;  %v4032_v14 = vld [vmem:[%s5600_s1 + $0xc] sm:$0x3] }
 0x897   : > { %v1712_v18 = vmul.f32 %v1708_v12, %v1705_v17  ;;  %v1713_v19 = vmul.f32 %v1709_v13, %v1704_v16  ;;  %v4034_v17 = vld [vmem:[%s5600_s1 + $0x1a] sm:$0x3]  ;;  %v1950_v20 = vperm.slane %v4032_v14, 0 }
 0x899   : > { %1714 = vst [vmem:[#allocation2 + $0x18] sm:$0xf] %v1712_v18 }
 0x89a   : > { %1715 = vst [vmem:[#allocation2 + $0x10] sm:$0xf] %v1713_v19 }
 0x89c   : > { %v1665_v26 = vpop.permute.xlu0 %1664 }
 0x89d   : > { %v1666_v27 = vsel %vm5641_vm9, %v1663_v25, %v1665_v26  ;;  %v1667_v28 = vsel %vm5641_vm9, %v1665_v26, %v1663_v25  ;;  %v1833_v36 = vpop.permute.xlu1 %1832  ;;  %v1997_v25 = vperm.slane %v4034_v17, 1  ;;  %vm5660_vm9 = vcmp.lt.s32.totalorder %v4314_v9, 98 }
 0x89e   : > { %v1674_v29 = vmul.f32 %v1670_v23, %v1667_v28  ;;  %v1675_v30 = vmul.f32 %v1671_v24, %v1666_v27  ;;  %v1951_v23 = vperm.slane %v4032_v14, 1  ;;  %v1996_v24 = vperm.slane %v4034_v17, 0  ;;  %vm5661_vm8 = vmmov %vm5660_vm9 }
 0x8a0   : > { %1676 = vst [vmem:[#allocation2 + $0x30] sm:$0xf] %v1674_v29  ;;  %v1820_v31 = vld [vmem:[#allocation2 + $0x18] sm:$0xff] }
 0x8a1   : > { %1677 = vst [vmem:[#allocation2] sm:$0xf] %v1675_v30  ;;  %1858 = vmatpush.msrb.mxu2 %v1820_v31  ;;  %v1821_v32 = vld [vmem:[#allocation2 + $0x10] sm:$0xff] }
 0x8a2   : > { %1878 = vmatpush.msrb.mxu3 %v1821_v32 }
 0x8a7   : > { %v1818_v34 = vld [vmem:[#allocation2 + $0x30] sm:$0xff] }
 0x8a8   : > { %1859 = vmatpush.msrb.mxu2 %v1818_v34  ;;  %v1819_v35 = vld [vmem:[#allocation2] sm:$0xff] }
 0x8a9   : > { %1879 = vmatpush.msrb.mxu3 %v1819_v35  ;;  %4027 = vmatmul.msk.f32.vlgmr.msrb.gmra.mxu2 %vm717_vm10, %v4024_v33 }
 0x8aa   : > { %4029 = vmatmul.msk.f32.vlgmr.msrb.gmra.mxu3 %vm717_vm10, %v4024_v33 }
 0x92c   : > { %v1861_v37 = vpop.f32.mrf.mxu2 }
 0x92d   : > { %v1862_v38 = vadd.f32 %v1861_v37, %v1833_v36  ;;  %v1881_v39 = vpop.f32.mrf.mxu3 }
 0x92e   : > { %v1882_v40 = vadd.f32 %v1881_v39, %v1833_v36 }
 0x92f   : > { %v1884_v41 = vmul.f32 0.01, %v1862_v38 }
 0x930   : > { %v1885_v42 = vmul.f32 0.01, %v1882_v40 }
 0x931   : > { %v1886_v43 = vmax.f32 %v1862_v38, %v1884_v41  ;;  %v4030_v38 = vld [vmem:[%s5600_s1 + $0x2] sm:$0x3] }
 0x932   : > { %v1887_v44 = vmax.f32 %v1882_v40, %v1885_v42  ;;  %v1912_v40 = vperm.slane %v4030_v38, 0  ;;  %v1913_v41 = vperm.slane %v4030_v38, 1 }
 0x933   : > { %1964 = vst [vmem:[#allocation2 + $0x48] sm:$0xf] %v1886_v43  ;;  %2026 = vrot.lane.b32.xlu1 %v1886_v43, %s5653_s13  ;;  %2004 = vrot.lane.b32.xlu2 %v1886_v43, %s5651_s18 }
 0x934   : > { %1965 = vst [vmem:[#allocation2 + $0x28] sm:$0xf] %v1887_v44  ;;  %2006 = vrot.lane.b32.xlu0 %v1887_v44, %s5651_s18 }
 0x93b   : > { %1968 = vrot.lane.b32.xlu1 %v1887_v44, %s5654_s23  ;;  %2028 = vrot.lane.b32.xlu2 %v1887_v44, %s5653_s13 }
 0x93c   : > { %1966 = vrot.lane.b32.xlu0 %v1886_v43, %s5654_s23 }
 0x943   : > { %1942 = vrot.lane.b32.xlu1 %v1886_v43, %s5655_s14  ;;  %1988 = vrot.lane.b32.xlu2 %v1886_v43, %s5656_s17 }
 0x944   : > { %1990 = vrot.lane.b32.xlu0 %v1887_v44, %s5656_s17 }
 0x94b   : > { %1906 = vrot.lane.b32.xlu1 %v1887_v44, %s5647_s15  ;;  %1944 = vrot.lane.b32.xlu2 %v1887_v44, %s5655_s14 }
 0x94c   : > { %1904 = vrot.lane.b32.xlu0 %v1886_v43, %s5647_s15 }
 0x953   : > { %1888 = vrot.lane.b32.xlu1 %v1886_v43, %s5645_s16  ;;  %1926 = vrot.lane.b32.xlu2 %v1886_v43, %s5657_s29 }
 0x954   : > { %1928 = vrot.lane.b32.xlu0 %v1887_v44, %s5657_s29 }
 0x95b   : > { %1890 = vrot.lane.b32.xlu2 %v1887_v44, %s5645_s16  ;;  %s5677_s16 = smov 32  }
 0x95c   : > { %2058 = vperm.xlu0 %4178, %v4038_v45  }
 0x98d   : > { %v2005_v46 = vpop.permute.xlu2 %2004 }
 0x995   : > { %v2029_v47 = vpop.permute.xlu2 %2028 }
 0x99d   : > { %v1989_v58 = vpop.permute.xlu2 %1988 }
 0x9a5   : > { %v2027_v54 = vpop.permute.xlu1 %2026  ;;  %v1945_v15 = vpop.permute.xlu2 %1944 }
 0x9a6   : > { %v2007_v55 = vpop.permute.xlu0 %2006  ;;  %v2030_v56 = vsel %vm5640_vm13, %v2027_v54, %v2029_v47  ;;  %v2031_v57 = vsel %vm5640_vm13, %v2029_v47, %v2027_v54 }
 0x9a7   : > { %v2008_v59 = vsel %vm1124_vm11, %v2005_v46, %v2007_v55  ;;  %v2009_v60 = vsel %vm1124_vm11, %v2007_v55, %v2005_v46  ;;  %v2038_v61 = vmul.f32 %v2034_v50, %v2030_v56  ;;  %v2039_v62 = vmul.f32 %v2035_v51, %v2031_v57  ;;  %v4031_v50 = vld [vmem:[%s5600_s1 + $0x4] sm:$0x3] }
 0x9a8   : > { %v2016_v63 = vmul.f32 %v2012_v52, %v2008_v59  ;;  %v2017_v0 = vmul.f32 %v2013_v53, %v2009_v60  ;;  %v1896_v55 = vperm.slane %v1894_v48, 0  ;;  %v1934_v57 = vperm.slane %v4031_v50, 0 }
 0x9a9   : > { %2040 = vst [vmem:[#allocation2 + $0x40] sm:$0xf] %v2038_v61  ;;  %v1897_v59 = vperm.slane %v1894_v48, 1 }
 0x9aa   : > { %v2020_v21 = vrot.slane %v2016_v63, 4  ;;  %v2021_v22 = vrot.slane %v2017_v0, 4  ;;  %2041 = vst [vmem:[#allocation2 + $0x38] sm:$0xf] %v2039_v62 }
 0x9ac   : > { %2024 = vst [vmem:[#allocation2 + $0x8] sm:$0xf0] %v2020_v21 }
 0x9ad   : > { %2025 = vst [vmem:[#allocation2 + $0x20] sm:$0xf0] %v2021_v22  ;;  %v1969_v6 = vpop.permute.xlu1 %1968  ;;  %v1927_v39 = vpop.permute.xlu2 %1926 }
 0x9ae   : > { %v1967_v7 = vpop.permute.xlu0 %1966 }
 0x9af   : > { %v1970_v8 = vsel %vm5639_vm12, %v1967_v7, %v1969_v6  ;;  %v1971_v10 = vsel %vm5639_vm12, %v1969_v6, %v1967_v7  ;;  %vm5658_vm12 = vcmp.lt.s32.totalorder %v4314_v9, 2 }
 0x9b0   : > { %v1978_v11 = vmul.f32 %v1974_v4, %v1970_v8  ;;  %v1979_v12 = vmul.f32 %v1975_v5, %v1971_v10  ;;  %v2052_v13 = vld [vmem:[#allocation2 + $0x40] sm:$0xf]  ;;  %vm5659_vm13 = vmmov %vm5658_vm12  ;;  %v4037_v10 = vld [vmem:[%s5603_s4 + $0x10] sm:$0xf] }
 0x9b1   : > { %4039 = vmatpush.msk.msra.mxu0 %vm487_vm2, %v2052_v13  ;;  %v2053_v16 = vld [vmem:[#allocation2 + $0x38] sm:$0xf] }
 0x9b2   : > { %v1982_v18 = vrot.slane %v1978_v11, 4  ;;  %v1983_v19 = vrot.slane %v1979_v12, 4  ;;  %4041 = vmatpush.msk.msra.mxu1 %vm487_vm2, %v2053_v16 }
 0x9b4   : > { %1986 = vst [vmem:[#allocation2 + $0x48] sm:$0xf0] %v1982_v18 }
 0x9b5   : > { %1987 = vst [vmem:[#allocation2 + $0x28] sm:$0xf0] %v1983_v19  ;;  %v1943_v26 = vpop.permute.xlu1 %1942  ;;  %v1891_v60 = vpop.permute.xlu2 %1890 }
 0x9b6   : > { %v1991_v27 = vpop.permute.xlu0 %1990  ;;  %v1946_v28 = vsel %vm5658_vm12, %v1943_v26, %v1945_v15  ;;  %v1947_v29 = vsel %vm5659_vm13, %v1945_v15, %v1943_v26  ;;  %vm5664_vm12 = vcmask 162816  }
 0x9b7   : > { %v1992_v30 = vsel %vm5660_vm9, %v1989_v58, %v1991_v27  ;;  %v1993_v31 = vsel %vm5661_vm8, %v1991_v27, %v1989_v58  ;;  %v1954_v32 = vmul.f32 %v1950_v20, %v1947_v29  ;;  %v1955_v33 = vmul.f32 %v1951_v23, %v1946_v28  ;;  %vm5665_vm13 = vmmov %vm5664_vm12 }
 0x9b8   : > { %v2000_v34 = vmul.f32 %v1996_v24, %v1992_v30  ;;  %v2001_v35 = vmul.f32 %v1997_v25, %v1993_v31  ;;  %v1935_v58 = vperm.slane %v4031_v50, 1  ;;  %vm5662_vm8 = vcmp.lt.s32.totalorder %v4314_v9, 30  ;;  %v4048_v24 = vld [vmem:[%s5606_s7 + $0x8] sm:$0xff]  ;;  %v4045_v25 = vld [vmem:[%s5600_s1 + $0x16] sm:$0x3] }
 0x9b9   : > { %v1958_v36 = vrot.slane %v1954_v32, 4  ;;  %v1959_v37 = vrot.slane %v1955_v33, 4  ;;  %vm5663_vm9 = vmmov %vm5662_vm8  ;;  %v2162_v27 = vperm.slane %v4045_v25, 0  ;;  %v2163_v28 = vperm.slane %v4045_v25, 1 }
 0x9ba   : > { %2002 = vst [vmem:[#allocation2 + $0x8] sm:$0xf] %v2000_v34 }
 0x9bb   : > { %2003 = vst [vmem:[#allocation2 + $0x20] sm:$0xf] %v2001_v35  ;;  %v2048_v54 = vld [vmem:[#allocation2 + $0x48] sm:$0xff]  ;;  %v4044_v35 = vld [vmem:[%s5600_s1 + $0x8] sm:$0x3] }
 0x9bc   : > { %1962 = vst [vmem:[#allocation2 + $0x18] sm:$0xf0] %v1958_v36  ;;  %v2049_v56 = vld [vmem:[#allocation2 + $0x28] sm:$0xff]  ;;  %v4046_v36 = vld [vmem:[%s5600_s1 + $0x1c] sm:$0x3] }
 0x9bd   : > { %1963 = vst [vmem:[#allocation2 + $0x10] sm:$0xf0] %v1959_v37  ;;  %v1907_v42 = vpop.permute.xlu1 %1906 }
 0x9be   : > { %v1905_v43 = vpop.permute.xlu0 %1904 }
 0x9bf   : > { %v1908_v44 = vsel %vm1014_vm15, %v1905_v43, %v1907_v42  ;;  %v1909_v45 = vsel %vm1014_vm15, %v1907_v42, %v1905_v43  ;;  %v2184_v42 = vperm.slane %v4046_v36, 0  ;;  %v2185_v43 = vperm.slane %v4046_v36, 1 }
 0x9c0   : > { %v1916_v46 = vmul.f32 %v1912_v40, %v1909_v45  ;;  %v1917_v47 = vmul.f32 %v1913_v41, %v1908_v44  ;;  %v2138_v40 = vperm.slane %v4044_v35, 0  ;;  %v2139_v41 = vperm.slane %v4044_v35, 1 }
 0x9c1   : > { %v2050_v49 = vld [vmem:[#allocation2 + $0x8] sm:$0xff] }
 0x9c2   : > { %v1920_v51 = vrot.slane %v1916_v46, 4  ;;  %v1921_v52 = vrot.slane %v1917_v47, 4  ;;  %2082 = vmatpush.msra.mxu0 %v2050_v49  ;;  %v2051_v53 = vld [vmem:[#allocation2 + $0x20] sm:$0xff] }
 0x9c3   : > { %2102 = vmatpush.msra.mxu1 %v2051_v53 }
 0x9c4   : > { %1924 = vst [vmem:[#allocation2 + $0x30] sm:$0xf0] %v1920_v51  ;;  %2083 = vmatpush.msra.mxu0 %v2048_v54  ;;  %v4043_v54 = vld [vmem:[%s5600_s1 + $0x2] sm:$0x3] }
 0x9c5   : > { %1925 = vst [vmem:[#allocation2] sm:$0xf0] %v1921_v52  ;;  %2103 = vmatpush.msra.mxu1 %v2049_v56  ;;  %v1889_v61 = vpop.permute.xlu1 %1888 }
 0x9c6   : > { %v1929_v62 = vpop.permute.xlu0 %1928  ;;  %v1892_v63 = vsel %vm997_vm3, %v1889_v61, %v1891_v60  ;;  %v1893_v0 = vsel %vm997_vm3, %v1891_v60, %v1889_v61 }
 0x9c7   : > { %v1930_v1 = vsel %vm5662_vm8, %v1927_v39, %v1929_v62  ;;  %v1931_v21 = vsel %vm5663_vm9, %v1929_v62, %v1927_v39  ;;  %v1900_v22 = vmul.f32 %v1896_v55, %v1893_v0  ;;  %v1901_v6 = vmul.f32 %v1897_v59, %v1892_v63 }
 0x9c8   : > { %v1938_v4 = vmul.f32 %v1934_v57, %v1931_v21  ;;  %v1939_v5 = vmul.f32 %v1935_v58, %v1930_v1  ;;  %v2122_v57 = vperm.slane %v4043_v54, 0  ;;  %v2123_v58 = vperm.slane %v4043_v54, 1 }
 0x9c9   : > { %1902 = vst [vmem:[#allocation2 + $0x30] sm:$0xf] %v1900_v22  ;;  %vm5672_vm8 = vcmp.lt.s32.totalorder %v4314_v9, 15 }
 0x9ca   : > { %1940 = vst [vmem:[#allocation2 + $0x18] sm:$0xf] %v1938_v4  ;;  %vm5673_vm9 = vmmov %vm5672_vm8 }
 0x9cb   : > { %1941 = vst [vmem:[#allocation2 + $0x10] sm:$0xf] %v1939_v5  ;;  %v4047_v5 = vld [vmem:[%s5605_s6 + $0x8] sm:$0xff] }
 0x9cc   : > { %1903 = vst [vmem:[#allocation2] sm:$0xf] %v1901_v6 }
 0x9ce   : > { %v2059_v13 = vpop.permute.xlu0 %2058 }
 0x9d0   : > { %v2044_v11 = vld [vmem:[#allocation2 + $0x30] sm:$0xff] }
 0x9d1   : > { %v2046_v7 = vld [vmem:[#allocation2 + $0x18] sm:$0xff] }
 0x9d2   : > { %2084 = vmatpush.msra.mxu0 %v2046_v7  ;;  %v2047_v8 = vld [vmem:[#allocation2 + $0x10] sm:$0xff] }
 0x9d3   : > { %2104 = vmatpush.msra.mxu1 %v2047_v8  ;;  %v2045_v12 = vld [vmem:[#allocation2] sm:$0xff] }
 0x9d4   : > { %2085 = vmatpush.msra.mxu0 %v2044_v11 }
 0x9d5   : > { %2105 = vmatpush.msra.mxu1 %v2045_v12  ;;  %4040 = vmatmul.msk.f32.vlgmr.msra.gmra.mxu0 %vm717_vm10, %v4037_v10 }
 0x9d6   : > { %4042 = vmatmul.msk.f32.vlgmr.msra.gmra.mxu1 %vm717_vm10, %v4037_v10 }
 0xa52   : > { %v2087_v14 = vpop.f32.mrf.mxu0 }
 0xa53   : > { %v2088_v15 = vadd.f32 %v2087_v14, %v2059_v13  ;;  %v2107_v16 = vpop.f32.mrf.mxu1 }
 0xa54   : > { %v2108_v17 = vadd.f32 %v2107_v16, %v2059_v13 }
 0xa55   : > { %v2110_v18 = vmul.f32 0.01, %v2088_v15 }
 0xa56   : > { %v2111_v19 = vmul.f32 0.01, %v2108_v17 }
 0xa57   : > { %v4936_v20 = vmax.f32 %v2088_v15, %v2110_v18  ;;  %v4058_v18 = vld [vmem:[%s5608_s9 + $0x10] sm:$0xff] }
 0xa58   : > { %v4938_v23 = vmax.f32 %v2108_v17, %v2111_v19  ;;  %v4056_v19 = vld [vmem:[%s5600_s1 + $0x1c] sm:$0x3] }
 0xa59   : > { %2152 = vst [vmem:[#allocation2 + $0x18] sm:$0xf] %v4936_v20  ;;  %2176 = vrot.lane.b32.xlu0 %v4936_v20, %s5651_s18  ;;  %2154 = vrot.lane.b32.xlu1 %v4936_v20, %s5643_s28  ;;  %v2318_v25 = vperm.slane %v4056_v19, 0 }
 0xa5a   : > { %2153 = vst [vmem:[#allocation2 + $0x10] sm:$0xf] %v4938_v23  ;;  %2156 = vrot.lane.b32.xlu2 %v4938_v23, %s5643_s28 }
 0xa61   : > { %2132 = vrot.lane.b32.xlu0 %v4938_v23, %s5649_s27  ;;  %2178 = vrot.lane.b32.xlu1 %v4938_v23, %s5651_s18 }
 0xa62   : > { %2130 = vrot.lane.b32.xlu2 %v4936_v20, %s5649_s27 }
 0xa69   : > { %2204 = vperm.xlu0 %4178, %v4048_v24   ;;  %2114 = vrot.lane.b32.xlu1 %v4936_v20, %s5647_s15 }
 0xa6a   : > { %2116 = vrot.lane.b32.xlu2 %v4938_v23, %s5647_s15 }
 0xab4   : > { %v2157_v26 = vpop.permute.xlu2 %2156 }
 0xabc   : > { %v2131_v39 = vpop.permute.xlu2 %2130 }
 0xac4   : > { %v2117_v59 = vpop.permute.xlu2 %2116 }
 0xacb   : > { %v2177_v29 = vpop.permute.xlu0 %2176  ;;  %v2155_v30 = vpop.permute.xlu1 %2154 }
 0xacc   : > { %v2158_v31 = vsel %vm458_vm1, %v2155_v30, %v2157_v26  ;;  %v2159_v32 = vsel %vm458_vm1, %v2157_v26, %v2155_v30  ;;  %v2319_v26 = vperm.slane %v4056_v19, 1 }
 0xacd   : > { %v2166_v33 = vmul.f32 %v2162_v27, %v2158_v31  ;;  %v2167_v34 = vmul.f32 %v2163_v28, %v2159_v32 }
 0xacf   : > { %v2170_v37 = vrot.slane %v2166_v33, 4  ;;  %v2171_v38 = vrot.slane %v2167_v34, 4  ;;  %v4055_v33 = vld [vmem:[%s5600_s1 + $0x16] sm:$0x3] }
 0xad0   : > { %v2302_v35 = vperm.slane %v4055_v33, 0  ;;  %v2303_v36 = vperm.slane %v4055_v33, 1 }
 0xad1   : > { %2174 = vst [vmem:[#allocation2 + $0x18] sm:$0xf0] %v2170_v37  ;;  %v4054_v37 = vld [vmem:[%s5600_s1 + $0x8] sm:$0x3] }
 0xad2   : > { %2175 = vst [vmem:[#allocation2 + $0x10] sm:$0xf0] %v2171_v38 }
 0xad3   : > { %v2133_v44 = vpop.permute.xlu0 %2132  ;;  %v2179_v45 = vpop.permute.xlu1 %2178 }
 0xad4   : > { %v2134_v46 = vsel %vm427_vm0, %v2131_v39, %v2133_v44  ;;  %v2135_v47 = vsel %vm427_vm0, %v2133_v44, %v2131_v39  ;;  %v2180_v48 = vsel %vm1124_vm11, %v2177_v29, %v2179_v45  ;;  %v2181_v49 = vsel %vm1124_vm11, %v2179_v45, %v2177_v29 }
 0xad5   : > { %v2142_v50 = vmul.f32 %v2138_v40, %v2135_v47  ;;  %v2143_v51 = vmul.f32 %v2139_v41, %v2134_v46  ;;  %v2188_v52 = vmul.f32 %v2184_v42, %v2180_v48  ;;  %v2189_v53 = vmul.f32 %v2185_v43, %v2181_v49  ;;  %v4053_v48 = vld [vmem:[%s5600_s1 + $0x2] sm:$0x3] }
 0xad6   : > { %v2284_v42 = vperm.slane %v4054_v37, 0  ;;  %v2285_v43 = vperm.slane %v4054_v37, 1 }
 0xad7   : > { %v2146_v55 = vrot.slane %v2142_v50, 4  ;;  %v2147_v56 = vrot.slane %v2143_v51, 4  ;;  %2190 = vst [vmem:[#allocation2 + $0x48] sm:$0xf] %v2188_v52  ;;  %v2268_v51 = vperm.slane %v4053_v48, 0  ;;  %v2269_v52 = vperm.slane %v4053_v48, 1 }
 0xad8   : > { %2191 = vst [vmem:[#allocation2 + $0x28] sm:$0xf] %v2189_v53  ;;  %v2196_v22 = vld [vmem:[#allocation2 + $0x18] sm:$0xff] }
 0xad9   : > { %2150 = vst [vmem:[#allocation2 + $0x30] sm:$0xf0] %v2146_v55  ;;  %v2197_v4 = vld [vmem:[#allocation2 + $0x10] sm:$0xff] }
 0xada   : > { %2151 = vst [vmem:[#allocation2] sm:$0xf0] %v2147_v56 }
 0xadb   : > { %v2115_v60 = vpop.permute.xlu1 %2114  ;;  %v2205_v8 = vpop.permute.xlu0 %2204 }
 0xadc   : > { %v2118_v61 = vsel %vm1014_vm15, %v2115_v60, %v2117_v59  ;;  %v2119_v62 = vsel %vm1014_vm15, %v2117_v59, %v2115_v60  ;;  %v4057_v59 = vld [vmem:[%s5607_s8 + $0x10] sm:$0xff] }
 0xadd   : > { %v2126_v63 = vmul.f32 %v2122_v57, %v2119_v62  ;;  %v2127_v0 = vmul.f32 %v2123_v58, %v2118_v61 }
 0xade   : > { %v2198_v1 = vld [vmem:[#allocation2 + $0x48] sm:$0xf] }
 0xadf   : > { %2128 = vst [vmem:[#allocation2 + $0x30] sm:$0xf] %v2126_v63  ;;  %4049 = vmatpush.msk.msra.mxu2 %vm487_vm2, %v2198_v1  ;;  %v2199_v21 = vld [vmem:[#allocation2 + $0x28] sm:$0xf] }
 0xae0   : > { %2129 = vst [vmem:[#allocation2] sm:$0xf] %v2127_v0  ;;  %4051 = vmatpush.msk.msra.mxu3 %vm487_vm2, %v2199_v21 }
 0xae1   : > { %2230 = vmatpush.msra.mxu2 %v2196_v22 }
 0xae2   : > { %2250 = vmatpush.msra.mxu3 %v2197_v4 }
 0xae6   : > { %v2194_v6 = vld [vmem:[#allocation2 + $0x30] sm:$0xff] }
 0xae7   : > { %2231 = vmatpush.msra.mxu2 %v2194_v6  ;;  %v2195_v7 = vld [vmem:[#allocation2] sm:$0xff]  ;;  %v4064_v6 = vld [vmem:[%s5600_s1 + $0x1c] sm:$0x3] }
 0xae8   : > { %2251 = vmatpush.msra.mxu3 %v2195_v7  ;;  %4050 = vmatmul.msk.f32.vlgmr.msra.gmra.mxu2 %vm5664_vm12, %v4047_v5  ;;  %vm5674_vm12 = vcmp.lt.s32.totalorder %v4314_v9, 17 }
 0xae9   : > { %4052 = vmatmul.msk.f32.vlgmr.msra.gmra.mxu3 %vm5665_vm13, %v4047_v5  ;;  %v4066_v5 = vld [vmem:[%s5608_s9 + $0x18] sm:$0xff]  ;;  %vm5675_vm13 = vmmov %vm5674_vm12 }
 0xb6b   : > { %v2233_v10 = vpop.f32.mrf.mxu2 }
 0xb6c   : > { %v2234_v11 = vadd.f32 %v2233_v10, %v2205_v8  ;;  %v2253_v12 = vpop.f32.mrf.mxu3  ;;  %v2451_v10 = vperm.slane %v4064_v6, 1 }
 0xb6d   : > { %v2254_v13 = vadd.f32 %v2253_v12, %v2205_v8  ;;  %v2450_v8 = vperm.slane %v4064_v6, 0 }
 0xb6e   : > { %v2256_v14 = vmul.f32 0.01, %v2234_v11 }
 0xb6f   : > { %v2257_v15 = vmul.f32 0.01, %v2254_v13 }
 0xb70   : > { %v2258_v16 = vmax.f32 %v2234_v11, %v2256_v14 }
 0xb71   : > { %v2259_v17 = vmax.f32 %v2254_v13, %v2257_v15 }
 0xb72   : > { %2294 = vrot.lane.b32.xlu0 %v2258_v16, %s5643_s28  ;;  %2310 = vrot.lane.b32.xlu1 %v2258_v16, %s5651_s18 }
 0xb73   : > { %2312 = vrot.lane.b32.xlu2 %v2259_v17, %s5651_s18 }
 0xb7a   : > { %2278 = vrot.lane.b32.xlu0 %v2259_v17, %s5649_s27  ;;  %2296 = vrot.lane.b32.xlu1 %v2259_v17, %s5643_s28 }
 0xb7b   : > { %2276 = vrot.lane.b32.xlu2 %v2258_v16, %s5649_s27 }
 0xb82   : > { %2342 = vperm.xlu0 %4178, %v4058_v18   ;;  %2260 = vrot.lane.b32.xlu1 %v2258_v16, %s5647_s15  ;;  %v4063_v18 = vld [vmem:[%s5600_s1 + $0x16] sm:$0x3] }
 0xb83   : > { %2262 = vrot.lane.b32.xlu2 %v2259_v17, %s5647_s15 }
 0xbcd   : > { %v2313_v24 = vpop.permute.xlu2 %2312 }
 0xbd5   : > { %v2277_v34 = vpop.permute.xlu2 %2276 }
 0xbdd   : > { %v2263_v53 = vpop.permute.xlu2 %2262 }
 0xbe4   : > { %v2295_v27 = vpop.permute.xlu0 %2294  ;;  %v2311_v28 = vpop.permute.xlu1 %2310 }
 0xbe5   : > { %v2314_v29 = vsel %vm1124_vm11, %v2311_v28, %v2313_v24  ;;  %v2315_v30 = vsel %vm1124_vm11, %v2313_v24, %v2311_v28 }
 0xbe6   : > { %v2322_v31 = vmul.f32 %v2318_v25, %v2314_v29  ;;  %v2323_v32 = vmul.f32 %v2319_v26, %v2315_v30  ;;  %v2434_v26 = vperm.slane %v4063_v18, 0 }
 0xbe8   : > { %2359 = vmatpush.msrb.mxu0 %v2322_v31  ;;  %2379 = vmatpush.msrb.mxu1 %v2323_v32 }
 0xbec   : > { %v2279_v38 = vpop.permute.xlu0 %2278  ;;  %v2297_v39 = vpop.permute.xlu1 %2296 }
 0xbed   : > { %v2298_v40 = vsel %vm458_vm1, %v2295_v27, %v2297_v39  ;;  %v2299_v41 = vsel %vm458_vm1, %v2297_v39, %v2295_v27  ;;  %v2280_v46 = vsel %vm427_vm0, %v2277_v34, %v2279_v38  ;;  %v2281_v47 = vsel %vm427_vm0, %v2279_v38, %v2277_v34  ;;  %v4061_v38 = vld [vmem:[%s5600_s1 + $0x2] sm:$0x3] }
 0xbee   : > { %v2306_v44 = vmul.f32 %v2302_v35, %v2298_v40  ;;  %v2307_v45 = vmul.f32 %v2303_v36, %v2299_v41  ;;  %v2288_v49 = vmul.f32 %v2284_v42, %v2281_v47  ;;  %v2289_v50 = vmul.f32 %v2285_v43, %v2280_v46  ;;  %v4065_v47 = vld [vmem:[%s5607_s8 + $0x18] sm:$0xff] }
 0xbef   : > { %v2435_v27 = vperm.slane %v4063_v18, 1  ;;  %v2400_v39 = vperm.slane %v4061_v38, 0  ;;  %v2401_v40 = vperm.slane %v4061_v38, 1 }
 0xbf0   : > { %2360 = vmatpush.msrb.mxu0 %v2306_v44  ;;  %2380 = vmatpush.msrb.mxu1 %v2307_v45 }
 0xbf2   : > { %2361 = vmatpush.msrb.mxu0 %v2258_v16  ;;  %2381 = vmatpush.msrb.mxu1 %v2259_v17  ;;  %v4062_v17 = vld [vmem:[%s5600_s1 + $0x8] sm:$0x3] }
 0xbf3   : > { %v2416_v19 = vperm.slane %v4062_v17, 0  ;;  %v2417_v24 = vperm.slane %v4062_v17, 1 }
 0xbf4   : > { %v2261_v54 = vpop.permute.xlu1 %2260  ;;  %2362 = vmatpush.msrb.mxu0 %v2288_v49  ;;  %2382 = vmatpush.msrb.mxu1 %v2289_v50  ;;  %v2343_v60 = vpop.permute.xlu0 %2342 }
 0xbf5   : > { %v2264_v55 = vsel %vm1014_vm15, %v2261_v54, %v2263_v53  ;;  %v2265_v56 = vsel %vm1014_vm15, %v2263_v53, %v2261_v54 }
 0xbf6   : > { %v2272_v57 = vmul.f32 %v2268_v51, %v2265_v56  ;;  %v2273_v58 = vmul.f32 %v2269_v52, %v2264_v55 }
 0xbf8   : > { %2363 = vmatpush.msrb.mxu0 %v2272_v57  ;;  %2383 = vmatpush.msrb.mxu1 %v2273_v58 }
 0xbf9   : > { %4059 = vmatmul.msk.f32.vlgmr.msrb.gmra.mxu0 %vm1462_vm14, %v4057_v59  ;;  %4060 = vmatmul.msk.f32.vlgmr.msrb.gmra.mxu1 %vm1462_vm14, %v4057_v59 }
 0xc76   : > { %v2365_v61 = vpop.f32.mrf.mxu0  ;;  %v2385_v62 = vpop.f32.mrf.mxu1 }
 0xc77   : > { %v2366_v63 = vadd.f32 %v2365_v61, %v2343_v60  ;;  %v2386_v0 = vadd.f32 %v2385_v62, %v2343_v60 }
 0xc79   : > { %v2388_v1 = vmul.f32 0.01, %v2366_v63  ;;  %v2389_v21 = vmul.f32 0.01, %v2386_v0 }
 0xc7b   : > { %v2390_v22 = vmax.f32 %v2366_v63, %v2388_v1  ;;  %v2391_v4 = vmax.f32 %v2386_v0, %v2389_v21 }
 0xc7d   : > { %2424 = vst [vmem:[#allocation2 + $0x48] sm:$0xff] %v2390_v22  ;;  %2444 = vrot.lane.b32.xlu2 %v2391_v4, %s5651_s18  ;;  %2426 = vrot.lane.b32.xlu0 %v2390_v22, %s5643_s28 }
 0xc7e   : > { %2425 = vst [vmem:[#allocation2 + $0x28] sm:$0xff] %v2391_v4  ;;  %2442 = vrot.lane.b32.xlu1 %v2390_v22, %s5651_s18 }
 0xc85   : > { %2408 = vrot.lane.b32.xlu2 %v2390_v22, %s5649_s27  ;;  %2410 = vrot.lane.b32.xlu0 %v2391_v4, %s5649_s27 }
 0xc86   : > { %2428 = vrot.lane.b32.xlu1 %v2391_v4, %s5643_s28 }
 0xc8d   : > { %2394 = vrot.lane.b32.xlu2 %v2391_v4, %s5647_s15  ;;  %2474 = vperm.xlu0 %4178, %v4066_v5  }
 0xc8e   : > { %2392 = vrot.lane.b32.xlu1 %v2390_v22, %s5647_s15 }
 0xcd7   : > { %v2445_v7 = vpop.permute.xlu2 %2444 }
 0xcdf   : > { %v2409_v25 = vpop.permute.xlu2 %2408 }
 0xce7   : > { %v2395_v41 = vpop.permute.xlu2 %2394 }
 0xcef   : > { %v2427_v11 = vpop.permute.xlu0 %2426 }
 0xcf0   : > { %v2443_v12 = vpop.permute.xlu1 %2442 }
 0xcf1   : > { %v2446_v13 = vsel %vm1124_vm11, %v2443_v12, %v2445_v7  ;;  %v2447_v14 = vsel %vm1124_vm11, %v2445_v7, %v2443_v12 }
 0xcf2   : > { %v2454_v15 = vmul.f32 %v2450_v8, %v2446_v13  ;;  %v2455_v16 = vmul.f32 %v2451_v10, %v2447_v14  ;;  %v4075_v10 = vld [vmem:[%s5600_s1 + $0x16] sm:$0x3] }
 0xcf3   : > { %v2669_v12 = vperm.slane %v4075_v10, 1 }
 0xcf4   : > { %2456 = vst [vmem:[#allocation2 + $0x40] sm:$0xff] %v2454_v15  ;;  %2491 = vmatpush.msrb.mxu2 %v2454_v15  ;;  %2511 = vmatpush.msrb.mxu3 %v2455_v16 }
 0xcf5   : > { %2457 = vst [vmem:[#allocation2 + $0x38] sm:$0xff] %v2455_v16 }
 0xcf7   : > { %v2411_v28 = vpop.permute.xlu0 %2410 }
 0xcf8   : > { %v2412_v29 = vsel %vm427_vm0, %v2409_v25, %v2411_v28  ;;  %v2413_v30 = vsel %vm427_vm0, %v2411_v28, %v2409_v25  ;;  %v2429_v31 = vpop.permute.xlu1 %2428  ;;  %v4076_v25 = vld [vmem:[%s5600_s1 + $0x18] sm:$0x3] }
 0xcf9   : > { %v2420_v32 = vmul.f32 %v2416_v19, %v2413_v30  ;;  %v2421_v33 = vmul.f32 %v2417_v24, %v2412_v29  ;;  %v2430_v34 = vsel %vm458_vm1, %v2427_v11, %v2429_v31  ;;  %v2431_v35 = vsel %vm458_vm1, %v2429_v31, %v2427_v11  ;;  %v4073_v24 = vld [vmem:[%s5600_s1 + $0x10] sm:$0x3] }
 0xcfa   : > { %v2438_v36 = vmul.f32 %v2434_v26, %v2430_v34  ;;  %v2439_v37 = vmul.f32 %v2435_v27, %v2431_v35  ;;  %v2668_v11 = vperm.slane %v4075_v10, 0  ;;  %v2630_v28 = vperm.slane %v4073_v24, 0 }
 0xcfb   : > { %2422 = vst [vmem:[#allocation2 + $0x18] sm:$0xff] %v2420_v32  ;;  %v2631_v29 = vperm.slane %v4073_v24, 1  ;;  %v2690_v30 = vperm.slane %v4076_v25, 0  ;;  %v2691_v31 = vperm.slane %v4076_v25, 1 }
 0xcfc   : > { %2423 = vst [vmem:[#allocation2 + $0x10] sm:$0xff] %v2421_v33  ;;  %2492 = vmatpush.msrb.mxu2 %v2438_v36  ;;  %2512 = vmatpush.msrb.mxu3 %v2439_v37 }
 0xcfd   : > { %2440 = vst [vmem:[#allocation2 + $0x8] sm:$0xff] %v2438_v36 }
 0xcfe   : > { %2441 = vst [vmem:[#allocation2 + $0x20] sm:$0xff] %v2439_v37  ;;  %2493 = vmatpush.msrb.mxu2 %v2390_v22  ;;  %2513 = vmatpush.msrb.mxu3 %v2391_v4 }
 0xcff   : > { %v2475_v48 = vpop.permute.xlu0 %2474 }
 0xd00   : > { %v2393_v42 = vpop.permute.xlu1 %2392  ;;  %2494 = vmatpush.msrb.mxu2 %v2420_v32  ;;  %2514 = vmatpush.msrb.mxu3 %v2421_v33 }
 0xd01   : > { %v2396_v43 = vsel %vm1014_vm15, %v2393_v42, %v2395_v41  ;;  %v2397_v44 = vsel %vm1014_vm15, %v2395_v41, %v2393_v42  ;;  %v4074_v42 = vld [vmem:[%s5600_s1 + $0x14] sm:$0x3] }
 0xd02   : > { %v2404_v45 = vmul.f32 %v2400_v39, %v2397_v44  ;;  %v2405_v46 = vmul.f32 %v2401_v40, %v2396_v43 }
 0xd04   : > { %2406 = vst [vmem:[#allocation2 + $0x30] sm:$0xff] %v2404_v45  ;;  %2495 = vmatpush.msrb.mxu2 %v2404_v45  ;;  %2515 = vmatpush.msrb.mxu3 %v2405_v46 }
 0xd05   : > { %2407 = vst [vmem:[#allocation2] sm:$0xff] %v2405_v46  ;;  %4067 = vmatmul.msk.f32.vlgmr.msrb.gmra.mxu2 %vm1462_vm14, %v4065_v47  ;;  %4068 = vmatmul.msk.f32.vlgmr.msrb.gmra.mxu3 %vm1462_vm14, %v4065_v47  ;;  %v2652_v46 = vperm.slane %v4074_v42, 0  ;;  %v2653_v47 = vperm.slane %v4074_v42, 1  ;;  %v4077_v42 = vld [vmem:[%s5603_s4 + $0x14] sm:$0xf] }
 0xd88   : > { %v2497_v49 = vpop.f32.mrf.mxu2  ;;  %v2517_v50 = vpop.f32.mrf.mxu3 }
 0xd89   : > { %v2498_v51 = vadd.f32 %v2497_v49, %v2475_v48  ;;  %v2518_v52 = vadd.f32 %v2517_v50, %v2475_v48 }
 0xd8b   : > { %v2520_v53 = vmul.f32 0.01, %v2498_v51  ;;  %v2521_v54 = vmul.f32 0.01, %v2518_v52 }
 0xd8d   : > { %v2522_v55 = vmax.f32 %v2498_v51, %v2520_v53  ;;  %v2523_v56 = vmax.f32 %v2518_v52, %v2521_v54 }
 0xd8f   : > { %v2526_v57 = vrot.slane %v2522_v55, 4  ;;  %v2527_v58 = vrot.slane %v2523_v56, 4 }
 0xd91   : > { %v2530_v59 = vadd.f32 %v2526_v57, %v2522_v55  ;;  %v2531_v60 = vadd.f32 %v2527_v58, %v2523_v56  ;;  %v4070_v55 = vld [vmem:[%s5600_s1 + $0x8] sm:$0x3]  ;;  %v4072_v56 = vld [vmem:[%s5600_s1 + $0xe] sm:$0x3] }
 0xd93   : > { %v2532_v61 = vsub.f32 0.0, %v2530_v59  ;;  %v2533_v62 = vsub.f32 0.0, %v2531_v60  ;;  %v2568_v59 = vperm.slane %v4070_v55, 0  ;;  %v2569_v60 = vperm.slane %v4070_v55, 1 }
 0xd95   : > { %v2534_v63 = vmul.f32 1.442695, %v2532_v61  ;;  %v2536_v0 = vmul.f32 1.442695, %v2533_v62  ;;  %v2606_v61 = vperm.slane %v4072_v56, 0  ;;  %v2607_v62 = vperm.slane %v4072_v56, 1 }
 0xd96   : > { %v4088_v56 = vld [vmem:[%s5600_s1 + $0x1c] sm:$0x3] }
 0xd97   : > { %4188 = vpow2.f32 %v2534_v63 }
 0xd98   : > { %4190 = vpow2.f32 %v2536_v0 }
 0xd9d   : > { %v4189_v1 = vpop.eup %4188 }
 0xd9e   : > { %v4191_v21 = vpop.eup %4190  ;;  %v2538_v22 = vadd.f32 1.0, %v4189_v1 }
 0xd9f   : > { %v2539_v4 = vadd.f32 1.0, %v4191_v21 }
 0xda0   : > { %4192 = vrcp.f32 %v2538_v22 }
 0xda1   : > { %4194 = vrcp.f32 %v2539_v4 }
 0xda6   : > { %v4193_v5 = vpop.eup %4192 }
 0xda7   : > { %v4195_v6 = vpop.eup %4194  ;;  %v5085_v7 = vmul.f32 %v4193_v5, %v4936_v20  ;;  %v4078_v20 = vld [vmem:[%s5604_s5 + $0x14] sm:$0xf] }
 0xda8   : > { %v5088_v8 = vmul.f32 %v4195_v6, %v4938_v23 }
 0xda9   : > { %2620 = vst [vmem:[#allocation2 + $0x48] sm:$0xf] %v5085_v7  ;;  %2682 = vrot.lane.b32.xlu0 %v5085_v7, %s5666_s24  ;;  %2660 = vrot.lane.b32.xlu1 %v5085_v7, %s5643_s28 }
 0xdaa   : > { %2621 = vst [vmem:[#allocation2 + $0x28] sm:$0xf] %v5088_v8  ;;  %2662 = vrot.lane.b32.xlu2 %v5088_v8, %s5643_s28  ;;  %s5676_s28 = smov 96  }
 0xdb1   : > { %2624 = vrot.lane.b32.xlu0 %v5088_v8, %s5667_s25  ;;  %2684 = vrot.lane.b32.xlu1 %v5088_v8, %s5666_s24 }
 0xdb2   : > { %2622 = vrot.lane.b32.xlu2 %v5085_v7, %s5667_s25 }
 0xdb9   : > { %2598 = vrot.lane.b32.xlu0 %v5085_v7, %s5668_s26  ;;  %2644 = vrot.lane.b32.xlu1 %v5085_v7, %s5669_s30 }
 0xdba   : > { %2646 = vrot.lane.b32.xlu2 %v5088_v8, %s5669_s30 }
 0xdc1   : > { %2562 = vrot.lane.b32.xlu0 %v5088_v8, %s5649_s27  ;;  %2600 = vrot.lane.b32.xlu1 %v5088_v8, %s5668_s26 }
 0xdc2   : > { %2560 = vrot.lane.b32.xlu2 %v5085_v7, %s5649_s27  ;;  %s5678_s27 = smov 34  }
 0xdc9   : > { %2544 = vrot.lane.b32.xlu0 %v5085_v7, %s5670_s19  ;;  %2582 = vrot.lane.b32.xlu1 %v5085_v7, %s5671_s20 }
 0xdca   : > { %2584 = vrot.lane.b32.xlu2 %v5088_v8, %s5671_s20 }
 0xdd1   : > { %2546 = vrot.lane.b32.xlu1 %v5088_v8, %s5670_s19 }
 0xdd2   : > { %2714 = vperm.xlu2 %4177, %v4078_v20  }
 0xe04   : > { %v2663_v23 = vpop.permute.xlu2 %2662 }
 0xe0c   : > { %v2623_v17 = vpop.permute.xlu2 %2622 }
 0xe14   : > { %v2647_v43 = vpop.permute.xlu2 %2646 }
 0xe1b   : > { %v2683_v13 = vpop.permute.xlu0 %2682  ;;  %v2661_v14 = vpop.permute.xlu1 %2660 }
 0xe1c   : > { %v2664_v15 = vsel %vm458_vm1, %v2661_v14, %v2663_v23  ;;  %v2665_v16 = vsel %vm458_vm1, %v2663_v23, %v2661_v14  ;;  %v2561_v58 = vpop.permute.xlu2 %2560 }
 0xe1d   : > { %v2672_v18 = vmul.f32 %v2668_v11, %v2664_v15  ;;  %v2673_v19 = vmul.f32 %v2669_v12, %v2665_v16  ;;  %v4071_v11 = vld [vmem:[%s5600_s1 + $0xa] sm:$0x3] }
 0xe1e   : > { %v2591_v24 = vperm.slane %v4071_v11, 1 }
 0xe1f   : > { %v2676_v26 = vrot.slane %v2672_v18, 4  ;;  %v2677_v27 = vrot.slane %v2673_v19, 4  ;;  %v2590_v19 = vperm.slane %v4071_v11, 0 }
 0xe21   : > { %2680 = vst [vmem:[#allocation2 + $0x8] sm:$0xf0] %v2676_v26 }
 0xe22   : > { %2681 = vst [vmem:[#allocation2 + $0x20] sm:$0xf0] %v2677_v27 }
 0xe23   : > { %v2625_v32 = vpop.permute.xlu0 %2624  ;;  %v2685_v33 = vpop.permute.xlu1 %2684 }
 0xe24   : > { %v2626_v34 = vsel %vm622_vm5, %v2623_v17, %v2625_v32  ;;  %v2627_v35 = vsel %vm622_vm5, %v2625_v32, %v2623_v17  ;;  %v2686_v36 = vsel %vm686_vm4, %v2683_v13, %v2685_v33  ;;  %v2687_v37 = vsel %vm686_vm4, %v2685_v33, %v2683_v13  ;;  %v2585_v25 = vpop.permute.xlu2 %2584 }
 0xe25   : > { %v2634_v38 = vmul.f32 %v2630_v28, %v2626_v34  ;;  %v2635_v39 = vmul.f32 %v2631_v29, %v2627_v35  ;;  %v2694_v40 = vmul.f32 %v2690_v30, %v2686_v36  ;;  %v2695_v41 = vmul.f32 %v2691_v31, %v2687_v37  ;;  %v4069_v31 = vld [vmem:[%s5600_s1 + $0x6] sm:$0x3] }
 0xe26   : > { %v2552_v32 = vperm.slane %v4069_v31, 0  ;;  %v2553_v33 = vperm.slane %v4069_v31, 1 }
 0xe27   : > { %v2638_v44 = vrot.slane %v2634_v38, 4  ;;  %v2639_v45 = vrot.slane %v2635_v39, 4  ;;  %2696 = vst [vmem:[#allocation2 + $0x40] sm:$0xf] %v2694_v40 }
 0xe28   : > { %2697 = vst [vmem:[#allocation2 + $0x38] sm:$0xf] %v2695_v41 }
 0xe29   : > { %2642 = vst [vmem:[#allocation2 + $0x48] sm:$0xf0] %v2638_v44 }
 0xe2a   : > { %2643 = vst [vmem:[#allocation2 + $0x28] sm:$0xf0] %v2639_v45 }
 0xe2b   : > { %v2599_v48 = vpop.permute.xlu0 %2598  ;;  %v2645_v49 = vpop.permute.xlu1 %2644 }
 0xe2c   : > { %v2648_v50 = vsel %vm646_vm7, %v2645_v49, %v2647_v43  ;;  %v2649_v51 = vsel %vm646_vm7, %v2647_v43, %v2645_v49  ;;  %v2715_v45 = vpop.permute.xlu2 %2714 }
 0xe2d   : > { %v2656_v52 = vmul.f32 %v2652_v46, %v2648_v50  ;;  %v2657_v53 = vmul.f32 %v2653_v47, %v2649_v51 }
 0xe2e   : > { %v2708_v54 = vld [vmem:[#allocation2 + $0x40] sm:$0xf] }
 0xe2f   : > { %2658 = vst [vmem:[#allocation2 + $0x8] sm:$0xf] %v2656_v52  ;;  %4079 = vmatpush.msk.msra.mxu0 %vm487_vm2, %v2708_v54  ;;  %v2709_v57 = vld [vmem:[#allocation2 + $0x38] sm:$0xf]  ;;  %v4091_v54 = vld [vmem:[%s5604_s5 + $0x18] sm:$0xf] }
 0xe30   : > { %2659 = vst [vmem:[#allocation2 + $0x20] sm:$0xf] %v2657_v53  ;;  %4081 = vmatpush.msk.msra.mxu1 %vm487_vm2, %v2709_v57  ;;  %v2704_v17 = vld [vmem:[#allocation2 + $0x48] sm:$0xff]  ;;  %v2894_v57 = vperm.slane %v4088_v56, 0 }
 0xe31   : > { %v2705_v18 = vld [vmem:[#allocation2 + $0x28] sm:$0xff] }
 0xe33   : > { %v2563_v63 = vpop.permute.xlu0 %2562  ;;  %v2601_v0 = vpop.permute.xlu1 %2600 }
 0xe34   : > { %v2564_v1 = vsel %vm427_vm0, %v2561_v58, %v2563_v63  ;;  %v2565_v21 = vsel %vm427_vm0, %v2563_v63, %v2561_v58  ;;  %v2602_v22 = vsel %vm596_vm6, %v2599_v48, %v2601_v0  ;;  %v2603_v4 = vsel %vm596_vm6, %v2601_v0, %v2599_v48 }
 0xe35   : > { %v2572_v5 = vmul.f32 %v2568_v59, %v2565_v21  ;;  %v2573_v6 = vmul.f32 %v2569_v60, %v2564_v1  ;;  %v2610_v20 = vmul.f32 %v2606_v61, %v2603_v4  ;;  %v2611_v23 = vmul.f32 %v2607_v62, %v2602_v22  ;;  %v4089_v1 = vld [vmem:[%s5600_s1 + $0x1e] sm:$0x3]  ;;  %v4086_v21 = vld [vmem:[%s5600_s1 + $0x12] sm:$0x3] }
 0xe36   : > { %v2706_v10 = vld [vmem:[#allocation2 + $0x8] sm:$0xff]  ;;  %v2895_v58 = vperm.slane %v4088_v56, 1 }
 0xe37   : > { %v2576_v12 = vrot.slane %v2572_v5, 4  ;;  %v2577_v13 = vrot.slane %v2573_v6, 4  ;;  %v2614_v14 = vrot.slane %v2610_v20, 4  ;;  %2738 = vmatpush.msra.mxu0 %v2706_v10  ;;  %v2707_v15 = vld [vmem:[#allocation2 + $0x20] sm:$0xff]  ;;  %v2615_v16 = vrot.slane %v2611_v23, 4 }
 0xe38   : > { %2758 = vmatpush.msra.mxu1 %v2707_v15  ;;  %v2916_v6 = vperm.slane %v4089_v1, 0  ;;  %v2917_v20 = vperm.slane %v4089_v1, 1  ;;  %v2856_v23 = vperm.slane %v4086_v21, 0  ;;  %v2857_v10 = vperm.slane %v4086_v21, 1 }
 0xe39   : > { %2580 = vst [vmem:[#allocation2 + $0x30] sm:$0xf0] %v2576_v12  ;;  %2739 = vmatpush.msra.mxu0 %v2704_v17 }
 0xe3a   : > { %2581 = vst [vmem:[#allocation2] sm:$0xf0] %v2577_v13  ;;  %2759 = vmatpush.msra.mxu1 %v2705_v18 }
 0xe3b   : > { %2618 = vst [vmem:[#allocation2 + $0x18] sm:$0xf0] %v2614_v14  ;;  %v2583_v26 = vpop.permute.xlu1 %2582  ;;  %v2545_v34 = vpop.permute.xlu0 %2544 }
 0xe3c   : > { %2619 = vst [vmem:[#allocation2 + $0x10] sm:$0xf0] %v2615_v16  ;;  %v2586_v27 = vsel %vm5672_vm8, %v2583_v26, %v2585_v25  ;;  %v2587_v28 = vsel %vm5673_vm9, %v2585_v25, %v2583_v26  ;;  %vm5679_vm8 = vcmp.lt.s32.totalorder %v4314_v9, 94  ;;  %v4087_v25 = vld [vmem:[%s5600_s1 + $0x1a] sm:$0x3] }
 0xe3d   : > { %v2594_v29 = vmul.f32 %v2590_v19, %v2587_v28  ;;  %v2595_v30 = vmul.f32 %v2591_v24, %v2586_v27  ;;  %vm5680_vm9 = vmmov %vm5679_vm8 }
 0xe3f   : > { %2596 = vst [vmem:[#allocation2 + $0x18] sm:$0xf] %v2594_v29  ;;  %v2878_v29 = vperm.slane %v4087_v25, 0 }
 0xe40   : > { %2597 = vst [vmem:[#allocation2 + $0x10] sm:$0xf] %v2595_v30  ;;  %v2879_v30 = vperm.slane %v4087_v25, 1  ;;  %v4090_v25 = vld [vmem:[%s5603_s4 + $0x18] sm:$0xf] }
 0xe43   : > { %v2547_v35 = vpop.permute.xlu1 %2546 }
 0xe44   : > { %v2548_v36 = vsel %vm5674_vm12, %v2545_v34, %v2547_v35  ;;  %v2549_v37 = vsel %vm5675_vm13, %v2547_v35, %v2545_v34  ;;  %vm5681_vm12 = vcmp.lt.s32.totalorder %v4314_v9, 126 }
 0xe45   : > { %v2556_v38 = vmul.f32 %v2552_v32, %v2549_v37  ;;  %v2557_v39 = vmul.f32 %v2553_v33, %v2548_v36  ;;  %vm5682_vm13 = vmmov %vm5681_vm12 }
 0xe46   : > { %v2702_v40 = vld [vmem:[#allocation2 + $0x18] sm:$0xff] }
 0xe47   : > { %2558 = vst [vmem:[#allocation2 + $0x30] sm:$0xf] %v2556_v38  ;;  %2740 = vmatpush.msra.mxu0 %v2702_v40  ;;  %v2703_v41 = vld [vmem:[#allocation2 + $0x10] sm:$0xff]  ;;  %v4085_v38 = vld [vmem:[%s5600_s1 + $0xc] sm:$0x3] }
 0xe48   : > { %2559 = vst [vmem:[#allocation2] sm:$0xf] %v2557_v39  ;;  %2760 = vmatpush.msra.mxu1 %v2703_v41  ;;  %v4083_v40 = vld [vmem:[%s5600_s1 + $0x2] sm:$0x3]  ;;  %v2832_v41 = vperm.slane %v4085_v38, 0 }
 0xe4e   : > { %v2700_v43 = vld [vmem:[#allocation2 + $0x30] sm:$0xff] }
 0xe4f   : > { %2741 = vmatpush.msra.mxu0 %v2700_v43  ;;  %v2701_v44 = vld [vmem:[#allocation2] sm:$0xff]  ;;  %v2794_v43 = vperm.slane %v4083_v40, 0 }
 0xe50   : > { %2761 = vmatpush.msra.mxu1 %v2701_v44  ;;  %4080 = vmatmul.msk.f32.vlgmr.msra.gmra.mxu0 %vm717_vm10, %v4077_v42  ;;  %v2795_v44 = vperm.slane %v4083_v40, 1  ;;  %v4098_v40 = vld [vmem:[%s5600_s1 + $0x16] sm:$0x3] }
 0xe51   : > { %4082 = vmatmul.msk.f32.vlgmr.msra.gmra.mxu1 %vm717_vm10, %v4077_v42  ;;  %v2833_v42 = vperm.slane %v4085_v38, 1 }
 0xecd   : > { %v2743_v46 = vpop.f32.mrf.mxu0 }
 0xece   : > { %v2744_v47 = vadd.f32 %v2743_v46, %v2715_v45  ;;  %v2763_v48 = vpop.f32.mrf.mxu1 }
 0xecf   : > { %v2764_v49 = vadd.f32 %v2763_v48, %v2715_v45 }
 0xed0   : > { %v2766_v50 = vmul.f32 0.01, %v2744_v47 }
 0xed1   : > { %v2767_v51 = vmul.f32 0.01, %v2764_v49 }
 0xed2   : > { %v2768_v52 = vmax.f32 %v2744_v47, %v2766_v50 }
 0xed3   : > { %v2769_v53 = vmax.f32 %v2764_v49, %v2767_v51 }
 0xed4   : > { %2846 = vst [vmem:[#allocation2 + $0x48] sm:$0xf] %v2768_v52  ;;  %2908 = vrot.lane.b32.xlu2 %v2768_v52, %s5653_s13  ;;  %2886 = vrot.lane.b32.xlu0 %v2768_v52, %s5676_s28 }
 0xed5   : > { %2847 = vst [vmem:[#allocation2 + $0x28] sm:$0xf] %v2769_v53  ;;  %2888 = vrot.lane.b32.xlu1 %v2769_v53, %s5676_s28 }
 0xedc   : > { %2850 = vrot.lane.b32.xlu2 %v2769_v53, %s5654_s23  ;;  %2910 = vrot.lane.b32.xlu0 %v2769_v53, %s5653_s13 }
 0xedd   : > { %2848 = vrot.lane.b32.xlu1 %v2768_v52, %s5654_s23 }
 0xee4   : > { %2824 = vrot.lane.b32.xlu2 %v2768_v52, %s5655_s14  ;;  %2870 = vrot.lane.b32.xlu0 %v2768_v52, %s5656_s17 }
 0xee5   : > { %2872 = vrot.lane.b32.xlu1 %v2769_v53, %s5656_s17 }
 0xeec   : > { %2788 = vrot.lane.b32.xlu2 %v2769_v53, %s5677_s16  ;;  %2826 = vrot.lane.b32.xlu0 %v2769_v53, %s5655_s14  ;;  %s5689_s14 = smov 112  }
 0xeed   : > { %2786 = vrot.lane.b32.xlu1 %v2768_v52, %s5677_s16 }
 0xef4   : > { %2770 = vrot.lane.b32.xlu2 %v2768_v52, %s5678_s27  ;;  %2808 = vrot.lane.b32.xlu0 %v2768_v52, %s5657_s29 }
 0xef5   : > { %2810 = vrot.lane.b32.xlu1 %v2769_v53, %s5657_s29  ;;  %s5690_s29 = smov 16  }
 0xefc   : > { %2772 = vrot.lane.b32.xlu0 %v2769_v53, %s5678_s27 }
 0xefd   : > { %2940 = vperm.xlu1 %4179, %v4091_v54  }
 0xf2e   : > { %v2909_v55 = vpop.permute.xlu2 %2908 }
 0xf36   : > { %v2851_v22 = vpop.permute.xlu2 %2850 }
 0xf3e   : > { %v2825_v28 = vpop.permute.xlu2 %2824 }
 0xf46   : > { %v2887_v59 = vpop.permute.xlu0 %2886  ;;  %v2789_v46 = vpop.permute.xlu2 %2788 }
 0xf47   : > { %v2889_v60 = vpop.permute.xlu1 %2888 }
 0xf48   : > { %v2890_v61 = vsel %vm1124_vm11, %v2887_v59, %v2889_v60  ;;  %v2891_v62 = vsel %vm1124_vm11, %v2889_v60, %v2887_v59 }
 0xf49   : > { %v2898_v63 = vmul.f32 %v2894_v57, %v2890_v61  ;;  %v2899_v0 = vmul.f32 %v2895_v58, %v2891_v62  ;;  %v4084_v58 = vld [vmem:[%s5600_s1 + $0x4] sm:$0x3] }
 0xf4a   : > { %v2816_v1 = vperm.slane %v4084_v58, 0  ;;  %v2817_v21 = vperm.slane %v4084_v58, 1 }
 0xf4b   : > { %v2902_v4 = vrot.slane %v2898_v63, 4  ;;  %v2903_v5 = vrot.slane %v2899_v0, 4 }
 0xf4d   : > { %2906 = vst [vmem:[#allocation2 + $0x8] sm:$0xf0] %v2902_v4 }
 0xf4e   : > { %2907 = vst [vmem:[#allocation2 + $0x20] sm:$0xf0] %v2903_v5  ;;  %v2911_v11 = vpop.permute.xlu0 %2910 }
 0xf4f   : > { %v2849_v12 = vpop.permute.xlu1 %2848  ;;  %v2912_v13 = vsel %vm5679_vm8, %v2909_v55, %v2911_v11  ;;  %v2913_v14 = vsel %vm5680_vm9, %v2911_v11, %v2909_v55  ;;  %vm5683_vm8 = vcmp.lt.s32.totalorder %v4314_v9, 98 }
 0xf50   : > { %v2852_v15 = vsel %vm5681_vm12, %v2849_v12, %v2851_v22  ;;  %v2853_v16 = vsel %vm5682_vm13, %v2851_v22, %v2849_v12  ;;  %v2920_v17 = vmul.f32 %v2916_v6, %v2912_v13  ;;  %v2921_v18 = vmul.f32 %v2917_v20, %v2913_v14  ;;  %vm5684_vm9 = vmmov %vm5683_vm8  ;;  %v2771_v13 = vpop.permute.xlu2 %2770 }
 0xf51   : > { %v2860_v19 = vmul.f32 %v2856_v23, %v2852_v15  ;;  %v2861_v24 = vmul.f32 %v2857_v10, %v2853_v16  ;;  %vm5685_vm12 = vcmp.lt.s32.totalorder %v4314_v9, 2  ;;  %v2776_v10 = vld [vmem:[%s5600_s1] sm:$0x3] }
 0xf52   : > { %2922 = vst [vmem:[#allocation2 + $0x40] sm:$0xf] %v2920_v17  ;;  %vm5686_vm13 = vmmov %vm5685_vm12  ;;  %v2778_v11 = vperm.slane %v2776_v10, 0  ;;  %v2779_v12 = vperm.slane %v2776_v10, 1 }
 0xf53   : > { %v2864_v26 = vrot.slane %v2860_v19, 4  ;;  %v2865_v27 = vrot.slane %v2861_v24, 4  ;;  %2923 = vst [vmem:[#allocation2 + $0x38] sm:$0xf] %v2921_v18 }
 0xf55   : > { %2868 = vst [vmem:[#allocation2 + $0x48] sm:$0xf0] %v2864_v26 }
 0xf56   : > { %2869 = vst [vmem:[#allocation2 + $0x28] sm:$0xf0] %v2865_v27  ;;  %v2871_v31 = vpop.permute.xlu0 %2870 }
 0xf57   : > { %v2873_v32 = vpop.permute.xlu1 %2872 }
 0xf58   : > { %v2874_v33 = vsel %vm5683_vm8, %v2871_v31, %v2873_v32  ;;  %v2875_v34 = vsel %vm5684_vm9, %v2873_v32, %v2871_v31  ;;  %vm5687_vm8 = vcmp.lt.s32.totalorder %v4314_v9, 30 }
 0xf59   : > { %v2882_v35 = vmul.f32 %v2878_v29, %v2874_v33  ;;  %v2883_v36 = vmul.f32 %v2879_v30, %v2875_v34  ;;  %v2934_v37 = vld [vmem:[#allocation2 + $0x40] sm:$0xf]  ;;  %vm5688_vm9 = vmmov %vm5687_vm8 }
 0xf5a   : > { %4092 = vmatpush.msk.msra.mxu2 %vm487_vm2, %v2934_v37  ;;  %v2935_v39 = vld [vmem:[#allocation2 + $0x38] sm:$0xf]  ;;  %v4101_v37 = vld [vmem:[%s5606_s7 + $0x10] sm:$0xff] }
 0xf5b   : > { %2884 = vst [vmem:[#allocation2 + $0x8] sm:$0xf] %v2882_v35  ;;  %4094 = vmatpush.msk.msra.mxu3 %vm487_vm2, %v2935_v39  ;;  %v4099_v39 = vld [vmem:[%s5600_s1 + $0x1c] sm:$0x3] }
 0xf5c   : > { %2885 = vst [vmem:[#allocation2 + $0x20] sm:$0xf] %v2883_v36  ;;  %v2930_v63 = vld [vmem:[#allocation2 + $0x48] sm:$0xff] }
 0xf5d   : > { %v2931_v0 = vld [vmem:[#allocation2 + $0x28] sm:$0xff] }
 0xf5e   : > { %v2827_v45 = vpop.permute.xlu0 %2826 }
 0xf5f   : > { %v2787_v47 = vpop.permute.xlu1 %2786  ;;  %v2828_v48 = vsel %vm5685_vm12, %v2825_v28, %v2827_v45  ;;  %v2829_v49 = vsel %vm5686_vm13, %v2827_v45, %v2825_v28 }
 0xf60   : > { %v2790_v50 = vsel %vm1014_vm15, %v2787_v47, %v2789_v46  ;;  %v2791_v51 = vsel %vm1014_vm15, %v2789_v46, %v2787_v47  ;;  %v2836_v52 = vmul.f32 %v2832_v41, %v2829_v49  ;;  %v2837_v53 = vmul.f32 %v2833_v42, %v2828_v48 }
 0xf61   : > { %v2798_v54 = vmul.f32 %v2794_v43, %v2791_v51  ;;  %v2799_v55 = vmul.f32 %v2795_v44, %v2790_v50  ;;  %v3066_v41 = vperm.slane %v4099_v39, 0  ;;  %v3067_v42 = vperm.slane %v4099_v39, 1  ;;  %v4109_v39 = vld [vmem:[%s5600_s1 + $0x1c] sm:$0x3] }
 0xf62   : > { %v2840_v56 = vrot.slane %v2836_v52, 4  ;;  %v2932_v57 = vld [vmem:[#allocation2 + $0x8] sm:$0xff]  ;;  %v2841_v61 = vrot.slane %v2837_v53, 4  ;;  %v3044_v43 = vperm.slane %v4098_v40, 0  ;;  %v3045_v44 = vperm.slane %v4098_v40, 1 }
 0xf63   : > { %v2802_v59 = vrot.slane %v2798_v54, 4  ;;  %v2803_v60 = vrot.slane %v2799_v55, 4  ;;  %2964 = vmatpush.msra.mxu2 %v2932_v57  ;;  %v2933_v62 = vld [vmem:[#allocation2 + $0x20] sm:$0xff]  ;;  %v4108_v40 = vld [vmem:[%s5600_s1 + $0x16] sm:$0x3] }
 0xf64   : > { %2844 = vst [vmem:[#allocation2 + $0x18] sm:$0xf0] %v2840_v56  ;;  %2984 = vmatpush.msra.mxu3 %v2933_v62  ;;  %v4097_v56 = vld [vmem:[%s5600_s1 + $0x8] sm:$0x3] }
 0xf65   : > { %2806 = vst [vmem:[#allocation2 + $0x30] sm:$0xf0] %v2802_v59  ;;  %2965 = vmatpush.msra.mxu2 %v2930_v63  ;;  %v3020_v59 = vperm.slane %v4097_v56, 0 }
 0xf66   : > { %2807 = vst [vmem:[#allocation2] sm:$0xf0] %v2803_v60  ;;  %2985 = vmatpush.msra.mxu3 %v2931_v0  ;;  %v2809_v22 = vpop.permute.xlu0 %2808  ;;  %v3021_v60 = vperm.slane %v4097_v56, 1 }
 0xf67   : > { %2845 = vst [vmem:[#allocation2 + $0x10] sm:$0xf0] %v2841_v61  ;;  %v2811_v4 = vpop.permute.xlu1 %2810 }
 0xf68   : > { %v2812_v5 = vsel %vm5687_vm8, %v2809_v22, %v2811_v4  ;;  %v2813_v6 = vsel %vm5688_vm9, %v2811_v4, %v2809_v22 }
 0xf69   : > { %v2820_v20 = vmul.f32 %v2816_v1, %v2813_v6  ;;  %v2821_v23 = vmul.f32 %v2817_v21, %v2812_v5  ;;  %v4096_v5 = vld [vmem:[%s5600_s1 + $0x2] sm:$0x3] }
 0xf6b   : > { %2822 = vst [vmem:[#allocation2 + $0x18] sm:$0xf] %v2820_v20 }
 0xf6c   : > { %2823 = vst [vmem:[#allocation2 + $0x10] sm:$0xf] %v2821_v23 }
 0xf6e   : > { %v2773_v14 = vpop.permute.xlu0 %2772 }
 0xf6f   : > { %v2774_v15 = vsel %vm997_vm3, %v2771_v13, %v2773_v14  ;;  %v2775_v16 = vsel %vm997_vm3, %v2773_v14, %v2771_v13  ;;  %v2941_v28 = vpop.permute.xlu1 %2940  ;;  %vm5691_vm3 = vcmask 162816  }
 0xf70   : > { %v2782_v17 = vmul.f32 %v2778_v11, %v2775_v16  ;;  %v2783_v18 = vmul.f32 %v2779_v12, %v2774_v15  ;;  %v3004_v11 = vperm.slane %v4096_v5, 0  ;;  %v3005_v12 = vperm.slane %v4096_v5, 1  ;;  %vm5692_vm12 = vmmov %vm5691_vm3 }
 0xf72   : > { %2784 = vst [vmem:[#allocation2 + $0x30] sm:$0xf] %v2782_v17  ;;  %v2928_v19 = vld [vmem:[#allocation2 + $0x18] sm:$0xff] }
 0xf73   : > { %2785 = vst [vmem:[#allocation2] sm:$0xf] %v2783_v18  ;;  %2966 = vmatpush.msra.mxu2 %v2928_v19  ;;  %v2929_v24 = vld [vmem:[#allocation2 + $0x10] sm:$0xff]  ;;  %v4100_v19 = vld [vmem:[%s5605_s6 + $0x10] sm:$0xff] }
 0xf74   : > { %2986 = vmatpush.msra.mxu3 %v2929_v24 }
 0xf79   : > { %v2926_v26 = vld [vmem:[#allocation2 + $0x30] sm:$0xff] }
 0xf7a   : > { %2967 = vmatpush.msra.mxu2 %v2926_v26  ;;  %v2927_v27 = vld [vmem:[#allocation2] sm:$0xff] }
 0xf7b   : > { %2987 = vmatpush.msra.mxu3 %v2927_v27  ;;  %4093 = vmatmul.msk.f32.vlgmr.msra.gmra.mxu2 %vm717_vm10, %v4090_v25 }
 0xf7c   : > { %4095 = vmatmul.msk.f32.vlgmr.msra.gmra.mxu3 %vm717_vm10, %v4090_v25 }
 0xffe   : > { %v2969_v29 = vpop.f32.mrf.mxu2 }
 0xfff   : > { %v2970_v30 = vadd.f32 %v2969_v29, %v2941_v28  ;;  %v2989_v31 = vpop.f32.mrf.mxu3 }
0x1000   : > { %v2990_v32 = vadd.f32 %v2989_v31, %v2941_v28 }
0x1001   : > { %v2992_v33 = vmul.f32 0.01, %v2970_v30 }
0x1002   : > { %v2993_v34 = vmul.f32 0.01, %v2990_v32 }
0x1003   : > { %v5272_v35 = vmax.f32 %v2970_v30, %v2992_v33 }
0x1004   : > { %v5274_v36 = vmax.f32 %v2990_v32, %v2993_v34 }
0x1005   : > { %3034 = vst [vmem:[#allocation2 + $0x18] sm:$0xf] %v5272_v35  ;;  %3058 = vrot.lane.b32.xlu1 %v5272_v35, %s5676_s28  ;;  %3036 = vrot.lane.b32.xlu2 %v5272_v35, %s5689_s14 }
0x1006   : > { %3035 = vst [vmem:[#allocation2 + $0x10] sm:$0xf] %v5274_v36  ;;  %3038 = vrot.lane.b32.xlu0 %v5274_v36, %s5689_s14 }
0x100d   : > { %3014 = vrot.lane.b32.xlu1 %v5274_v36, %s5690_s29  ;;  %3060 = vrot.lane.b32.xlu2 %v5274_v36, %s5676_s28 }
0x100e   : > { %3012 = vrot.lane.b32.xlu0 %v5272_v35, %s5690_s29 }
0x1015   : > { %3086 = vperm.xlu1 %4179, %v4101_v37   ;;  %2996 = vrot.lane.b32.xlu2 %v5272_v35, %s5677_s16  ;;  %v4111_v37 = vld [vmem:[%s5608_s9 + $0x20] sm:$0xff] }
0x1016   : > { %2998 = vrot.lane.b32.xlu0 %v5274_v36, %s5677_s16 }
0x105f   : > { %v3037_v38 = vpop.permute.xlu2 %3036 }
0x1067   : > { %v3061_v45 = vpop.permute.xlu2 %3060 }
0x106f   : > { %v2997_v13 = vpop.permute.xlu2 %2996 }
0x1077   : > { %v3059_v46 = vpop.permute.xlu1 %3058 }
0x1078   : > { %v3039_v47 = vpop.permute.xlu0 %3038  ;;  %v3062_v48 = vsel %vm1124_vm11, %v3059_v46, %v3061_v45  ;;  %v3063_v49 = vsel %vm1124_vm11, %v3061_v45, %v3059_v46  ;;  %v3184_v46 = vperm.slane %v4108_v40, 0 }
0x1079   : > { %v3040_v50 = vsel %vm458_vm1, %v3037_v38, %v3039_v47  ;;  %v3041_v51 = vsel %vm458_vm1, %v3039_v47, %v3037_v38  ;;  %v3070_v52 = vmul.f32 %v3066_v41, %v3062_v48  ;;  %v3071_v53 = vmul.f32 %v3067_v42, %v3063_v49 }
0x107a   : > { %v3048_v54 = vmul.f32 %v3044_v43, %v3040_v50  ;;  %v3049_v55 = vmul.f32 %v3045_v44, %v3041_v51  ;;  %v3200_v41 = vperm.slane %v4109_v39, 0  ;;  %v3201_v42 = vperm.slane %v4109_v39, 1 }
0x107b   : > { %3072 = vst [vmem:[#allocation2 + $0x48] sm:$0xf] %v3070_v52  ;;  %v3185_v47 = vperm.slane %v4108_v40, 1 }
0x107c   : > { %v3052_v57 = vrot.slane %v3048_v54, 4  ;;  %v3053_v58 = vrot.slane %v3049_v55, 4  ;;  %3073 = vst [vmem:[#allocation2 + $0x28] sm:$0xf] %v3071_v53  ;;  %v4107_v54 = vld [vmem:[%s5600_s1 + $0x8] sm:$0x3] }
0x107e   : > { %3056 = vst [vmem:[#allocation2 + $0x18] sm:$0xf0] %v3052_v57  ;;  %v3166_v57 = vperm.slane %v4107_v54, 0 }
0x107f   : > { %3057 = vst [vmem:[#allocation2 + $0x10] sm:$0xf0] %v3053_v58  ;;  %v3015_v61 = vpop.permute.xlu1 %3014  ;;  %v3167_v58 = vperm.slane %v4107_v54, 1 }
0x1080   : > { %v3013_v62 = vpop.permute.xlu0 %3012 }
0x1081   : > { %v3016_v63 = vsel %vm427_vm0, %v3013_v62, %v3015_v61  ;;  %v3017_v0 = vsel %vm427_vm0, %v3015_v61, %v3013_v62 }
0x1082   : > { %v3024_v1 = vmul.f32 %v3020_v59, %v3017_v0  ;;  %v3025_v21 = vmul.f32 %v3021_v60, %v3016_v63  ;;  %v3080_v22 = vld [vmem:[#allocation2 + $0x48] sm:$0xf] }
0x1083   : > { %4102 = vmatpush.msk.msrb.mxu0 %vm487_vm2, %v3080_v22  ;;  %v3081_v4 = vld [vmem:[#allocation2 + $0x28] sm:$0xf] }
0x1084   : > { %v3028_v6 = vrot.slane %v3024_v1, 4  ;;  %v3029_v20 = vrot.slane %v3025_v21, 4  ;;  %4104 = vmatpush.msk.msrb.mxu1 %vm487_vm2, %v3081_v4  ;;  %v4106_v1 = vld [vmem:[%s5600_s1 + $0x2] sm:$0x3] }
0x1085   : > { %v3078_v23 = vld [vmem:[#allocation2 + $0x18] sm:$0xff]  ;;  %v3150_v21 = vperm.slane %v4106_v1, 0  ;;  %v3151_v22 = vperm.slane %v4106_v1, 1 }
0x1086   : > { %3032 = vst [vmem:[#allocation2 + $0x30] sm:$0xf0] %v3028_v6  ;;  %3112 = vmatpush.msrb.mxu0 %v3078_v23  ;;  %v3079_v10 = vld [vmem:[#allocation2 + $0x10] sm:$0xff] }
0x1087   : > { %3033 = vst [vmem:[#allocation2] sm:$0xf0] %v3029_v20  ;;  %3132 = vmatpush.msrb.mxu1 %v3079_v10  ;;  %v3087_v26 = vpop.permute.xlu1 %3086 }
0x1088   : > { %v2999_v14 = vpop.permute.xlu0 %2998 }
0x1089   : > { %v3000_v15 = vsel %vm1014_vm15, %v2997_v13, %v2999_v14  ;;  %v3001_v16 = vsel %vm1014_vm15, %v2999_v14, %v2997_v13 }
0x108a   : > { %v3008_v17 = vmul.f32 %v3004_v11, %v3001_v16  ;;  %v3009_v18 = vmul.f32 %v3005_v12, %v3000_v15  ;;  %v4110_v11 = vld [vmem:[%s5607_s8 + $0x20] sm:$0xff] }
0x108c   : > { %3010 = vst [vmem:[#allocation2 + $0x30] sm:$0xf] %v3008_v17 }
0x108d   : > { %3011 = vst [vmem:[#allocation2] sm:$0xf] %v3009_v18 }
0x1093   : > { %v3076_v24 = vld [vmem:[#allocation2 + $0x30] sm:$0xff] }
0x1094   : > { %3113 = vmatpush.msrb.mxu0 %v3076_v24  ;;  %v3077_v25 = vld [vmem:[#allocation2] sm:$0xff] }
0x1095   : > { %3133 = vmatpush.msrb.mxu1 %v3077_v25  ;;  %4103 = vmatmul.msk.f32.vlgmr.msrb.gmra.mxu0 %vm5691_vm3, %v4100_v19  ;;  %v4119_v25 = vld [vmem:[%s5608_s9 + $0x28] sm:$0xff] }
0x1096   : > { %4105 = vmatmul.msk.f32.vlgmr.msrb.gmra.mxu1 %vm5692_vm12, %v4100_v19 }
0x1112   : > { %v3115_v27 = vpop.f32.mrf.mxu0 }
0x1113   : > { %v3116_v28 = vadd.f32 %v3115_v27, %v3087_v26  ;;  %v3135_v29 = vpop.f32.mrf.mxu1  ;;  %v4117_v27 = vld [vmem:[%s5600_s1 + $0x1c] sm:$0x3] }
0x1114   : > { %v3136_v30 = vadd.f32 %v3135_v29, %v3087_v26  ;;  %v3332_v29 = vperm.slane %v4117_v27, 0 }
0x1115   : > { %v3138_v31 = vmul.f32 0.01, %v3116_v28 }
0x1116   : > { %v3139_v32 = vmul.f32 0.01, %v3136_v30 }
0x1117   : > { %v3140_v33 = vmax.f32 %v3116_v28, %v3138_v31  ;;  %v4116_v28 = vld [vmem:[%s5600_s1 + $0x16] sm:$0x3] }
0x1118   : > { %v3141_v34 = vmax.f32 %v3136_v30, %v3139_v32  ;;  %v3333_v30 = vperm.slane %v4117_v27, 1  ;;  %v3316_v31 = vperm.slane %v4116_v28, 0 }
0x1119   : > { %3176 = vrot.lane.b32.xlu1 %v3140_v33, %s5689_s14  ;;  %3192 = vrot.lane.b32.xlu2 %v3140_v33, %s5676_s28 }
0x111a   : > { %3194 = vrot.lane.b32.xlu0 %v3141_v34, %s5676_s28 }
0x1121   : > { %3160 = vrot.lane.b32.xlu1 %v3141_v34, %s5690_s29  ;;  %3178 = vrot.lane.b32.xlu2 %v3141_v34, %s5689_s14 }
0x1122   : > { %3158 = vrot.lane.b32.xlu0 %v3140_v33, %s5690_s29 }
0x1129   : > { %3224 = vperm.xlu1 %4179, %v4111_v37   ;;  %3142 = vrot.lane.b32.xlu2 %v3140_v33, %s5677_s16 }
0x112a   : > { %3144 = vrot.lane.b32.xlu0 %v3141_v34, %s5677_s16 }
0x1173   : > { %v3193_v38 = vpop.permute.xlu2 %3192 }
0x117b   : > { %v3179_v44 = vpop.permute.xlu2 %3178 }
0x1183   : > { %v3143_v4 = vpop.permute.xlu2 %3142 }
0x118b   : > { %v3177_v43 = vpop.permute.xlu1 %3176 }
0x118c   : > { %v3195_v45 = vpop.permute.xlu0 %3194  ;;  %v3180_v50 = vsel %vm458_vm1, %v3177_v43, %v3179_v44  ;;  %v3181_v51 = vsel %vm458_vm1, %v3179_v44, %v3177_v43 }
0x118d   : > { %v3196_v48 = vsel %vm1124_vm11, %v3193_v38, %v3195_v45  ;;  %v3197_v49 = vsel %vm1124_vm11, %v3195_v45, %v3193_v38  ;;  %v3188_v55 = vmul.f32 %v3184_v46, %v3180_v50  ;;  %v3189_v56 = vmul.f32 %v3185_v47, %v3181_v51  ;;  %v4115_v46 = vld [vmem:[%s5600_s1 + $0x8] sm:$0x3] }
0x118e   : > { %v3204_v52 = vmul.f32 %v3200_v41, %v3196_v48  ;;  %v3205_v53 = vmul.f32 %v3201_v42, %v3197_v49  ;;  %v3298_v47 = vperm.slane %v4115_v46, 0  ;;  %v3299_v48 = vperm.slane %v4115_v46, 1 }
0x1190   : > { %3241 = vmatpush.msrb.mxu2 %v3204_v52  ;;  %3261 = vmatpush.msrb.mxu3 %v3205_v53 }
0x1192   : > { %3242 = vmatpush.msrb.mxu2 %v3188_v55  ;;  %3262 = vmatpush.msrb.mxu3 %v3189_v56  ;;  %v4114_v55 = vld [vmem:[%s5600_s1 + $0x2] sm:$0x3] }
0x1193   : > { %v3161_v59 = vpop.permute.xlu1 %3160  ;;  %v3282_v56 = vperm.slane %v4114_v55, 0 }
0x1194   : > { %v3159_v60 = vpop.permute.xlu0 %3158  ;;  %3243 = vmatpush.msrb.mxu2 %v3140_v33  ;;  %3263 = vmatpush.msrb.mxu3 %v3141_v34  ;;  %v3317_v33 = vperm.slane %v4116_v28, 1  ;;  %v3427_v28 = vld.sshfl [vmem:[#allocation1] sm:$0xff pattern:$0x75316420] }
0x1195   : > { %v3162_v61 = vsel %vm427_vm0, %v3159_v60, %v3161_v59  ;;  %v3163_v62 = vsel %vm427_vm0, %v3161_v59, %v3159_v60 }
0x1196   : > { %v3170_v63 = vmul.f32 %v3166_v57, %v3163_v62  ;;  %v3171_v0 = vmul.f32 %v3167_v58, %v3162_v61  ;;  %v3283_v57 = vperm.slane %v4114_v55, 1  ;;  %v4126_v55 = vld [vmem:[%s5600_s1 + $0x10] sm:$0x3] }
0x1198   : > { %3244 = vmatpush.msrb.mxu2 %v3170_v63  ;;  %3264 = vmatpush.msrb.mxu3 %v3171_v0  ;;  %v4118_v0 = vld [vmem:[%s5607_s8 + $0x28] sm:$0xff] }
0x119b   : > { %v3225_v12 = vpop.permute.xlu1 %3224 }
0x119c   : > { %v3145_v5 = vpop.permute.xlu0 %3144 }
0x119d   : > { %v3146_v6 = vsel %vm1014_vm15, %v3143_v4, %v3145_v5  ;;  %v3147_v20 = vsel %vm1014_vm15, %v3145_v5, %v3143_v4 }
0x119e   : > { %v3154_v23 = vmul.f32 %v3150_v21, %v3147_v20  ;;  %v3155_v10 = vmul.f32 %v3151_v22, %v3146_v6 }
0x11a0   : > { %3245 = vmatpush.msrb.mxu2 %v3154_v23  ;;  %3265 = vmatpush.msrb.mxu3 %v3155_v10 }
0x11a1   : > { %4112 = vmatmul.msk.f32.vlgmr.msrb.gmra.mxu2 %vm1462_vm14, %v4110_v11  ;;  %4113 = vmatmul.msk.f32.vlgmr.msrb.gmra.mxu3 %vm1462_vm14, %v4110_v11 }
0x1224   : > { %v3247_v13 = vpop.f32.mrf.mxu2  ;;  %v3267_v14 = vpop.f32.mrf.mxu3 }
0x1225   : > { %v3248_v15 = vadd.f32 %v3247_v13, %v3225_v12  ;;  %v3268_v16 = vadd.f32 %v3267_v14, %v3225_v12 }
0x1227   : > { %v3270_v17 = vmul.f32 0.01, %v3248_v15  ;;  %v3271_v18 = vmul.f32 0.01, %v3268_v16 }
0x1229   : > { %v3272_v19 = vmax.f32 %v3248_v15, %v3270_v17  ;;  %v3273_v24 = vmax.f32 %v3268_v16, %v3271_v18 }
0x122b   : > { %3306 = vst [vmem:[#allocation2 + $0x48] sm:$0xff] %v3272_v19  ;;  %3326 = vrot.lane.b32.xlu0 %v3273_v24, %s5676_s28  ;;  %3308 = vrot.lane.b32.xlu1 %v3272_v19, %s5689_s14 }
0x122c   : > { %3307 = vst [vmem:[#allocation2 + $0x28] sm:$0xff] %v3273_v24  ;;  %3324 = vrot.lane.b32.xlu2 %v3272_v19, %s5676_s28 }
0x1233   : > { %3290 = vrot.lane.b32.xlu0 %v3272_v19, %s5690_s29  ;;  %3292 = vrot.lane.b32.xlu1 %v3273_v24, %s5690_s29 }
0x1234   : > { %3310 = vrot.lane.b32.xlu2 %v3273_v24, %s5689_s14 }
0x123b   : > { %3276 = vrot.lane.b32.xlu0 %v3273_v24, %s5677_s16  ;;  %3356 = vperm.xlu1 %4179, %v4119_v25  }
0x123c   : > { %3274 = vrot.lane.b32.xlu2 %v3272_v19, %s5677_s16 }
0x1286   : > { %v3325_v26 = vpop.permute.xlu2 %3324 }
0x128e   : > { %v3311_v32 = vpop.permute.xlu2 %3310 }
0x1296   : > { %v3275_v58 = vpop.permute.xlu2 %3274 }
0x129d   : > { %v3327_v34 = vpop.permute.xlu0 %3326  ;;  %v3309_v37 = vpop.permute.xlu1 %3308 }
0x129e   : > { %v3328_v38 = vsel %vm1124_vm11, %v3325_v26, %v3327_v34  ;;  %v3329_v39 = vsel %vm1124_vm11, %v3327_v34, %v3325_v26  ;;  %v3312_v40 = vsel %vm458_vm1, %v3309_v37, %v3311_v32  ;;  %v3313_v41 = vsel %vm458_vm1, %v3311_v32, %v3309_v37 }
0x129f   : > { %v3336_v42 = vmul.f32 %v3332_v29, %v3328_v38  ;;  %v3337_v43 = vmul.f32 %v3333_v30, %v3329_v39  ;;  %v3320_v44 = vmul.f32 %v3316_v31, %v3312_v40  ;;  %v3321_v45 = vmul.f32 %v3317_v33, %v3313_v41  ;;  %v3428_v31 = vld.sshfl [vmem:[#allocation1 + $0x8] sm:$0xff pattern:$0x75316420] }
0x12a0   : > { %vm5693_vm11 = vcmp.lt.s32.totalorder %v4314_v9, 17 }
0x12a1   : > { %3338 = vst [vmem:[#allocation2 + $0x40] sm:$0xff] %v3336_v42  ;;  %3373 = vmatpush.msra.mxu0 %v3336_v42  ;;  %3393 = vmatpush.msra.mxu1 %v3337_v43 }
0x12a2   : > { %3339 = vst [vmem:[#allocation2 + $0x38] sm:$0xff] %v3337_v43 }
0x12a3   : > { %3322 = vst [vmem:[#allocation2 + $0x8] sm:$0xff] %v3320_v44  ;;  %3374 = vmatpush.msra.mxu0 %v3320_v44  ;;  %3394 = vmatpush.msra.mxu1 %v3321_v45 }
0x12a4   : > { %3323 = vst [vmem:[#allocation2 + $0x20] sm:$0xff] %v3321_v45 }
0x12a5   : > { %v3291_v49 = vpop.permute.xlu0 %3290  ;;  %v3293_v50 = vpop.permute.xlu1 %3292  ;;  %3375 = vmatpush.msra.mxu0 %v3272_v19  ;;  %3395 = vmatpush.msra.mxu1 %v3273_v24 }
0x12a6   : > { %v3294_v51 = vsel %vm427_vm0, %v3291_v49, %v3293_v50  ;;  %v3295_v52 = vsel %vm427_vm0, %v3293_v50, %v3291_v49 }
0x12a7   : > { %v3302_v53 = vmul.f32 %v3298_v47, %v3295_v52  ;;  %v3303_v54 = vmul.f32 %v3299_v48, %v3294_v51 }
0x12a9   : > { %3304 = vst [vmem:[#allocation2 + $0x18] sm:$0xff] %v3302_v53  ;;  %3376 = vmatpush.msra.mxu0 %v3302_v53  ;;  %3396 = vmatpush.msra.mxu1 %v3303_v54 }
0x12aa   : > { %3305 = vst [vmem:[#allocation2 + $0x10] sm:$0xff] %v3303_v54 }
0x12ad   : > { %v3277_v59 = vpop.permute.xlu0 %3276  ;;  %v3357_v1 = vpop.permute.xlu1 %3356 }
0x12ae   : > { %v3278_v60 = vsel %vm1014_vm15, %v3275_v58, %v3277_v59  ;;  %v3279_v61 = vsel %vm1014_vm15, %v3277_v59, %v3275_v58  ;;  %v3523_v58 = vperm.slane %v4126_v55, 0  ;;  %v3524_v59 = vperm.slane %v4126_v55, 1 }
0x12af   : > { %v3286_v62 = vmul.f32 %v3282_v56, %v3279_v61  ;;  %v3287_v63 = vmul.f32 %v3283_v57, %v3278_v60  ;;  %vm5695_vm15 = vcmp.lt.s32.totalorder %v4314_v9, 15 }
0x12b0   : > { %vm5696_vm13 = vmmov %vm5695_vm15 }
0x12b1   : > { %3288 = vst [vmem:[#allocation2 + $0x30] sm:$0xff] %v3286_v62  ;;  %3377 = vmatpush.msra.mxu0 %v3286_v62  ;;  %3397 = vmatpush.msra.mxu1 %v3287_v63 }
0x12b2   : > { %3289 = vst [vmem:[#allocation2] sm:$0xff] %v3287_v63  ;;  %4120 = vmatmul.msk.f32.vlgmr.msra.gmra.mxu0 %vm1462_vm14, %v4118_v0  ;;  %4121 = vmatmul.msk.f32.vlgmr.msra.gmra.mxu1 %vm1462_vm14, %v4118_v0  ;;  %vm5694_vm14 = vmmov %vm5693_vm11 }
0x132f   : > { %v3379_v21 = vpop.f32.mrf.mxu0  ;;  %v3399_v22 = vpop.f32.mrf.mxu1 }
0x1330   : > { %v3380_v4 = vadd.f32 %v3379_v21, %v3357_v1  ;;  %v3400_v5 = vadd.f32 %v3399_v22, %v3357_v1  ;;  %v4125_v22 = vld [vmem:[%s5600_s1 + $0xe] sm:$0x3] }
0x1332   : > { %v3402_v6 = vmul.f32 0.01, %v3380_v4  ;;  %v3403_v20 = vmul.f32 0.01, %v3400_v5 }
0x1334   : > { %v3404_v23 = vmax.f32 %v3380_v4, %v3402_v6  ;;  %v3405_v10 = vmax.f32 %v3400_v5, %v3403_v20  ;;  %v4127_v6 = vld [vmem:[%s5600_s1 + $0x14] sm:$0x3] }
0x1336   : > { %v3408_v11 = vrot.slane %v3404_v23, 4  ;;  %v3409_v12 = vrot.slane %v3405_v10, 4 }
0x1338   : > { %v3412_v13 = vadd.f32 %v3408_v11, %v3404_v23  ;;  %v3413_v14 = vadd.f32 %v3409_v12, %v3405_v10  ;;  %v3499_v10 = vperm.slane %v4125_v22, 0  ;;  %v3500_v11 = vperm.slane %v4125_v22, 1 }
0x1339   : > { %v3545_v12 = vperm.slane %v4127_v6, 0 }
0x133a   : > { %v3414_v15 = vsub.f32 0.0, %v3412_v13  ;;  %v3415_v16 = vsub.f32 0.0, %v3413_v14  ;;  %v3546_v13 = vperm.slane %v4127_v6, 1 }
0x133c   : > { %v3416_v17 = vmul.f32 1.442695, %v3414_v15  ;;  %v3418_v18 = vmul.f32 1.442695, %v3415_v16 }
0x133e   : > { %4196 = vpow2.f32 %v3416_v17 }
0x133f   : > { %4198 = vpow2.f32 %v3418_v18 }
0x1344   : > { %v4197_v19 = vpop.eup %4196 }
0x1345   : > { %v4199_v24 = vpop.eup %4198  ;;  %v3420_v25 = vadd.f32 1.0, %v4197_v19 }
0x1346   : > { %v3421_v26 = vadd.f32 1.0, %v4199_v24 }
0x1347   : > { %4200 = vrcp.f32 %v3420_v25 }
0x1348   : > { %4202 = vrcp.f32 %v3421_v26 }
0x134d   : > { %v4201_v27 = vpop.eup %4200 }
0x134e   : > { %v4203_v29 = vpop.eup %4202  ;;  %v3424_v30 = vmul.f32 %v4201_v27, %v5272_v35  ;;  %v4128_v35 = vld [vmem:[%s5600_s1 + $0x16] sm:$0x3] }
0x134f   : > { %v3425_v32 = vmul.f32 %v4203_v29, %v5274_v36  ;;  %v3561_v42 = vperm.slane %v4128_v35, 0  ;;  %v3562_v43 = vperm.slane %v4128_v35, 1 }
0x1350   : > { %v3431_v33 = vadd.f32 %v3427_v28, %v3424_v30  ;;  %v4123_v30 = vld [vmem:[%s5600_s1 + $0x8] sm:$0x3] }
0x1351   : > { %v3432_v34 = vadd.f32 %v3428_v31, %v3425_v32  ;;  %v3461_v32 = vperm.slane %v4123_v30, 0 }
0x1352   : > { %v3433_v37 = vadd.f32 %v3431_v33, %v5085_v7  ;;  %v3462_v33 = vperm.slane %v4123_v30, 1 }
0x1353   : > { %v3434_v38 = vadd.f32 %v3432_v34, %v5088_v8  ;;  %v4129_v8 = vld [vmem:[%s5600_s1 + $0x18] sm:$0x3] }
0x1354   : > { %v3435_v39 = vadd.f32 %v3433_v37, %v4749_v2  ;;  %v4131_v2 = vld [vmem:[%s5604_s5 + $0x1c] sm:$0xf]  ;;  %v3583_v36 = vperm.slane %v4129_v8, 0  ;;  %v3584_v41 = vperm.slane %v4129_v8, 1  ;;  %v4124_v8 = vld [vmem:[%s5600_s1 + $0xa] sm:$0x3] }
0x1355   : > { %v3436_v40 = vadd.f32 %v3434_v38, %v4752_v3 }
0x1356   : > { %3513 = vst [vmem:[#allocation2 + $0x48] sm:$0xf] %v3435_v39  ;;  %3575 = vrot.lane.b32.xlu1 %v3435_v39, %s5666_s24  ;;  %3553 = vrot.lane.b32.xlu2 %v3435_v39, %s5689_s14 }
0x1357   : > { %3514 = vst [vmem:[#allocation2 + $0x28] sm:$0xf] %v3436_v40  ;;  %3555 = vrot.lane.b32.xlu0 %v3436_v40, %s5689_s14 }
0x135e   : > { %3517 = vrot.lane.b32.xlu1 %v3436_v40, %s5667_s25  ;;  %3577 = vrot.lane.b32.xlu2 %v3436_v40, %s5666_s24 }
0x135f   : > { %3515 = vrot.lane.b32.xlu0 %v3435_v39, %s5667_s25 }
0x1366   : > { %3491 = vrot.lane.b32.xlu1 %v3435_v39, %s5668_s26  ;;  %3537 = vrot.lane.b32.xlu2 %v3435_v39, %s5669_s30 }
0x1367   : > { %3539 = vrot.lane.b32.xlu0 %v3436_v40, %s5669_s30 }
0x136e   : > { %3455 = vrot.lane.b32.xlu1 %v3436_v40, %s5690_s29  ;;  %3493 = vrot.lane.b32.xlu2 %v3436_v40, %s5668_s26 }
0x136f   : > { %3453 = vrot.lane.b32.xlu0 %v3435_v39, %s5690_s29 }
0x1376   : > { %3437 = vrot.lane.b32.xlu1 %v3435_v39, %s5670_s19  ;;  %3475 = vrot.lane.b32.xlu2 %v3435_v39, %s5671_s20 }
0x1377   : > { %3477 = vrot.lane.b32.xlu0 %v3436_v40, %s5671_s20 }
0x137e   : > { %3439 = vrot.lane.b32.xlu2 %v3436_v40, %s5670_s19 }
0x137f   : > { %3607 = vperm.xlu0 %4178, %v4131_v2  }
0x13b0   : > { %v3554_v3 = vpop.permute.xlu2 %3553 }
0x13b8   : > { %v3578_v7 = vpop.permute.xlu2 %3577 }
0x13c0   : > { %v3538_v48 = vpop.permute.xlu2 %3537 }
0x13c8   : > { %v3576_v44 = vpop.permute.xlu1 %3575  ;;  %v3494_v4 = vpop.permute.xlu2 %3493 }
0x13c9   : > { %v3556_v45 = vpop.permute.xlu0 %3555  ;;  %v3579_v46 = vsel %vm686_vm4, %v3576_v44, %v3578_v7  ;;  %v3580_v47 = vsel %vm686_vm4, %v3578_v7, %v3576_v44 }
0x13ca   : > { %v3557_v49 = vsel %vm458_vm1, %v3554_v3, %v3556_v45  ;;  %v3558_v50 = vsel %vm458_vm1, %v3556_v45, %v3554_v3  ;;  %v3587_v51 = vmul.f32 %v3583_v36, %v3579_v46  ;;  %v3588_v52 = vmul.f32 %v3584_v41, %v3580_v47  ;;  %v4122_v3 = vld [vmem:[%s5600_s1 + $0x6] sm:$0x3] }
0x13cb   : > { %v3565_v53 = vmul.f32 %v3561_v42, %v3557_v49  ;;  %v3566_v54 = vmul.f32 %v3562_v43, %v3558_v50  ;;  %v3445_v43 = vperm.slane %v4122_v3, 0  ;;  %v3483_v45 = vperm.slane %v4124_v8, 0 }
0x13cc   : > { %3589 = vst [vmem:[#allocation2 + $0x40] sm:$0xf] %v3587_v51  ;;  %v3484_v46 = vperm.slane %v4124_v8, 1  ;;  %v3446_v47 = vperm.slane %v4122_v3, 1  ;;  %v4141_v3 = vld [vmem:[%s5600_s1 + $0x14] sm:$0x3] }
0x13cd   : > { %v3569_v56 = vrot.slane %v3565_v53, 4  ;;  %v3570_v57 = vrot.slane %v3566_v54, 4  ;;  %3590 = vst [vmem:[#allocation2 + $0x38] sm:$0xf] %v3588_v52 }
0x13cf   : > { %3573 = vst [vmem:[#allocation2 + $0x8] sm:$0xf0] %v3569_v56 }
0x13d0   : > { %3574 = vst [vmem:[#allocation2 + $0x20] sm:$0xf0] %v3570_v57  ;;  %v3518_v60 = vpop.permute.xlu1 %3517  ;;  %v3476_v31 = vpop.permute.xlu2 %3475 }
0x13d1   : > { %v3516_v61 = vpop.permute.xlu0 %3515 }
0x13d2   : > { %v3519_v62 = vsel %vm622_vm5, %v3516_v61, %v3518_v60  ;;  %v3520_v63 = vsel %vm622_vm5, %v3518_v60, %v3516_v61  ;;  %v4130_v61 = vld [vmem:[%s5603_s4 + $0x1c] sm:$0xf] }
0x13d3   : > { %v3527_v0 = vmul.f32 %v3523_v58, %v3519_v62  ;;  %v3528_v1 = vmul.f32 %v3524_v59, %v3520_v63  ;;  %v3601_v21 = vld [vmem:[#allocation2 + $0x40] sm:$0xf] }
0x13d4   : > { %4132 = vmatpush.msk.msra.mxu2 %vm487_vm2, %v3601_v21  ;;  %v3602_v5 = vld [vmem:[#allocation2 + $0x38] sm:$0xf] }
0x13d5   : > { %v3531_v20 = vrot.slane %v3527_v0, 4  ;;  %v3532_v23 = vrot.slane %v3528_v1, 4  ;;  %4134 = vmatpush.msk.msra.mxu3 %vm487_vm2, %v3602_v5  ;;  %v3824_v5 = vld [vmem:[%s5610_s11] sm:$0xf] }
0x13d7   : > { %3535 = vst [vmem:[#allocation2 + $0x48] sm:$0xf0] %v3531_v20  ;;  %v4142_v20 = vld [vmem:[%s5600_s1 + $0x16] sm:$0x3] }
0x13d8   : > { %3536 = vst [vmem:[#allocation2 + $0x28] sm:$0xf0] %v3532_v23  ;;  %v3492_v14 = vpop.permute.xlu1 %3491  ;;  %v3783_v23 = vperm.slane %v4142_v20, 0 }
0x13d9   : > { %v3540_v15 = vpop.permute.xlu0 %3539  ;;  %v3495_v16 = vsel %vm596_vm6, %v3492_v14, %v3494_v4  ;;  %v3496_v17 = vsel %vm596_vm6, %v3494_v4, %v3492_v14 }
0x13da   : > { %v3541_v18 = vsel %vm646_vm7, %v3538_v48, %v3540_v15  ;;  %v3542_v19 = vsel %vm646_vm7, %v3540_v15, %v3538_v48  ;;  %v3503_v24 = vmul.f32 %v3499_v10, %v3496_v17  ;;  %v3504_v25 = vmul.f32 %v3500_v11, %v3495_v16  ;;  %v3440_v48 = vpop.permute.xlu2 %3439 }
0x13db   : > { %v3549_v26 = vmul.f32 %v3545_v12, %v3541_v18  ;;  %v3550_v27 = vmul.f32 %v3546_v13, %v3542_v19  ;;  %v3784_v10 = vperm.slane %v4142_v20, 1  ;;  %v4140_v18 = vld [vmem:[%s5600_s1 + $0x10] sm:$0x3]  ;;  %v4143_v19 = vld [vmem:[%s5600_s1 + $0x18] sm:$0x3] }
0x13dc   : > { %v3507_v28 = vrot.slane %v3503_v24, 4  ;;  %v3508_v29 = vrot.slane %v3504_v25, 4 }
0x13dd   : > { %3551 = vst [vmem:[#allocation2 + $0x8] sm:$0xf] %v3549_v26  ;;  %v3745_v26 = vperm.slane %v4140_v18, 0 }
0x13de   : > { %3552 = vst [vmem:[#allocation2 + $0x20] sm:$0xf] %v3550_v27  ;;  %v3597_v42 = vld [vmem:[#allocation2 + $0x48] sm:$0xff]  ;;  %v3746_v27 = vperm.slane %v4140_v18, 1 }
0x13df   : > { %3511 = vst [vmem:[#allocation2 + $0x18] sm:$0xf0] %v3507_v28  ;;  %v3598_v44 = vld [vmem:[#allocation2 + $0x28] sm:$0xff]  ;;  %v3805_v28 = vperm.slane %v4143_v19, 0 }
0x13e0   : > { %3512 = vst [vmem:[#allocation2 + $0x10] sm:$0xf0] %v3508_v29  ;;  %v3456_v34 = vpop.permute.xlu1 %3455  ;;  %v3806_v29 = vperm.slane %v4143_v19, 1 }
0x13e1   : > { %v3454_v37 = vpop.permute.xlu0 %3453 }
0x13e2   : > { %v3457_v38 = vsel %vm427_vm0, %v3454_v37, %v3456_v34  ;;  %v3458_v39 = vsel %vm427_vm0, %v3456_v34, %v3454_v37 }
0x13e3   : > { %v3465_v40 = vmul.f32 %v3461_v32, %v3458_v39  ;;  %v3466_v2 = vmul.f32 %v3462_v33, %v3457_v38 }
0x13e4   : > { %v3599_v7 = vld [vmem:[#allocation2 + $0x8] sm:$0xff] }
0x13e5   : > { %v3469_v35 = vrot.slane %v3465_v40, 4  ;;  %v3470_v36 = vrot.slane %v3466_v2, 4  ;;  %3631 = vmatpush.msra.mxu2 %v3599_v7  ;;  %v3600_v41 = vld [vmem:[#allocation2 + $0x20] sm:$0xff] }
0x13e6   : > { %3651 = vmatpush.msra.mxu3 %v3600_v41  ;;  %v3768_v41 = vperm.slane %v4141_v3, 1 }
0x13e7   : > { %3473 = vst [vmem:[#allocation2 + $0x30] sm:$0xf0] %v3469_v35  ;;  %3632 = vmatpush.msra.mxu2 %v3597_v42 }
0x13e8   : > { %3474 = vst [vmem:[#allocation2] sm:$0xf0] %v3470_v36  ;;  %3652 = vmatpush.msra.mxu3 %v3598_v44  ;;  %v3438_v49 = vpop.permute.xlu1 %3437  ;;  %v3767_v36 = vperm.slane %v4141_v3, 0 }
0x13e9   : > { %v3478_v50 = vpop.permute.xlu0 %3477  ;;  %v3441_v51 = vsel %vm5693_vm11, %v3438_v49, %v3440_v48  ;;  %v3442_v52 = vsel %vm5694_vm14, %v3440_v48, %v3438_v49  ;;  %v4137_v49 = vld [vmem:[%s5600_s1 + $0x8] sm:$0x3] }
0x13ea   : > { %v3479_v53 = vsel %vm5695_vm15, %v3476_v31, %v3478_v50  ;;  %v3480_v54 = vsel %vm5696_vm13, %v3478_v50, %v3476_v31  ;;  %v3449_v55 = vmul.f32 %v3445_v43, %v3442_v52  ;;  %v3450_v58 = vmul.f32 %v3446_v47, %v3441_v51  ;;  %v4139_v50 = vld [vmem:[%s5600_s1 + $0xe] sm:$0x3] }
0x13eb   : > { %v3487_v56 = vmul.f32 %v3483_v45, %v3480_v54  ;;  %v3488_v57 = vmul.f32 %v3484_v46, %v3479_v53  ;;  %v3683_v53 = vperm.slane %v4137_v49, 0  ;;  %v3684_v54 = vperm.slane %v4137_v49, 1 }
0x13ec   : > { %3451 = vst [vmem:[#allocation2 + $0x30] sm:$0xf] %v3449_v55  ;;  %v3721_v55 = vperm.slane %v4139_v50, 0 }
0x13ed   : > { %3489 = vst [vmem:[#allocation2 + $0x18] sm:$0xf] %v3487_v56  ;;  %v3722_v56 = vperm.slane %v4139_v50, 1 }
0x13ee   : > { %3490 = vst [vmem:[#allocation2 + $0x10] sm:$0xf] %v3488_v57 }
0x13ef   : > { %3452 = vst [vmem:[#allocation2] sm:$0xf] %v3450_v58 }
0x13f1   : > { %v3608_v0 = vpop.permute.xlu0 %3607 }
0x13f3   : > { %v3593_v62 = vld [vmem:[#allocation2 + $0x30] sm:$0xff] }
0x13f4   : > { %v3595_v59 = vld [vmem:[#allocation2 + $0x18] sm:$0xff] }
0x13f5   : > { %3633 = vmatpush.msra.mxu2 %v3595_v59  ;;  %v3596_v60 = vld [vmem:[#allocation2 + $0x10] sm:$0xff] }
0x13f6   : > { %3653 = vmatpush.msra.mxu3 %v3596_v60  ;;  %v3594_v63 = vld [vmem:[#allocation2] sm:$0xff] }
0x13f7   : > { %3634 = vmatpush.msra.mxu2 %v3593_v62 }
0x13f8   : > { %3654 = vmatpush.msra.mxu3 %v3594_v63  ;;  %4133 = vmatmul.msk.f32.vlgmr.msra.gmra.mxu2 %vm717_vm10, %v4130_v61 }
0x13f9   : > { %4135 = vmatmul.msk.f32.vlgmr.msra.gmra.mxu3 %vm717_vm10, %v4130_v61 }
0x147b   : > { %v3636_v1 = vpop.f32.mrf.mxu2 }
0x147c   : > { %v3637_v21 = vadd.f32 %v3636_v1, %v3608_v0  ;;  %v3656_v22 = vpop.f32.mrf.mxu3 }
0x147d   : > { %v3657_v4 = vadd.f32 %v3656_v22, %v3608_v0 }
0x147e   : > { %3735 = vst [vmem:[#allocation2 + $0x48] sm:$0xf] %v3637_v21  ;;  %3797 = vrot.lane.b32.xlu0 %v3637_v21, %s5666_s24  ;;  %3775 = vrot.lane.b32.xlu1 %v3637_v21, %s5689_s14 }
0x147f   : > { %3736 = vst [vmem:[#allocation2 + $0x28] sm:$0xf] %v3657_v4  ;;  %3777 = vrot.lane.b32.xlu2 %v3657_v4, %s5689_s14 }
0x1486   : > { %3739 = vrot.lane.b32.xlu0 %v3657_v4, %s5667_s25  ;;  %3799 = vrot.lane.b32.xlu1 %v3657_v4, %s5666_s24 }
0x1487   : > { %3737 = vrot.lane.b32.xlu2 %v3637_v21, %s5667_s25 }
0x148e   : > { %3713 = vrot.lane.b32.xlu0 %v3637_v21, %s5668_s26  ;;  %3759 = vrot.lane.b32.xlu1 %v3637_v21, %s5669_s30 }
0x148f   : > { %3761 = vrot.lane.b32.xlu2 %v3657_v4, %s5669_s30 }
0x1496   : > { %3677 = vrot.lane.b32.xlu0 %v3657_v4, %s5690_s29  ;;  %3715 = vrot.lane.b32.xlu1 %v3657_v4, %s5668_s26  ;;  %s5701_s26 = sshll.u32 %s5703_s22, 3 }
0x1497   : > { %3675 = vrot.lane.b32.xlu2 %v3637_v21, %s5690_s29  ;;  %s413_s29 = scalar_lea.vmem %s5611_s12, %s5701_s26 }
0x149e   : > { %3659 = vrot.lane.b32.xlu0 %v3637_v21, %s5670_s19  ;;  %3697 = vrot.lane.b32.xlu1 %v3637_v21, %s5671_s20 }
0x149f   : > { %3699 = vrot.lane.b32.xlu2 %v3657_v4, %s5671_s20 }
0x14a6   : > { %3661 = vrot.lane.b32.xlu1 %v3657_v4, %s5670_s19  ;;  %v4138_v4 = vld [vmem:[%s5600_s1 + $0xa] sm:$0x3] }
0x14a7   : > { %3827 = vperm.xlu2 %4177, %v3824_v5  }
0x14d9   : > { %v3778_v6 = vpop.permute.xlu2 %3777 }
0x14e1   : > { %v3738_v15 = vpop.permute.xlu2 %3737 }
0x14e9   : > { %v3762_v7 = vpop.permute.xlu2 %3761 }
0x14f0   : > { %v3798_v11 = vpop.permute.xlu0 %3797  ;;  %v3776_v12 = vpop.permute.xlu1 %3775 }
0x14f1   : > { %v3779_v13 = vsel %vm458_vm1, %v3776_v12, %v3778_v6  ;;  %v3780_v14 = vsel %vm458_vm1, %v3778_v6, %v3776_v12  ;;  %v3676_v52 = vpop.permute.xlu2 %3675 }
0x14f2   : > { %v3787_v16 = vmul.f32 %v3783_v23, %v3779_v13  ;;  %v3788_v17 = vmul.f32 %v3784_v10, %v3780_v14  ;;  %v3705_v13 = vperm.slane %v4138_v4, 0  ;;  %v3706_v14 = vperm.slane %v4138_v4, 1 }
0x14f4   : > { %v3791_v24 = vrot.slane %v3787_v16, 4  ;;  %v3792_v25 = vrot.slane %v3788_v17, 4 }
0x14f6   : > { %3795 = vst [vmem:[#allocation2 + $0x8] sm:$0xf0] %v3791_v24 }
0x14f7   : > { %3796 = vst [vmem:[#allocation2 + $0x20] sm:$0xf0] %v3792_v25  ;;  %v4136_v25 = vld [vmem:[%s5600_s1 + $0x6] sm:$0x3] }
0x14f8   : > { %v3740_v30 = vpop.permute.xlu0 %3739  ;;  %v3800_v31 = vpop.permute.xlu1 %3799 }
0x14f9   : > { %v3741_v32 = vsel %vm622_vm5, %v3738_v15, %v3740_v30  ;;  %v3742_v33 = vsel %vm622_vm5, %v3740_v30, %v3738_v15  ;;  %v3801_v34 = vsel %vm686_vm4, %v3798_v11, %v3800_v31  ;;  %v3802_v37 = vsel %vm686_vm4, %v3800_v31, %v3798_v11  ;;  %v3700_v15 = vpop.permute.xlu2 %3699  ;;  %vm5699_vm4 = vmmov %vm5693_vm11 }
0x14fa   : > { %v3749_v38 = vmul.f32 %v3745_v26, %v3741_v32  ;;  %v3750_v39 = vmul.f32 %v3746_v27, %v3742_v33  ;;  %v3809_v40 = vmul.f32 %v3805_v28, %v3801_v34  ;;  %v3810_v2 = vmul.f32 %v3806_v29, %v3802_v37  ;;  %vm5700_vm5 = vmmov %vm5699_vm4 }
0x14fb   : > { %v3667_v26 = vperm.slane %v4136_v25, 0  ;;  %v3668_v27 = vperm.slane %v4136_v25, 1 }
0x14fc   : > { %v3753_v8 = vrot.slane %v3749_v38, 4  ;;  %v3754_v35 = vrot.slane %v3750_v39, 4  ;;  %3811 = vst [vmem:[#allocation2 + $0x40] sm:$0xf] %v3809_v40  ;;  %v3813_v38 = vld [vmem:[%s5609_s10] sm:$0xf] }
0x14fd   : > { %3812 = vst [vmem:[#allocation2 + $0x38] sm:$0xf] %v3810_v2 }
0x14fe   : > { %3757 = vst [vmem:[#allocation2 + $0x48] sm:$0xf0] %v3753_v8 }
0x14ff   : > { %3758 = vst [vmem:[#allocation2 + $0x28] sm:$0xf0] %v3754_v35 }
0x1500   : > { %v3714_v42 = vpop.permute.xlu0 %3713  ;;  %v3760_v43 = vpop.permute.xlu1 %3759 }
0x1501   : > { %v3763_v44 = vsel %vm646_vm7, %v3760_v43, %v3762_v7  ;;  %v3764_v45 = vsel %vm646_vm7, %v3762_v7, %v3760_v43  ;;  %v3828_v9 = vpop.permute.xlu2 %3827 }
0x1502   : > { %v3771_v46 = vmul.f32 %v3767_v36, %v3763_v44  ;;  %v3772_v47 = vmul.f32 %v3768_v41, %v3764_v45 }
0x1503   : > { %v3822_v48 = vld [vmem:[#allocation2 + $0x40] sm:$0xf] }
0x1504   : > { %3773 = vst [vmem:[#allocation2 + $0x8] sm:$0xf] %v3771_v46  ;;  %4144 = vmatpush.msk.msrb.mxu0 %vm487_vm2, %v3822_v48  ;;  %v3823_v51 = vld [vmem:[#allocation2 + $0x38] sm:$0xf] }
0x1505   : > { %3774 = vst [vmem:[#allocation2 + $0x20] sm:$0xf] %v3772_v47  ;;  %4146 = vmatpush.msk.msrb.mxu1 %vm487_vm2, %v3823_v51  ;;  %v3818_v11 = vld [vmem:[#allocation2 + $0x48] sm:$0xff] }
0x1506   : > { %v3819_v12 = vld [vmem:[#allocation2 + $0x28] sm:$0xff] }
0x1508   : > { %v3678_v57 = vpop.permute.xlu0 %3677  ;;  %v3716_v58 = vpop.permute.xlu1 %3715 }
0x1509   : > { %v3679_v59 = vsel %vm427_vm0, %v3676_v52, %v3678_v57  ;;  %v3680_v60 = vsel %vm427_vm0, %v3678_v57, %v3676_v52  ;;  %v3717_v61 = vsel %vm596_vm6, %v3714_v42, %v3716_v58  ;;  %v3718_v62 = vsel %vm596_vm6, %v3716_v58, %v3714_v42  ;;  %vm5697_vm0 = vmmov %vm5696_vm13 }
0x150a   : > { %v3687_v63 = vmul.f32 %v3683_v53, %v3680_v60  ;;  %v3688_v0 = vmul.f32 %v3684_v54, %v3679_v59  ;;  %v3725_v1 = vmul.f32 %v3721_v55, %v3718_v62  ;;  %v3726_v21 = vmul.f32 %v3722_v56, %v3717_v61  ;;  %vm5698_vm1 = vmmov %vm5697_vm0 }
0x150b   : > { %v3820_v22 = vld [vmem:[#allocation2 + $0x8] sm:$0xff] }
0x150c   : > { %v3691_v5 = vrot.slane %v3687_v63, 4  ;;  %v3692_v6 = vrot.slane %v3688_v0, 4  ;;  %v3729_v20 = vrot.slane %v3725_v1, 4  ;;  %3851 = vmatpush.msrb.mxu0 %v3820_v22  ;;  %v3821_v23 = vld [vmem:[#allocation2 + $0x20] sm:$0xff]  ;;  %v3730_v10 = vrot.slane %v3726_v21, 4 }
0x150d   : > { %3871 = vmatpush.msrb.mxu1 %v3821_v23 }
0x150e   : > { %3695 = vst [vmem:[#allocation2 + $0x30] sm:$0xf0] %v3691_v5  ;;  %3852 = vmatpush.msrb.mxu0 %v3818_v11 }
0x150f   : > { %3696 = vst [vmem:[#allocation2] sm:$0xf0] %v3692_v6  ;;  %3872 = vmatpush.msrb.mxu1 %v3819_v12 }
0x1510   : > { %3733 = vst [vmem:[#allocation2 + $0x18] sm:$0xf0] %v3729_v20  ;;  %v3698_v16 = vpop.permute.xlu1 %3697  ;;  %v3660_v28 = vpop.permute.xlu0 %3659 }
0x1511   : > { %3734 = vst [vmem:[#allocation2 + $0x10] sm:$0xf0] %v3730_v10  ;;  %v3701_v17 = vsel %vm5697_vm0, %v3698_v16, %v3700_v15  ;;  %v3702_v18 = vsel %vm5698_vm1, %v3700_v15, %v3698_v16 }
0x1512   : > { %v3709_v19 = vmul.f32 %v3705_v13, %v3702_v18  ;;  %v3710_v24 = vmul.f32 %v3706_v14, %v3701_v17 }
0x1514   : > { %3711 = vst [vmem:[#allocation2 + $0x18] sm:$0xf] %v3709_v19 }
0x1515   : > { %3712 = vst [vmem:[#allocation2 + $0x10] sm:$0xf] %v3710_v24 }
0x1518   : > { %v3662_v29 = vpop.permute.xlu1 %3661 }
0x1519   : > { %v3663_v30 = vsel %vm5699_vm4, %v3660_v28, %v3662_v29  ;;  %v3664_v31 = vsel %vm5700_vm5, %v3662_v29, %v3660_v28 }
0x151a   : > { %v3671_v32 = vmul.f32 %v3667_v26, %v3664_v31  ;;  %v3672_v33 = vmul.f32 %v3668_v27, %v3663_v30 }
0x151b   : > { %v3816_v34 = vld [vmem:[#allocation2 + $0x18] sm:$0xff] }
0x151c   : > { %3673 = vst [vmem:[#allocation2 + $0x30] sm:$0xf] %v3671_v32  ;;  %3853 = vmatpush.msrb.mxu0 %v3816_v34  ;;  %v3817_v37 = vld [vmem:[#allocation2 + $0x10] sm:$0xff] }
0x151d   : > { %3674 = vst [vmem:[#allocation2] sm:$0xf] %v3672_v33  ;;  %3873 = vmatpush.msrb.mxu1 %v3817_v37 }
0x1523   : > { %v3814_v39 = vld [vmem:[#allocation2 + $0x30] sm:$0xff] }
0x1524   : > { %3854 = vmatpush.msrb.mxu0 %v3814_v39  ;;  %v3815_v40 = vld [vmem:[#allocation2] sm:$0xff] }
0x1525   : > { %3874 = vmatpush.msrb.mxu1 %v3815_v40  ;;  %4145 = vmatmul.msk.f32.vlgmr.msrb.gmra.mxu0 %vm717_vm10, %v3813_v38 }
0x1526   : > { %4147 = vmatmul.msk.f32.vlgmr.msrb.gmra.mxu1 %vm717_vm10, %v3813_v38 }
0x15a2   : > { %v3856_v2 = vpop.f32.mrf.mxu0 }
0x15a3   : > { %v3876_v3 = vpop.f32.mrf.mxu1  ;;  %v3857_v8 = vadd.f32 %v3856_v2, %v3828_v9 }
0x15a4   : > { %v3877_v7 = vadd.f32 %v3876_v3, %v3828_v9 }
0x15a6   : > { %v3881_v35 = vrot.slane %v3877_v7, 4 }
0x15a8   : > { %v3882_v36 = vsel %vm487_vm2, %v3857_v8, %v3881_v35 }
0x15a9   : > { %3884 = vst [vmem:[%s413_s29] sm:$0xff] %v3882_v36 }
0x15aa PF: > { %s22_s21 = sadd.s32 1, %s4210_s21  }
0x15ab   : > { %p19_p4 = scmp.ge.s32.totalorder %s22_s21, 4  }
0x15ad   :  { %21 = sbr.rel (!%p19_p4) target bundleno = 1 (0x1), region = 142 }

</bundles_post_ra>
